<compile_context>
chip_gen: v6e
topology: v6e:2x2x1
jax: 0.10.0
libtpu: 0.0.40
codegen_flags: <defaults>
</compile_context>

<pallas_src>
import functools
import math

import jax
import jax.numpy as jnp
from jax.experimental import pallas as pl
from jax.experimental.pallas import tpu as pltpu

# ----------------------------- config (mirrors the module) -----------------------------
HIDDEN = 64          # config['hidden_dim']
NHEAD = 8            # nn.TransformerEncoderLayer(hidden_size, nhead=8)
HEAD_DIM = HIDDEN // NHEAD
DFF = 2048           # PyTorch default dim_feedforward
INPUT_VOCAB = 50     # stand-in for len(article_field.vocab)
OUTPUT_VOCAB = 60    # stand-in for len(summary_field.vocab)
MAX_LEN = 64         # PositionalEncoding max_len (5000 in ref; small slice is identical)
EPS = 1e-5


# ------------------------------ in-kernel building blocks -------------------------------
def _ln(x, g, b):
    """LayerNorm over last dim (PyTorch eps=1e-5). x:(M,E), g/b:(1,E)."""
    mu = jnp.mean(x, axis=-1, keepdims=True)
    xc = x - mu
    var = jnp.mean(xc * xc, axis=-1, keepdims=True)
    return xc * jax.lax.rsqrt(var + EPS) * g + b


def _mha(q2, k2, v2, wout, e, nhead, scale):
    """Multi-head softmax attention for one batch element.
    q2:(Lq,E), k2/v2:(Lk,E), wout:(E,E).  Heads are folded straight into the output-projection
    accumulation (out += o_h @ Wout[h*dh:(h+1)*dh, :]) so nothing narrow is ever stored."""
    dh = e // nhead
    lq = q2.shape[0]
    out = jnp.zeros((lq, e), jnp.float32)
    for h in range(nhead):
        sl = slice(h * dh, (h + 1) * dh)
        qh = q2[:, sl] * scale                                         # (Lq, dh)
        kh = k2[:, sl]                                                 # (Lk, dh)
        vh = v2[:, sl]                                                 # (Lk, dh)
        # scores = qh @ kh^T (contract on dh, no materialized transpose)
        s = jax.lax.dot_general(qh, kh, (((1,), (1,)), ((), ())),
                                preferred_element_type=jnp.float32)    # (Lq, Lk)
        s = s - jnp.max(s, axis=-1, keepdims=True)
        p = jnp.exp(s)
        p = p * pl.reciprocal(jnp.sum(p, axis=-1, keepdims=True), approx=True)
        oh = jnp.dot(p, vh, preferred_element_type=jnp.float32)        # (Lq, dh)
        out = out + jnp.dot(oh, wout[sl, :], preferred_element_type=jnp.float32)
    return out


# --------------------------- fully-fused summarizer kernel ------------------------------
def _summarizer_kernel(xs_ref, xt_ref,
                       # encoder layer params
                       e_wqkv, e_bqkv, e_wout, e_bout, e_g1, e_b1,
                       e_w1, e_fb1, e_w2, e_fb2, e_g2, e_b2,
                       # decoder layer params
                       d_wqkv, d_bqkv, d_wout, d_bout, d_g1, d_b1,
                       d_wqc, d_bqc, d_wkvc, d_bkvc, d_woutc, d_boutc, d_g2, d_b2,
                       d_w1, d_fb1, d_w2, d_fb2, d_g3, d_b3,
                       o_ref, *, e, nhead):
    scale = 1.0 / math.sqrt(e // nhead)

    # ---------------- encoder layer (post-norm, relu FFN) ----------------
    x = xs_ref[0]                                                      # (Ls, E)
    qkv = jnp.dot(x, e_wqkv[...], preferred_element_type=jnp.float32) + e_bqkv[...]
    attn = _mha(qkv[:, :e], qkv[:, e:2 * e], qkv[:, 2 * e:],
                e_wout[...], e, nhead, scale) + e_bout[...]
    x = _ln(x + attn, e_g1[...], e_b1[...])                            # add & norm1
    h = jnp.maximum(jnp.dot(x, e_w1[...], preferred_element_type=jnp.float32) + e_fb1[...], 0.0)
    ff = jnp.dot(h, e_w2[...], preferred_element_type=jnp.float32) + e_fb2[...]
    mem = _ln(x + ff, e_g2[...], e_b2[...])                            # encoder output, stays in VMEM

    # ---------------- decoder layer ----------------
    y = xt_ref[0]                                                      # (Lt, E)
    # self-attention + add & norm1
    qkv = jnp.dot(y, d_wqkv[...], preferred_element_type=jnp.float32) + d_bqkv[...]
    attn = _mha(qkv[:, :e], qkv[:, e:2 * e], qkv[:, 2 * e:],
                d_wout[...], e, nhead, scale) + d_bout[...]
    y = _ln(y + attn, d_g1[...], d_b1[...])
    # cross-attention (q from y, fused k/v from encoder memory) + add & norm2
    q = jnp.dot(y, d_wqc[...], preferred_element_type=jnp.float32) + d_bqc[...]
    kv = jnp.dot(mem, d_wkvc[...], preferred_element_type=jnp.float32) + d_bkvc[...]
    attn = _mha(q, kv[:, :e], kv[:, e:],
                d_woutc[...], e, nhead, scale) + d_boutc[...]
    y = _ln(y + attn, d_g2[...], d_b2[...])
    # FFN + add & norm3
    h = jnp.maximum(jnp.dot(y, d_w1[...], preferred_element_type=jnp.float32) + d_fb1[...], 0.0)
    ff = jnp.dot(h, d_w2[...], preferred_element_type=jnp.float32) + d_fb2[...]
    o_ref[0] = _ln(y + ff, d_g3[...], d_b3[...])


# ------------------------------------- wrapper -------------------------------------------
def _resident_spec(a):
    """Full-array block with a constant index_map -> weight stays VMEM-resident across the grid."""
    nd = a.ndim

    def idx(i, nd=nd):
        return (0,) * nd

    return pl.BlockSpec(a.shape, idx)


def summarizer_layers_pallas(x_src, x_tgt, enc_p, dec_p):
    """x_src: (N, Ls, E) embedded source, x_tgt: (N, Lt, E) embedded target -> (N, Lt, E)."""
    N, Ls, E = x_src.shape
    Lt = x_tgt.shape[1]
    src_spec = pl.BlockSpec((1, Ls, E), lambda i: (i, 0, 0))
    tgt_spec = pl.BlockSpec((1, Lt, E), lambda i: (i, 0, 0))
    weights = (
        enc_p["wqkv"], enc_p["bqkv"], enc_p["wout"], enc_p["bout"],
        enc_p["norm1_g"], enc_p["norm1_b"],
        enc_p["w1"], enc_p["b1"], enc_p["w2"], enc_p["b2"],
        enc_p["norm2_g"], enc_p["norm2_b"],
        dec_p["wqkv_s"], dec_p["bqkv_s"], dec_p["wout_s"], dec_p["bout_s"],
        dec_p["norm1_g"], dec_p["norm1_b"],
        dec_p["wq_c"], dec_p["bq_c"], dec_p["wkv_c"], dec_p["bkv_c"],
        dec_p["wout_c"], dec_p["bout_c"],
        dec_p["norm2_g"], dec_p["norm2_b"],
        dec_p["w1"], dec_p["b1"], dec_p["w2"], dec_p["b2"],
        dec_p["norm3_g"], dec_p["norm3_b"],
    )
    in_specs = [src_spec, tgt_spec] + [_resident_spec(w) for w in weights]
    return pl.pallas_call(
        functools.partial(_summarizer_kernel, e=E, nhead=NHEAD),
        out_shape=jax.ShapeDtypeStruct((N, Lt, E), jnp.float32),
        grid=(N,),
        in_specs=in_specs,
        out_specs=tgt_spec,
        compiler_params=pltpu.CompilerParams(
            dimension_semantics=("parallel",),
            vmem_limit_bytes=64 << 20),
    )(x_src, x_tgt, *weights)


# ------------------------------------ model pieces ---------------------------------------
def positional_encoding(max_len, d_model):
    position = jnp.arange(max_len, dtype=jnp.float32)[:, None]
    div_term = jnp.exp(jnp.arange(0, d_model, 2, dtype=jnp.float32) * (-math.log(10000.0) / d_model))
    pe = jnp.zeros((max_len, d_model), dtype=jnp.float32)
    pe = pe.at[:, 0::2].set(jnp.sin(position * div_term))
    pe = pe.at[:, 1::2].set(jnp.cos(position * div_term))
    return pe  # (max_len, d_model)


def summarizer_forward(src_tokens, tgt_tokens, params):
    """src_tokens/tgt_tokens: (L, N) int32; returns (L_tgt, N, HIDDEN) float32."""
    E = HIDDEN
    pe = params["pe"]
    # embeddings + positional encoding (lane-dense (N, L, E); dropout = identity, eval mode)
    src_nl = src_tokens.T                                              # (N, L_src)
    tgt_nl = tgt_tokens.T                                              # (N, L_tgt)
    x = params["enc"]["embedding"][src_nl] * math.sqrt(E) + pe[None, :src_nl.shape[1], :]
    y = params["dec"]["embedding"][tgt_nl] * math.sqrt(E) + pe[None, :tgt_nl.shape[1], :]
    # one fused kernel: encoder layer -> cross-attended decoder layer
    out = summarizer_layers_pallas(x, y, params["enc"]["layer"], params["dec"]["layer"])
    return out.transpose(1, 0, 2)                                      # (L_tgt, N, E), batch_first=False


# ----------------------------------- parameter init --------------------------------------
def _normal(key, shape, std=0.02):
    return std * jax.random.normal(key, shape, dtype=jnp.float32)


def _init_enc_layer(key, E, dff):
    k1, k2, k3, k4 = jax.random.split(key, 4)
    return {
        # weights stored matmul-ready: (in, out)
        "wqkv": _normal(k1, (E, 3 * E)), "bqkv": jnp.zeros((1, 3 * E), jnp.float32),
        "wout": _normal(k2, (E, E)), "bout": jnp.zeros((1, E), jnp.float32),
        "norm1_g": jnp.ones((1, E), jnp.float32), "norm1_b": jnp.zeros((1, E), jnp.float32),
        "w1": _normal(k3, (E, dff)), "b1": jnp.zeros((1, dff), jnp.float32),
        "w2": _normal(k4, (dff, E)), "b2": jnp.zeros((1, E), jnp.float32),
        "norm2_g": jnp.ones((1, E), jnp.float32), "norm2_b": jnp.zeros((1, E), jnp.float32),
    }


def _init_dec_layer(key, E, dff):
    k1, k2, k3, k4, k5, k6, k7 = jax.random.split(key, 7)
    return {
        "wqkv_s": _normal(k1, (E, 3 * E)), "bqkv_s": jnp.zeros((1, 3 * E), jnp.float32),
        "wout_s": _normal(k2, (E, E)), "bout_s": jnp.zeros((1, E), jnp.float32),
        "norm1_g": jnp.ones((1, E), jnp.float32), "norm1_b": jnp.zeros((1, E), jnp.float32),
        "wq_c": _normal(k3, (E, E)), "bq_c": jnp.zeros((1, E), jnp.float32),
        "wkv_c": _normal(k4, (E, 2 * E)), "bkv_c": jnp.zeros((1, 2 * E), jnp.float32),
        "wout_c": _normal(k5, (E, E)), "bout_c": jnp.zeros((1, E), jnp.float32),
        "norm2_g": jnp.ones((1, E), jnp.float32), "norm2_b": jnp.zeros((1, E), jnp.float32),
        "w1": _normal(k6, (E, dff)), "b1": jnp.zeros((1, dff), jnp.float32),
        "w2": _normal(k7, (dff, E)), "b2": jnp.zeros((1, E), jnp.float32),
        "norm3_g": jnp.ones((1, E), jnp.float32), "norm3_b": jnp.zeros((1, E), jnp.float32),
    }


def init_params(key):
    k1, k2, k3, k4 = jax.random.split(key, 4)
    return {
        "pe": positional_encoding(MAX_LEN, HIDDEN),
        "enc": {
            "embedding": _normal(k1, (INPUT_VOCAB, HIDDEN), std=1.0),
            "layer": _init_enc_layer(k2, HIDDEN, DFF),
        },
        "dec": {
            "embedding": _normal(k3, (OUTPUT_VOCAB, HIDDEN), std=1.0),
            "layer": _init_dec_layer(k4, HIDDEN, DFF),
        },
    }


# ---------------------------------------- main --------------------------------------------
if __name__ == "__main__":
    key = jax.random.PRNGKey(0)
    kp, ks, kt = jax.random.split(key, 3)

    L_SRC, L_TGT, N = 8, 8, 2  # axis 0 = sequence axis (PyTorch batch_first=False convention)
    params = init_params(kp)
    src = jax.random.randint(ks, (L_SRC, N), 0, INPUT_VOCAB, dtype=jnp.int32)
    tgt = jax.random.randint(kt, (L_TGT, N), 0, OUTPUT_VOCAB, dtype=jnp.int32)

    fwd = jax.jit(summarizer_forward)
    out = fwd(src, tgt, params)                  # (L_TGT, N, HIDDEN)
    jax.block_until_ready(out)
    assert out.shape == (L_TGT, N, HIDDEN) and out.dtype == jnp.float32
    assert bool(jnp.all(jnp.isfinite(out)))

    # TODO(synk): dropout layers (p=0.1) are treated as identity (eval mode); stochastic
    # training-mode dropout is not implemented.
    print("KERNEL_OK")
</pallas_src>

<mosaic_0001>
module attributes {stable_mosaic.version = 11 : i64} {
  func.func @_summarizer_kernel(%arg0: i32, %arg1: memref<1x8x64xf32, #tpu.memory_space<vmem>>, %arg2: memref<1x8x64xf32, #tpu.memory_space<vmem>>, %arg3: memref<64x192xf32, #tpu.memory_space<vmem>>, %arg4: memref<1x192xf32, #tpu.memory_space<vmem>>, %arg5: memref<64x64xf32, #tpu.memory_space<vmem>>, %arg6: memref<1x64xf32, #tpu.memory_space<vmem>>, %arg7: memref<1x64xf32, #tpu.memory_space<vmem>>, %arg8: memref<1x64xf32, #tpu.memory_space<vmem>>, %arg9: memref<64x2048xf32, #tpu.memory_space<vmem>>, %arg10: memref<1x2048xf32, #tpu.memory_space<vmem>>, %arg11: memref<2048x64xf32, #tpu.memory_space<vmem>>, %arg12: memref<1x64xf32, #tpu.memory_space<vmem>>, %arg13: memref<1x64xf32, #tpu.memory_space<vmem>>, %arg14: memref<1x64xf32, #tpu.memory_space<vmem>>, %arg15: memref<64x192xf32, #tpu.memory_space<vmem>>, %arg16: memref<1x192xf32, #tpu.memory_space<vmem>>, %arg17: memref<64x64xf32, #tpu.memory_space<vmem>>, %arg18: memref<1x64xf32, #tpu.memory_space<vmem>>, %arg19: memref<1x64xf32, #tpu.memory_space<vmem>>, %arg20: memref<1x64xf32, #tpu.memory_space<vmem>>, %arg21: memref<64x64xf32, #tpu.memory_space<vmem>>, %arg22: memref<1x64xf32, #tpu.memory_space<vmem>>, %arg23: memref<64x128xf32, #tpu.memory_space<vmem>>, %arg24: memref<1x128xf32, #tpu.memory_space<vmem>>, %arg25: memref<64x64xf32, #tpu.memory_space<vmem>>, %arg26: memref<1x64xf32, #tpu.memory_space<vmem>>, %arg27: memref<1x64xf32, #tpu.memory_space<vmem>>, %arg28: memref<1x64xf32, #tpu.memory_space<vmem>>, %arg29: memref<64x2048xf32, #tpu.memory_space<vmem>>, %arg30: memref<1x2048xf32, #tpu.memory_space<vmem>>, %arg31: memref<2048x64xf32, #tpu.memory_space<vmem>>, %arg32: memref<1x64xf32, #tpu.memory_space<vmem>>, %arg33: memref<1x64xf32, #tpu.memory_space<vmem>>, %arg34: memref<1x64xf32, #tpu.memory_space<vmem>>, %arg35: memref<1x8x64xf32, #tpu.memory_space<vmem>>) attributes {dimension_semantics = [#tpu.dimension_semantics<parallel>], iteration_bounds = array<i64: 2>, scalar_prefetch = 0 : i64, scratch_operands = 0 : i64, tpu.core_type = #tpu.core_type<tc>, window_params = [{transform_indices = @transform_0, window_bounds = array<i64: 1, 8, 64>}, {transform_indices = @transform_1, window_bounds = array<i64: 1, 8, 64>}, {pipeline_mode = #tpu.pipeline_mode<synchronous>, transform_indices = @transform_2, window_bounds = array<i64: 64, 192>}, {pipeline_mode = #tpu.pipeline_mode<synchronous>, transform_indices = @transform_3, window_bounds = array<i64: 1, 192>}, {pipeline_mode = #tpu.pipeline_mode<synchronous>, transform_indices = @transform_4, window_bounds = array<i64: 64, 64>}, {pipeline_mode = #tpu.pipeline_mode<synchronous>, transform_indices = @transform_5, window_bounds = array<i64: 1, 64>}, {pipeline_mode = #tpu.pipeline_mode<synchronous>, transform_indices = @transform_6, window_bounds = array<i64: 1, 64>}, {pipeline_mode = #tpu.pipeline_mode<synchronous>, transform_indices = @transform_7, window_bounds = array<i64: 1, 64>}, {pipeline_mode = #tpu.pipeline_mode<synchronous>, transform_indices = @transform_8, window_bounds = array<i64: 64, 2048>}, {pipeline_mode = #tpu.pipeline_mode<synchronous>, transform_indices = @transform_9, window_bounds = array<i64: 1, 2048>}, {pipeline_mode = #tpu.pipeline_mode<synchronous>, transform_indices = @transform_10, window_bounds = array<i64: 2048, 64>}, {pipeline_mode = #tpu.pipeline_mode<synchronous>, transform_indices = @transform_11, window_bounds = array<i64: 1, 64>}, {pipeline_mode = #tpu.pipeline_mode<synchronous>, transform_indices = @transform_12, window_bounds = array<i64: 1, 64>}, {pipeline_mode = #tpu.pipeline_mode<synchronous>, transform_indices = @transform_13, window_bounds = array<i64: 1, 64>}, {pipeline_mode = #tpu.pipeline_mode<synchronous>, transform_indices = @transform_14, window_bounds = array<i64: 64, 192>}, {pipeline_mode = #tpu.pipeline_mode<synchronous>, transform_indices = @transform_15, window_bounds = array<i64: 1, 192>}, {pipeline_mode = #tpu.pipeline_mode<synchronous>, transform_indices = @transform_16, window_bounds = array<i64: 64, 64>}, {pipeline_mode = #tpu.pipeline_mode<synchronous>, transform_indices = @transform_17, window_bounds = array<i64: 1, 64>}, {pipeline_mode = #tpu.pipeline_mode<synchronous>, transform_indices = @transform_18, window_bounds = array<i64: 1, 64>}, {pipeline_mode = #tpu.pipeline_mode<synchronous>, transform_indices = @transform_19, window_bounds = array<i64: 1, 64>}, {pipeline_mode = #tpu.pipeline_mode<synchronous>, transform_indices = @transform_20, window_bounds = array<i64: 64, 64>}, {pipeline_mode = #tpu.pipeline_mode<synchronous>, transform_indices = @transform_21, window_bounds = array<i64: 1, 64>}, {pipeline_mode = #tpu.pipeline_mode<synchronous>, transform_indices = @transform_22, window_bounds = array<i64: 64, 128>}, {pipeline_mode = #tpu.pipeline_mode<synchronous>, transform_indices = @transform_23, window_bounds = array<i64: 1, 128>}, {pipeline_mode = #tpu.pipeline_mode<synchronous>, transform_indices = @transform_24, window_bounds = array<i64: 64, 64>}, {pipeline_mode = #tpu.pipeline_mode<synchronous>, transform_indices = @transform_25, window_bounds = array<i64: 1, 64>}, {pipeline_mode = #tpu.pipeline_mode<synchronous>, transform_indices = @transform_26, window_bounds = array<i64: 1, 64>}, {pipeline_mode = #tpu.pipeline_mode<synchronous>, transform_indices = @transform_27, window_bounds = array<i64: 1, 64>}, {pipeline_mode = #tpu.pipeline_mode<synchronous>, transform_indices = @transform_28, window_bounds = array<i64: 64, 2048>}, {pipeline_mode = #tpu.pipeline_mode<synchronous>, transform_indices = @transform_29, window_bounds = array<i64: 1, 2048>}, {pipeline_mode = #tpu.pipeline_mode<synchronous>, transform_indices = @transform_30, window_bounds = array<i64: 2048, 64>}, {pipeline_mode = #tpu.pipeline_mode<synchronous>, transform_indices = @transform_31, window_bounds = array<i64: 1, 64>}, {pipeline_mode = #tpu.pipeline_mode<synchronous>, transform_indices = @transform_32, window_bounds = array<i64: 1, 64>}, {pipeline_mode = #tpu.pipeline_mode<synchronous>, transform_indices = @transform_33, window_bounds = array<i64: 1, 64>}, {transform_indices = @transform_34, window_bounds = array<i64: 1, 8, 64>}]} {
    %c0 = arith.constant 0 : index
    %c0_0 = arith.constant 0 : index
    %c0_1 = arith.constant 0 : index
    %0 = vector.load %arg1[%c0, %c0_0, %c0_1] : memref<1x8x64xf32, #tpu.memory_space<vmem>>, vector<1x8x64xf32>
    %1 = vector.shape_cast %0 : vector<1x8x64xf32> to vector<8x64xf32>
    %c0_2 = arith.constant 0 : index
    %c0_3 = arith.constant 0 : index
    %2 = vector.load %arg3[%c0_2, %c0_3] : memref<64x192xf32, #tpu.memory_space<vmem>>, vector<64x192xf32>
    %cst = arith.constant dense<0.000000e+00> : vector<8x192xf32>
    %3 = tpu.matmul %1, %2, %cst {dimension_numbers = #tpu.dot_dimension_numbers<[1], [0], [0], [1], [0, 0, 1, 1], [], []>} : vector<8x64xf32>, vector<64x192xf32>, vector<8x192xf32> -> vector<8x192xf32>
    %c0_4 = arith.constant 0 : index
    %c0_5 = arith.constant 0 : index
    %4 = vector.load %arg4[%c0_4, %c0_5] : memref<1x192xf32, #tpu.memory_space<vmem>>, vector<1x192xf32>
    %5 = vector.broadcast %4 : vector<1x192xf32> to vector<8x192xf32>
    %6 = arith.addf %3, %5 : vector<8x192xf32>
    %7 = vector.extract_strided_slice %6 {offsets = [0, 0], sizes = [8, 64], strides = [1, 1]} : vector<8x192xf32> to vector<8x64xf32>
    %8 = vector.extract_strided_slice %6 {offsets = [0, 64], sizes = [8, 64], strides = [1, 1]} : vector<8x192xf32> to vector<8x64xf32>
    %9 = vector.extract_strided_slice %6 {offsets = [0, 128], sizes = [8, 64], strides = [1, 1]} : vector<8x192xf32> to vector<8x64xf32>
    %c0_6 = arith.constant 0 : index
    %c0_7 = arith.constant 0 : index
    %10 = vector.load %arg5[%c0_6, %c0_7] : memref<64x64xf32, #tpu.memory_space<vmem>>, vector<64x64xf32>
    %cst_8 = arith.constant 0.000000e+00 : f32
    %11 = vector.broadcast %cst_8 : f32 to vector<8x64xf32>
    %12 = vector.extract_strided_slice %7 {offsets = [0, 0], sizes = [8, 8], strides = [1, 1]} : vector<8x64xf32> to vector<8x8xf32>
    %cst_9 = arith.constant 0.353553385 : f32
    %13 = vector.broadcast %cst_9 : f32 to vector<8x8xf32>
    %14 = arith.mulf %12, %13 : vector<8x8xf32>
    %15 = vector.extract_strided_slice %8 {offsets = [0, 0], sizes = [8, 8], strides = [1, 1]} : vector<8x64xf32> to vector<8x8xf32>
    %16 = vector.extract_strided_slice %9 {offsets = [0, 0], sizes = [8, 8], strides = [1, 1]} : vector<8x64xf32> to vector<8x8xf32>
    %cst_10 = arith.constant dense<0.000000e+00> : vector<8x8xf32>
    %17 = tpu.matmul %14, %15, %cst_10 {dimension_numbers = #tpu.dot_dimension_numbers<[1], [1], [0], [0], [0, 0, 1, 0], [], []>} : vector<8x8xf32>, vector<8x8xf32>, vector<8x8xf32> -> vector<8x8xf32>
    %cst_11 = arith.constant dense<0xFF800000> : vector<8xf32>
    %18 = vector.multi_reduction <maximumf>, %17, %cst_11 [1] : vector<8x8xf32> to vector<8xf32>
    %19 = vector.shape_cast %18 : vector<8xf32> to vector<8x1xf32>
    %20 = vector.broadcast %19 : vector<8x1xf32> to vector<8x8xf32>
    %21 = arith.subf %17, %20 : vector<8x8xf32>
    %22 = math.exp %21 : vector<8x8xf32>
    %cst_12 = arith.constant dense<0.000000e+00> : vector<8xf32>
    %23 = vector.multi_reduction <add>, %22, %cst_12 [1] : vector<8x8xf32> to vector<8xf32>
    %24 = vector.shape_cast %23 : vector<8xf32> to vector<8x1xf32>
    %25 = tpu.reciprocal %24 {approx = true} : vector<8x1xf32> -> vector<8x1xf32>
    %26 = vector.broadcast %25 : vector<8x1xf32> to vector<8x8xf32>
    %27 = arith.mulf %22, %26 : vector<8x8xf32>
    %cst_13 = arith.constant dense<0.000000e+00> : vector<8x8xf32>
    %28 = tpu.matmul %27, %16, %cst_13 {dimension_numbers = #tpu.dot_dimension_numbers<[1], [0], [0], [1], [0, 0, 1, 1], [], []>} : vector<8x8xf32>, vector<8x8xf32>, vector<8x8xf32> -> vector<8x8xf32>
    %29 = vector.extract_strided_slice %10 {offsets = [0, 0], sizes = [8, 64], strides = [1, 1]} : vector<64x64xf32> to vector<8x64xf32>
    %cst_14 = arith.constant dense<0.000000e+00> : vector<8x64xf32>
    %30 = tpu.matmul %28, %29, %cst_14 {dimension_numbers = #tpu.dot_dimension_numbers<[1], [0], [0], [1], [0, 0, 1, 1], [], []>} : vector<8x8xf32>, vector<8x64xf32>, vector<8x64xf32> -> vector<8x64xf32>
    %31 = arith.addf %11, %30 : vector<8x64xf32>
    %32 = vector.extract_strided_slice %7 {offsets = [0, 8], sizes = [8, 8], strides = [1, 1]} : vector<8x64xf32> to vector<8x8xf32>
    %cst_15 = arith.constant 0.353553385 : f32
    %33 = vector.broadcast %cst_15 : f32 to vector<8x8xf32>
    %34 = arith.mulf %32, %33 : vector<8x8xf32>
    %35 = vector.extract_strided_slice %8 {offsets = [0, 8], sizes = [8, 8], strides = [1, 1]} : vector<8x64xf32> to vector<8x8xf32>
    %36 = vector.extract_strided_slice %9 {offsets = [0, 8], sizes = [8, 8], strides = [1, 1]} : vector<8x64xf32> to vector<8x8xf32>
    %cst_16 = arith.constant dense<0.000000e+00> : vector<8x8xf32>
    %37 = tpu.matmul %34, %35, %cst_16 {dimension_numbers = #tpu.dot_dimension_numbers<[1], [1], [0], [0], [0, 0, 1, 0], [], []>} : vector<8x8xf32>, vector<8x8xf32>, vector<8x8xf32> -> vector<8x8xf32>
    %cst_17 = arith.constant dense<0xFF800000> : vector<8xf32>
    %38 = vector.multi_reduction <maximumf>, %37, %cst_17 [1] : vector<8x8xf32> to vector<8xf32>
    %39 = vector.shape_cast %38 : vector<8xf32> to vector<8x1xf32>
    %40 = vector.broadcast %39 : vector<8x1xf32> to vector<8x8xf32>
    %41 = arith.subf %37, %40 : vector<8x8xf32>
    %42 = math.exp %41 : vector<8x8xf32>
    %cst_18 = arith.constant dense<0.000000e+00> : vector<8xf32>
    %43 = vector.multi_reduction <add>, %42, %cst_18 [1] : vector<8x8xf32> to vector<8xf32>
    %44 = vector.shape_cast %43 : vector<8xf32> to vector<8x1xf32>
    %45 = tpu.reciprocal %44 {approx = true} : vector<8x1xf32> -> vector<8x1xf32>
    %46 = vector.broadcast %45 : vector<8x1xf32> to vector<8x8xf32>
    %47 = arith.mulf %42, %46 : vector<8x8xf32>
    %cst_19 = arith.constant dense<0.000000e+00> : vector<8x8xf32>
    %48 = tpu.matmul %47, %36, %cst_19 {dimension_numbers = #tpu.dot_dimension_numbers<[1], [0], [0], [1], [0, 0, 1, 1], [], []>} : vector<8x8xf32>, vector<8x8xf32>, vector<8x8xf32> -> vector<8x8xf32>
    %49 = vector.extract_strided_slice %10 {offsets = [8, 0], sizes = [8, 64], strides = [1, 1]} : vector<64x64xf32> to vector<8x64xf32>
    %cst_20 = arith.constant dense<0.000000e+00> : vector<8x64xf32>
    %50 = tpu.matmul %48, %49, %cst_20 {dimension_numbers = #tpu.dot_dimension_numbers<[1], [0], [0], [1], [0, 0, 1, 1], [], []>} : vector<8x8xf32>, vector<8x64xf32>, vector<8x64xf32> -> vector<8x64xf32>
    %51 = arith.addf %31, %50 : vector<8x64xf32>
    %52 = vector.extract_strided_slice %7 {offsets = [0, 16], sizes = [8, 8], strides = [1, 1]} : vector<8x64xf32> to vector<8x8xf32>
    %cst_21 = arith.constant 0.353553385 : f32
    %53 = vector.broadcast %cst_21 : f32 to vector<8x8xf32>
    %54 = arith.mulf %52, %53 : vector<8x8xf32>
    %55 = vector.extract_strided_slice %8 {offsets = [0, 16], sizes = [8, 8], strides = [1, 1]} : vector<8x64xf32> to vector<8x8xf32>
    %56 = vector.extract_strided_slice %9 {offsets = [0, 16], sizes = [8, 8], strides = [1, 1]} : vector<8x64xf32> to vector<8x8xf32>
    %cst_22 = arith.constant dense<0.000000e+00> : vector<8x8xf32>
    %57 = tpu.matmul %54, %55, %cst_22 {dimension_numbers = #tpu.dot_dimension_numbers<[1], [1], [0], [0], [0, 0, 1, 0], [], []>} : vector<8x8xf32>, vector<8x8xf32>, vector<8x8xf32> -> vector<8x8xf32>
    %cst_23 = arith.constant dense<0xFF800000> : vector<8xf32>
    %58 = vector.multi_reduction <maximumf>, %57, %cst_23 [1] : vector<8x8xf32> to vector<8xf32>
    %59 = vector.shape_cast %58 : vector<8xf32> to vector<8x1xf32>
    %60 = vector.broadcast %59 : vector<8x1xf32> to vector<8x8xf32>
    %61 = arith.subf %57, %60 : vector<8x8xf32>
    %62 = math.exp %61 : vector<8x8xf32>
    %cst_24 = arith.constant dense<0.000000e+00> : vector<8xf32>
    %63 = vector.multi_reduction <add>, %62, %cst_24 [1] : vector<8x8xf32> to vector<8xf32>
    %64 = vector.shape_cast %63 : vector<8xf32> to vector<8x1xf32>
    %65 = tpu.reciprocal %64 {approx = true} : vector<8x1xf32> -> vector<8x1xf32>
    %66 = vector.broadcast %65 : vector<8x1xf32> to vector<8x8xf32>
    %67 = arith.mulf %62, %66 : vector<8x8xf32>
    %cst_25 = arith.constant dense<0.000000e+00> : vector<8x8xf32>
    %68 = tpu.matmul %67, %56, %cst_25 {dimension_numbers = #tpu.dot_dimension_numbers<[1], [0], [0], [1], [0, 0, 1, 1], [], []>} : vector<8x8xf32>, vector<8x8xf32>, vector<8x8xf32> -> vector<8x8xf32>
    %69 = vector.extract_strided_slice %10 {offsets = [16, 0], sizes = [8, 64], strides = [1, 1]} : vector<64x64xf32> to vector<8x64xf32>
    %cst_26 = arith.constant dense<0.000000e+00> : vector<8x64xf32>
    %70 = tpu.matmul %68, %69, %cst_26 {dimension_numbers = #tpu.dot_dimension_numbers<[1], [0], [0], [1], [0, 0, 1, 1], [], []>} : vector<8x8xf32>, vector<8x64xf32>, vector<8x64xf32> -> vector<8x64xf32>
    %71 = arith.addf %51, %70 : vector<8x64xf32>
    %72 = vector.extract_strided_slice %7 {offsets = [0, 24], sizes = [8, 8], strides = [1, 1]} : vector<8x64xf32> to vector<8x8xf32>
    %cst_27 = arith.constant 0.353553385 : f32
    %73 = vector.broadcast %cst_27 : f32 to vector<8x8xf32>
    %74 = arith.mulf %72, %73 : vector<8x8xf32>
    %75 = vector.extract_strided_slice %8 {offsets = [0, 24], sizes = [8, 8], strides = [1, 1]} : vector<8x64xf32> to vector<8x8xf32>
    %76 = vector.extract_strided_slice %9 {offsets = [0, 24], sizes = [8, 8], strides = [1, 1]} : vector<8x64xf32> to vector<8x8xf32>
    %cst_28 = arith.constant dense<0.000000e+00> : vector<8x8xf32>
    %77 = tpu.matmul %74, %75, %cst_28 {dimension_numbers = #tpu.dot_dimension_numbers<[1], [1], [0], [0], [0, 0, 1, 0], [], []>} : vector<8x8xf32>, vector<8x8xf32>, vector<8x8xf32> -> vector<8x8xf32>
    %cst_29 = arith.constant dense<0xFF800000> : vector<8xf32>
    %78 = vector.multi_reduction <maximumf>, %77, %cst_29 [1] : vector<8x8xf32> to vector<8xf32>
    %79 = vector.shape_cast %78 : vector<8xf32> to vector<8x1xf32>
    %80 = vector.broadcast %79 : vector<8x1xf32> to vector<8x8xf32>
    %81 = arith.subf %77, %80 : vector<8x8xf32>
    %82 = math.exp %81 : vector<8x8xf32>
    %cst_30 = arith.constant dense<0.000000e+00> : vector<8xf32>
    %83 = vector.multi_reduction <add>, %82, %cst_30 [1] : vector<8x8xf32> to vector<8xf32>
    %84 = vector.shape_cast %83 : vector<8xf32> to vector<8x1xf32>
    %85 = tpu.reciprocal %84 {approx = true} : vector<8x1xf32> -> vector<8x1xf32>
    %86 = vector.broadcast %85 : vector<8x1xf32> to vector<8x8xf32>
    %87 = arith.mulf %82, %86 : vector<8x8xf32>
    %cst_31 = arith.constant dense<0.000000e+00> : vector<8x8xf32>
    %88 = tpu.matmul %87, %76, %cst_31 {dimension_numbers = #tpu.dot_dimension_numbers<[1], [0], [0], [1], [0, 0, 1, 1], [], []>} : vector<8x8xf32>, vector<8x8xf32>, vector<8x8xf32> -> vector<8x8xf32>
    %89 = vector.extract_strided_slice %10 {offsets = [24, 0], sizes = [8, 64], strides = [1, 1]} : vector<64x64xf32> to vector<8x64xf32>
    %cst_32 = arith.constant dense<0.000000e+00> : vector<8x64xf32>
    %90 = tpu.matmul %88, %89, %cst_32 {dimension_numbers = #tpu.dot_dimension_numbers<[1], [0], [0], [1], [0, 0, 1, 1], [], []>} : vector<8x8xf32>, vector<8x64xf32>, vector<8x64xf32> -> vector<8x64xf32>
    %91 = arith.addf %71, %90 : vector<8x64xf32>
    %92 = vector.extract_strided_slice %7 {offsets = [0, 32], sizes = [8, 8], strides = [1, 1]} : vector<8x64xf32> to vector<8x8xf32>
    %cst_33 = arith.constant 0.353553385 : f32
    %93 = vector.broadcast %cst_33 : f32 to vector<8x8xf32>
    %94 = arith.mulf %92, %93 : vector<8x8xf32>
    %95 = vector.extract_strided_slice %8 {offsets = [0, 32], sizes = [8, 8], strides = [1, 1]} : vector<8x64xf32> to vector<8x8xf32>
    %96 = vector.extract_strided_slice %9 {offsets = [0, 32], sizes = [8, 8], strides = [1, 1]} : vector<8x64xf32> to vector<8x8xf32>
    %cst_34 = arith.constant dense<0.000000e+00> : vector<8x8xf32>
    %97 = tpu.matmul %94, %95, %cst_34 {dimension_numbers = #tpu.dot_dimension_numbers<[1], [1], [0], [0], [0, 0, 1, 0], [], []>} : vector<8x8xf32>, vector<8x8xf32>, vector<8x8xf32> -> vector<8x8xf32>
    %cst_35 = arith.constant dense<0xFF800000> : vector<8xf32>
    %98 = vector.multi_reduction <maximumf>, %97, %cst_35 [1] : vector<8x8xf32> to vector<8xf32>
    %99 = vector.shape_cast %98 : vector<8xf32> to vector<8x1xf32>
    %100 = vector.broadcast %99 : vector<8x1xf32> to vector<8x8xf32>
    %101 = arith.subf %97, %100 : vector<8x8xf32>
    %102 = math.exp %101 : vector<8x8xf32>
    %cst_36 = arith.constant dense<0.000000e+00> : vector<8xf32>
    %103 = vector.multi_reduction <add>, %102, %cst_36 [1] : vector<8x8xf32> to vector<8xf32>
    %104 = vector.shape_cast %103 : vector<8xf32> to vector<8x1xf32>
    %105 = tpu.reciprocal %104 {approx = true} : vector<8x1xf32> -> vector<8x1xf32>
    %106 = vector.broadcast %105 : vector<8x1xf32> to vector<8x8xf32>
    %107 = arith.mulf %102, %106 : vector<8x8xf32>
    %cst_37 = arith.constant dense<0.000000e+00> : vector<8x8xf32>
    %108 = tpu.matmul %107, %96, %cst_37 {dimension_numbers = #tpu.dot_dimension_numbers<[1], [0], [0], [1], [0, 0, 1, 1], [], []>} : vector<8x8xf32>, vector<8x8xf32>, vector<8x8xf32> -> vector<8x8xf32>
    %109 = vector.extract_strided_slice %10 {offsets = [32, 0], sizes = [8, 64], strides = [1, 1]} : vector<64x64xf32> to vector<8x64xf32>
    %cst_38 = arith.constant dense<0.000000e+00> : vector<8x64xf32>
    %110 = tpu.matmul %108, %109, %cst_38 {dimension_numbers = #tpu.dot_dimension_numbers<[1], [0], [0], [1], [0, 0, 1, 1], [], []>} : vector<8x8xf32>, vector<8x64xf32>, vector<8x64xf32> -> vector<8x64xf32>
    %111 = arith.addf %91, %110 : vector<8x64xf32>
    %112 = vector.extract_strided_slice %7 {offsets = [0, 40], sizes = [8, 8], strides = [1, 1]} : vector<8x64xf32> to vector<8x8xf32>
    %cst_39 = arith.constant 0.353553385 : f32
    %113 = vector.broadcast %cst_39 : f32 to vector<8x8xf32>
    %114 = arith.mulf %112, %113 : vector<8x8xf32>
    %115 = vector.extract_strided_slice %8 {offsets = [0, 40], sizes = [8, 8], strides = [1, 1]} : vector<8x64xf32> to vector<8x8xf32>
    %116 = vector.extract_strided_slice %9 {offsets = [0, 40], sizes = [8, 8], strides = [1, 1]} : vector<8x64xf32> to vector<8x8xf32>
    %cst_40 = arith.constant dense<0.000000e+00> : vector<8x8xf32>
    %117 = tpu.matmul %114, %115, %cst_40 {dimension_numbers = #tpu.dot_dimension_numbers<[1], [1], [0], [0], [0, 0, 1, 0], [], []>} : vector<8x8xf32>, vector<8x8xf32>, vector<8x8xf32> -> vector<8x8xf32>
    %cst_41 = arith.constant dense<0xFF800000> : vector<8xf32>
    %118 = vector.multi_reduction <maximumf>, %117, %cst_41 [1] : vector<8x8xf32> to vector<8xf32>
    %119 = vector.shape_cast %118 : vector<8xf32> to vector<8x1xf32>
    %120 = vector.broadcast %119 : vector<8x1xf32> to vector<8x8xf32>
    %121 = arith.subf %117, %120 : vector<8x8xf32>
    %122 = math.exp %121 : vector<8x8xf32>
    %cst_42 = arith.constant dense<0.000000e+00> : vector<8xf32>
    %123 = vector.multi_reduction <add>, %122, %cst_42 [1] : vector<8x8xf32> to vector<8xf32>
    %124 = vector.shape_cast %123 : vector<8xf32> to vector<8x1xf32>
    %125 = tpu.reciprocal %124 {approx = true} : vector<8x1xf32> -> vector<8x1xf32>
    %126 = vector.broadcast %125 : vector<8x1xf32> to vector<8x8xf32>
    %127 = arith.mulf %122, %126 : vector<8x8xf32>
    %cst_43 = arith.constant dense<0.000000e+00> : vector<8x8xf32>
    %128 = tpu.matmul %127, %116, %cst_43 {dimension_numbers = #tpu.dot_dimension_numbers<[1], [0], [0], [1], [0, 0, 1, 1], [], []>} : vector<8x8xf32>, vector<8x8xf32>, vector<8x8xf32> -> vector<8x8xf32>
    %129 = vector.extract_strided_slice %10 {offsets = [40, 0], sizes = [8, 64], strides = [1, 1]} : vector<64x64xf32> to vector<8x64xf32>
    %cst_44 = arith.constant dense<0.000000e+00> : vector<8x64xf32>
    %130 = tpu.matmul %128, %129, %cst_44 {dimension_numbers = #tpu.dot_dimension_numbers<[1], [0], [0], [1], [0, 0, 1, 1], [], []>} : vector<8x8xf32>, vector<8x64xf32>, vector<8x64xf32> -> vector<8x64xf32>
    %131 = arith.addf %111, %130 : vector<8x64xf32>
    %132 = vector.extract_strided_slice %7 {offsets = [0, 48], sizes = [8, 8], strides = [1, 1]} : vector<8x64xf32> to vector<8x8xf32>
    %cst_45 = arith.constant 0.353553385 : f32
    %133 = vector.broadcast %cst_45 : f32 to vector<8x8xf32>
    %134 = arith.mulf %132, %133 : vector<8x8xf32>
    %135 = vector.extract_strided_slice %8 {offsets = [0, 48], sizes = [8, 8], strides = [1, 1]} : vector<8x64xf32> to vector<8x8xf32>
    %136 = vector.extract_strided_slice %9 {offsets = [0, 48], sizes = [8, 8], strides = [1, 1]} : vector<8x64xf32> to vector<8x8xf32>
    %cst_46 = arith.constant dense<0.000000e+00> : vector<8x8xf32>
    %137 = tpu.matmul %134, %135, %cst_46 {dimension_numbers = #tpu.dot_dimension_numbers<[1], [1], [0], [0], [0, 0, 1, 0], [], []>} : vector<8x8xf32>, vector<8x8xf32>, vector<8x8xf32> -> vector<8x8xf32>
    %cst_47 = arith.constant dense<0xFF800000> : vector<8xf32>
    %138 = vector.multi_reduction <maximumf>, %137, %cst_47 [1] : vector<8x8xf32> to vector<8xf32>
    %139 = vector.shape_cast %138 : vector<8xf32> to vector<8x1xf32>
    %140 = vector.broadcast %139 : vector<8x1xf32> to vector<8x8xf32>
    %141 = arith.subf %137, %140 : vector<8x8xf32>
    %142 = math.exp %141 : vector<8x8xf32>
    %cst_48 = arith.constant dense<0.000000e+00> : vector<8xf32>
    %143 = vector.multi_reduction <add>, %142, %cst_48 [1] : vector<8x8xf32> to vector<8xf32>
    %144 = vector.shape_cast %143 : vector<8xf32> to vector<8x1xf32>
    %145 = tpu.reciprocal %144 {approx = true} : vector<8x1xf32> -> vector<8x1xf32>
    %146 = vector.broadcast %145 : vector<8x1xf32> to vector<8x8xf32>
    %147 = arith.mulf %142, %146 : vector<8x8xf32>
    %cst_49 = arith.constant dense<0.000000e+00> : vector<8x8xf32>
    %148 = tpu.matmul %147, %136, %cst_49 {dimension_numbers = #tpu.dot_dimension_numbers<[1], [0], [0], [1], [0, 0, 1, 1], [], []>} : vector<8x8xf32>, vector<8x8xf32>, vector<8x8xf32> -> vector<8x8xf32>
    %149 = vector.extract_strided_slice %10 {offsets = [48, 0], sizes = [8, 64], strides = [1, 1]} : vector<64x64xf32> to vector<8x64xf32>
    %cst_50 = arith.constant dense<0.000000e+00> : vector<8x64xf32>
    %150 = tpu.matmul %148, %149, %cst_50 {dimension_numbers = #tpu.dot_dimension_numbers<[1], [0], [0], [1], [0, 0, 1, 1], [], []>} : vector<8x8xf32>, vector<8x64xf32>, vector<8x64xf32> -> vector<8x64xf32>
    %151 = arith.addf %131, %150 : vector<8x64xf32>
    %152 = vector.extract_strided_slice %7 {offsets = [0, 56], sizes = [8, 8], strides = [1, 1]} : vector<8x64xf32> to vector<8x8xf32>
    %cst_51 = arith.constant 0.353553385 : f32
    %153 = vector.broadcast %cst_51 : f32 to vector<8x8xf32>
    %154 = arith.mulf %152, %153 : vector<8x8xf32>
    %155 = vector.extract_strided_slice %8 {offsets = [0, 56], sizes = [8, 8], strides = [1, 1]} : vector<8x64xf32> to vector<8x8xf32>
    %156 = vector.extract_strided_slice %9 {offsets = [0, 56], sizes = [8, 8], strides = [1, 1]} : vector<8x64xf32> to vector<8x8xf32>
    %cst_52 = arith.constant dense<0.000000e+00> : vector<8x8xf32>
    %157 = tpu.matmul %154, %155, %cst_52 {dimension_numbers = #tpu.dot_dimension_numbers<[1], [1], [0], [0], [0, 0, 1, 0], [], []>} : vector<8x8xf32>, vector<8x8xf32>, vector<8x8xf32> -> vector<8x8xf32>
    %cst_53 = arith.constant dense<0xFF800000> : vector<8xf32>
    %158 = vector.multi_reduction <maximumf>, %157, %cst_53 [1] : vector<8x8xf32> to vector<8xf32>
    %159 = vector.shape_cast %158 : vector<8xf32> to vector<8x1xf32>
    %160 = vector.broadcast %159 : vector<8x1xf32> to vector<8x8xf32>
    %161 = arith.subf %157, %160 : vector<8x8xf32>
    %162 = math.exp %161 : vector<8x8xf32>
    %cst_54 = arith.constant dense<0.000000e+00> : vector<8xf32>
    %163 = vector.multi_reduction <add>, %162, %cst_54 [1] : vector<8x8xf32> to vector<8xf32>
    %164 = vector.shape_cast %163 : vector<8xf32> to vector<8x1xf32>
    %165 = tpu.reciprocal %164 {approx = true} : vector<8x1xf32> -> vector<8x1xf32>
    %166 = vector.broadcast %165 : vector<8x1xf32> to vector<8x8xf32>
    %167 = arith.mulf %162, %166 : vector<8x8xf32>
    %cst_55 = arith.constant dense<0.000000e+00> : vector<8x8xf32>
    %168 = tpu.matmul %167, %156, %cst_55 {dimension_numbers = #tpu.dot_dimension_numbers<[1], [0], [0], [1], [0, 0, 1, 1], [], []>} : vector<8x8xf32>, vector<8x8xf32>, vector<8x8xf32> -> vector<8x8xf32>
    %169 = vector.extract_strided_slice %10 {offsets = [56, 0], sizes = [8, 64], strides = [1, 1]} : vector<64x64xf32> to vector<8x64xf32>
    %cst_56 = arith.constant dense<0.000000e+00> : vector<8x64xf32>
    %170 = tpu.matmul %168, %169, %cst_56 {dimension_numbers = #tpu.dot_dimension_numbers<[1], [0], [0], [1], [0, 0, 1, 1], [], []>} : vector<8x8xf32>, vector<8x64xf32>, vector<8x64xf32> -> vector<8x64xf32>
    %171 = arith.addf %151, %170 : vector<8x64xf32>
    %c0_57 = arith.constant 0 : index
    %c0_58 = arith.constant 0 : index
    %172 = vector.load %arg6[%c0_57, %c0_58] : memref<1x64xf32, #tpu.memory_space<vmem>>, vector<1x64xf32>
    %173 = vector.broadcast %172 : vector<1x64xf32> to vector<8x64xf32>
    %174 = arith.addf %171, %173 : vector<8x64xf32>
    %175 = arith.addf %1, %174 : vector<8x64xf32>
    %c0_59 = arith.constant 0 : index
    %c0_60 = arith.constant 0 : index
    %176 = vector.load %arg7[%c0_59, %c0_60] : memref<1x64xf32, #tpu.memory_space<vmem>>, vector<1x64xf32>
    %c0_61 = arith.constant 0 : index
    %c0_62 = arith.constant 0 : index
    %177 = vector.load %arg8[%c0_61, %c0_62] : memref<1x64xf32, #tpu.memory_space<vmem>>, vector<1x64xf32>
    %cst_63 = arith.constant dense<0.000000e+00> : vector<8xf32>
    %178 = vector.multi_reduction <add>, %175, %cst_63 [1] : vector<8x64xf32> to vector<8xf32>
    %179 = vector.shape_cast %178 : vector<8xf32> to vector<8x1xf32>
    %cst_64 = arith.constant 6.400000e+01 : f32
    %180 = vector.broadcast %cst_64 : f32 to vector<8x1xf32>
    %181 = arith.divf %179, %180 : vector<8x1xf32>
    %182 = vector.broadcast %181 : vector<8x1xf32> to vector<8x64xf32>
    %183 = arith.subf %175, %182 : vector<8x64xf32>
    %184 = arith.mulf %183, %183 : vector<8x64xf32>
    %cst_65 = arith.constant dense<0.000000e+00> : vector<8xf32>
    %185 = vector.multi_reduction <add>, %184, %cst_65 [1] : vector<8x64xf32> to vector<8xf32>
    %186 = vector.shape_cast %185 : vector<8xf32> to vector<8x1xf32>
    %cst_66 = arith.constant 6.400000e+01 : f32
    %187 = vector.broadcast %cst_66 : f32 to vector<8x1xf32>
    %188 = arith.divf %186, %187 : vector<8x1xf32>
    %cst_67 = arith.constant 9.99999974E-6 : f32
    %189 = vector.broadcast %cst_67 : f32 to vector<8x1xf32>
    %190 = arith.addf %188, %189 : vector<8x1xf32>
    %191 = math.rsqrt %190 : vector<8x1xf32>
    %192 = vector.broadcast %191 : vector<8x1xf32> to vector<8x64xf32>
    %193 = arith.mulf %183, %192 : vector<8x64xf32>
    %194 = vector.broadcast %176 : vector<1x64xf32> to vector<8x64xf32>
    %195 = arith.mulf %193, %194 : vector<8x64xf32>
    %196 = vector.broadcast %177 : vector<1x64xf32> to vector<8x64xf32>
    %197 = arith.addf %195, %196 : vector<8x64xf32>
    %c0_68 = arith.constant 0 : index
    %c0_69 = arith.constant 0 : index
    %198 = vector.load %arg9[%c0_68, %c0_69] : memref<64x2048xf32, #tpu.memory_space<vmem>>, vector<64x2048xf32>
    %cst_70 = arith.constant dense<0.000000e+00> : vector<8x2048xf32>
    %199 = tpu.matmul %197, %198, %cst_70 {dimension_numbers = #tpu.dot_dimension_numbers<[1], [0], [0], [1], [0, 0, 1, 1], [], []>} : vector<8x64xf32>, vector<64x2048xf32>, vector<8x2048xf32> -> vector<8x2048xf32>
    %c0_71 = arith.constant 0 : index
    %c0_72 = arith.constant 0 : index
    %200 = vector.load %arg10[%c0_71, %c0_72] : memref<1x2048xf32, #tpu.memory_space<vmem>>, vector<1x2048xf32>
    %201 = vector.broadcast %200 : vector<1x2048xf32> to vector<8x2048xf32>
    %202 = arith.addf %199, %201 : vector<8x2048xf32>
    %cst_73 = arith.constant 0.000000e+00 : f32
    %203 = vector.broadcast %cst_73 : f32 to vector<8x2048xf32>
    %204 = arith.maximumf %202, %203 : vector<8x2048xf32>
    %c0_74 = arith.constant 0 : index
    %c0_75 = arith.constant 0 : index
    %205 = vector.load %arg11[%c0_74, %c0_75] : memref<2048x64xf32, #tpu.memory_space<vmem>>, vector<2048x64xf32>
    %cst_76 = arith.constant dense<0.000000e+00> : vector<8x64xf32>
    %206 = tpu.matmul %204, %205, %cst_76 {dimension_numbers = #tpu.dot_dimension_numbers<[1], [0], [0], [1], [0, 0, 1, 1], [], []>} : vector<8x2048xf32>, vector<2048x64xf32>, vector<8x64xf32> -> vector<8x64xf32>
    %c0_77 = arith.constant 0 : index
    %c0_78 = arith.constant 0 : index
    %207 = vector.load %arg12[%c0_77, %c0_78] : memref<1x64xf32, #tpu.memory_space<vmem>>, vector<1x64xf32>
    %208 = vector.broadcast %207 : vector<1x64xf32> to vector<8x64xf32>
    %209 = arith.addf %206, %208 : vector<8x64xf32>
    %210 = arith.addf %197, %209 : vector<8x64xf32>
    %c0_79 = arith.constant 0 : index
    %c0_80 = arith.constant 0 : index
    %211 = vector.load %arg13[%c0_79, %c0_80] : memref<1x64xf32, #tpu.memory_space<vmem>>, vector<1x64xf32>
    %c0_81 = arith.constant 0 : index
    %c0_82 = arith.constant 0 : index
    %212 = vector.load %arg14[%c0_81, %c0_82] : memref<1x64xf32, #tpu.memory_space<vmem>>, vector<1x64xf32>
    %cst_83 = arith.constant dense<0.000000e+00> : vector<8xf32>
    %213 = vector.multi_reduction <add>, %210, %cst_83 [1] : vector<8x64xf32> to vector<8xf32>
    %214 = vector.shape_cast %213 : vector<8xf32> to vector<8x1xf32>
    %cst_84 = arith.constant 6.400000e+01 : f32
    %215 = vector.broadcast %cst_84 : f32 to vector<8x1xf32>
    %216 = arith.divf %214, %215 : vector<8x1xf32>
    %217 = vector.broadcast %216 : vector<8x1xf32> to vector<8x64xf32>
    %218 = arith.subf %210, %217 : vector<8x64xf32>
    %219 = arith.mulf %218, %218 : vector<8x64xf32>
    %cst_85 = arith.constant dense<0.000000e+00> : vector<8xf32>
    %220 = vector.multi_reduction <add>, %219, %cst_85 [1] : vector<8x64xf32> to vector<8xf32>
    %221 = vector.shape_cast %220 : vector<8xf32> to vector<8x1xf32>
    %cst_86 = arith.constant 6.400000e+01 : f32
    %222 = vector.broadcast %cst_86 : f32 to vector<8x1xf32>
    %223 = arith.divf %221, %222 : vector<8x1xf32>
    %cst_87 = arith.constant 9.99999974E-6 : f32
    %224 = vector.broadcast %cst_87 : f32 to vector<8x1xf32>
    %225 = arith.addf %223, %224 : vector<8x1xf32>
    %226 = math.rsqrt %225 : vector<8x1xf32>
    %227 = vector.broadcast %226 : vector<8x1xf32> to vector<8x64xf32>
    %228 = arith.mulf %218, %227 : vector<8x64xf32>
    %229 = vector.broadcast %211 : vector<1x64xf32> to vector<8x64xf32>
    %230 = arith.mulf %228, %229 : vector<8x64xf32>
    %231 = vector.broadcast %212 : vector<1x64xf32> to vector<8x64xf32>
    %232 = arith.addf %230, %231 : vector<8x64xf32>
    %c0_88 = arith.constant 0 : index
    %c0_89 = arith.constant 0 : index
    %c0_90 = arith.constant 0 : index
    %233 = vector.load %arg2[%c0_88, %c0_89, %c0_90] : memref<1x8x64xf32, #tpu.memory_space<vmem>>, vector<1x8x64xf32>
    %234 = vector.shape_cast %233 : vector<1x8x64xf32> to vector<8x64xf32>
    %c0_91 = arith.constant 0 : index
    %c0_92 = arith.constant 0 : index
    %235 = vector.load %arg15[%c0_91, %c0_92] : memref<64x192xf32, #tpu.memory_space<vmem>>, vector<64x192xf32>
    %cst_93 = arith.constant dense<0.000000e+00> : vector<8x192xf32>
    %236 = tpu.matmul %234, %235, %cst_93 {dimension_numbers = #tpu.dot_dimension_numbers<[1], [0], [0], [1], [0, 0, 1, 1], [], []>} : vector<8x64xf32>, vector<64x192xf32>, vector<8x192xf32> -> vector<8x192xf32>
    %c0_94 = arith.constant 0 : index
    %c0_95 = arith.constant 0 : index
    %237 = vector.load %arg16[%c0_94, %c0_95] : memref<1x192xf32, #tpu.memory_space<vmem>>, vector<1x192xf32>
    %238 = vector.broadcast %237 : vector<1x192xf32> to vector<8x192xf32>
    %239 = arith.addf %236, %238 : vector<8x192xf32>
    %240 = vector.extract_strided_slice %239 {offsets = [0, 0], sizes = [8, 64], strides = [1, 1]} : vector<8x192xf32> to vector<8x64xf32>
    %241 = vector.extract_strided_slice %239 {offsets = [0, 64], sizes = [8, 64], strides = [1, 1]} : vector<8x192xf32> to vector<8x64xf32>
    %242 = vector.extract_strided_slice %239 {offsets = [0, 128], sizes = [8, 64], strides = [1, 1]} : vector<8x192xf32> to vector<8x64xf32>
    %c0_96 = arith.constant 0 : index
    %c0_97 = arith.constant 0 : index
    %243 = vector.load %arg17[%c0_96, %c0_97] : memref<64x64xf32, #tpu.memory_space<vmem>>, vector<64x64xf32>
    %cst_98 = arith.constant 0.000000e+00 : f32
    %244 = vector.broadcast %cst_98 : f32 to vector<8x64xf32>
    %245 = vector.extract_strided_slice %240 {offsets = [0, 0], sizes = [8, 8], strides = [1, 1]} : vector<8x64xf32> to vector<8x8xf32>
    %cst_99 = arith.constant 0.353553385 : f32
    %246 = vector.broadcast %cst_99 : f32 to vector<8x8xf32>
    %247 = arith.mulf %245, %246 : vector<8x8xf32>
    %248 = vector.extract_strided_slice %241 {offsets = [0, 0], sizes = [8, 8], strides = [1, 1]} : vector<8x64xf32> to vector<8x8xf32>
    %249 = vector.extract_strided_slice %242 {offsets = [0, 0], sizes = [8, 8], strides = [1, 1]} : vector<8x64xf32> to vector<8x8xf32>
    %cst_100 = arith.constant dense<0.000000e+00> : vector<8x8xf32>
    %250 = tpu.matmul %247, %248, %cst_100 {dimension_numbers = #tpu.dot_dimension_numbers<[1], [1], [0], [0], [0, 0, 1, 0], [], []>} : vector<8x8xf32>, vector<8x8xf32>, vector<8x8xf32> -> vector<8x8xf32>
    %cst_101 = arith.constant dense<0xFF800000> : vector<8xf32>
    %251 = vector.multi_reduction <maximumf>, %250, %cst_101 [1] : vector<8x8xf32> to vector<8xf32>
    %252 = vector.shape_cast %251 : vector<8xf32> to vector<8x1xf32>
    %253 = vector.broadcast %252 : vector<8x1xf32> to vector<8x8xf32>
    %254 = arith.subf %250, %253 : vector<8x8xf32>
    %255 = math.exp %254 : vector<8x8xf32>
    %cst_102 = arith.constant dense<0.000000e+00> : vector<8xf32>
    %256 = vector.multi_reduction <add>, %255, %cst_102 [1] : vector<8x8xf32> to vector<8xf32>
    %257 = vector.shape_cast %256 : vector<8xf32> to vector<8x1xf32>
    %258 = tpu.reciprocal %257 {approx = true} : vector<8x1xf32> -> vector<8x1xf32>
    %259 = vector.broadcast %258 : vector<8x1xf32> to vector<8x8xf32>
    %260 = arith.mulf %255, %259 : vector<8x8xf32>
    %cst_103 = arith.constant dense<0.000000e+00> : vector<8x8xf32>
    %261 = tpu.matmul %260, %249, %cst_103 {dimension_numbers = #tpu.dot_dimension_numbers<[1], [0], [0], [1], [0, 0, 1, 1], [], []>} : vector<8x8xf32>, vector<8x8xf32>, vector<8x8xf32> -> vector<8x8xf32>
    %262 = vector.extract_strided_slice %243 {offsets = [0, 0], sizes = [8, 64], strides = [1, 1]} : vector<64x64xf32> to vector<8x64xf32>
    %cst_104 = arith.constant dense<0.000000e+00> : vector<8x64xf32>
    %263 = tpu.matmul %261, %262, %cst_104 {dimension_numbers = #tpu.dot_dimension_numbers<[1], [0], [0], [1], [0, 0, 1, 1], [], []>} : vector<8x8xf32>, vector<8x64xf32>, vector<8x64xf32> -> vector<8x64xf32>
    %264 = arith.addf %244, %263 : vector<8x64xf32>
    %265 = vector.extract_strided_slice %240 {offsets = [0, 8], sizes = [8, 8], strides = [1, 1]} : vector<8x64xf32> to vector<8x8xf32>
    %cst_105 = arith.constant 0.353553385 : f32
    %266 = vector.broadcast %cst_105 : f32 to vector<8x8xf32>
    %267 = arith.mulf %265, %266 : vector<8x8xf32>
    %268 = vector.extract_strided_slice %241 {offsets = [0, 8], sizes = [8, 8], strides = [1, 1]} : vector<8x64xf32> to vector<8x8xf32>
    %269 = vector.extract_strided_slice %242 {offsets = [0, 8], sizes = [8, 8], strides = [1, 1]} : vector<8x64xf32> to vector<8x8xf32>
    %cst_106 = arith.constant dense<0.000000e+00> : vector<8x8xf32>
    %270 = tpu.matmul %267, %268, %cst_106 {dimension_numbers = #tpu.dot_dimension_numbers<[1], [1], [0], [0], [0, 0, 1, 0], [], []>} : vector<8x8xf32>, vector<8x8xf32>, vector<8x8xf32> -> vector<8x8xf32>
    %cst_107 = arith.constant dense<0xFF800000> : vector<8xf32>
    %271 = vector.multi_reduction <maximumf>, %270, %cst_107 [1] : vector<8x8xf32> to vector<8xf32>
    %272 = vector.shape_cast %271 : vector<8xf32> to vector<8x1xf32>
    %273 = vector.broadcast %272 : vector<8x1xf32> to vector<8x8xf32>
    %274 = arith.subf %270, %273 : vector<8x8xf32>
    %275 = math.exp %274 : vector<8x8xf32>
    %cst_108 = arith.constant dense<0.000000e+00> : vector<8xf32>
    %276 = vector.multi_reduction <add>, %275, %cst_108 [1] : vector<8x8xf32> to vector<8xf32>
    %277 = vector.shape_cast %276 : vector<8xf32> to vector<8x1xf32>
    %278 = tpu.reciprocal %277 {approx = true} : vector<8x1xf32> -> vector<8x1xf32>
    %279 = vector.broadcast %278 : vector<8x1xf32> to vector<8x8xf32>
    %280 = arith.mulf %275, %279 : vector<8x8xf32>
    %cst_109 = arith.constant dense<0.000000e+00> : vector<8x8xf32>
    %281 = tpu.matmul %280, %269, %cst_109 {dimension_numbers = #tpu.dot_dimension_numbers<[1], [0], [0], [1], [0, 0, 1, 1], [], []>} : vector<8x8xf32>, vector<8x8xf32>, vector<8x8xf32> -> vector<8x8xf32>
    %282 = vector.extract_strided_slice %243 {offsets = [8, 0], sizes = [8, 64], strides = [1, 1]} : vector<64x64xf32> to vector<8x64xf32>
    %cst_110 = arith.constant dense<0.000000e+00> : vector<8x64xf32>
    %283 = tpu.matmul %281, %282, %cst_110 {dimension_numbers = #tpu.dot_dimension_numbers<[1], [0], [0], [1], [0, 0, 1, 1], [], []>} : vector<8x8xf32>, vector<8x64xf32>, vector<8x64xf32> -> vector<8x64xf32>
    %284 = arith.addf %264, %283 : vector<8x64xf32>
    %285 = vector.extract_strided_slice %240 {offsets = [0, 16], sizes = [8, 8], strides = [1, 1]} : vector<8x64xf32> to vector<8x8xf32>
    %cst_111 = arith.constant 0.353553385 : f32
    %286 = vector.broadcast %cst_111 : f32 to vector<8x8xf32>
    %287 = arith.mulf %285, %286 : vector<8x8xf32>
    %288 = vector.extract_strided_slice %241 {offsets = [0, 16], sizes = [8, 8], strides = [1, 1]} : vector<8x64xf32> to vector<8x8xf32>
    %289 = vector.extract_strided_slice %242 {offsets = [0, 16], sizes = [8, 8], strides = [1, 1]} : vector<8x64xf32> to vector<8x8xf32>
    %cst_112 = arith.constant dense<0.000000e+00> : vector<8x8xf32>
    %290 = tpu.matmul %287, %288, %cst_112 {dimension_numbers = #tpu.dot_dimension_numbers<[1], [1], [0], [0], [0, 0, 1, 0], [], []>} : vector<8x8xf32>, vector<8x8xf32>, vector<8x8xf32> -> vector<8x8xf32>
    %cst_113 = arith.constant dense<0xFF800000> : vector<8xf32>
    %291 = vector.multi_reduction <maximumf>, %290, %cst_113 [1] : vector<8x8xf32> to vector<8xf32>
    %292 = vector.shape_cast %291 : vector<8xf32> to vector<8x1xf32>
    %293 = vector.broadcast %292 : vector<8x1xf32> to vector<8x8xf32>
    %294 = arith.subf %290, %293 : vector<8x8xf32>
    %295 = math.exp %294 : vector<8x8xf32>
    %cst_114 = arith.constant dense<0.000000e+00> : vector<8xf32>
    %296 = vector.multi_reduction <add>, %295, %cst_114 [1] : vector<8x8xf32> to vector<8xf32>
    %297 = vector.shape_cast %296 : vector<8xf32> to vector<8x1xf32>
    %298 = tpu.reciprocal %297 {approx = true} : vector<8x1xf32> -> vector<8x1xf32>
    %299 = vector.broadcast %298 : vector<8x1xf32> to vector<8x8xf32>
    %300 = arith.mulf %295, %299 : vector<8x8xf32>
    %cst_115 = arith.constant dense<0.000000e+00> : vector<8x8xf32>
    %301 = tpu.matmul %300, %289, %cst_115 {dimension_numbers = #tpu.dot_dimension_numbers<[1], [0], [0], [1], [0, 0, 1, 1], [], []>} : vector<8x8xf32>, vector<8x8xf32>, vector<8x8xf32> -> vector<8x8xf32>
    %302 = vector.extract_strided_slice %243 {offsets = [16, 0], sizes = [8, 64], strides = [1, 1]} : vector<64x64xf32> to vector<8x64xf32>
    %cst_116 = arith.constant dense<0.000000e+00> : vector<8x64xf32>
    %303 = tpu.matmul %301, %302, %cst_116 {dimension_numbers = #tpu.dot_dimension_numbers<[1], [0], [0], [1], [0, 0, 1, 1], [], []>} : vector<8x8xf32>, vector<8x64xf32>, vector<8x64xf32> -> vector<8x64xf32>
    %304 = arith.addf %284, %303 : vector<8x64xf32>
    %305 = vector.extract_strided_slice %240 {offsets = [0, 24], sizes = [8, 8], strides = [1, 1]} : vector<8x64xf32> to vector<8x8xf32>
    %cst_117 = arith.constant 0.353553385 : f32
    %306 = vector.broadcast %cst_117 : f32 to vector<8x8xf32>
    %307 = arith.mulf %305, %306 : vector<8x8xf32>
    %308 = vector.extract_strided_slice %241 {offsets = [0, 24], sizes = [8, 8], strides = [1, 1]} : vector<8x64xf32> to vector<8x8xf32>
    %309 = vector.extract_strided_slice %242 {offsets = [0, 24], sizes = [8, 8], strides = [1, 1]} : vector<8x64xf32> to vector<8x8xf32>
    %cst_118 = arith.constant dense<0.000000e+00> : vector<8x8xf32>
    %310 = tpu.matmul %307, %308, %cst_118 {dimension_numbers = #tpu.dot_dimension_numbers<[1], [1], [0], [0], [0, 0, 1, 0], [], []>} : vector<8x8xf32>, vector<8x8xf32>, vector<8x8xf32> -> vector<8x8xf32>
    %cst_119 = arith.constant dense<0xFF800000> : vector<8xf32>
    %311 = vector.multi_reduction <maximumf>, %310, %cst_119 [1] : vector<8x8xf32> to vector<8xf32>
    %312 = vector.shape_cast %311 : vector<8xf32> to vector<8x1xf32>
    %313 = vector.broadcast %312 : vector<8x1xf32> to vector<8x8xf32>
    %314 = arith.subf %310, %313 : vector<8x8xf32>
    %315 = math.exp %314 : vector<8x8xf32>
    %cst_120 = arith.constant dense<0.000000e+00> : vector<8xf32>
    %316 = vector.multi_reduction <add>, %315, %cst_120 [1] : vector<8x8xf32> to vector<8xf32>
    %317 = vector.shape_cast %316 : vector<8xf32> to vector<8x1xf32>
    %318 = tpu.reciprocal %317 {approx = true} : vector<8x1xf32> -> vector<8x1xf32>
    %319 = vector.broadcast %318 : vector<8x1xf32> to vector<8x8xf32>
    %320 = arith.mulf %315, %319 : vector<8x8xf32>
    %cst_121 = arith.constant dense<0.000000e+00> : vector<8x8xf32>
    %321 = tpu.matmul %320, %309, %cst_121 {dimension_numbers = #tpu.dot_dimension_numbers<[1], [0], [0], [1], [0, 0, 1, 1], [], []>} : vector<8x8xf32>, vector<8x8xf32>, vector<8x8xf32> -> vector<8x8xf32>
    %322 = vector.extract_strided_slice %243 {offsets = [24, 0], sizes = [8, 64], strides = [1, 1]} : vector<64x64xf32> to vector<8x64xf32>
    %cst_122 = arith.constant dense<0.000000e+00> : vector<8x64xf32>
    %323 = tpu.matmul %321, %322, %cst_122 {dimension_numbers = #tpu.dot_dimension_numbers<[1], [0], [0], [1], [0, 0, 1, 1], [], []>} : vector<8x8xf32>, vector<8x64xf32>, vector<8x64xf32> -> vector<8x64xf32>
    %324 = arith.addf %304, %323 : vector<8x64xf32>
    %325 = vector.extract_strided_slice %240 {offsets = [0, 32], sizes = [8, 8], strides = [1, 1]} : vector<8x64xf32> to vector<8x8xf32>
    %cst_123 = arith.constant 0.353553385 : f32
    %326 = vector.broadcast %cst_123 : f32 to vector<8x8xf32>
    %327 = arith.mulf %325, %326 : vector<8x8xf32>
    %328 = vector.extract_strided_slice %241 {offsets = [0, 32], sizes = [8, 8], strides = [1, 1]} : vector<8x64xf32> to vector<8x8xf32>
    %329 = vector.extract_strided_slice %242 {offsets = [0, 32], sizes = [8, 8], strides = [1, 1]} : vector<8x64xf32> to vector<8x8xf32>
    %cst_124 = arith.constant dense<0.000000e+00> : vector<8x8xf32>
    %330 = tpu.matmul %327, %328, %cst_124 {dimension_numbers = #tpu.dot_dimension_numbers<[1], [1], [0], [0], [0, 0, 1, 0], [], []>} : vector<8x8xf32>, vector<8x8xf32>, vector<8x8xf32> -> vector<8x8xf32>
    %cst_125 = arith.constant dense<0xFF800000> : vector<8xf32>
    %331 = vector.multi_reduction <maximumf>, %330, %cst_125 [1] : vector<8x8xf32> to vector<8xf32>
    %332 = vector.shape_cast %331 : vector<8xf32> to vector<8x1xf32>
    %333 = vector.broadcast %332 : vector<8x1xf32> to vector<8x8xf32>
    %334 = arith.subf %330, %333 : vector<8x8xf32>
    %335 = math.exp %334 : vector<8x8xf32>
    %cst_126 = arith.constant dense<0.000000e+00> : vector<8xf32>
    %336 = vector.multi_reduction <add>, %335, %cst_126 [1] : vector<8x8xf32> to vector<8xf32>
    %337 = vector.shape_cast %336 : vector<8xf32> to vector<8x1xf32>
    %338 = tpu.reciprocal %337 {approx = true} : vector<8x1xf32> -> vector<8x1xf32>
    %339 = vector.broadcast %338 : vector<8x1xf32> to vector<8x8xf32>
    %340 = arith.mulf %335, %339 : vector<8x8xf32>
    %cst_127 = arith.constant dense<0.000000e+00> : vector<8x8xf32>
    %341 = tpu.matmul %340, %329, %cst_127 {dimension_numbers = #tpu.dot_dimension_numbers<[1], [0], [0], [1], [0, 0, 1, 1], [], []>} : vector<8x8xf32>, vector<8x8xf32>, vector<8x8xf32> -> vector<8x8xf32>
    %342 = vector.extract_strided_slice %243 {offsets = [32, 0], sizes = [8, 64], strides = [1, 1]} : vector<64x64xf32> to vector<8x64xf32>
    %cst_128 = arith.constant dense<0.000000e+00> : vector<8x64xf32>
    %343 = tpu.matmul %341, %342, %cst_128 {dimension_numbers = #tpu.dot_dimension_numbers<[1], [0], [0], [1], [0, 0, 1, 1], [], []>} : vector<8x8xf32>, vector<8x64xf32>, vector<8x64xf32> -> vector<8x64xf32>
    %344 = arith.addf %324, %343 : vector<8x64xf32>
    %345 = vector.extract_strided_slice %240 {offsets = [0, 40], sizes = [8, 8], strides = [1, 1]} : vector<8x64xf32> to vector<8x8xf32>
    %cst_129 = arith.constant 0.353553385 : f32
    %346 = vector.broadcast %cst_129 : f32 to vector<8x8xf32>
    %347 = arith.mulf %345, %346 : vector<8x8xf32>
    %348 = vector.extract_strided_slice %241 {offsets = [0, 40], sizes = [8, 8], strides = [1, 1]} : vector<8x64xf32> to vector<8x8xf32>
    %349 = vector.extract_strided_slice %242 {offsets = [0, 40], sizes = [8, 8], strides = [1, 1]} : vector<8x64xf32> to vector<8x8xf32>
    %cst_130 = arith.constant dense<0.000000e+00> : vector<8x8xf32>
    %350 = tpu.matmul %347, %348, %cst_130 {dimension_numbers = #tpu.dot_dimension_numbers<[1], [1], [0], [0], [0, 0, 1, 0], [], []>} : vector<8x8xf32>, vector<8x8xf32>, vector<8x8xf32> -> vector<8x8xf32>
    %cst_131 = arith.constant dense<0xFF800000> : vector<8xf32>
    %351 = vector.multi_reduction <maximumf>, %350, %cst_131 [1] : vector<8x8xf32> to vector<8xf32>
    %352 = vector.shape_cast %351 : vector<8xf32> to vector<8x1xf32>
    %353 = vector.broadcast %352 : vector<8x1xf32> to vector<8x8xf32>
    %354 = arith.subf %350, %353 : vector<8x8xf32>
    %355 = math.exp %354 : vector<8x8xf32>
    %cst_132 = arith.constant dense<0.000000e+00> : vector<8xf32>
    %356 = vector.multi_reduction <add>, %355, %cst_132 [1] : vector<8x8xf32> to vector<8xf32>
    %357 = vector.shape_cast %356 : vector<8xf32> to vector<8x1xf32>
    %358 = tpu.reciprocal %357 {approx = true} : vector<8x1xf32> -> vector<8x1xf32>
    %359 = vector.broadcast %358 : vector<8x1xf32> to vector<8x8xf32>
    %360 = arith.mulf %355, %359 : vector<8x8xf32>
    %cst_133 = arith.constant dense<0.000000e+00> : vector<8x8xf32>
    %361 = tpu.matmul %360, %349, %cst_133 {dimension_numbers = #tpu.dot_dimension_numbers<[1], [0], [0], [1], [0, 0, 1, 1], [], []>} : vector<8x8xf32>, vector<8x8xf32>, vector<8x8xf32> -> vector<8x8xf32>
    %362 = vector.extract_strided_slice %243 {offsets = [40, 0], sizes = [8, 64], strides = [1, 1]} : vector<64x64xf32> to vector<8x64xf32>
    %cst_134 = arith.constant dense<0.000000e+00> : vector<8x64xf32>
    %363 = tpu.matmul %361, %362, %cst_134 {dimension_numbers = #tpu.dot_dimension_numbers<[1], [0], [0], [1], [0, 0, 1, 1], [], []>} : vector<8x8xf32>, vector<8x64xf32>, vector<8x64xf32> -> vector<8x64xf32>
    %364 = arith.addf %344, %363 : vector<8x64xf32>
    %365 = vector.extract_strided_slice %240 {offsets = [0, 48], sizes = [8, 8], strides = [1, 1]} : vector<8x64xf32> to vector<8x8xf32>
    %cst_135 = arith.constant 0.353553385 : f32
    %366 = vector.broadcast %cst_135 : f32 to vector<8x8xf32>
    %367 = arith.mulf %365, %366 : vector<8x8xf32>
    %368 = vector.extract_strided_slice %241 {offsets = [0, 48], sizes = [8, 8], strides = [1, 1]} : vector<8x64xf32> to vector<8x8xf32>
    %369 = vector.extract_strided_slice %242 {offsets = [0, 48], sizes = [8, 8], strides = [1, 1]} : vector<8x64xf32> to vector<8x8xf32>
    %cst_136 = arith.constant dense<0.000000e+00> : vector<8x8xf32>
    %370 = tpu.matmul %367, %368, %cst_136 {dimension_numbers = #tpu.dot_dimension_numbers<[1], [1], [0], [0], [0, 0, 1, 0], [], []>} : vector<8x8xf32>, vector<8x8xf32>, vector<8x8xf32> -> vector<8x8xf32>
    %cst_137 = arith.constant dense<0xFF800000> : vector<8xf32>
    %371 = vector.multi_reduction <maximumf>, %370, %cst_137 [1] : vector<8x8xf32> to vector<8xf32>
    %372 = vector.shape_cast %371 : vector<8xf32> to vector<8x1xf32>
    %373 = vector.broadcast %372 : vector<8x1xf32> to vector<8x8xf32>
    %374 = arith.subf %370, %373 : vector<8x8xf32>
    %375 = math.exp %374 : vector<8x8xf32>
    %cst_138 = arith.constant dense<0.000000e+00> : vector<8xf32>
    %376 = vector.multi_reduction <add>, %375, %cst_138 [1] : vector<8x8xf32> to vector<8xf32>
    %377 = vector.shape_cast %376 : vector<8xf32> to vector<8x1xf32>
    %378 = tpu.reciprocal %377 {approx = true} : vector<8x1xf32> -> vector<8x1xf32>
    %379 = vector.broadcast %378 : vector<8x1xf32> to vector<8x8xf32>
    %380 = arith.mulf %375, %379 : vector<8x8xf32>
    %cst_139 = arith.constant dense<0.000000e+00> : vector<8x8xf32>
    %381 = tpu.matmul %380, %369, %cst_139 {dimension_numbers = #tpu.dot_dimension_numbers<[1], [0], [0], [1], [0, 0, 1, 1], [], []>} : vector<8x8xf32>, vector<8x8xf32>, vector<8x8xf32> -> vector<8x8xf32>
    %382 = vector.extract_strided_slice %243 {offsets = [48, 0], sizes = [8, 64], strides = [1, 1]} : vector<64x64xf32> to vector<8x64xf32>
    %cst_140 = arith.constant dense<0.000000e+00> : vector<8x64xf32>
    %383 = tpu.matmul %381, %382, %cst_140 {dimension_numbers = #tpu.dot_dimension_numbers<[1], [0], [0], [1], [0, 0, 1, 1], [], []>} : vector<8x8xf32>, vector<8x64xf32>, vector<8x64xf32> -> vector<8x64xf32>
    %384 = arith.addf %364, %383 : vector<8x64xf32>
    %385 = vector.extract_strided_slice %240 {offsets = [0, 56], sizes = [8, 8], strides = [1, 1]} : vector<8x64xf32> to vector<8x8xf32>
    %cst_141 = arith.constant 0.353553385 : f32
    %386 = vector.broadcast %cst_141 : f32 to vector<8x8xf32>
    %387 = arith.mulf %385, %386 : vector<8x8xf32>
    %388 = vector.extract_strided_slice %241 {offsets = [0, 56], sizes = [8, 8], strides = [1, 1]} : vector<8x64xf32> to vector<8x8xf32>
    %389 = vector.extract_strided_slice %242 {offsets = [0, 56], sizes = [8, 8], strides = [1, 1]} : vector<8x64xf32> to vector<8x8xf32>
    %cst_142 = arith.constant dense<0.000000e+00> : vector<8x8xf32>
    %390 = tpu.matmul %387, %388, %cst_142 {dimension_numbers = #tpu.dot_dimension_numbers<[1], [1], [0], [0], [0, 0, 1, 0], [], []>} : vector<8x8xf32>, vector<8x8xf32>, vector<8x8xf32> -> vector<8x8xf32>
    %cst_143 = arith.constant dense<0xFF800000> : vector<8xf32>
    %391 = vector.multi_reduction <maximumf>, %390, %cst_143 [1] : vector<8x8xf32> to vector<8xf32>
    %392 = vector.shape_cast %391 : vector<8xf32> to vector<8x1xf32>
    %393 = vector.broadcast %392 : vector<8x1xf32> to vector<8x8xf32>
    %394 = arith.subf %390, %393 : vector<8x8xf32>
    %395 = math.exp %394 : vector<8x8xf32>
    %cst_144 = arith.constant dense<0.000000e+00> : vector<8xf32>
    %396 = vector.multi_reduction <add>, %395, %cst_144 [1] : vector<8x8xf32> to vector<8xf32>
    %397 = vector.shape_cast %396 : vector<8xf32> to vector<8x1xf32>
    %398 = tpu.reciprocal %397 {approx = true} : vector<8x1xf32> -> vector<8x1xf32>
    %399 = vector.broadcast %398 : vector<8x1xf32> to vector<8x8xf32>
    %400 = arith.mulf %395, %399 : vector<8x8xf32>
    %cst_145 = arith.constant dense<0.000000e+00> : vector<8x8xf32>
    %401 = tpu.matmul %400, %389, %cst_145 {dimension_numbers = #tpu.dot_dimension_numbers<[1], [0], [0], [1], [0, 0, 1, 1], [], []>} : vector<8x8xf32>, vector<8x8xf32>, vector<8x8xf32> -> vector<8x8xf32>
    %402 = vector.extract_strided_slice %243 {offsets = [56, 0], sizes = [8, 64], strides = [1, 1]} : vector<64x64xf32> to vector<8x64xf32>
    %cst_146 = arith.constant dense<0.000000e+00> : vector<8x64xf32>
    %403 = tpu.matmul %401, %402, %cst_146 {dimension_numbers = #tpu.dot_dimension_numbers<[1], [0], [0], [1], [0, 0, 1, 1], [], []>} : vector<8x8xf32>, vector<8x64xf32>, vector<8x64xf32> -> vector<8x64xf32>
    %404 = arith.addf %384, %403 : vector<8x64xf32>
    %c0_147 = arith.constant 0 : index
    %c0_148 = arith.constant 0 : index
    %405 = vector.load %arg18[%c0_147, %c0_148] : memref<1x64xf32, #tpu.memory_space<vmem>>, vector<1x64xf32>
    %406 = vector.broadcast %405 : vector<1x64xf32> to vector<8x64xf32>
    %407 = arith.addf %404, %406 : vector<8x64xf32>
    %408 = arith.addf %234, %407 : vector<8x64xf32>
    %c0_149 = arith.constant 0 : index
    %c0_150 = arith.constant 0 : index
    %409 = vector.load %arg19[%c0_149, %c0_150] : memref<1x64xf32, #tpu.memory_space<vmem>>, vector<1x64xf32>
    %c0_151 = arith.constant 0 : index
    %c0_152 = arith.constant 0 : index
    %410 = vector.load %arg20[%c0_151, %c0_152] : memref<1x64xf32, #tpu.memory_space<vmem>>, vector<1x64xf32>
    %cst_153 = arith.constant dense<0.000000e+00> : vector<8xf32>
    %411 = vector.multi_reduction <add>, %408, %cst_153 [1] : vector<8x64xf32> to vector<8xf32>
    %412 = vector.shape_cast %411 : vector<8xf32> to vector<8x1xf32>
    %cst_154 = arith.constant 6.400000e+01 : f32
    %413 = vector.broadcast %cst_154 : f32 to vector<8x1xf32>
    %414 = arith.divf %412, %413 : vector<8x1xf32>
    %415 = vector.broadcast %414 : vector<8x1xf32> to vector<8x64xf32>
    %416 = arith.subf %408, %415 : vector<8x64xf32>
    %417 = arith.mulf %416, %416 : vector<8x64xf32>
    %cst_155 = arith.constant dense<0.000000e+00> : vector<8xf32>
    %418 = vector.multi_reduction <add>, %417, %cst_155 [1] : vector<8x64xf32> to vector<8xf32>
    %419 = vector.shape_cast %418 : vector<8xf32> to vector<8x1xf32>
    %cst_156 = arith.constant 6.400000e+01 : f32
    %420 = vector.broadcast %cst_156 : f32 to vector<8x1xf32>
    %421 = arith.divf %419, %420 : vector<8x1xf32>
    %cst_157 = arith.constant 9.99999974E-6 : f32
    %422 = vector.broadcast %cst_157 : f32 to vector<8x1xf32>
    %423 = arith.addf %421, %422 : vector<8x1xf32>
    %424 = math.rsqrt %423 : vector<8x1xf32>
    %425 = vector.broadcast %424 : vector<8x1xf32> to vector<8x64xf32>
    %426 = arith.mulf %416, %425 : vector<8x64xf32>
    %427 = vector.broadcast %409 : vector<1x64xf32> to vector<8x64xf32>
    %428 = arith.mulf %426, %427 : vector<8x64xf32>
    %429 = vector.broadcast %410 : vector<1x64xf32> to vector<8x64xf32>
    %430 = arith.addf %428, %429 : vector<8x64xf32>
    %c0_158 = arith.constant 0 : index
    %c0_159 = arith.constant 0 : index
    %431 = vector.load %arg21[%c0_158, %c0_159] : memref<64x64xf32, #tpu.memory_space<vmem>>, vector<64x64xf32>
    %cst_160 = arith.constant dense<0.000000e+00> : vector<8x64xf32>
    %432 = tpu.matmul %430, %431, %cst_160 {dimension_numbers = #tpu.dot_dimension_numbers<[1], [0], [0], [1], [0, 0, 1, 1], [], []>} : vector<8x64xf32>, vector<64x64xf32>, vector<8x64xf32> -> vector<8x64xf32>
    %c0_161 = arith.constant 0 : index
    %c0_162 = arith.constant 0 : index
    %433 = vector.load %arg22[%c0_161, %c0_162] : memref<1x64xf32, #tpu.memory_space<vmem>>, vector<1x64xf32>
    %434 = vector.broadcast %433 : vector<1x64xf32> to vector<8x64xf32>
    %435 = arith.addf %432, %434 : vector<8x64xf32>
    %c0_163 = arith.constant 0 : index
    %c0_164 = arith.constant 0 : index
    %436 = vector.load %arg23[%c0_163, %c0_164] : memref<64x128xf32, #tpu.memory_space<vmem>>, vector<64x128xf32>
    %cst_165 = arith.constant dense<0.000000e+00> : vector<8x128xf32>
    %437 = tpu.matmul %232, %436, %cst_165 {dimension_numbers = #tpu.dot_dimension_numbers<[1], [0], [0], [1], [0, 0, 1, 1], [], []>} : vector<8x64xf32>, vector<64x128xf32>, vector<8x128xf32> -> vector<8x128xf32>
    %c0_166 = arith.constant 0 : index
    %c0_167 = arith.constant 0 : index
    %438 = vector.load %arg24[%c0_166, %c0_167] : memref<1x128xf32, #tpu.memory_space<vmem>>, vector<1x128xf32>
    %439 = vector.broadcast %438 : vector<1x128xf32> to vector<8x128xf32>
    %440 = arith.addf %437, %439 : vector<8x128xf32>
    %441 = vector.extract_strided_slice %440 {offsets = [0, 0], sizes = [8, 64], strides = [1, 1]} : vector<8x128xf32> to vector<8x64xf32>
    %442 = vector.extract_strided_slice %440 {offsets = [0, 64], sizes = [8, 64], strides = [1, 1]} : vector<8x128xf32> to vector<8x64xf32>
    %c0_168 = arith.constant 0 : index
    %c0_169 = arith.constant 0 : index
    %443 = vector.load %arg25[%c0_168, %c0_169] : memref<64x64xf32, #tpu.memory_space<vmem>>, vector<64x64xf32>
    %cst_170 = arith.constant 0.000000e+00 : f32
    %444 = vector.broadcast %cst_170 : f32 to vector<8x64xf32>
    %445 = vector.extract_strided_slice %435 {offsets = [0, 0], sizes = [8, 8], strides = [1, 1]} : vector<8x64xf32> to vector<8x8xf32>
    %cst_171 = arith.constant 0.353553385 : f32
    %446 = vector.broadcast %cst_171 : f32 to vector<8x8xf32>
    %447 = arith.mulf %445, %446 : vector<8x8xf32>
    %448 = vector.extract_strided_slice %441 {offsets = [0, 0], sizes = [8, 8], strides = [1, 1]} : vector<8x64xf32> to vector<8x8xf32>
    %449 = vector.extract_strided_slice %442 {offsets = [0, 0], sizes = [8, 8], strides = [1, 1]} : vector<8x64xf32> to vector<8x8xf32>
    %cst_172 = arith.constant dense<0.000000e+00> : vector<8x8xf32>
    %450 = tpu.matmul %447, %448, %cst_172 {dimension_numbers = #tpu.dot_dimension_numbers<[1], [1], [0], [0], [0, 0, 1, 0], [], []>} : vector<8x8xf32>, vector<8x8xf32>, vector<8x8xf32> -> vector<8x8xf32>
    %cst_173 = arith.constant dense<0xFF800000> : vector<8xf32>
    %451 = vector.multi_reduction <maximumf>, %450, %cst_173 [1] : vector<8x8xf32> to vector<8xf32>
    %452 = vector.shape_cast %451 : vector<8xf32> to vector<8x1xf32>
    %453 = vector.broadcast %452 : vector<8x1xf32> to vector<8x8xf32>
    %454 = arith.subf %450, %453 : vector<8x8xf32>
    %455 = math.exp %454 : vector<8x8xf32>
    %cst_174 = arith.constant dense<0.000000e+00> : vector<8xf32>
    %456 = vector.multi_reduction <add>, %455, %cst_174 [1] : vector<8x8xf32> to vector<8xf32>
    %457 = vector.shape_cast %456 : vector<8xf32> to vector<8x1xf32>
    %458 = tpu.reciprocal %457 {approx = true} : vector<8x1xf32> -> vector<8x1xf32>
    %459 = vector.broadcast %458 : vector<8x1xf32> to vector<8x8xf32>
    %460 = arith.mulf %455, %459 : vector<8x8xf32>
    %cst_175 = arith.constant dense<0.000000e+00> : vector<8x8xf32>
    %461 = tpu.matmul %460, %449, %cst_175 {dimension_numbers = #tpu.dot_dimension_numbers<[1], [0], [0], [1], [0, 0, 1, 1], [], []>} : vector<8x8xf32>, vector<8x8xf32>, vector<8x8xf32> -> vector<8x8xf32>
    %462 = vector.extract_strided_slice %443 {offsets = [0, 0], sizes = [8, 64], strides = [1, 1]} : vector<64x64xf32> to vector<8x64xf32>
    %cst_176 = arith.constant dense<0.000000e+00> : vector<8x64xf32>
    %463 = tpu.matmul %461, %462, %cst_176 {dimension_numbers = #tpu.dot_dimension_numbers<[1], [0], [0], [1], [0, 0, 1, 1], [], []>} : vector<8x8xf32>, vector<8x64xf32>, vector<8x64xf32> -> vector<8x64xf32>
    %464 = arith.addf %444, %463 : vector<8x64xf32>
    %465 = vector.extract_strided_slice %435 {offsets = [0, 8], sizes = [8, 8], strides = [1, 1]} : vector<8x64xf32> to vector<8x8xf32>
    %cst_177 = arith.constant 0.353553385 : f32
    %466 = vector.broadcast %cst_177 : f32 to vector<8x8xf32>
    %467 = arith.mulf %465, %466 : vector<8x8xf32>
    %468 = vector.extract_strided_slice %441 {offsets = [0, 8], sizes = [8, 8], strides = [1, 1]} : vector<8x64xf32> to vector<8x8xf32>
    %469 = vector.extract_strided_slice %442 {offsets = [0, 8], sizes = [8, 8], strides = [1, 1]} : vector<8x64xf32> to vector<8x8xf32>
    %cst_178 = arith.constant dense<0.000000e+00> : vector<8x8xf32>
    %470 = tpu.matmul %467, %468, %cst_178 {dimension_numbers = #tpu.dot_dimension_numbers<[1], [1], [0], [0], [0, 0, 1, 0], [], []>} : vector<8x8xf32>, vector<8x8xf32>, vector<8x8xf32> -> vector<8x8xf32>
    %cst_179 = arith.constant dense<0xFF800000> : vector<8xf32>
    %471 = vector.multi_reduction <maximumf>, %470, %cst_179 [1] : vector<8x8xf32> to vector<8xf32>
    %472 = vector.shape_cast %471 : vector<8xf32> to vector<8x1xf32>
    %473 = vector.broadcast %472 : vector<8x1xf32> to vector<8x8xf32>
    %474 = arith.subf %470, %473 : vector<8x8xf32>
    %475 = math.exp %474 : vector<8x8xf32>
    %cst_180 = arith.constant dense<0.000000e+00> : vector<8xf32>
    %476 = vector.multi_reduction <add>, %475, %cst_180 [1] : vector<8x8xf32> to vector<8xf32>
    %477 = vector.shape_cast %476 : vector<8xf32> to vector<8x1xf32>
    %478 = tpu.reciprocal %477 {approx = true} : vector<8x1xf32> -> vector<8x1xf32>
    %479 = vector.broadcast %478 : vector<8x1xf32> to vector<8x8xf32>
    %480 = arith.mulf %475, %479 : vector<8x8xf32>
    %cst_181 = arith.constant dense<0.000000e+00> : vector<8x8xf32>
    %481 = tpu.matmul %480, %469, %cst_181 {dimension_numbers = #tpu.dot_dimension_numbers<[1], [0], [0], [1], [0, 0, 1, 1], [], []>} : vector<8x8xf32>, vector<8x8xf32>, vector<8x8xf32> -> vector<8x8xf32>
    %482 = vector.extract_strided_slice %443 {offsets = [8, 0], sizes = [8, 64], strides = [1, 1]} : vector<64x64xf32> to vector<8x64xf32>
    %cst_182 = arith.constant dense<0.000000e+00> : vector<8x64xf32>
    %483 = tpu.matmul %481, %482, %cst_182 {dimension_numbers = #tpu.dot_dimension_numbers<[1], [0], [0], [1], [0, 0, 1, 1], [], []>} : vector<8x8xf32>, vector<8x64xf32>, vector<8x64xf32> -> vector<8x64xf32>
    %484 = arith.addf %464, %483 : vector<8x64xf32>
    %485 = vector.extract_strided_slice %435 {offsets = [0, 16], sizes = [8, 8], strides = [1, 1]} : vector<8x64xf32> to vector<8x8xf32>
    %cst_183 = arith.constant 0.353553385 : f32
    %486 = vector.broadcast %cst_183 : f32 to vector<8x8xf32>
    %487 = arith.mulf %485, %486 : vector<8x8xf32>
    %488 = vector.extract_strided_slice %441 {offsets = [0, 16], sizes = [8, 8], strides = [1, 1]} : vector<8x64xf32> to vector<8x8xf32>
    %489 = vector.extract_strided_slice %442 {offsets = [0, 16], sizes = [8, 8], strides = [1, 1]} : vector<8x64xf32> to vector<8x8xf32>
    %cst_184 = arith.constant dense<0.000000e+00> : vector<8x8xf32>
    %490 = tpu.matmul %487, %488, %cst_184 {dimension_numbers = #tpu.dot_dimension_numbers<[1], [1], [0], [0], [0, 0, 1, 0], [], []>} : vector<8x8xf32>, vector<8x8xf32>, vector<8x8xf32> -> vector<8x8xf32>
    %cst_185 = arith.constant dense<0xFF800000> : vector<8xf32>
    %491 = vector.multi_reduction <maximumf>, %490, %cst_185 [1] : vector<8x8xf32> to vector<8xf32>
    %492 = vector.shape_cast %491 : vector<8xf32> to vector<8x1xf32>
    %493 = vector.broadcast %492 : vector<8x1xf32> to vector<8x8xf32>
    %494 = arith.subf %490, %493 : vector<8x8xf32>
    %495 = math.exp %494 : vector<8x8xf32>
    %cst_186 = arith.constant dense<0.000000e+00> : vector<8xf32>
    %496 = vector.multi_reduction <add>, %495, %cst_186 [1] : vector<8x8xf32> to vector<8xf32>
    %497 = vector.shape_cast %496 : vector<8xf32> to vector<8x1xf32>
    %498 = tpu.reciprocal %497 {approx = true} : vector<8x1xf32> -> vector<8x1xf32>
    %499 = vector.broadcast %498 : vector<8x1xf32> to vector<8x8xf32>
    %500 = arith.mulf %495, %499 : vector<8x8xf32>
    %cst_187 = arith.constant dense<0.000000e+00> : vector<8x8xf32>
    %501 = tpu.matmul %500, %489, %cst_187 {dimension_numbers = #tpu.dot_dimension_numbers<[1], [0], [0], [1], [0, 0, 1, 1], [], []>} : vector<8x8xf32>, vector<8x8xf32>, vector<8x8xf32> -> vector<8x8xf32>
    %502 = vector.extract_strided_slice %443 {offsets = [16, 0], sizes = [8, 64], strides = [1, 1]} : vector<64x64xf32> to vector<8x64xf32>
    %cst_188 = arith.constant dense<0.000000e+00> : vector<8x64xf32>
    %503 = tpu.matmul %501, %502, %cst_188 {dimension_numbers = #tpu.dot_dimension_numbers<[1], [0], [0], [1], [0, 0, 1, 1], [], []>} : vector<8x8xf32>, vector<8x64xf32>, vector<8x64xf32> -> vector<8x64xf32>
    %504 = arith.addf %484, %503 : vector<8x64xf32>
    %505 = vector.extract_strided_slice %435 {offsets = [0, 24], sizes = [8, 8], strides = [1, 1]} : vector<8x64xf32> to vector<8x8xf32>
    %cst_189 = arith.constant 0.353553385 : f32
    %506 = vector.broadcast %cst_189 : f32 to vector<8x8xf32>
    %507 = arith.mulf %505, %506 : vector<8x8xf32>
    %508 = vector.extract_strided_slice %441 {offsets = [0, 24], sizes = [8, 8], strides = [1, 1]} : vector<8x64xf32> to vector<8x8xf32>
    %509 = vector.extract_strided_slice %442 {offsets = [0, 24], sizes = [8, 8], strides = [1, 1]} : vector<8x64xf32> to vector<8x8xf32>
    %cst_190 = arith.constant dense<0.000000e+00> : vector<8x8xf32>
    %510 = tpu.matmul %507, %508, %cst_190 {dimension_numbers = #tpu.dot_dimension_numbers<[1], [1], [0], [0], [0, 0, 1, 0], [], []>} : vector<8x8xf32>, vector<8x8xf32>, vector<8x8xf32> -> vector<8x8xf32>
    %cst_191 = arith.constant dense<0xFF800000> : vector<8xf32>
    %511 = vector.multi_reduction <maximumf>, %510, %cst_191 [1] : vector<8x8xf32> to vector<8xf32>
    %512 = vector.shape_cast %511 : vector<8xf32> to vector<8x1xf32>
    %513 = vector.broadcast %512 : vector<8x1xf32> to vector<8x8xf32>
    %514 = arith.subf %510, %513 : vector<8x8xf32>
    %515 = math.exp %514 : vector<8x8xf32>
    %cst_192 = arith.constant dense<0.000000e+00> : vector<8xf32>
    %516 = vector.multi_reduction <add>, %515, %cst_192 [1] : vector<8x8xf32> to vector<8xf32>
    %517 = vector.shape_cast %516 : vector<8xf32> to vector<8x1xf32>
    %518 = tpu.reciprocal %517 {approx = true} : vector<8x1xf32> -> vector<8x1xf32>
    %519 = vector.broadcast %518 : vector<8x1xf32> to vector<8x8xf32>
    %520 = arith.mulf %515, %519 : vector<8x8xf32>
    %cst_193 = arith.constant dense<0.000000e+00> : vector<8x8xf32>
    %521 = tpu.matmul %520, %509, %cst_193 {dimension_numbers = #tpu.dot_dimension_numbers<[1], [0], [0], [1], [0, 0, 1, 1], [], []>} : vector<8x8xf32>, vector<8x8xf32>, vector<8x8xf32> -> vector<8x8xf32>
    %522 = vector.extract_strided_slice %443 {offsets = [24, 0], sizes = [8, 64], strides = [1, 1]} : vector<64x64xf32> to vector<8x64xf32>
    %cst_194 = arith.constant dense<0.000000e+00> : vector<8x64xf32>
    %523 = tpu.matmul %521, %522, %cst_194 {dimension_numbers = #tpu.dot_dimension_numbers<[1], [0], [0], [1], [0, 0, 1, 1], [], []>} : vector<8x8xf32>, vector<8x64xf32>, vector<8x64xf32> -> vector<8x64xf32>
    %524 = arith.addf %504, %523 : vector<8x64xf32>
    %525 = vector.extract_strided_slice %435 {offsets = [0, 32], sizes = [8, 8], strides = [1, 1]} : vector<8x64xf32> to vector<8x8xf32>
    %cst_195 = arith.constant 0.353553385 : f32
    %526 = vector.broadcast %cst_195 : f32 to vector<8x8xf32>
    %527 = arith.mulf %525, %526 : vector<8x8xf32>
    %528 = vector.extract_strided_slice %441 {offsets = [0, 32], sizes = [8, 8], strides = [1, 1]} : vector<8x64xf32> to vector<8x8xf32>
    %529 = vector.extract_strided_slice %442 {offsets = [0, 32], sizes = [8, 8], strides = [1, 1]} : vector<8x64xf32> to vector<8x8xf32>
    %cst_196 = arith.constant dense<0.000000e+00> : vector<8x8xf32>
    %530 = tpu.matmul %527, %528, %cst_196 {dimension_numbers = #tpu.dot_dimension_numbers<[1], [1], [0], [0], [0, 0, 1, 0], [], []>} : vector<8x8xf32>, vector<8x8xf32>, vector<8x8xf32> -> vector<8x8xf32>
    %cst_197 = arith.constant dense<0xFF800000> : vector<8xf32>
    %531 = vector.multi_reduction <maximumf>, %530, %cst_197 [1] : vector<8x8xf32> to vector<8xf32>
    %532 = vector.shape_cast %531 : vector<8xf32> to vector<8x1xf32>
    %533 = vector.broadcast %532 : vector<8x1xf32> to vector<8x8xf32>
    %534 = arith.subf %530, %533 : vector<8x8xf32>
    %535 = math.exp %534 : vector<8x8xf32>
    %cst_198 = arith.constant dense<0.000000e+00> : vector<8xf32>
    %536 = vector.multi_reduction <add>, %535, %cst_198 [1] : vector<8x8xf32> to vector<8xf32>
    %537 = vector.shape_cast %536 : vector<8xf32> to vector<8x1xf32>
    %538 = tpu.reciprocal %537 {approx = true} : vector<8x1xf32> -> vector<8x1xf32>
    %539 = vector.broadcast %538 : vector<8x1xf32> to vector<8x8xf32>
    %540 = arith.mulf %535, %539 : vector<8x8xf32>
    %cst_199 = arith.constant dense<0.000000e+00> : vector<8x8xf32>
    %541 = tpu.matmul %540, %529, %cst_199 {dimension_numbers = #tpu.dot_dimension_numbers<[1], [0], [0], [1], [0, 0, 1, 1], [], []>} : vector<8x8xf32>, vector<8x8xf32>, vector<8x8xf32> -> vector<8x8xf32>
    %542 = vector.extract_strided_slice %443 {offsets = [32, 0], sizes = [8, 64], strides = [1, 1]} : vector<64x64xf32> to vector<8x64xf32>
    %cst_200 = arith.constant dense<0.000000e+00> : vector<8x64xf32>
    %543 = tpu.matmul %541, %542, %cst_200 {dimension_numbers = #tpu.dot_dimension_numbers<[1], [0], [0], [1], [0, 0, 1, 1], [], []>} : vector<8x8xf32>, vector<8x64xf32>, vector<8x64xf32> -> vector<8x64xf32>
    %544 = arith.addf %524, %543 : vector<8x64xf32>
    %545 = vector.extract_strided_slice %435 {offsets = [0, 40], sizes = [8, 8], strides = [1, 1]} : vector<8x64xf32> to vector<8x8xf32>
    %cst_201 = arith.constant 0.353553385 : f32
    %546 = vector.broadcast %cst_201 : f32 to vector<8x8xf32>
    %547 = arith.mulf %545, %546 : vector<8x8xf32>
    %548 = vector.extract_strided_slice %441 {offsets = [0, 40], sizes = [8, 8], strides = [1, 1]} : vector<8x64xf32> to vector<8x8xf32>
    %549 = vector.extract_strided_slice %442 {offsets = [0, 40], sizes = [8, 8], strides = [1, 1]} : vector<8x64xf32> to vector<8x8xf32>
    %cst_202 = arith.constant dense<0.000000e+00> : vector<8x8xf32>
    %550 = tpu.matmul %547, %548, %cst_202 {dimension_numbers = #tpu.dot_dimension_numbers<[1], [1], [0], [0], [0, 0, 1, 0], [], []>} : vector<8x8xf32>, vector<8x8xf32>, vector<8x8xf32> -> vector<8x8xf32>
    %cst_203 = arith.constant dense<0xFF800000> : vector<8xf32>
    %551 = vector.multi_reduction <maximumf>, %550, %cst_203 [1] : vector<8x8xf32> to vector<8xf32>
    %552 = vector.shape_cast %551 : vector<8xf32> to vector<8x1xf32>
    %553 = vector.broadcast %552 : vector<8x1xf32> to vector<8x8xf32>
    %554 = arith.subf %550, %553 : vector<8x8xf32>
    %555 = math.exp %554 : vector<8x8xf32>
    %cst_204 = arith.constant dense<0.000000e+00> : vector<8xf32>
    %556 = vector.multi_reduction <add>, %555, %cst_204 [1] : vector<8x8xf32> to vector<8xf32>
    %557 = vector.shape_cast %556 : vector<8xf32> to vector<8x1xf32>
    %558 = tpu.reciprocal %557 {approx = true} : vector<8x1xf32> -> vector<8x1xf32>
    %559 = vector.broadcast %558 : vector<8x1xf32> to vector<8x8xf32>
    %560 = arith.mulf %555, %559 : vector<8x8xf32>
    %cst_205 = arith.constant dense<0.000000e+00> : vector<8x8xf32>
    %561 = tpu.matmul %560, %549, %cst_205 {dimension_numbers = #tpu.dot_dimension_numbers<[1], [0], [0], [1], [0, 0, 1, 1], [], []>} : vector<8x8xf32>, vector<8x8xf32>, vector<8x8xf32> -> vector<8x8xf32>
    %562 = vector.extract_strided_slice %443 {offsets = [40, 0], sizes = [8, 64], strides = [1, 1]} : vector<64x64xf32> to vector<8x64xf32>
    %cst_206 = arith.constant dense<0.000000e+00> : vector<8x64xf32>
    %563 = tpu.matmul %561, %562, %cst_206 {dimension_numbers = #tpu.dot_dimension_numbers<[1], [0], [0], [1], [0, 0, 1, 1], [], []>} : vector<8x8xf32>, vector<8x64xf32>, vector<8x64xf32> -> vector<8x64xf32>
    %564 = arith.addf %544, %563 : vector<8x64xf32>
    %565 = vector.extract_strided_slice %435 {offsets = [0, 48], sizes = [8, 8], strides = [1, 1]} : vector<8x64xf32> to vector<8x8xf32>
    %cst_207 = arith.constant 0.353553385 : f32
    %566 = vector.broadcast %cst_207 : f32 to vector<8x8xf32>
    %567 = arith.mulf %565, %566 : vector<8x8xf32>
    %568 = vector.extract_strided_slice %441 {offsets = [0, 48], sizes = [8, 8], strides = [1, 1]} : vector<8x64xf32> to vector<8x8xf32>
    %569 = vector.extract_strided_slice %442 {offsets = [0, 48], sizes = [8, 8], strides = [1, 1]} : vector<8x64xf32> to vector<8x8xf32>
    %cst_208 = arith.constant dense<0.000000e+00> : vector<8x8xf32>
    %570 = tpu.matmul %567, %568, %cst_208 {dimension_numbers = #tpu.dot_dimension_numbers<[1], [1], [0], [0], [0, 0, 1, 0], [], []>} : vector<8x8xf32>, vector<8x8xf32>, vector<8x8xf32> -> vector<8x8xf32>
    %cst_209 = arith.constant dense<0xFF800000> : vector<8xf32>
    %571 = vector.multi_reduction <maximumf>, %570, %cst_209 [1] : vector<8x8xf32> to vector<8xf32>
    %572 = vector.shape_cast %571 : vector<8xf32> to vector<8x1xf32>
    %573 = vector.broadcast %572 : vector<8x1xf32> to vector<8x8xf32>
    %574 = arith.subf %570, %573 : vector<8x8xf32>
    %575 = math.exp %574 : vector<8x8xf32>
    %cst_210 = arith.constant dense<0.000000e+00> : vector<8xf32>
    %576 = vector.multi_reduction <add>, %575, %cst_210 [1] : vector<8x8xf32> to vector<8xf32>
    %577 = vector.shape_cast %576 : vector<8xf32> to vector<8x1xf32>
    %578 = tpu.reciprocal %577 {approx = true} : vector<8x1xf32> -> vector<8x1xf32>
    %579 = vector.broadcast %578 : vector<8x1xf32> to vector<8x8xf32>
    %580 = arith.mulf %575, %579 : vector<8x8xf32>
    %cst_211 = arith.constant dense<0.000000e+00> : vector<8x8xf32>
    %581 = tpu.matmul %580, %569, %cst_211 {dimension_numbers = #tpu.dot_dimension_numbers<[1], [0], [0], [1], [0, 0, 1, 1], [], []>} : vector<8x8xf32>, vector<8x8xf32>, vector<8x8xf32> -> vector<8x8xf32>
    %582 = vector.extract_strided_slice %443 {offsets = [48, 0], sizes = [8, 64], strides = [1, 1]} : vector<64x64xf32> to vector<8x64xf32>
    %cst_212 = arith.constant dense<0.000000e+00> : vector<8x64xf32>
    %583 = tpu.matmul %581, %582, %cst_212 {dimension_numbers = #tpu.dot_dimension_numbers<[1], [0], [0], [1], [0, 0, 1, 1], [], []>} : vector<8x8xf32>, vector<8x64xf32>, vector<8x64xf32> -> vector<8x64xf32>
    %584 = arith.addf %564, %583 : vector<8x64xf32>
    %585 = vector.extract_strided_slice %435 {offsets = [0, 56], sizes = [8, 8], strides = [1, 1]} : vector<8x64xf32> to vector<8x8xf32>
    %cst_213 = arith.constant 0.353553385 : f32
    %586 = vector.broadcast %cst_213 : f32 to vector<8x8xf32>
    %587 = arith.mulf %585, %586 : vector<8x8xf32>
    %588 = vector.extract_strided_slice %441 {offsets = [0, 56], sizes = [8, 8], strides = [1, 1]} : vector<8x64xf32> to vector<8x8xf32>
    %589 = vector.extract_strided_slice %442 {offsets = [0, 56], sizes = [8, 8], strides = [1, 1]} : vector<8x64xf32> to vector<8x8xf32>
    %cst_214 = arith.constant dense<0.000000e+00> : vector<8x8xf32>
    %590 = tpu.matmul %587, %588, %cst_214 {dimension_numbers = #tpu.dot_dimension_numbers<[1], [1], [0], [0], [0, 0, 1, 0], [], []>} : vector<8x8xf32>, vector<8x8xf32>, vector<8x8xf32> -> vector<8x8xf32>
    %cst_215 = arith.constant dense<0xFF800000> : vector<8xf32>
    %591 = vector.multi_reduction <maximumf>, %590, %cst_215 [1] : vector<8x8xf32> to vector<8xf32>
    %592 = vector.shape_cast %591 : vector<8xf32> to vector<8x1xf32>
    %593 = vector.broadcast %592 : vector<8x1xf32> to vector<8x8xf32>
    %594 = arith.subf %590, %593 : vector<8x8xf32>
    %595 = math.exp %594 : vector<8x8xf32>
    %cst_216 = arith.constant dense<0.000000e+00> : vector<8xf32>
    %596 = vector.multi_reduction <add>, %595, %cst_216 [1] : vector<8x8xf32> to vector<8xf32>
    %597 = vector.shape_cast %596 : vector<8xf32> to vector<8x1xf32>
    %598 = tpu.reciprocal %597 {approx = true} : vector<8x1xf32> -> vector<8x1xf32>
    %599 = vector.broadcast %598 : vector<8x1xf32> to vector<8x8xf32>
    %600 = arith.mulf %595, %599 : vector<8x8xf32>
    %cst_217 = arith.constant dense<0.000000e+00> : vector<8x8xf32>
    %601 = tpu.matmul %600, %589, %cst_217 {dimension_numbers = #tpu.dot_dimension_numbers<[1], [0], [0], [1], [0, 0, 1, 1], [], []>} : vector<8x8xf32>, vector<8x8xf32>, vector<8x8xf32> -> vector<8x8xf32>
    %602 = vector.extract_strided_slice %443 {offsets = [56, 0], sizes = [8, 64], strides = [1, 1]} : vector<64x64xf32> to vector<8x64xf32>
    %cst_218 = arith.constant dense<0.000000e+00> : vector<8x64xf32>
    %603 = tpu.matmul %601, %602, %cst_218 {dimension_numbers = #tpu.dot_dimension_numbers<[1], [0], [0], [1], [0, 0, 1, 1], [], []>} : vector<8x8xf32>, vector<8x64xf32>, vector<8x64xf32> -> vector<8x64xf32>
    %604 = arith.addf %584, %603 : vector<8x64xf32>
    %c0_219 = arith.constant 0 : index
    %c0_220 = arith.constant 0 : index
    %605 = vector.load %arg26[%c0_219, %c0_220] : memref<1x64xf32, #tpu.memory_space<vmem>>, vector<1x64xf32>
    %606 = vector.broadcast %605 : vector<1x64xf32> to vector<8x64xf32>
    %607 = arith.addf %604, %606 : vector<8x64xf32>
    %608 = arith.addf %430, %607 : vector<8x64xf32>
    %c0_221 = arith.constant 0 : index
    %c0_222 = arith.constant 0 : index
    %609 = vector.load %arg27[%c0_221, %c0_222] : memref<1x64xf32, #tpu.memory_space<vmem>>, vector<1x64xf32>
    %c0_223 = arith.constant 0 : index
    %c0_224 = arith.constant 0 : index
    %610 = vector.load %arg28[%c0_223, %c0_224] : memref<1x64xf32, #tpu.memory_space<vmem>>, vector<1x64xf32>
    %cst_225 = arith.constant dense<0.000000e+00> : vector<8xf32>
    %611 = vector.multi_reduction <add>, %608, %cst_225 [1] : vector<8x64xf32> to vector<8xf32>
    %612 = vector.shape_cast %611 : vector<8xf32> to vector<8x1xf32>
    %cst_226 = arith.constant 6.400000e+01 : f32
    %613 = vector.broadcast %cst_226 : f32 to vector<8x1xf32>
    %614 = arith.divf %612, %613 : vector<8x1xf32>
    %615 = vector.broadcast %614 : vector<8x1xf32> to vector<8x64xf32>
    %616 = arith.subf %608, %615 : vector<8x64xf32>
    %617 = arith.mulf %616, %616 : vector<8x64xf32>
    %cst_227 = arith.constant dense<0.000000e+00> : vector<8xf32>
    %618 = vector.multi_reduction <add>, %617, %cst_227 [1] : vector<8x64xf32> to vector<8xf32>
    %619 = vector.shape_cast %618 : vector<8xf32> to vector<8x1xf32>
    %cst_228 = arith.constant 6.400000e+01 : f32
    %620 = vector.broadcast %cst_228 : f32 to vector<8x1xf32>
    %621 = arith.divf %619, %620 : vector<8x1xf32>
    %cst_229 = arith.constant 9.99999974E-6 : f32
    %622 = vector.broadcast %cst_229 : f32 to vector<8x1xf32>
    %623 = arith.addf %621, %622 : vector<8x1xf32>
    %624 = math.rsqrt %623 : vector<8x1xf32>
    %625 = vector.broadcast %624 : vector<8x1xf32> to vector<8x64xf32>
    %626 = arith.mulf %616, %625 : vector<8x64xf32>
    %627 = vector.broadcast %609 : vector<1x64xf32> to vector<8x64xf32>
    %628 = arith.mulf %626, %627 : vector<8x64xf32>
    %629 = vector.broadcast %610 : vector<1x64xf32> to vector<8x64xf32>
    %630 = arith.addf %628, %629 : vector<8x64xf32>
    %c0_230 = arith.constant 0 : index
    %c0_231 = arith.constant 0 : index
    %631 = vector.load %arg29[%c0_230, %c0_231] : memref<64x2048xf32, #tpu.memory_space<vmem>>, vector<64x2048xf32>
    %cst_232 = arith.constant dense<0.000000e+00> : vector<8x2048xf32>
    %632 = tpu.matmul %630, %631, %cst_232 {dimension_numbers = #tpu.dot_dimension_numbers<[1], [0], [0], [1], [0, 0, 1, 1], [], []>} : vector<8x64xf32>, vector<64x2048xf32>, vector<8x2048xf32> -> vector<8x2048xf32>
    %c0_233 = arith.constant 0 : index
    %c0_234 = arith.constant 0 : index
    %633 = vector.load %arg30[%c0_233, %c0_234] : memref<1x2048xf32, #tpu.memory_space<vmem>>, vector<1x2048xf32>
    %634 = vector.broadcast %633 : vector<1x2048xf32> to vector<8x2048xf32>
    %635 = arith.addf %632, %634 : vector<8x2048xf32>
    %cst_235 = arith.constant 0.000000e+00 : f32
    %636 = vector.broadcast %cst_235 : f32 to vector<8x2048xf32>
    %637 = arith.maximumf %635, %636 : vector<8x2048xf32>
    %c0_236 = arith.constant 0 : index
    %c0_237 = arith.constant 0 : index
    %638 = vector.load %arg31[%c0_236, %c0_237] : memref<2048x64xf32, #tpu.memory_space<vmem>>, vector<2048x64xf32>
    %cst_238 = arith.constant dense<0.000000e+00> : vector<8x64xf32>
    %639 = tpu.matmul %637, %638, %cst_238 {dimension_numbers = #tpu.dot_dimension_numbers<[1], [0], [0], [1], [0, 0, 1, 1], [], []>} : vector<8x2048xf32>, vector<2048x64xf32>, vector<8x64xf32> -> vector<8x64xf32>
    %c0_239 = arith.constant 0 : index
    %c0_240 = arith.constant 0 : index
    %640 = vector.load %arg32[%c0_239, %c0_240] : memref<1x64xf32, #tpu.memory_space<vmem>>, vector<1x64xf32>
    %641 = vector.broadcast %640 : vector<1x64xf32> to vector<8x64xf32>
    %642 = arith.addf %639, %641 : vector<8x64xf32>
    %643 = arith.addf %630, %642 : vector<8x64xf32>
    %c0_241 = arith.constant 0 : index
    %c0_242 = arith.constant 0 : index
    %644 = vector.load %arg33[%c0_241, %c0_242] : memref<1x64xf32, #tpu.memory_space<vmem>>, vector<1x64xf32>
    %c0_243 = arith.constant 0 : index
    %c0_244 = arith.constant 0 : index
    %645 = vector.load %arg34[%c0_243, %c0_244] : memref<1x64xf32, #tpu.memory_space<vmem>>, vector<1x64xf32>
    %cst_245 = arith.constant dense<0.000000e+00> : vector<8xf32>
    %646 = vector.multi_reduction <add>, %643, %cst_245 [1] : vector<8x64xf32> to vector<8xf32>
    %647 = vector.shape_cast %646 : vector<8xf32> to vector<8x1xf32>
    %cst_246 = arith.constant 6.400000e+01 : f32
    %648 = vector.broadcast %cst_246 : f32 to vector<8x1xf32>
    %649 = arith.divf %647, %648 : vector<8x1xf32>
    %650 = vector.broadcast %649 : vector<8x1xf32> to vector<8x64xf32>
    %651 = arith.subf %643, %650 : vector<8x64xf32>
    %652 = arith.mulf %651, %651 : vector<8x64xf32>
    %cst_247 = arith.constant dense<0.000000e+00> : vector<8xf32>
    %653 = vector.multi_reduction <add>, %652, %cst_247 [1] : vector<8x64xf32> to vector<8xf32>
    %654 = vector.shape_cast %653 : vector<8xf32> to vector<8x1xf32>
    %cst_248 = arith.constant 6.400000e+01 : f32
    %655 = vector.broadcast %cst_248 : f32 to vector<8x1xf32>
    %656 = arith.divf %654, %655 : vector<8x1xf32>
    %cst_249 = arith.constant 9.99999974E-6 : f32
    %657 = vector.broadcast %cst_249 : f32 to vector<8x1xf32>
    %658 = arith.addf %656, %657 : vector<8x1xf32>
    %659 = math.rsqrt %658 : vector<8x1xf32>
    %660 = vector.broadcast %659 : vector<8x1xf32> to vector<8x64xf32>
    %661 = arith.mulf %651, %660 : vector<8x64xf32>
    %662 = vector.broadcast %644 : vector<1x64xf32> to vector<8x64xf32>
    %663 = arith.mulf %661, %662 : vector<8x64xf32>
    %664 = vector.broadcast %645 : vector<1x64xf32> to vector<8x64xf32>
    %665 = arith.addf %663, %664 : vector<8x64xf32>
    %c0_250 = arith.constant 0 : index
    %c0_251 = arith.constant 0 : index
    %c0_252 = arith.constant 0 : index
    %666 = vector.load %arg35[%c0_250, %c0_251, %c0_252] : memref<1x8x64xf32, #tpu.memory_space<vmem>>, vector<1x8x64xf32>
    %667 = vector.shape_cast %666 : vector<1x8x64xf32> to vector<8x64xf32>
    %668 = vector.shape_cast %665 : vector<8x64xf32> to vector<1x8x64xf32>
    tpu.vector_store %arg35[%c0_250, %c0_251, %c0_252], %668 {strides = array<i32>} : memref<1x8x64xf32, #tpu.memory_space<vmem>>, vector<1x8x64xf32>,
    return
  }
  func.func @transform_0(%arg0: i32) -> (i32, i32, i32) {
    %c0_i32 = arith.constant 0 : i32
    %c0_i32_0 = arith.constant 0 : i32
    %c0_i32_1 = arith.constant 0 : i32
    return %arg0, %c0_i32, %c0_i32_0 : i32, i32, i32
  }
  func.func @transform_1(%arg0: i32) -> (i32, i32, i32) {
    %c0_i32 = arith.constant 0 : i32
    %c0_i32_0 = arith.constant 0 : i32
    %c0_i32_1 = arith.constant 0 : i32
    return %arg0, %c0_i32, %c0_i32_0 : i32, i32, i32
  }
  func.func @transform_2(%arg0: i32) -> (i32, i32) {
    %c0_i32 = arith.constant 0 : i32
    %c0_i32_0 = arith.constant 0 : i32
    %c0_i32_1 = arith.constant 0 : i32
    return %c0_i32, %c0_i32_0 : i32, i32
  }
  func.func @transform_3(%arg0: i32) -> (i32, i32) {
    %c0_i32 = arith.constant 0 : i32
    %c0_i32_0 = arith.constant 0 : i32
    %c0_i32_1 = arith.constant 0 : i32
    return %c0_i32, %c0_i32_0 : i32, i32
  }
  func.func @transform_4(%arg0: i32) -> (i32, i32) {
    %c0_i32 = arith.constant 0 : i32
    %c0_i32_0 = arith.constant 0 : i32
    %c0_i32_1 = arith.constant 0 : i32
    return %c0_i32, %c0_i32_0 : i32, i32
  }
  func.func @transform_5(%arg0: i32) -> (i32, i32) {
    %c0_i32 = arith.constant 0 : i32
    %c0_i32_0 = arith.constant 0 : i32
    %c0_i32_1 = arith.constant 0 : i32
    return %c0_i32, %c0_i32_0 : i32, i32
  }
  func.func @transform_6(%arg0: i32) -> (i32, i32) {
    %c0_i32 = arith.constant 0 : i32
    %c0_i32_0 = arith.constant 0 : i32
    %c0_i32_1 = arith.constant 0 : i32
    return %c0_i32, %c0_i32_0 : i32, i32
  }
  func.func @transform_7(%arg0: i32) -> (i32, i32) {
    %c0_i32 = arith.constant 0 : i32
    %c0_i32_0 = arith.constant 0 : i32
    %c0_i32_1 = arith.constant 0 : i32
    return %c0_i32, %c0_i32_0 : i32, i32
  }
  func.func @transform_8(%arg0: i32) -> (i32, i32) {
    %c0_i32 = arith.constant 0 : i32
    %c0_i32_0 = arith.constant 0 : i32
    %c0_i32_1 = arith.constant 0 : i32
    return %c0_i32, %c0_i32_0 : i32, i32
  }
  func.func @transform_9(%arg0: i32) -> (i32, i32) {
    %c0_i32 = arith.constant 0 : i32
    %c0_i32_0 = arith.constant 0 : i32
    %c0_i32_1 = arith.constant 0 : i32
    return %c0_i32, %c0_i32_0 : i32, i32
  }
  func.func @transform_10(%arg0: i32) -> (i32, i32) {
    %c0_i32 = arith.constant 0 : i32
    %c0_i32_0 = arith.constant 0 : i32
    %c0_i32_1 = arith.constant 0 : i32
    return %c0_i32, %c0_i32_0 : i32, i32
  }
  func.func @transform_11(%arg0: i32) -> (i32, i32) {
    %c0_i32 = arith.constant 0 : i32
    %c0_i32_0 = arith.constant 0 : i32
    %c0_i32_1 = arith.constant 0 : i32
    return %c0_i32, %c0_i32_0 : i32, i32
  }
  func.func @transform_12(%arg0: i32) -> (i32, i32) {
    %c0_i32 = arith.constant 0 : i32
    %c0_i32_0 = arith.constant 0 : i32
    %c0_i32_1 = arith.constant 0 : i32
    return %c0_i32, %c0_i32_0 : i32, i32
  }
  func.func @transform_13(%arg0: i32) -> (i32, i32) {
    %c0_i32 = arith.constant 0 : i32
    %c0_i32_0 = arith.constant 0 : i32
    %c0_i32_1 = arith.constant 0 : i32
    return %c0_i32, %c0_i32_0 : i32, i32
  }
  func.func @transform_14(%arg0: i32) -> (i32, i32) {
    %c0_i32 = arith.constant 0 : i32
    %c0_i32_0 = arith.constant 0 : i32
    %c0_i32_1 = arith.constant 0 : i32
    return %c0_i32, %c0_i32_0 : i32, i32
  }
  func.func @transform_15(%arg0: i32) -> (i32, i32) {
    %c0_i32 = arith.constant 0 : i32
    %c0_i32_0 = arith.constant 0 : i32
    %c0_i32_1 = arith.constant 0 : i32
    return %c0_i32, %c0_i32_0 : i32, i32
  }
  func.func @transform_16(%arg0: i32) -> (i32, i32) {
    %c0_i32 = arith.constant 0 : i32
    %c0_i32_0 = arith.constant 0 : i32
    %c0_i32_1 = arith.constant 0 : i32
    return %c0_i32, %c0_i32_0 : i32, i32
  }
  func.func @transform_17(%arg0: i32) -> (i32, i32) {
    %c0_i32 = arith.constant 0 : i32
    %c0_i32_0 = arith.constant 0 : i32
    %c0_i32_1 = arith.constant 0 : i32
    return %c0_i32, %c0_i32_0 : i32, i32
  }
  func.func @transform_18(%arg0: i32) -> (i32, i32) {
    %c0_i32 = arith.constant 0 : i32
    %c0_i32_0 = arith.constant 0 : i32
    %c0_i32_1 = arith.constant 0 : i32
    return %c0_i32, %c0_i32_0 : i32, i32
  }
  func.func @transform_19(%arg0: i32) -> (i32, i32) {
    %c0_i32 = arith.constant 0 : i32
    %c0_i32_0 = arith.constant 0 : i32
    %c0_i32_1 = arith.constant 0 : i32
    return %c0_i32, %c0_i32_0 : i32, i32
  }
  func.func @transform_20(%arg0: i32) -> (i32, i32) {
    %c0_i32 = arith.constant 0 : i32
    %c0_i32_0 = arith.constant 0 : i32
    %c0_i32_1 = arith.constant 0 : i32
    return %c0_i32, %c0_i32_0 : i32, i32
  }
  func.func @transform_21(%arg0: i32) -> (i32, i32) {
    %c0_i32 = arith.constant 0 : i32
    %c0_i32_0 = arith.constant 0 : i32
    %c0_i32_1 = arith.constant 0 : i32
    return %c0_i32, %c0_i32_0 : i32, i32
  }
  func.func @transform_22(%arg0: i32) -> (i32, i32) {
    %c0_i32 = arith.constant 0 : i32
    %c0_i32_0 = arith.constant 0 : i32
    %c0_i32_1 = arith.constant 0 : i32
    return %c0_i32, %c0_i32_0 : i32, i32
  }
  func.func @transform_23(%arg0: i32) -> (i32, i32) {
    %c0_i32 = arith.constant 0 : i32
    %c0_i32_0 = arith.constant 0 : i32
    %c0_i32_1 = arith.constant 0 : i32
    return %c0_i32, %c0_i32_0 : i32, i32
  }
  func.func @transform_24(%arg0: i32) -> (i32, i32) {
    %c0_i32 = arith.constant 0 : i32
    %c0_i32_0 = arith.constant 0 : i32
    %c0_i32_1 = arith.constant 0 : i32
    return %c0_i32, %c0_i32_0 : i32, i32
  }
  func.func @transform_25(%arg0: i32) -> (i32, i32) {
    %c0_i32 = arith.constant 0 : i32
    %c0_i32_0 = arith.constant 0 : i32
    %c0_i32_1 = arith.constant 0 : i32
    return %c0_i32, %c0_i32_0 : i32, i32
  }
  func.func @transform_26(%arg0: i32) -> (i32, i32) {
    %c0_i32 = arith.constant 0 : i32
    %c0_i32_0 = arith.constant 0 : i32
    %c0_i32_1 = arith.constant 0 : i32
    return %c0_i32, %c0_i32_0 : i32, i32
  }
  func.func @transform_27(%arg0: i32) -> (i32, i32) {
    %c0_i32 = arith.constant 0 : i32
    %c0_i32_0 = arith.constant 0 : i32
    %c0_i32_1 = arith.constant 0 : i32
    return %c0_i32, %c0_i32_0 : i32, i32
  }
  func.func @transform_28(%arg0: i32) -> (i32, i32) {
    %c0_i32 = arith.constant 0 : i32
    %c0_i32_0 = arith.constant 0 : i32
    %c0_i32_1 = arith.constant 0 : i32
    return %c0_i32, %c0_i32_0 : i32, i32
  }
  func.func @transform_29(%arg0: i32) -> (i32, i32) {
    %c0_i32 = arith.constant 0 : i32
    %c0_i32_0 = arith.constant 0 : i32
    %c0_i32_1 = arith.constant 0 : i32
    return %c0_i32, %c0_i32_0 : i32, i32
  }
  func.func @transform_30(%arg0: i32) -> (i32, i32) {
    %c0_i32 = arith.constant 0 : i32
    %c0_i32_0 = arith.constant 0 : i32
    %c0_i32_1 = arith.constant 0 : i32
    return %c0_i32, %c0_i32_0 : i32, i32
  }
  func.func @transform_31(%arg0: i32) -> (i32, i32) {
    %c0_i32 = arith.constant 0 : i32
    %c0_i32_0 = arith.constant 0 : i32
    %c0_i32_1 = arith.constant 0 : i32
    return %c0_i32, %c0_i32_0 : i32, i32
  }
  func.func @transform_32(%arg0: i32) -> (i32, i32) {
    %c0_i32 = arith.constant 0 : i32
    %c0_i32_0 = arith.constant 0 : i32
    %c0_i32_1 = arith.constant 0 : i32
    return %c0_i32, %c0_i32_0 : i32, i32
  }
  func.func @transform_33(%arg0: i32) -> (i32, i32) {
    %c0_i32 = arith.constant 0 : i32
    %c0_i32_0 = arith.constant 0 : i32
    %c0_i32_1 = arith.constant 0 : i32
    return %c0_i32, %c0_i32_0 : i32, i32
  }
  func.func @transform_34(%arg0: i32) -> (i32, i32, i32) {
    %c0_i32 = arith.constant 0 : i32
    %c0_i32_0 = arith.constant 0 : i32
    %c0_i32_1 = arith.constant 0 : i32
    return %arg0, %c0_i32, %c0_i32_0 : i32, i32, i32
  }
}

</mosaic_0001>

<bundles_post_ra>
// kernel: summarizer_forward.1
= control target key start
LH: loop header
LB: loop body
LE: loop exit
PB: predicated region body
PF: predicated region fallthrough
CT: control target
= control target key end

     0   :  { %s12145_s6 = smov 1   ;;  %s12146_s10 = smov 2   ;;  %s14031_s0 = inlined_call_operand.smem [shape: u32[35], index: -1, kind: input, shape index: {}] }
   0x1   :  { %s12204_s5 = sld [smem:[%s14031_s0]]   ;;  %s12147_s14 = smov 3  }
   0x2   :  { %s12209_s9 = sld [smem:[%s14031_s0 + %s12145_s6]]   ;;  %s12148_s18 = smov 4  }
   0x3   :  { %s12214_s13 = sld [smem:[%s14031_s0 + %s12146_s10]]   ;;  %s12149_s22 = smov 5  }
   0x4   :  { %s12219_s17 = sld [smem:[%s14031_s0 + %s12147_s14]]   ;;  %s12150_s26 = smov 6  }
   0x5   :  { %s12224_s21 = sld [smem:[%s14031_s0 + %s12148_s18]]   ;;  %s12151_s30 = smov 7  }
   0x6   :  { %s12229_s25 = sld [smem:[%s14031_s0 + %s12149_s22]]   ;;  %s12152_s4 = smov 8  }
   0x7   :  { %14064 = sst [smem:[#allocation2_spill]] %s12204_s5  ;;  %s12153_s10 = smov 9  }
   0x8   :  { %s12234_s29 = sld [smem:[%s14031_s0 + %s12150_s26]]   ;;  %s12154_s15 = smov 10  }
   0x9   :  { %s12239_s3 = sld [smem:[%s14031_s0 + %s12151_s30]]   ;;  %s12155_s20 = smov 11  }
   0xa   :  { %s12244_s8 = sld [smem:[%s14031_s0 + %s12152_s4]]   ;;  %s12156_s26 = smov 12  }
   0xb   :  { %s12249_s14 = sld [smem:[%s14031_s0 + %s12153_s10]]   ;;  %s12157_s1 = smov 13  }
   0xc   :  { %s12254_s19 = sld [smem:[%s14031_s0 + %s12154_s15]]   ;;  %s12158_s7 = smov 14  }
   0xd   :  { %s12259_s24 = sld [smem:[%s14031_s0 + %s12155_s20]]   ;;  %s12159_s15 = smov 15  }
   0xe   :  { %s12264_s30 = sld [smem:[%s14031_s0 + %s12156_s26]]   ;;  %s12160_s22 = smov 16  }
   0xf   :  { %14065 = sst [smem:[#allocation3_spill]] %s12239_s3  ;;  %s12161_s28 = smov 17  }
  0x10   :  { %s12269_s6 = sld [smem:[%s14031_s0 + %s12157_s1]]  }
  0x11   :  { %s12274_s12 = sld [smem:[%s14031_s0 + %s12158_s7]]   ;;  %s12162_s7 = smov 18  }
  0x12   :  { %s12279_s20 = sld [smem:[%s14031_s0 + %s12159_s15]]   ;;  %s12163_s15 = smov 19  }
  0x13   :  { %s12284_s27 = sld [smem:[%s14031_s0 + %s12160_s22]]   ;;  %s12164_s22 = smov 20  }
  0x14   :  { %14066 = sst [smem:[#allocation4_spill]] %s12264_s30 }
  0x15   :  { %s12289_s4 = sld [smem:[%s14031_s0 + %s12161_s28]]   ;;  %s12165_s28 = smov 21  }
  0x16   :  { %14067 = sst [smem:[#allocation5_spill]] %s12269_s6 }
  0x17   :  { %s12294_s6 = sld [smem:[%s14031_s0 + %s12162_s7]]   ;;  %s12166_s7 = smov 22  }
  0x18   :  { %s12299_s30 = sld [smem:[%s14031_s0 + %s12163_s15]]   ;;  %s12167_s15 = smov 23  }
  0x19   :  { %14068 = sst [smem:[#allocation6_spill]] %s12284_s27 }
  0x1a   :  { %s12304_s27 = sld [smem:[%s14031_s0 + %s12164_s22]]   ;;  %s12168_s22 = smov 24  }
  0x1b   :  { %14069 = sst [smem:[#allocation7_spill]] %s12289_s4 }
  0x1c   :  { %s12309_s4 = sld [smem:[%s14031_s0 + %s12165_s28]]   ;;  %s12169_s28 = smov 25  }
  0x1d   :  { %14070 = sst [smem:[#allocation8_spill]] %s12294_s6 }
  0x1e   :  { %14071 = sst [smem:[#allocation9_spill]] %s12299_s30 }
  0x1f   :  { %s12314_s6 = sld [smem:[%s14031_s0 + %s12166_s7]]   ;;  %s12170_s7 = smov 26  }
  0x20   :  { %14072 = sst [smem:[#allocation10_spill]] %s12304_s27 }
  0x21   :  { %s12319_s30 = sld [smem:[%s14031_s0 + %s12167_s15]]   ;;  %s12171_s15 = smov 27  }
  0x22   :  { %14073 = sst [smem:[#allocation11_spill]] %s12309_s4 }
  0x23   :  { %s12324_s27 = sld [smem:[%s14031_s0 + %s12168_s22]]   ;;  %s12172_s22 = smov 28  }
  0x24   :  { %s12329_s4 = sld [smem:[%s14031_s0 + %s12169_s28]]   ;;  %s12173_s28 = smov 29  }
  0x25   :  { %14074 = sst [smem:[#allocation12_spill]] %s12314_s6 }
  0x26   :  { %s12334_s6 = sld [smem:[%s14031_s0 + %s12170_s7]]   ;;  %s12174_s7 = smov 30  }
  0x27   :  { %14075 = sst [smem:[#allocation13_spill]] %s12319_s30 }
  0x28   :  { %s12339_s30 = sld [smem:[%s14031_s0 + %s12171_s15]]   ;;  %s12175_s15 = smov 31  }
  0x29   :  { %14076 = sst [smem:[#allocation14_spill]] %s12324_s27 }
  0x2a   :  { %14077 = sst [smem:[#allocation15_spill]] %s12329_s4 }
  0x2b   :  { %s12344_s27 = sld [smem:[%s14031_s0 + %s12172_s22]]   ;;  %s12176_s22 = smov 32  }
  0x2c   :  { %14078 = sst [smem:[#allocation16_spill]] %s12334_s6 }
  0x2d   :  { %s12349_s4 = sld [smem:[%s14031_s0 + %s12173_s28]]   ;;  %s12177_s28 = smov 33  }
  0x2e   :  { %14079 = sst [smem:[#allocation17_spill]] %s12339_s30 }
  0x2f   :  { %s12354_s6 = sld [smem:[%s14031_s0 + %s12174_s7]]   ;;  %s12178_s7 = smov 34  }
  0x30   :  { %s12359_s30 = sld [smem:[%s14031_s0 + %s12175_s15]]   ;;  %s12376_s15 = smov 0  }
  0x31   :  { %14080 = sst [smem:[#allocation18_spill]] %s12344_s27 }
  0x32   :  { %s12364_s27 = sld [smem:[%s14031_s0 + %s12176_s22]]  }
  0x33   :  { %14081 = sst [smem:[#allocation19_spill]] %s12349_s4 }
  0x34   :  { %s12369_s4 = sld [smem:[%s14031_s0 + %s12177_s28]]  }
  0x35   :  { %14082 = sst [smem:[#allocation20_spill]] %s12354_s6 }
  0x36   :  { %s12374_s6 = sld [smem:[%s14031_s0 + %s12178_s7]]  }
  0x37 LB: > { %s10709_s16 = sadd.s32 4294967295, %s12143_s15   ;;  %p10713_p0 = scmp.ge.s32.totalorder %s12143_s15, 1  ;;  %s12143_s15 = sphi %s12376_s15, %s79_s15  }
  0x38   : > { %p955_p1 = scmp.lt.s32.totalorder %s12143_s15, 3 }
  0x3a   : > { %p956_p2 = pnand %p10713_p0, %p955_p1 }
  0x3b   : > { %p1043_p3 = scmp.lt.s32.totalorder (!%p956_p2), %s10709_s16, 1  ;;  %s14083_s5 = sld [smem:[#allocation2_spill]] (!%p956_p2) }
  0x3c   : > { %959 = sbr.rel (%p956_p2) target bundleno = 16525 (0x408d), region = 156  ;;  %s14061_s22 = smov (!%p956_p2), 56  }
  0x3d   : > { %s14060_s23 = smov (!%p956_p2), 64   ;;  %s14062_s26 = smov (!%p956_p2), 120  }
  0x3e   : > { %s14055_s28 = smov (!%p956_p2), 112   ;;  %s14050_s1 = smov (!%p956_p2), 48  }
  0x3f   : > { %s14051_s2 = smov (!%p956_p2), 104   ;;  %s14049_s7 = smov (!%p956_p2), 40  }
  0x40   : > { %s14053_s10 = smov (!%p956_p2), 96   ;;  %s14041_s11 = smov (!%p956_p2), 32  }
  0x41   : > { %v1071_v0 = vld [vmem:[%s12214_s13 + $0x78] sm:$0xff]  ;;  %v1070_v1 = vld [vmem:[%s12214_s13 + $0x70] sm:$0xff]  ;;  %v1069_v2 = vld [vmem:[%s12214_s13 + $0x68] sm:$0xff]  ;;  %v12179_v4 = vmov 0.0   ;;  %s14118_s16 = smov (!%p1043_p3, %s10709_s16), 1  ;;  %vm1084_vm0 = vcmask 523264   ;;  %v1074_v18 = vlaneseq }
  0x42   : > { %1104 = vmatprep.subr.mxu0 %v1071_v0  ;;  %v1068_v3 = vld [vmem:[%s12214_s13 + $0x60] sm:$0xff]  ;;  %1152 = vmatprep.mubr.f32.mxu0 %v12179_v4  ;;  %v1067_v5 = vld [vmem:[%s12214_s13 + $0x58] sm:$0xff]  ;;  %v1066_v6 = vld [vmem:[%s12214_s13 + $0x50] sm:$0xff]  ;;  %s12397_s0 = sshll.u32 %s14118_s16, 3  ;;  %vm12180_vm1 = vmmov 0   ;;  %vm1171_vm2 = vcmask 64512  }
  0x43   : > { %1105 = vmatpush1.msra.mxu0 %v1070_v1  ;;  %11574 = vmatprep.subr.mxu1 %v12179_v4  ;;  %v1065_v7 = vld [vmem:[%s12214_s13 + $0x48] sm:$0xff]  ;;  %v1064_v8 = vld [vmem:[%s12214_s13 + $0x40] sm:$0xff]  ;;  %v1063_v9 = vld [vmem:[%s12214_s13 + $0x38] sm:$0xff]  ;;  %s1046_s18 = scalar_lea.vmem %s14083_s5, %s12397_s0  ;;  %v12411_v19 = vshrl.u32 %v1074_v18, 7  ;;  %s14045_s16 = smov 88  }
  0x44   : > { %1106 = vmatprep.subr.mxu0 %v1069_v2  ;;  %v1062_v10 = vld [vmem:[%s12214_s13 + $0x30] sm:$0xff]  ;;  %v1061_v11 = vld [vmem:[%s12214_s13 + $0x28] sm:$0xff]  ;;  %v1060_v12 = vld [vmem:[%s12214_s13 + $0x20] sm:$0xff]  ;;  %11576 = vmatprep.mubr.msk.f32.mxu1 %vm12180_vm1, %v12179_v4  ;;  %s14084_s3 = sld [smem:[#allocation3_spill]]  ;;  %s14100_s5 = smov 120  }
  0x45   : > { %1107 = vmatpush1.msra.mxu0 %v1068_v3  ;;  %v1059_v13 = vld [vmem:[%s12214_s13 + $0x18] sm:$0xff]  ;;  %v1058_v14 = vld [vmem:[%s12214_s13 + $0x10] sm:$0xff]  ;;  %v1057_v15 = vld [vmem:[%s12214_s13 + $0x8] sm:$0xff]  ;;  %v12418_v20 = vsub.s32 0, %v12411_v19  ;;  %v12429_v25 = vsub.s32 1, %v12411_v19 }
  0x46   : > { %1108 = vmatprep.subr.mxu0 %v1067_v5  ;;  %v1056_v16 = vld [vmem:[%s12214_s13] sm:$0xff]  ;;  %v1160_v54 = vld [vmem:[%s12224_s21 + $0x8] sm:$0xff] }
  0x47   : > { %1109 = vmatpush1.msra.mxu0 %v1066_v6  ;;  %v12406_v17 = vld [vmem:[%s1046_s18] sm:$0xff]  ;;  %s14039_s18 = smov 24  }
  0x48   : > { %1110 = vmatprep.subr.mxu0 %v1065_v7  ;;  %v1072_v21 = vld [vmem:[%s12219_s17] sm:$0x3] }
  0x49   : > { %1111 = vmatpush1.msra.mxu0 %v1064_v8  ;;  %v1077_v22 = vrot.slane %v1072_v21, %v12418_v20  ;;  %v1081_v26 = vrot.slane %v1072_v21, %v12429_v25  ;;  %v1159_v59 = vld [vmem:[%s12224_s21] sm:$0xff] }
  0x4a   : > { %1112 = vmatprep.subr.mxu0 %v1063_v9 }
  0x4b   : > { %1113 = vmatpush1.msra.mxu0 %v1062_v10 }
  0x4c   : > { %1114 = vmatprep.subr.mxu0 %v1061_v11 }
  0x4d   : > { %1115 = vmatpush1.msra.mxu0 %v1060_v12 }
  0x4e   : > { %1116 = vmatprep.subr.mxu0 %v1059_v13 }
  0x4f   : > { %1117 = vmatpush1.msra.mxu0 %v1058_v14 }
  0x50   : > { %1118 = vmatprep.subr.mxu0 %v1057_v15 }
  0x51   : > { %1119 = vmatpush1.msra.mxu0 %v1056_v16 }
  0x52   : > { %10717 = vmatmul.mubr.msk.f32.vlgmr.msra.gmra.mxu0 %vm1084_vm0, %v12406_v17  ;;  %11594 = vmatprep.subr.mxu0 %v12179_v4 }
  0x53   : > { %11596 = vmatprep.mubr.msk.f32.mxu0 %vm12180_vm1, %v12179_v4  ;;  %11595 = vmatpush3.msra.mxu0 %v1160_v54 }
  0x54   : > { %11604 = vmatprep.subr.mxu0 %v12179_v4 }
 0x112   : > { %v1154_v23 = vpop.f32.mrf.mxu0 }
 0x113   : > { %v12422_v24 = vadd.f32 %v1154_v23, %v1077_v22  ;;  %v1161_v22 = vld [vmem:[%s12224_s21 + $0x10] sm:$0xff] }
 0x114   : > { %v1156_v27 = vpop.f32.mrf.mxu0 }
 0x115   : > { %1333 = vrot.lane.b32.xlu1 %v12422_v24, %s14061_s22  ;;  %1169 = vrot.lane.b32.xlu0 %v12422_v24, %s14060_s23  ;;  %v12434_v29 = vmul.f32 0.35355338, %v12422_v24  ;;  %v12437_v30 = vadd.f32 %v1156_v27, %v1081_v26 }
 0x187   : > { %v1170_v28 = vpop.permute.xlu0 %1169  ;;  %v1334_v39 = vpop.permute.xlu1 %1333 }
 0x188   : > { %11575 = vmatpush3.xpose.msk.msra.mxu1 %vm1171_vm2, %v1170_v28 }
 0x189   : > { %11579 = vmatprep.subr.mxu1 %v12179_v4 }
 0x18b   : > { %11577 = vmatmul.mubr.msk.f32.vlgmr.msra.gmra.mxu1 %vm1171_vm2, %v12434_v29 }
 0x18c   : > { %11580 = vmatpush3.msra.mxu1 %v12437_v30  ;;  %11581 = vmatprep.mubr.msk.f32.mxu1 %vm12180_vm1, %v12179_v4 }
 0x18d   : > { %11584 = vmatprep.subr.mxu1 %v12179_v4 }
 0x24b   : > { %v1243_v31 = vpop.f32.mrf.mxu1 }
 0x24c   : > { %v1247_v32 = vsel %vm1171_vm2, %v1243_v31, -inf }
 0x24d   : > { %1248 = vmax.xlane.f32.xlu0 %v1247_v32  ;;  %v11578_v33 = vpop.f32.mrf.mxu1 }
 0x2d6   : > { %v1249_v34 = vpop.xlane.xlu0 %1248 }
 0x2d7   : > { %v1250_v35 = vsub.f32 %v1243_v31, %v1249_v34 }
 0x2d9   : > { %v1251_v36 = vmul.f32 1.442695, %v1250_v35 }
 0x2db   : > { %12031 = vpow2.f32 %v1251_v36 }
 0x2e8   : > { %v12032_v37 = vpop.eup %12031 }
 0x2e9   : > { %v1253_v38 = vsel %vm1171_vm2, %v12032_v37, 0.0 }
 0x2ea   : > { %1254 = vadd.xlane.f32.xlu1 %v1253_v38 }
 0x2fb   : > { %1331 = vrot.lane.b32.xlu1 %v12434_v29, %s14062_s26 }
 0x373   : > { %v1255_v40 = vpop.xlane.xlu1 %1254 }
 0x374   : > { %12033 = vrcp.f32 %v1255_v40 }
 0x377   : > { %v1332_v43 = vpop.permute.xlu1 %1331 }
 0x381   : > { %v12034_v41 = vpop.eup %12033 }
 0x382   : > { %v1257_v42 = vmul.f32 %v12034_v41, %v12032_v37 }
 0x384   : > { %11582 = vmatmul.mubr.msk.f32.vlgmr.msra.gmra.mxu1 %vm1171_vm2, %v1257_v42 }
 0x385   : > { %11585 = vmatpush3.xpose.msk.msra.mxu1 %vm1171_vm2, %v1334_v39  ;;  %11586 = vmatprep.mubr.msk.f32.mxu1 %vm12180_vm1, %v12179_v4 }
 0x386   : > { %11589 = vmatprep.subr.mxu1 %v12179_v4 }
 0x388   : > { %11587 = vmatmul.mubr.msk.f32.vlgmr.msra.gmra.mxu1 %vm1171_vm2, %v1332_v43 }
 0x389   : > { %11591 = vmatprep.mubr.msk.f32.mxu1 %vm12180_vm1, %v12179_v4 }
 0x444   : > { %v1327_v44 = vpop.f32.mrf.mxu1 }
 0x446   : > { %v11583_v45 = vpop.f32.mrf.mxu1 }
 0x448   : > { %v1405_v46 = vpop.f32.mrf.mxu1 }
 0x449   : > { %v1409_v47 = vsel %vm1171_vm2, %v1405_v46, -inf }
 0x44a   : > { %1410 = vmax.xlane.f32.xlu1 %v1409_v47  ;;  %v11588_v48 = vpop.f32.mrf.mxu1  ;;  %v1162_v47 = vld [vmem:[%s12224_s21 + $0x18] sm:$0xff] }
 0x45b   : > { %1643 = vrot.lane.b32.xlu1 %v12434_v29, %s14055_s28 }
 0x4d3   : > { %v1411_v49 = vpop.xlane.xlu1 %1410 }
 0x4d4   : > { %v1412_v50 = vsub.f32 %v1405_v46, %v1411_v49 }
 0x4d6   : > { %v1413_v51 = vmul.f32 1.442695, %v1412_v50 }
 0x4d7   : > { %v1644_v63 = vpop.permute.xlu1 %1643 }
 0x4d8   : > { %12035 = vpow2.f32 %v1413_v51 }
 0x4e5   : > { %v12036_v52 = vpop.eup %12035 }
 0x4e6   : > { %v1415_v53 = vsel %vm1171_vm2, %v12036_v52, 0.0 }
 0x4e7   : > { %1416 = vadd.xlane.f32.xlu0 %v1415_v53 }
 0x4fd   : > { %1421 = vrot.lane.b32.xlu0 %v12437_v30, %s14062_s26 }
 0x501   : > { %1645 = vrot.lane.b32.xlu0 %v12422_v24, %s14050_s1 }
 0x570   : > { %v1417_v55 = vpop.xlane.xlu0 %1416 }
 0x571   : > { %12037 = vrcp.f32 %v1417_v55 }
 0x574   : > { %v1422_v56 = vpop.permute.xlu0 %1421 }
 0x575   : > { %11590 = vmatpush3.msra.mxu1 %v1422_v56 }
 0x576   : > { %11599 = vmatprep.subr.mxu1 %v12179_v4 }
 0x578   : > { %v1646_v61 = vpop.permute.xlu0 %1645 }
 0x57e   : > { %v12038_v57 = vpop.eup %12037 }
 0x57f   : > { %v1419_v58 = vmul.f32 %v12038_v57, %v12036_v52 }
 0x581   : > { %11592 = vmatmul.mubr.msk.f32.vlgmr.msra.gmra.mxu1 %vm1171_vm2, %v1419_v58 }
 0x582   : > { %11600 = vmatpush3.msra.mxu1 %v1159_v59  ;;  %11601 = vmatprep.mubr.msk.f32.mxu1 %vm12180_vm1, %v12179_v4 }
 0x583   : > { %11609 = vmatprep.subr.mxu1 %v12179_v4 }
 0x585   : > { %11602 = vmatmul.mubr.msk.f32.vlgmr.msra.gmra.mxu1 %vm1171_vm2, %v1327_v44 }
 0x586   : > { %11611 = vmatprep.mubr.msk.f32.mxu1 %vm12180_vm1, %v12179_v4 }
 0x641   : > { %v1493_v60 = vpop.f32.mrf.mxu1 }
 0x642   : > { %11597 = vmatmul.mubr.msk.f32.vlgmr.msra.gmra.mxu0 %vm1171_vm2, %v1493_v60 }
 0x643   : > { %11605 = vmatpush3.xpose.msk.msra.mxu0 %vm1171_vm2, %v1646_v61  ;;  %v11593_v62 = vpop.f32.mrf.mxu1  ;;  %11606 = vmatprep.mubr.msk.f32.mxu0 %vm12180_vm1, %v12179_v4 }
 0x644   : > { %11614 = vmatprep.subr.mxu0 %v12179_v4 }
 0x645   : > { %v12481_v0 = vpop.f32.mrf.mxu1 }
 0x646   : > { %11607 = vmatmul.mubr.msk.f32.vlgmr.msra.gmra.mxu0 %vm1171_vm2, %v1644_v63 }
 0x647   : > { %v11603_v1 = vpop.f32.mrf.mxu1  ;;  %11616 = vmatprep.mubr.msk.f32.mxu0 %vm12180_vm1, %v12179_v4  ;;  %11615 = vmatpush3.msra.mxu0 %v1161_v22 }
 0x648   : > { %11624 = vmatprep.subr.mxu0 %v12179_v4 }
 0x702   : > { %v1566_v2 = vpop.f32.mrf.mxu0 }
 0x703   : > { %v1640_v38 = vadd.f32 %v12481_v0, %v1566_v2 }
 0x704   : > { %v11598_v3 = vpop.f32.mrf.mxu0 }
 0x705   : > { %v1163_v3 = vld [vmem:[%s12224_s21 + $0x20] sm:$0xff] }
 0x706   : > { %v1717_v5 = vpop.f32.mrf.mxu0 }
 0x707   : > { %v1721_v6 = vsel %vm1171_vm2, %v1717_v5, -inf }
 0x708   : > { %1722 = vmax.xlane.f32.xlu0 %v1721_v6  ;;  %v11608_v7 = vpop.f32.mrf.mxu0 }
 0x71e   : > { %1732 = vrot.lane.b32.xlu0 %v12437_v30, %s14055_s28 }
 0x722   : > { %1882 = vrot.lane.b32.xlu0 %v12434_v29, %s14051_s2 }
 0x791   : > { %v1723_v8 = vpop.xlane.xlu0 %1722 }
 0x792   : > { %v1724_v9 = vsub.f32 %v1717_v5, %v1723_v8 }
 0x794   : > { %v1725_v10 = vmul.f32 1.442695, %v1724_v9 }
 0x795   : > { %v1733_v11 = vpop.permute.xlu0 %1732 }
 0x796   : > { %12039 = vpow2.f32 %v1725_v10  ;;  %11610 = vmatpush3.msra.mxu1 %v1733_v11 }
 0x797   : > { %11619 = vmatprep.subr.mxu1 %v12179_v4 }
 0x799   : > { %v1883_v21 = vpop.permute.xlu0 %1882 }
 0x7a3   : > { %v12040_v12 = vpop.eup %12039 }
 0x7a4   : > { %v1727_v13 = vsel %vm1171_vm2, %v12040_v12, 0.0 }
 0x7a5   : > { %1728 = vadd.xlane.f32.xlu1 %v1727_v13 }
 0x7b6   : > { %1884 = vrot.lane.b32.xlu1 %v12422_v24, %s14049_s7 }
 0x82e   : > { %v1729_v14 = vpop.xlane.xlu1 %1728 }
 0x82f   : > { %12041 = vrcp.f32 %v1729_v14 }
 0x832   : > { %v1885_v18 = vpop.permute.xlu1 %1884 }
 0x83c   : > { %v12042_v15 = vpop.eup %12041 }
 0x83d   : > { %v1731_v16 = vmul.f32 %v12042_v15, %v12040_v12 }
 0x83f   : > { %11612 = vmatmul.mubr.msk.f32.vlgmr.msra.gmra.mxu1 %vm1171_vm2, %v1731_v16 }
 0x840   : > { %11620 = vmatpush3.xpose.msk.msra.mxu1 %vm1171_vm2, %v1885_v18  ;;  %11621 = vmatprep.mubr.msk.f32.mxu1 %vm12180_vm1, %v12179_v4 }
 0x841   : > { %11629 = vmatprep.subr.mxu1 %v12179_v4 }
 0x843   : > { %11622 = vmatmul.mubr.msk.f32.vlgmr.msra.gmra.mxu1 %vm1171_vm2, %v1883_v21 }
 0x844   : > { %11631 = vmatprep.mubr.msk.f32.mxu1 %vm12180_vm1, %v12179_v4  ;;  %11630 = vmatpush3.msra.mxu1 %v1162_v47 }
 0x845   : > { %11639 = vmatprep.subr.mxu1 %v12179_v4 }
 0x8ff   : > { %v1804_v23 = vpop.f32.mrf.mxu1 }
 0x900   : > { %11617 = vmatmul.mubr.msk.f32.vlgmr.msra.gmra.mxu0 %vm1171_vm2, %v1804_v23 }
 0x901   : > { %v11613_v26 = vpop.f32.mrf.mxu1  ;;  %11626 = vmatprep.mubr.msk.f32.mxu0 %vm12180_vm1, %v12179_v4 }
 0x903   : > { %v1956_v27 = vpop.f32.mrf.mxu1 }
 0x904   : > { %v1960_v28 = vsel %vm1171_vm2, %v1956_v27, -inf }
 0x905   : > { %1961 = vmax.xlane.f32.xlu0 %v1960_v28  ;;  %v11623_v31 = vpop.f32.mrf.mxu1 }
 0x906   : > { %v1164_v31 = vld [vmem:[%s12224_s21 + $0x28] sm:$0xff] }
 0x91b   : > { %1971 = vrot.lane.b32.xlu0 %v12437_v30, %s14051_s2 }
 0x91f   : > { %2121 = vrot.lane.b32.xlu0 %v12434_v29, %s14053_s10 }
 0x98e   : > { %v1962_v32 = vpop.xlane.xlu0 %1961 }
 0x98f   : > { %v1963_v33 = vsub.f32 %v1956_v27, %v1962_v32 }
 0x991   : > { %v1964_v34 = vmul.f32 1.442695, %v1963_v33 }
 0x992   : > { %v1972_v35 = vpop.permute.xlu0 %1971 }
 0x993   : > { %12043 = vpow2.f32 %v1964_v34  ;;  %11625 = vmatpush3.msra.mxu0 %v1972_v35 }
 0x994   : > { %11634 = vmatprep.subr.mxu0 %v12179_v4 }
 0x996   : > { %v2122_v46 = vpop.permute.xlu0 %2121 }
 0x9a0   : > { %v12044_v36 = vpop.eup %12043 }
 0x9a1   : > { %v1966_v37 = vsel %vm1171_vm2, %v12044_v36, 0.0 }
 0x9a2   : > { %1967 = vadd.xlane.f32.xlu1 %v1966_v37 }
 0x9b3   : > { %2123 = vrot.lane.b32.xlu1 %v12422_v24, %s14041_s11  ;;  %s14043_s11 = smov 16  }
 0x9c0   : > { %v1877_v39 = vpop.f32.mrf.mxu0 }
 0x9c1   : > { %v1881_v40 = vadd.f32 %v1877_v39, %v1640_v38 }
 0x9c2   : > { %v11618_v41 = vpop.f32.mrf.mxu0 }
 0xa2b   : > { %v1968_v42 = vpop.xlane.xlu1 %1967 }
 0xa2c   : > { %12045 = vrcp.f32 %v1968_v42 }
 0xa2f   : > { %v2124_v45 = vpop.permute.xlu1 %2123 }
 0xa39   : > { %v12046_v43 = vpop.eup %12045 }
 0xa3a   : > { %v1970_v44 = vmul.f32 %v12046_v43, %v12044_v36 }
 0xa3c   : > { %11627 = vmatmul.mubr.msk.f32.vlgmr.msra.gmra.mxu0 %vm1171_vm2, %v1970_v44 }
 0xa3d   : > { %11635 = vmatpush3.xpose.msk.msra.mxu0 %vm1171_vm2, %v2124_v45  ;;  %11636 = vmatprep.mubr.msk.f32.mxu0 %vm12180_vm1, %v12179_v4 }
 0xa3e   : > { %11644 = vmatprep.subr.mxu0 %v12179_v4 }
 0xa40   : > { %11637 = vmatmul.mubr.msk.f32.vlgmr.msra.gmra.mxu0 %vm1171_vm2, %v2122_v46 }
 0xa41   : > { %11646 = vmatprep.mubr.msk.f32.mxu0 %vm12180_vm1, %v12179_v4  ;;  %11645 = vmatpush3.msra.mxu0 %v1163_v3 }
 0xa42   : > { %11654 = vmatprep.subr.mxu0 %v12179_v4 }
 0xafc   : > { %v2043_v48 = vpop.f32.mrf.mxu0 }
 0xafd   : > { %11632 = vmatmul.mubr.msk.f32.vlgmr.msra.gmra.mxu1 %vm1171_vm2, %v2043_v48 }
 0xafe   : > { %v11628_v49 = vpop.f32.mrf.mxu0  ;;  %11641 = vmatprep.mubr.msk.f32.mxu1 %vm12180_vm1, %v12179_v4 }
 0xaff   : > { %v1165_v49 = vld [vmem:[%s12224_s21 + $0x30] sm:$0xff] }
 0xb00   : > { %v2195_v50 = vpop.f32.mrf.mxu0 }
 0xb01   : > { %v2199_v51 = vsel %vm1171_vm2, %v2195_v50, -inf }
 0xb02   : > { %2200 = vmax.xlane.f32.xlu0 %v2199_v51  ;;  %v11638_v52 = vpop.f32.mrf.mxu0 }
 0xb18   : > { %2210 = vrot.lane.b32.xlu0 %v12437_v30, %s14053_s10 }
 0xb1c   : > { %2360 = vrot.lane.b32.xlu0 %v12434_v29, %s14045_s16 }
 0xb8b   : > { %v2201_v53 = vpop.xlane.xlu0 %2200 }
 0xb8c   : > { %v2202_v54 = vsub.f32 %v2195_v50, %v2201_v53 }
 0xb8e   : > { %v2203_v55 = vmul.f32 1.442695, %v2202_v54 }
 0xb8f   : > { %v2211_v56 = vpop.permute.xlu0 %2210 }
 0xb90   : > { %12047 = vpow2.f32 %v2203_v55  ;;  %11640 = vmatpush3.msra.mxu1 %v2211_v56 }
 0xb91   : > { %11649 = vmatprep.subr.mxu1 %v12179_v4 }
 0xb93   : > { %v2361_v2 = vpop.permute.xlu0 %2360 }
 0xb9d   : > { %v12048_v57 = vpop.eup %12047 }
 0xb9e   : > { %v2205_v58 = vsel %vm1171_vm2, %v12048_v57, 0.0 }
 0xb9f   : > { %2206 = vadd.xlane.f32.xlu1 %v2205_v58 }
 0xbb0   : > { %2362 = vrot.lane.b32.xlu1 %v12422_v24, %s14039_s18  ;;  %s14058_s18 = smov 80  }
 0xbbd   : > { %v2116_v59 = vpop.f32.mrf.mxu1 }
 0xbbe   : > { %v2120_v60 = vadd.f32 %v2116_v59, %v1881_v40 }
 0xbbf   : > { %v11633_v61 = vpop.f32.mrf.mxu1 }
 0xbc0   : > { %v1166_v61 = vld [vmem:[%s12224_s21 + $0x38] sm:$0xff] }
 0xc28   : > { %v2207_v62 = vpop.xlane.xlu1 %2206 }
 0xc29   : > { %12049 = vrcp.f32 %v2207_v62 }
 0xc2c   : > { %v2363_v1 = vpop.permute.xlu1 %2362 }
 0xc36   : > { %v12050_v63 = vpop.eup %12049 }
 0xc37   : > { %v2209_v0 = vmul.f32 %v12050_v63, %v12048_v57 }
 0xc39   : > { %11642 = vmatmul.mubr.msk.f32.vlgmr.msra.gmra.mxu1 %vm1171_vm2, %v2209_v0 }
 0xc3a   : > { %11650 = vmatpush3.xpose.msk.msra.mxu1 %vm1171_vm2, %v2363_v1  ;;  %11651 = vmatprep.mubr.msk.f32.mxu1 %vm12180_vm1, %v12179_v4 }
 0xc3b   : > { %11659 = vmatprep.subr.mxu1 %v12179_v4 }
 0xc3d   : > { %11652 = vmatmul.mubr.msk.f32.vlgmr.msra.gmra.mxu1 %vm1171_vm2, %v2361_v2 }
 0xc3e   : > { %11661 = vmatprep.mubr.msk.f32.mxu1 %vm12180_vm1, %v12179_v4  ;;  %11660 = vmatpush3.msra.mxu1 %v1164_v31  ;;  %v3214_v31 = vld [vmem:[%s12244_s8 + $0x310] sm:$0xff] }
 0xc3f   : > { %11669 = vmatprep.subr.mxu1 %v12179_v4 }
 0xcf9   : > { %v2282_v5 = vpop.f32.mrf.mxu1 }
 0xcfa   : > { %11647 = vmatmul.mubr.msk.f32.vlgmr.msra.gmra.mxu0 %vm1171_vm2, %v2282_v5 }
 0xcfb   : > { %v11643_v6 = vpop.f32.mrf.mxu1  ;;  %11656 = vmatprep.mubr.msk.f32.mxu0 %vm12180_vm1, %v12179_v4 }
 0xcfd   : > { %v2434_v7 = vpop.f32.mrf.mxu1 }
 0xcfe   : > { %v2438_v8 = vsel %vm1171_vm2, %v2434_v7, -inf }
 0xcff   : > { %2439 = vmax.xlane.f32.xlu0 %v2438_v8  ;;  %v11653_v9 = vpop.f32.mrf.mxu1 }
 0xd15   : > { %2449 = vrot.lane.b32.xlu0 %v12437_v30, %s14045_s16  ;;  %s14047_s16 = smov 72  }
 0xd19   : > { %2599 = vrot.lane.b32.xlu0 %v12434_v29, %s14058_s18 }
 0xd88   : > { %v2440_v10 = vpop.xlane.xlu0 %2439 }
 0xd89   : > { %v2441_v11 = vsub.f32 %v2434_v7, %v2440_v10  ;;  %v10750_v7 = vld [vmem:[%s12229_s25] ss:$0 sm:$0xff] }
 0xd8b   : > { %v2442_v12 = vmul.f32 1.442695, %v2441_v11 }
 0xd8c   : > { %v2450_v13 = vpop.permute.xlu0 %2449 }
 0xd8d   : > { %12051 = vpow2.f32 %v2442_v12  ;;  %11655 = vmatpush3.msra.mxu0 %v2450_v13 }
 0xd8e   : > { %11664 = vmatprep.subr.mxu0 %v12179_v4 }
 0xd90   : > { %v2600_v28 = vpop.permute.xlu0 %2599 }
 0xd9a   : > { %v12052_v14 = vpop.eup %12051 }
 0xd9b   : > { %v2444_v15 = vsel %vm1171_vm2, %v12052_v14, 0.0 }
 0xd9c   : > { %2445 = vadd.xlane.f32.xlu1 %v2444_v15 }
 0xdad   : > { %2601 = vrot.lane.b32.xlu1 %v12422_v24, %s14043_s11  ;;  %s14057_s11 = smov 8  }
 0xdba   : > { %v2355_v16 = vpop.f32.mrf.mxu0 }
 0xdbb   : > { %v2359_v18 = vadd.f32 %v2355_v16, %v2120_v60 }
 0xdbc   : > { %v11648_v21 = vpop.f32.mrf.mxu0 }
 0xdbd   : > { %v3229_v21 = vld [vmem:[%s12244_s8 + $0x388] sm:$0xff] }
 0xe25   : > { %v2446_v22 = vpop.xlane.xlu1 %2445 }
 0xe26   : > { %12053 = vrcp.f32 %v2446_v22  ;;  %v3228_v22 = vld [vmem:[%s12244_s8 + $0x380] sm:$0xff] }
 0xe29   : > { %v2602_v27 = vpop.permute.xlu1 %2601 }
 0xe33   : > { %v12054_v23 = vpop.eup %12053 }
 0xe34   : > { %v2448_v26 = vmul.f32 %v12054_v23, %v12052_v14  ;;  %v3230_v23 = vld [vmem:[%s12244_s8 + $0x390] sm:$0xff] }
 0xe36   : > { %11657 = vmatmul.mubr.msk.f32.vlgmr.msra.gmra.mxu0 %vm1171_vm2, %v2448_v26  ;;  %v3213_v26 = vld [vmem:[%s12244_s8 + $0x308] sm:$0xff] }
 0xe37   : > { %11665 = vmatpush3.xpose.msk.msra.mxu0 %vm1171_vm2, %v2602_v27  ;;  %11666 = vmatprep.mubr.msk.f32.mxu0 %vm12180_vm1, %v12179_v4  ;;  %v3215_v27 = vld [vmem:[%s12244_s8 + $0x318] sm:$0xff] }
 0xe38   : > { %11674 = vmatprep.subr.mxu0 %v12179_v4 }
 0xe3a   : > { %11667 = vmatmul.mubr.msk.f32.vlgmr.msra.gmra.mxu0 %vm1171_vm2, %v2600_v28  ;;  %v3212_v28 = vld [vmem:[%s12244_s8 + $0x300] sm:$0xff] }
 0xe3b   : > { %11676 = vmatprep.mubr.msk.f32.mxu0 %vm12180_vm1, %v12179_v4  ;;  %11675 = vmatpush3.msra.mxu0 %v1165_v49  ;;  %v3134_v49 = vld [vmem:[%s12244_s8 + $0x90] sm:$0xff] }
 0xe3c   : > { %11684 = vmatprep.subr.mxu0 %v12179_v4 }
 0xef6   : > { %v2521_v32 = vpop.f32.mrf.mxu0 }
 0xef7   : > { %11662 = vmatmul.mubr.msk.f32.vlgmr.msra.gmra.mxu1 %vm1171_vm2, %v2521_v32  ;;  %v3197_v32 = vld [vmem:[%s12244_s8 + $0x288] sm:$0xff] }
 0xef8   : > { %v11658_v33 = vpop.f32.mrf.mxu0  ;;  %11671 = vmatprep.mubr.msk.f32.mxu1 %vm12180_vm1, %v12179_v4 }
 0xef9   : > { %v3199_v33 = vld [vmem:[%s12244_s8 + $0x298] sm:$0xff] }
 0xefa   : > { %v2673_v34 = vpop.f32.mrf.mxu0 }
 0xefb   : > { %v2677_v35 = vsel %vm1171_vm2, %v2673_v34, -inf }
 0xefc   : > { %2678 = vmax.xlane.f32.xlu1 %v2677_v35  ;;  %v11668_v36 = vpop.f32.mrf.mxu0  ;;  %v3198_v35 = vld [vmem:[%s12244_s8 + $0x290] sm:$0xff] }
 0xefd   : > { %v3181_v36 = vld [vmem:[%s12244_s8 + $0x208] sm:$0xff] }
 0xf0d   : > { %2840 = vrot.lane.b32.xlu1 %v12422_v24, %s14057_s11 }
 0xf11   : > { %2838 = vrot.lane.b32.xlu1 %v12434_v29, %s14047_s16 }
 0xf85   : > { %v2679_v37 = vpop.xlane.xlu1 %2678 }
 0xf86   : > { %v2680_v38 = vsub.f32 %v2673_v34, %v2679_v37  ;;  %v3196_v34 = vld [vmem:[%s12244_s8 + $0x280] sm:$0xff]  ;;  %v3183_v37 = vld [vmem:[%s12244_s8 + $0x218] sm:$0xff] }
 0xf88   : > { %v2681_v39 = vmul.f32 1.442695, %v2680_v38  ;;  %v3180_v38 = vld [vmem:[%s12244_s8 + $0x200] sm:$0xff] }
 0xf89   : > { %v2841_v46 = vpop.permute.xlu1 %2840 }
 0xf8a   : > { %12055 = vpow2.f32 %v2681_v39  ;;  %v3182_v39 = vld [vmem:[%s12244_s8 + $0x210] sm:$0xff] }
 0xf8d   : > { %v2839_v48 = vpop.permute.xlu1 %2838 }
 0xf97   : > { %v12056_v40 = vpop.eup %12055 }
 0xf98   : > { %v2683_v41 = vsel %vm1171_vm2, %v12056_v40, 0.0 }
 0xf99   : > { %2684 = vadd.xlane.f32.xlu0 %v2683_v41  ;;  %v3167_v41 = vld [vmem:[%s12244_s8 + $0x198] sm:$0xff] }
 0xfaf   : > { %2688 = vrot.lane.b32.xlu0 %v12437_v30, %s14058_s18 }
 0xfb7   : > { %v2594_v42 = vpop.f32.mrf.mxu1 }
 0xfb8   : > { %v2598_v43 = vadd.f32 %v2594_v42, %v2359_v18  ;;  %v3164_v42 = vld [vmem:[%s12244_s8 + $0x180] sm:$0xff] }
 0xfb9   : > { %v11663_v44 = vpop.f32.mrf.mxu1 }
 0xfba   : > { %v3149_v44 = vld [vmem:[%s12244_s8 + $0x108] sm:$0xff] }
0x1022   : > { %v2685_v24 = vpop.xlane.xlu0 %2684 }
0x1023   : > { %12057 = vrcp.f32 %v2685_v24  ;;  %v3151_v24 = vld [vmem:[%s12244_s8 + $0x118] sm:$0xff] }
0x1026   : > { %v2689_v45 = vpop.permute.xlu0 %2688 }
0x1027   : > { %11670 = vmatpush3.msra.mxu1 %v2689_v45  ;;  %v3148_v45 = vld [vmem:[%s12244_s8 + $0x100] sm:$0xff] }
0x1028   : > { %11679 = vmatprep.subr.mxu1 %v12179_v4 }
0x1030   : > { %v12058_v29 = vpop.eup %12057 }
0x1031   : > { %v2687_v47 = vmul.f32 %v12058_v29, %v12056_v40  ;;  %v3165_v40 = vld [vmem:[%s12244_s8 + $0x188] sm:$0xff]  ;;  %v3150_v29 = vld [vmem:[%s12244_s8 + $0x110] sm:$0xff] }
0x1033   : > { %11672 = vmatmul.mubr.msk.f32.vlgmr.msra.gmra.mxu1 %vm1171_vm2, %v2687_v47  ;;  %v3135_v47 = vld [vmem:[%s12244_s8 + $0x98] sm:$0xff] }
0x1034   : > { %11680 = vmatpush3.xpose.msk.msra.mxu1 %vm1171_vm2, %v2841_v46  ;;  %11681 = vmatprep.mubr.msk.f32.mxu1 %vm12180_vm1, %v12179_v4  ;;  %v3133_v46 = vld [vmem:[%s12244_s8 + $0x88] sm:$0xff] }
0x1035   : > { %11689 = vmatprep.subr.mxu1 %v12179_v4 }
0x1037   : > { %11682 = vmatmul.mubr.msk.f32.vlgmr.msra.gmra.mxu1 %vm1171_vm2, %v2839_v48  ;;  %v3132_v48 = vld [vmem:[%s12244_s8 + $0x80] sm:$0xff] }
0x1038   : > { %11691 = vmatprep.mubr.msk.f32.mxu1 %vm12180_vm1, %v12179_v4  ;;  %11690 = vmatpush3.msra.mxu1 %v1166_v61 }
0x10f3   : > { %v2760_v50 = vpop.f32.mrf.mxu1 }
0x10f4   : > { %11677 = vmatmul.mubr.msk.f32.vlgmr.msra.gmra.mxu0 %vm1171_vm2, %v2760_v50  ;;  %v3117_v50 = vld [vmem:[%s12244_s8 + $0x8] sm:$0xff] }
0x10f5   : > { %v11673_v51 = vpop.f32.mrf.mxu1  ;;  %11686 = vmatprep.mubr.msk.f32.mxu0 %vm12180_vm1, %v12179_v4 }
0x10f6   : > { %v3119_v51 = vld [vmem:[%s12244_s8 + $0x18] sm:$0xff] }
0x10f7   : > { %v2912_v52 = vpop.f32.mrf.mxu1 }
0x10f8   : > { %v2916_v53 = vsel %vm1171_vm2, %v2912_v52, -inf }
0x10f9   : > { %2917 = vmax.xlane.f32.xlu0 %v2916_v53  ;;  %v11683_v54 = vpop.f32.mrf.mxu1  ;;  %v3118_v53 = vld [vmem:[%s12244_s8 + $0x10] sm:$0xff] }
0x10fa   : > { %v3233_v54 = vld [vmem:[%s12244_s8 + $0x3a8] sm:$0xff] }
0x110f   : > { %2927 = vrot.lane.b32.xlu0 %v12437_v30, %s14047_s16  ;;  %s1050_s16 = scalar_lea.vmem %s12209_s9, %s12397_s0 }
0x1182   : > { %v2918_v55 = vpop.xlane.xlu0 %2917 }
0x1183   : > { %v2919_v56 = vsub.f32 %v2912_v52, %v2918_v55  ;;  %v3116_v52 = vld [vmem:[%s12244_s8] sm:$0xff]  ;;  %v3235_v55 = vld [vmem:[%s12244_s8 + $0x3b8] sm:$0xff] }
0x1185   : > { %v2920_v57 = vmul.f32 1.442695, %v2919_v56 }
0x1186   : > { %v2928_v58 = vpop.permute.xlu0 %2927 }
0x1187   : > { %12059 = vpow2.f32 %v2920_v57  ;;  %11685 = vmatpush3.msra.mxu0 %v2928_v58 }
0x1188   : > { %3347 = vmatprep.subr.mxu0 %v3229_v21  ;;  %v3170_v21 = vld [vmem:[%s12244_s8 + $0x1b0] sm:$0xff] }
0x1194   : > { %v12060_v59 = vpop.eup %12059 }
0x1195   : > { %v2922_v60 = vsel %vm1171_vm2, %v12060_v59, 0.0 }
0x1196   : > { %2923 = vadd.xlane.f32.xlu1 %v2922_v60  ;;  %v10751_v60 = vld [vmem:[%s12234_s29] ss:$0 sm:$0xff] }
0x11b4   : > { %v2833_v62 = vpop.f32.mrf.mxu0 }
0x11b5   : > { %v2837_v63 = vadd.f32 %v2833_v62, %v2598_v43  ;;  %v3166_v43 = vld [vmem:[%s12244_s8 + $0x190] sm:$0xff]  ;;  %v10752_v62 = vld [vmem:[%s14084_s3] ss:$0 sm:$0xff]  ;;  %s14099_s3 = sld [smem:[#allocation11_spill]] }
0x11b6   : > { %v11678_v0 = vpop.f32.mrf.mxu0 }
0x121f   : > { %v2924_v1 = vpop.xlane.xlu1 %2923 }
0x1220   : > { %12061 = vrcp.f32 %v2924_v1  ;;  %v3232_v1 = vld [vmem:[%s12244_s8 + $0x3a0] sm:$0xff] }
0x122d   : > { %v12062_v2 = vpop.eup %12061 }
0x122e   : > { %v2926_v30 = vmul.f32 %v12062_v2, %v12060_v59  ;;  %v3234_v2 = vld [vmem:[%s12244_s8 + $0x3b0] sm:$0xff] }
0x1230   : > { %11687 = vmatmul.mubr.msk.f32.vlgmr.msra.gmra.mxu0 %vm1171_vm2, %v2926_v30  ;;  %v3217_v30 = vld [vmem:[%s12244_s8 + $0x328] sm:$0xff] }
0x1231   : > { %3395 = vmatprep.mubr.f32.mxu0 %v12179_v4  ;;  %3348 = vmatpush1.msra.mxu0 %v3228_v22  ;;  %v3155_v22 = vld [vmem:[%s12244_s8 + $0x138] sm:$0xff] }
0x1232   : > { %3349 = vmatprep.subr.mxu0 %v3213_v26  ;;  %v3154_v26 = vld [vmem:[%s12244_s8 + $0x130] sm:$0xff] }
0x1233   : > { %3350 = vmatpush1.msra.mxu0 %v3212_v28  ;;  %v3139_v28 = vld [vmem:[%s12244_s8 + $0xb8] sm:$0xff] }
0x1234   : > { %3351 = vmatprep.subr.mxu0 %v3197_v32  ;;  %v3138_v32 = vld [vmem:[%s12244_s8 + $0xb0] sm:$0xff] }
0x1235   : > { %3352 = vmatpush1.msra.mxu0 %v3196_v34  ;;  %v3123_v34 = vld [vmem:[%s12244_s8 + $0x38] sm:$0xff] }
0x1236   : > { %3353 = vmatprep.subr.mxu0 %v3181_v36  ;;  %v3122_v36 = vld [vmem:[%s12244_s8 + $0x30] sm:$0xff] }
0x1237   : > { %3354 = vmatpush1.msra.mxu0 %v3180_v38  ;;  %v3239_v38 = vld [vmem:[%s12244_s8 + $0x3d8] sm:$0xff] }
0x1238   : > { %3355 = vmatprep.subr.mxu0 %v3165_v40  ;;  %v3238_v40 = vld [vmem:[%s12244_s8 + $0x3d0] sm:$0xff] }
0x1239   : > { %3356 = vmatpush1.msra.mxu0 %v3164_v42  ;;  %v3223_v42 = vld [vmem:[%s12244_s8 + $0x358] sm:$0xff] }
0x123a   : > { %3357 = vmatprep.subr.mxu0 %v3149_v44  ;;  %v3222_v44 = vld [vmem:[%s12244_s8 + $0x350] sm:$0xff] }
0x123b   : > { %3358 = vmatpush1.msra.mxu0 %v3148_v45  ;;  %v3207_v45 = vld [vmem:[%s12244_s8 + $0x2d8] sm:$0xff] }
0x123c   : > { %3359 = vmatprep.subr.mxu0 %v3133_v46  ;;  %v3206_v46 = vld [vmem:[%s12244_s8 + $0x2d0] sm:$0xff] }
0x123d   : > { %3360 = vmatpush1.msra.mxu0 %v3132_v48  ;;  %v3191_v48 = vld [vmem:[%s12244_s8 + $0x258] sm:$0xff] }
0x123e   : > { %3361 = vmatprep.subr.mxu0 %v3117_v50  ;;  %v3190_v50 = vld [vmem:[%s12244_s8 + $0x250] sm:$0xff] }
0x123f   : > { %3362 = vmatpush1.msra.mxu0 %v3116_v52  ;;  %v3175_v52 = vld [vmem:[%s12244_s8 + $0x1d8] sm:$0xff] }
0x1240   : > { %3489 = vmatprep.subr.mxu0 %v3233_v54  ;;  %v3174_v54 = vld [vmem:[%s12244_s8 + $0x1d0] sm:$0xff] }
0x12f0   : > { %v2999_v3 = vpop.f32.mrf.mxu0 }
0x12f1   : > { %11692 = vmatmul.mubr.msk.f32.vlgmr.msra.gmra.mxu1 %vm1171_vm2, %v2999_v3  ;;  %v3219_v3 = vld [vmem:[%s12244_s8 + $0x338] sm:$0xff] }
0x12f2   : > { %v11688_v5 = vpop.f32.mrf.mxu0  ;;  %3466 = vmatprep.mubr.f32.mxu1 %v12179_v4 }
0x12f3   : > { %v3216_v5 = vld [vmem:[%s12244_s8 + $0x320] sm:$0xff] }
0x13b1   : > { %v3072_v6 = vpop.f32.mrf.mxu1 }
0x13b2   : > { %v3076_v8 = vadd.f32 %v3072_v6, %v2837_v63  ;;  %v3218_v6 = vld [vmem:[%s12244_s8 + $0x330] sm:$0xff] }
0x13b3   : > { %v11693_v9 = vpop.f32.mrf.mxu1 }
0x13b4   : > { %v3084_v10 = vadd.f32 %v10750_v7, %v3076_v8  ;;  %v3201_v7 = vld [vmem:[%s12244_s8 + $0x2a8] sm:$0xff]  ;;  %v3203_v8 = vld [vmem:[%s12244_s8 + $0x2b8] sm:$0xff]  ;;  %v3200_v9 = vld [vmem:[%s12244_s8 + $0x2a0] sm:$0xff] }
0x13b6   : > { %v3085_v11 = vadd.f32 %v3084_v10, %v12406_v17  ;;  %v3231_v17 = vld [vmem:[%s12244_s8 + $0x398] sm:$0xff]  ;;  %v3202_v10 = vld [vmem:[%s12244_s8 + $0x2b0] sm:$0xff] }
0x13b7   : > { %3418 = vmatprep.subr.mxu1 %v3231_v17  ;;  %v3153_v17 = vld [vmem:[%s12244_s8 + $0x128] sm:$0xff] }
0x13b8   : > { %v3088_v12 = vsel %vm1084_vm0, %v3085_v11, 0.0  ;;  %3419 = vmatpush1.msra.mxu1 %v3230_v23  ;;  %v3152_v23 = vld [vmem:[%s12244_s8 + $0x120] sm:$0xff] }
0x13b9   : > { %3089 = vadd.xlane.f32.xlu1 %v3088_v12  ;;  %3420 = vmatprep.subr.mxu1 %v3215_v27  ;;  %v3187_v12 = vld [vmem:[%s12244_s8 + $0x238] sm:$0xff]  ;;  %v3137_v27 = vld [vmem:[%s12244_s8 + $0xa8] sm:$0xff] }
0x13ba   : > { %3421 = vmatpush1.msra.mxu1 %v3214_v31  ;;  %v3136_v31 = vld [vmem:[%s12244_s8 + $0xa0] sm:$0xff] }
0x13bb   : > { %3422 = vmatprep.subr.mxu1 %v3199_v33  ;;  %v3121_v33 = vld [vmem:[%s12244_s8 + $0x28] sm:$0xff] }
0x13bc   : > { %3423 = vmatpush1.msra.mxu1 %v3198_v35  ;;  %v3120_v35 = vld [vmem:[%s12244_s8 + $0x20] sm:$0xff] }
0x13bd   : > { %3424 = vmatprep.subr.mxu1 %v3183_v37  ;;  %v3237_v37 = vld [vmem:[%s12244_s8 + $0x3c8] sm:$0xff] }
0x13be   : > { %3425 = vmatpush1.msra.mxu1 %v3182_v39  ;;  %v3236_v39 = vld [vmem:[%s12244_s8 + $0x3c0] sm:$0xff] }
0x13bf   : > { %3426 = vmatprep.subr.mxu1 %v3167_v41  ;;  %v3221_v41 = vld [vmem:[%s12244_s8 + $0x348] sm:$0xff] }
0x13c0   : > { %3427 = vmatpush1.msra.mxu1 %v3166_v43  ;;  %v3220_v43 = vld [vmem:[%s12244_s8 + $0x340] sm:$0xff] }
0x13c1   : > { %3428 = vmatprep.subr.mxu1 %v3151_v24  ;;  %v3205_v24 = vld [vmem:[%s12244_s8 + $0x2c8] sm:$0xff] }
0x13c2   : > { %3429 = vmatpush1.msra.mxu1 %v3150_v29  ;;  %v3204_v29 = vld [vmem:[%s12244_s8 + $0x2c0] sm:$0xff] }
0x13c3   : > { %3430 = vmatprep.subr.mxu1 %v3135_v47  ;;  %v3189_v47 = vld [vmem:[%s12244_s8 + $0x248] sm:$0xff] }
0x13c4   : > { %3431 = vmatpush1.msra.mxu1 %v3134_v49  ;;  %v3188_v49 = vld [vmem:[%s12244_s8 + $0x240] sm:$0xff] }
0x13c5   : > { %3432 = vmatprep.subr.mxu1 %v3119_v51  ;;  %v3173_v51 = vld [vmem:[%s12244_s8 + $0x1c8] sm:$0xff] }
0x13c6   : > { %3433 = vmatpush1.msra.mxu1 %v3118_v53  ;;  %v3172_v53 = vld [vmem:[%s12244_s8 + $0x1c0] sm:$0xff] }
0x13c7   : > { %3560 = vmatprep.subr.mxu1 %v3235_v55  ;;  %v3157_v55 = vld [vmem:[%s12244_s8 + $0x148] sm:$0xff] }
0x1442   : > { %v3090_v13 = vpop.xlane.xlu1 %3089 }
0x1443   : > { %v3092_v14 = vmul.f32 0.015625, %v3090_v13  ;;  %v3184_v13 = vld [vmem:[%s12244_s8 + $0x220] sm:$0xff] }
0x1445   : > { %v12609_v15 = vsub.f32 %v3085_v11, %v3092_v14  ;;  %v3185_v11 = vld [vmem:[%s12244_s8 + $0x228] sm:$0xff]  ;;  %v3186_v14 = vld [vmem:[%s12244_s8 + $0x230] sm:$0xff] }
0x1447   : > { %v3094_v16 = vmul.f32 %v12609_v15, %v12609_v15 }
0x1449   : > { %v3095_v18 = vsel %vm1084_vm0, %v3094_v16, 0.0  ;;  %v3171_v16 = vld [vmem:[%s12244_s8 + $0x1b8] sm:$0xff] }
0x144a   : > { %3096 = vadd.xlane.f32.xlu1 %v3095_v18  ;;  %v3168_v18 = vld [vmem:[%s12244_s8 + $0x1a0] sm:$0xff] }
0x14d3   : > { %v3097_v56 = vpop.xlane.xlu1 %3096 }
0x14d4   : > { %v3098_v57 = vmul.f32 0.015625, %v3097_v56  ;;  %v3159_v56 = vld [vmem:[%s12244_s8 + $0x158] sm:$0xff] }
0x14d6   : > { %v3099_v58 = vadd.f32 1e-05, %v3098_v57  ;;  %v3156_v57 = vld [vmem:[%s12244_s8 + $0x140] sm:$0xff] }
0x14d8   : > { %12063 = vrsqrt.f32 %v3099_v58  ;;  %v3158_v58 = vld [vmem:[%s12244_s8 + $0x150] sm:$0xff] }
0x14e5   : > { %v12064_v59 = vpop.eup %12063 }
0x14e6   : > { %v3101_v61 = vmul.f32 %v12064_v59, %v12609_v15  ;;  %v3169_v15 = vld [vmem:[%s12244_s8 + $0x1a8] sm:$0xff] }
0x14e7   : > { %v3141_v59 = vld [vmem:[%s12244_s8 + $0xc8] sm:$0xff] }
0x14e8   : > { %v3108_v63 = vmul.f32 %v10751_v60, %v3101_v61  ;;  %v3143_v60 = vld [vmem:[%s12244_s8 + $0xd8] sm:$0xff]  ;;  %v3140_v61 = vld [vmem:[%s12244_s8 + $0xc0] sm:$0xff] }
0x14ea   : > { %v12651_v0 = vadd.f32 %v10752_v62, %v3108_v63  ;;  %v3142_v62 = vld [vmem:[%s12244_s8 + $0xd0] sm:$0xff]  ;;  %v3125_v63 = vld [vmem:[%s12244_s8 + $0x48] sm:$0xff] }
0x14ec   : > { %10753 = vmatmul.mubr.msk.f32.vlgmr.msra.gmra.mxu0 %vm1084_vm0, %v12651_v0  ;;  %10754 = vmatmul.mubr.msk.f32.vlgmr.msra.gmra.mxu1 %vm1084_vm0, %v12651_v0 }
0x14ed   : > { %3490 = vmatpush1.msra.mxu0 %v3232_v1  ;;  %3561 = vmatpush1.msra.mxu1 %v3234_v2  ;;  %v3127_v1 = vld [vmem:[%s12244_s8 + $0x58] sm:$0xff]  ;;  %v3124_v2 = vld [vmem:[%s12244_s8 + $0x40] sm:$0xff] }
0x14ee   : > { %3491 = vmatprep.subr.mxu0 %v3217_v30  ;;  %3562 = vmatprep.subr.mxu1 %v3219_v3  ;;  %v3126_v30 = vld [vmem:[%s12244_s8 + $0x50] sm:$0xff]  ;;  %v3241_v3 = vld [vmem:[%s12244_s8 + $0x3e8] sm:$0xff] }
0x14ef   : > { %3492 = vmatpush1.msra.mxu0 %v3216_v5  ;;  %3563 = vmatpush1.msra.mxu1 %v3218_v6  ;;  %v3243_v5 = vld [vmem:[%s12244_s8 + $0x3f8] sm:$0xff]  ;;  %v3240_v6 = vld [vmem:[%s12244_s8 + $0x3e0] sm:$0xff] }
0x14f0   : > { %3493 = vmatprep.subr.mxu0 %v3201_v7  ;;  %3564 = vmatprep.subr.mxu1 %v3203_v8  ;;  %v3242_v7 = vld [vmem:[%s12244_s8 + $0x3f0] sm:$0xff]  ;;  %v3225_v8 = vld [vmem:[%s12244_s8 + $0x368] sm:$0xff] }
0x14f1   : > { %3494 = vmatpush1.msra.mxu0 %v3200_v9  ;;  %3565 = vmatpush1.msra.mxu1 %v3202_v10  ;;  %v3227_v9 = vld [vmem:[%s12244_s8 + $0x378] sm:$0xff]  ;;  %v3224_v10 = vld [vmem:[%s12244_s8 + $0x360] sm:$0xff] }
0x14f2   : > { %3495 = vmatprep.subr.mxu0 %v3185_v11  ;;  %3566 = vmatprep.subr.mxu1 %v3187_v12  ;;  %v3226_v11 = vld [vmem:[%s12244_s8 + $0x370] sm:$0xff]  ;;  %v3209_v12 = vld [vmem:[%s12244_s8 + $0x2e8] sm:$0xff] }
0x14f3   : > { %3496 = vmatpush1.msra.mxu0 %v3184_v13  ;;  %3567 = vmatpush1.msra.mxu1 %v3186_v14  ;;  %v3211_v13 = vld [vmem:[%s12244_s8 + $0x2f8] sm:$0xff]  ;;  %v3208_v14 = vld [vmem:[%s12244_s8 + $0x2e0] sm:$0xff] }
0x14f4   : > { %3497 = vmatprep.subr.mxu0 %v3169_v15  ;;  %3568 = vmatprep.subr.mxu1 %v3171_v16  ;;  %v3210_v15 = vld [vmem:[%s12244_s8 + $0x2f0] sm:$0xff]  ;;  %v3193_v16 = vld [vmem:[%s12244_s8 + $0x268] sm:$0xff] }
0x14f5   : > { %3498 = vmatpush1.msra.mxu0 %v3168_v18  ;;  %3569 = vmatpush1.msra.mxu1 %v3170_v21  ;;  %v3195_v18 = vld [vmem:[%s12244_s8 + $0x278] sm:$0xff]  ;;  %v3192_v21 = vld [vmem:[%s12244_s8 + $0x260] sm:$0xff] }
0x14f6   : > { %3499 = vmatprep.subr.mxu0 %v3153_v17  ;;  %3570 = vmatprep.subr.mxu1 %v3155_v22  ;;  %v3194_v17 = vld [vmem:[%s12244_s8 + $0x270] sm:$0xff]  ;;  %v3177_v22 = vld [vmem:[%s12244_s8 + $0x1e8] sm:$0xff] }
0x14f7   : > { %3500 = vmatpush1.msra.mxu0 %v3152_v23  ;;  %3571 = vmatpush1.msra.mxu1 %v3154_v26  ;;  %v3179_v23 = vld [vmem:[%s12244_s8 + $0x1f8] sm:$0xff]  ;;  %v3176_v26 = vld [vmem:[%s12244_s8 + $0x1e0] sm:$0xff] }
0x14f8   : > { %3501 = vmatprep.subr.mxu0 %v3137_v27  ;;  %3572 = vmatprep.subr.mxu1 %v3139_v28  ;;  %v3178_v27 = vld [vmem:[%s12244_s8 + $0x1f0] sm:$0xff]  ;;  %v3161_v28 = vld [vmem:[%s12244_s8 + $0x168] sm:$0xff] }
0x14f9   : > { %3502 = vmatpush1.msra.mxu0 %v3136_v31  ;;  %3573 = vmatpush1.msra.mxu1 %v3138_v32  ;;  %v3163_v31 = vld [vmem:[%s12244_s8 + $0x178] sm:$0xff]  ;;  %v3160_v32 = vld [vmem:[%s12244_s8 + $0x160] sm:$0xff] }
0x14fa   : > { %3503 = vmatprep.subr.mxu0 %v3121_v33  ;;  %3574 = vmatprep.subr.mxu1 %v3123_v34  ;;  %v3162_v33 = vld [vmem:[%s12244_s8 + $0x170] sm:$0xff]  ;;  %v3145_v34 = vld [vmem:[%s12244_s8 + $0xe8] sm:$0xff] }
0x14fb   : > { %3504 = vmatpush1.msra.mxu0 %v3120_v35  ;;  %3537 = vmatprep.mubr.f32.mxu0 %v12179_v4  ;;  %v3147_v35 = vld [vmem:[%s12244_s8 + $0xf8] sm:$0xff] }
0x14fc   : > { %3575 = vmatpush1.msra.mxu1 %v3122_v36  ;;  %3608 = vmatprep.mubr.f32.mxu1 %v12179_v4  ;;  %v3144_v36 = vld [vmem:[%s12244_s8 + $0xe0] sm:$0xff] }
0x14fd   : > { %10755 = vmatmul.mubr.msk.f32.vlgmr.msra.gmra.mxu0 %vm1084_vm0, %v12651_v0  ;;  %10756 = vmatmul.mubr.msk.f32.vlgmr.msra.gmra.mxu1 %vm1084_vm0, %v12651_v0 }
0x14fe   : > { %3631 = vmatprep.subr.mxu0 %v3237_v37  ;;  %3702 = vmatprep.subr.mxu1 %v3239_v38  ;;  %v3146_v37 = vld [vmem:[%s12244_s8 + $0xf0] sm:$0xff]  ;;  %v3129_v38 = vld [vmem:[%s12244_s8 + $0x68] sm:$0xff] }
0x14ff   : > { %3632 = vmatpush1.msra.mxu0 %v3236_v39  ;;  %3703 = vmatpush1.msra.mxu1 %v3238_v40  ;;  %v3131_v39 = vld [vmem:[%s12244_s8 + $0x78] sm:$0xff]  ;;  %v3128_v40 = vld [vmem:[%s12244_s8 + $0x60] sm:$0xff] }
0x1500   : > { %3633 = vmatprep.subr.mxu0 %v3221_v41  ;;  %3704 = vmatprep.subr.mxu1 %v3223_v42  ;;  %v3130_v41 = vld [vmem:[%s12244_s8 + $0x70] sm:$0xff]  ;;  %v3946_v42 = vld [vmem:[%s12254_s19 + $0xf8] sm:$0xff] }
0x1501   : > { %3634 = vmatpush1.msra.mxu0 %v3220_v43  ;;  %3705 = vmatpush1.msra.mxu1 %v3222_v44  ;;  %v3978_v43 = vld [vmem:[%s12254_s19 + $0x1f8] sm:$0xff] }
0x1502   : > { %3635 = vmatprep.subr.mxu0 %v3205_v24  ;;  %3706 = vmatprep.subr.mxu1 %v3207_v45  ;;  %v3930_v44 = vld [vmem:[%s12254_s19 + $0x78] sm:$0xff]  ;;  %v3945_v45 = vld [vmem:[%s12254_s19 + $0xf0] sm:$0xff] }
0x1503   : > { %3636 = vmatpush1.msra.mxu0 %v3204_v29  ;;  %3707 = vmatpush1.msra.mxu1 %v3206_v46  ;;  %v3962_v24 = vld [vmem:[%s12254_s19 + $0x178] sm:$0xff]  ;;  %v3977_v29 = vld [vmem:[%s12254_s19 + $0x1f0] sm:$0xff] }
0x1504   : > { %3637 = vmatprep.subr.mxu0 %v3189_v47  ;;  %3708 = vmatprep.subr.mxu1 %v3191_v48  ;;  %v3929_v46 = vld [vmem:[%s12254_s19 + $0x70] sm:$0xff]  ;;  %v3944_v48 = vld [vmem:[%s12254_s19 + $0xe8] sm:$0xff] }
0x1505   : > { %3638 = vmatpush1.msra.mxu0 %v3188_v49  ;;  %3709 = vmatpush1.msra.mxu1 %v3190_v50  ;;  %v3961_v47 = vld [vmem:[%s12254_s19 + $0x170] sm:$0xff]  ;;  %v3976_v49 = vld [vmem:[%s12254_s19 + $0x1e8] sm:$0xff] }
0x1506   : > { %3639 = vmatprep.subr.mxu0 %v3173_v51  ;;  %3710 = vmatprep.subr.mxu1 %v3175_v52  ;;  %v3928_v50 = vld [vmem:[%s12254_s19 + $0x68] sm:$0xff]  ;;  %v3943_v52 = vld [vmem:[%s12254_s19 + $0xe0] sm:$0xff] }
0x1507   : > { %3640 = vmatpush1.msra.mxu0 %v3172_v53  ;;  %3711 = vmatpush1.msra.mxu1 %v3174_v54  ;;  %v3960_v51 = vld [vmem:[%s12254_s19 + $0x168] sm:$0xff]  ;;  %v3975_v53 = vld [vmem:[%s12254_s19 + $0x1e0] sm:$0xff] }
0x1508   : > { %3641 = vmatprep.subr.mxu0 %v3157_v55  ;;  %3712 = vmatprep.subr.mxu1 %v3159_v56  ;;  %v3927_v54 = vld [vmem:[%s12254_s19 + $0x60] sm:$0xff]  ;;  %v3942_v56 = vld [vmem:[%s12254_s19 + $0xd8] sm:$0xff] }
0x1509   : > { %3642 = vmatpush1.msra.mxu0 %v3156_v57  ;;  %3713 = vmatpush1.msra.mxu1 %v3158_v58  ;;  %v3959_v55 = vld [vmem:[%s12254_s19 + $0x160] sm:$0xff]  ;;  %v3974_v57 = vld [vmem:[%s12254_s19 + $0x1d8] sm:$0xff] }
0x150a   : > { %3643 = vmatprep.subr.mxu0 %v3141_v59  ;;  %3714 = vmatprep.subr.mxu1 %v3143_v60  ;;  %v3926_v58 = vld [vmem:[%s12254_s19 + $0x58] sm:$0xff]  ;;  %v3941_v60 = vld [vmem:[%s12254_s19 + $0xd0] sm:$0xff] }
0x150b   : > { %3644 = vmatpush1.msra.mxu0 %v3140_v61  ;;  %3715 = vmatpush1.msra.mxu1 %v3142_v62  ;;  %v3958_v59 = vld [vmem:[%s12254_s19 + $0x158] sm:$0xff]  ;;  %v3973_v61 = vld [vmem:[%s12254_s19 + $0x1d0] sm:$0xff] }
0x150c   : > { %3645 = vmatprep.subr.mxu0 %v3125_v63  ;;  %3716 = vmatprep.subr.mxu1 %v3127_v1  ;;  %v3925_v62 = vld [vmem:[%s12254_s19 + $0x50] sm:$0xff]  ;;  %v3940_v1 = vld [vmem:[%s12254_s19 + $0xc8] sm:$0xff] }
0x150d   : > { %3646 = vmatpush1.msra.mxu0 %v3124_v2  ;;  %3679 = vmatprep.mubr.f32.mxu0 %v12179_v4  ;;  %v3957_v63 = vld [vmem:[%s12254_s19 + $0x150] sm:$0xff]  ;;  %v3972_v2 = vld [vmem:[%s12254_s19 + $0x1c8] sm:$0xff] }
0x150e   : > { %3717 = vmatpush1.msra.mxu1 %v3126_v30  ;;  %3750 = vmatprep.mubr.f32.mxu1 %v12179_v4  ;;  %v3924_v30 = vld [vmem:[%s12254_s19 + $0x48] sm:$0xff] }
0x150f   : > { %10757 = vmatmul.mubr.msk.f32.vlgmr.msra.gmra.mxu0 %vm1084_vm0, %v12651_v0  ;;  %10758 = vmatmul.mubr.msk.f32.vlgmr.msra.gmra.mxu1 %vm1084_vm0, %v12651_v0 }
0x1510   : > { %3773 = vmatprep.subr.mxu0 %v3241_v3  ;;  %3844 = vmatprep.subr.mxu1 %v3243_v5  ;;  %v3956_v3 = vld [vmem:[%s12254_s19 + $0x148] sm:$0xff]  ;;  %v3939_v5 = vld [vmem:[%s12254_s19 + $0xc0] sm:$0xff] }
0x1511   : > { %3774 = vmatpush1.msra.mxu0 %v3240_v6  ;;  %3845 = vmatpush1.msra.mxu1 %v3242_v7  ;;  %v3971_v6 = vld [vmem:[%s12254_s19 + $0x1c0] sm:$0xff] }
0x1512   : > { %3775 = vmatprep.subr.mxu0 %v3225_v8  ;;  %3846 = vmatprep.subr.mxu1 %v3227_v9  ;;  %v3923_v7 = vld [vmem:[%s12254_s19 + $0x40] sm:$0xff]  ;;  %v3938_v9 = vld [vmem:[%s12254_s19 + $0xb8] sm:$0xff] }
0x1513   : > { %3776 = vmatpush1.msra.mxu0 %v3224_v10  ;;  %3847 = vmatpush1.msra.mxu1 %v3226_v11  ;;  %v3955_v8 = vld [vmem:[%s12254_s19 + $0x140] sm:$0xff]  ;;  %v3970_v10 = vld [vmem:[%s12254_s19 + $0x1b8] sm:$0xff] }
0x1514   : > { %3777 = vmatprep.subr.mxu0 %v3209_v12  ;;  %3848 = vmatprep.subr.mxu1 %v3211_v13  ;;  %v3922_v11 = vld [vmem:[%s12254_s19 + $0x38] sm:$0xff]  ;;  %v3937_v13 = vld [vmem:[%s12254_s19 + $0xb0] sm:$0xff] }
0x1515   : > { %3778 = vmatpush1.msra.mxu0 %v3208_v14  ;;  %3849 = vmatpush1.msra.mxu1 %v3210_v15  ;;  %v3954_v12 = vld [vmem:[%s12254_s19 + $0x138] sm:$0xff]  ;;  %v3969_v14 = vld [vmem:[%s12254_s19 + $0x1b0] sm:$0xff] }
0x1516   : > { %3779 = vmatprep.subr.mxu0 %v3193_v16  ;;  %3850 = vmatprep.subr.mxu1 %v3195_v18  ;;  %v3921_v15 = vld [vmem:[%s12254_s19 + $0x30] sm:$0xff]  ;;  %v3936_v18 = vld [vmem:[%s12254_s19 + $0xa8] sm:$0xff] }
0x1517   : > { %3780 = vmatpush1.msra.mxu0 %v3192_v21  ;;  %3851 = vmatpush1.msra.mxu1 %v3194_v17  ;;  %v3953_v16 = vld [vmem:[%s12254_s19 + $0x130] sm:$0xff]  ;;  %v3968_v21 = vld [vmem:[%s12254_s19 + $0x1a8] sm:$0xff] }
0x1518   : > { %3781 = vmatprep.subr.mxu0 %v3177_v22  ;;  %3852 = vmatprep.subr.mxu1 %v3179_v23  ;;  %v3920_v17 = vld [vmem:[%s12254_s19 + $0x28] sm:$0xff]  ;;  %v3935_v23 = vld [vmem:[%s12254_s19 + $0xa0] sm:$0xff] }
0x1519   : > { %3782 = vmatpush1.msra.mxu0 %v3176_v26  ;;  %3853 = vmatpush1.msra.mxu1 %v3178_v27  ;;  %v3952_v22 = vld [vmem:[%s12254_s19 + $0x128] sm:$0xff]  ;;  %v3967_v26 = vld [vmem:[%s12254_s19 + $0x1a0] sm:$0xff] }
0x151a   : > { %3783 = vmatprep.subr.mxu0 %v3161_v28  ;;  %3854 = vmatprep.subr.mxu1 %v3163_v31  ;;  %v3919_v27 = vld [vmem:[%s12254_s19 + $0x20] sm:$0xff]  ;;  %v3934_v31 = vld [vmem:[%s12254_s19 + $0x98] sm:$0xff] }
0x151b   : > { %3784 = vmatpush1.msra.mxu0 %v3160_v32  ;;  %3855 = vmatpush1.msra.mxu1 %v3162_v33  ;;  %v3951_v28 = vld [vmem:[%s12254_s19 + $0x120] sm:$0xff]  ;;  %v3966_v32 = vld [vmem:[%s12254_s19 + $0x198] sm:$0xff] }
0x151c   : > { %3785 = vmatprep.subr.mxu0 %v3145_v34  ;;  %3856 = vmatprep.subr.mxu1 %v3147_v35  ;;  %v3918_v33 = vld [vmem:[%s12254_s19 + $0x18] sm:$0xff]  ;;  %v3933_v35 = vld [vmem:[%s12254_s19 + $0x90] sm:$0xff] }
0x151d   : > { %3786 = vmatpush1.msra.mxu0 %v3144_v36  ;;  %3857 = vmatpush1.msra.mxu1 %v3146_v37  ;;  %v3950_v34 = vld [vmem:[%s12254_s19 + $0x118] sm:$0xff]  ;;  %v3965_v36 = vld [vmem:[%s12254_s19 + $0x190] sm:$0xff] }
0x151e   : > { %3787 = vmatprep.subr.mxu0 %v3129_v38  ;;  %3858 = vmatprep.subr.mxu1 %v3131_v39  ;;  %v3917_v37 = vld [vmem:[%s12254_s19 + $0x10] sm:$0xff]  ;;  %v3932_v39 = vld [vmem:[%s12254_s19 + $0x88] sm:$0xff] }
0x151f   : > { %3788 = vmatpush1.msra.mxu0 %v3128_v40  ;;  %3821 = vmatprep.mubr.f32.mxu0 %v12179_v4  ;;  %v3949_v38 = vld [vmem:[%s12254_s19 + $0x110] sm:$0xff]  ;;  %v3964_v40 = vld [vmem:[%s12254_s19 + $0x188] sm:$0xff] }
0x1520   : > { %3859 = vmatpush1.msra.mxu1 %v3130_v41  ;;  %3892 = vmatprep.mubr.f32.mxu1 %v12179_v4  ;;  %v3916_v41 = vld [vmem:[%s12254_s19 + $0x8] sm:$0xff] }
0x1521   : > { %10759 = vmatmul.mubr.msk.f32.vlgmr.msra.gmra.mxu0 %vm1084_vm0, %v12651_v0  ;;  %10760 = vmatmul.mubr.msk.f32.vlgmr.msra.gmra.mxu1 %vm1084_vm0, %v12651_v0 }
0x1522   : > { %10900 = vmatprep.subr.mxu0 %v3946_v42  ;;  %10935 = vmatprep.subr.mxu1 %v3978_v43  ;;  %v3948_v42 = vld [vmem:[%s12254_s19 + $0x108] sm:$0xff]  ;;  %v3931_v43 = vld [vmem:[%s12254_s19 + $0x80] sm:$0xff] }
0x1523   : > { %10901 = vmatpush3.msra.mxu0 %v3930_v44  ;;  %10936 = vmatpush3.msra.mxu1 %v3962_v24  ;;  %v3963_v44 = vld [vmem:[%s12254_s19 + $0x180] sm:$0xff] }
0x1524   : > { %10902 = vmatprep.subr.mxu0 %v3945_v45  ;;  %10937 = vmatprep.subr.mxu1 %v3977_v29  ;;  %v3915_v24 = vld [vmem:[%s12254_s19] sm:$0xff]  ;;  %v4010_v29 = vld [vmem:[%s12254_s19 + $0x2f8] sm:$0xff] }
0x1525   : > { %10903 = vmatpush3.msra.mxu0 %v3929_v46  ;;  %10938 = vmatpush3.msra.mxu1 %v3961_v47  ;;  %v3947_v45 = vld [vmem:[%s12254_s19 + $0x100] sm:$0xff]  ;;  %v4042_v46 = vld [vmem:[%s12254_s19 + $0x3f8] sm:$0xff]  ;;  %v12836_v47 = vsub.s32 2, %v12411_v19 }
0x1526   : > { %10904 = vmatprep.subr.mxu0 %v3944_v48  ;;  %10939 = vmatprep.subr.mxu1 %v3976_v49  ;;  %v12839_v48 = vld [vmem:[%s12249_s14] sm:$0xff]  ;;  %v12842_v49 = vsub.s32 3, %v12411_v19 }
0x1527   : > { %10905 = vmatpush3.msra.mxu0 %v3928_v50  ;;  %10940 = vmatpush3.msra.mxu1 %v3960_v51  ;;  %v3251_v50 = vrot.slane %v12839_v48, %v12418_v20  ;;  %v3259_v51 = vrot.slane %v12839_v48, %v12836_v47 }
0x1528   : > { %10906 = vmatprep.subr.mxu0 %v3943_v52  ;;  %10941 = vmatprep.subr.mxu1 %v3975_v53  ;;  %v3255_v52 = vrot.slane %v12839_v48, %v12429_v25  ;;  %v3263_v53 = vrot.slane %v12839_v48, %v12842_v49 }
0x1529   : > { %10907 = vmatpush3.msra.mxu0 %v3927_v54  ;;  %10942 = vmatpush3.msra.mxu1 %v3959_v55 }
0x152a   : > { %10908 = vmatprep.subr.mxu0 %v3942_v56  ;;  %10943 = vmatprep.subr.mxu1 %v3974_v57 }
0x152b   : > { %10909 = vmatpush3.msra.mxu0 %v3926_v58  ;;  %10944 = vmatpush3.msra.mxu1 %v3958_v59 }
0x152c   : > { %10910 = vmatprep.subr.mxu0 %v3941_v60  ;;  %10945 = vmatprep.subr.mxu1 %v3973_v61 }
0x152d   : > { %10911 = vmatpush3.msra.mxu0 %v3925_v62  ;;  %10946 = vmatpush3.msra.mxu1 %v3957_v63 }
0x152e   : > { %10912 = vmatprep.subr.mxu0 %v3940_v1  ;;  %10947 = vmatprep.subr.mxu1 %v3972_v2 }
0x152f   : > { %10913 = vmatpush3.msra.mxu0 %v3924_v30  ;;  %10948 = vmatpush3.msra.mxu1 %v3956_v3  ;;  %v3994_v30 = vld [vmem:[%s12254_s19 + $0x278] sm:$0xff] }
0x1530   : > { %10914 = vmatprep.subr.mxu0 %v3939_v5  ;;  %10949 = vmatprep.subr.mxu1 %v3971_v6  ;;  %v4026_v3 = vld [vmem:[%s12254_s19 + $0x378] sm:$0xff]  ;;  %v4009_v5 = vld [vmem:[%s12254_s19 + $0x2f0] sm:$0xff] }
0x1531   : > { %10915 = vmatpush3.msra.mxu0 %v3923_v7  ;;  %10950 = vmatpush3.msra.mxu1 %v3955_v8  ;;  %v4041_v6 = vld [vmem:[%s12254_s19 + $0x3f0] sm:$0xff] }
0x1532   : > { %10916 = vmatprep.subr.mxu0 %v3938_v9  ;;  %10951 = vmatprep.subr.mxu1 %v3970_v10  ;;  %v3993_v7 = vld [vmem:[%s12254_s19 + $0x270] sm:$0xff]  ;;  %v4008_v9 = vld [vmem:[%s12254_s19 + $0x2e8] sm:$0xff] }
0x1533   : > { %10917 = vmatpush3.msra.mxu0 %v3922_v11  ;;  %10952 = vmatpush3.msra.mxu1 %v3954_v12  ;;  %v4025_v8 = vld [vmem:[%s12254_s19 + $0x370] sm:$0xff]  ;;  %v4040_v10 = vld [vmem:[%s12254_s19 + $0x3e8] sm:$0xff] }
0x1534   : > { %10918 = vmatprep.subr.mxu0 %v3937_v13  ;;  %10953 = vmatprep.subr.mxu1 %v3969_v14  ;;  %v3992_v11 = vld [vmem:[%s12254_s19 + $0x268] sm:$0xff]  ;;  %v4007_v13 = vld [vmem:[%s12254_s19 + $0x2e0] sm:$0xff] }
0x1535   : > { %10919 = vmatpush3.msra.mxu0 %v3921_v15  ;;  %10954 = vmatpush3.msra.mxu1 %v3953_v16  ;;  %v4024_v12 = vld [vmem:[%s12254_s19 + $0x368] sm:$0xff]  ;;  %v4039_v14 = vld [vmem:[%s12254_s19 + $0x3e0] sm:$0xff] }
0x1536   : > { %10920 = vmatprep.subr.mxu0 %v3936_v18  ;;  %10955 = vmatprep.subr.mxu1 %v3968_v21  ;;  %v3991_v15 = vld [vmem:[%s12254_s19 + $0x260] sm:$0xff]  ;;  %v12867_v18 = vsub.s32 5, %v12411_v19  ;;  %v12870_v21 = vsub.s32 7, %v12411_v19 }
0x1537   : > { %10921 = vmatpush3.msra.mxu0 %v3920_v17  ;;  %10956 = vmatpush3.msra.mxu1 %v3952_v22  ;;  %v4023_v16 = vld [vmem:[%s12254_s19 + $0x360] sm:$0xff]  ;;  %v4006_v17 = vld [vmem:[%s12254_s19 + $0x2d8] sm:$0xff] }
0x1538   : > { %10922 = vmatprep.subr.mxu0 %v3935_v23  ;;  %10957 = vmatprep.subr.mxu1 %v3967_v26  ;;  %v4038_v22 = vld [vmem:[%s12254_s19 + $0x3d8] sm:$0xff] }
0x1539   : > { %10923 = vmatpush3.msra.mxu0 %v3919_v27  ;;  %10958 = vmatpush3.msra.mxu1 %v3951_v28  ;;  %v3990_v23 = vld [vmem:[%s12254_s19 + $0x258] sm:$0xff]  ;;  %v4005_v27 = vld [vmem:[%s12254_s19 + $0x2d0] sm:$0xff] }
0x153a   : > { %10924 = vmatprep.subr.mxu0 %v3934_v31  ;;  %10959 = vmatprep.subr.mxu1 %v3966_v32  ;;  %v4022_v26 = vld [vmem:[%s12254_s19 + $0x358] sm:$0xff]  ;;  %v4037_v28 = vld [vmem:[%s12254_s19 + $0x3d0] sm:$0xff]  ;;  %v3271_v31 = vrot.slane %v12839_v48, %v12867_v18  ;;  %v3279_v32 = vrot.slane %v12839_v48, %v12870_v21 }
0x153b   : > { %10925 = vmatpush3.msra.mxu0 %v3918_v33  ;;  %10960 = vmatpush3.msra.mxu1 %v3950_v34  ;;  %v3989_v33 = vld [vmem:[%s12254_s19 + $0x250] sm:$0xff] }
0x153c   : > { %10926 = vmatprep.subr.mxu0 %v3933_v35  ;;  %10961 = vmatprep.subr.mxu1 %v3965_v36  ;;  %v4021_v34 = vld [vmem:[%s12254_s19 + $0x350] sm:$0xff] }
0x153d   : > { %10927 = vmatpush3.msra.mxu0 %v3917_v37  ;;  %10962 = vmatpush3.msra.mxu1 %v3949_v38  ;;  %v4004_v37 = vld [vmem:[%s12254_s19 + $0x2c8] sm:$0xff] }
0x153e   : > { %10928 = vmatprep.subr.mxu0 %v3932_v39  ;;  %10963 = vmatprep.subr.mxu1 %v3964_v40  ;;  %v4036_v38 = vld [vmem:[%s12254_s19 + $0x3c8] sm:$0xff] }
0x153f   : > { %10929 = vmatpush3.msra.mxu0 %v3916_v41  ;;  %10964 = vmatpush3.msra.mxu1 %v3948_v42  ;;  %v3988_v39 = vld [vmem:[%s12254_s19 + $0x248] sm:$0xff] }
0x1540   : > { %10930 = vmatprep.subr.mxu0 %v3931_v43  ;;  %10965 = vmatprep.subr.mxu1 %v3963_v44  ;;  %v4020_v40 = vld [vmem:[%s12254_s19 + $0x348] sm:$0xff]  ;;  %v4003_v43 = vld [vmem:[%s12254_s19 + $0x2c0] sm:$0xff] }
0x1541   : > { %10931 = vmatpush3.msra.mxu0 %v3915_v24  ;;  %10966 = vmatpush3.msra.mxu1 %v3947_v45  ;;  %v4035_v44 = vld [vmem:[%s12254_s19 + $0x3c0] sm:$0xff] }
0x1542   : > { %10970 = vmatprep.subr.mxu0 %v4010_v29  ;;  %11005 = vmatprep.subr.mxu1 %v4042_v46  ;;  %v3987_v29 = vld [vmem:[%s12254_s19 + $0x240] sm:$0xff] }
0x1543   : > { %v4019_v46 = vld [vmem:[%s12254_s19 + $0x340] sm:$0xff] }
0x15ac   : > { %v3397_v54 = vpop.f32.mrf.mxu0  ;;  %v3468_v55 = vpop.f32.mrf.mxu1 }
0x15ad   : > { %v3398_v56 = vadd.f32 %v3397_v54, %v3251_v50  ;;  %v3469_v57 = vadd.f32 %v3468_v55, %v3259_v51  ;;  %v3986_v54 = vld [vmem:[%s12254_s19 + $0x238] sm:$0xff] }
0x15ae   : > { %v3399_v58 = vpop.f32.mrf.mxu0  ;;  %v3470_v59 = vpop.f32.mrf.mxu1  ;;  %v4018_v55 = vld [vmem:[%s12254_s19 + $0x338] sm:$0xff] }
0x15af   : > { %v3400_v60 = vadd.f32 %v3399_v58, %v3255_v52  ;;  %v3471_v61 = vadd.f32 %v3470_v59, %v3263_v53  ;;  %v3899_v1 = vmax.f32 %v3398_v56, 0.0  ;;  %v3901_v2 = vmax.f32 %v3469_v57, 0.0  ;;  %v4002_v52 = vld [vmem:[%s12254_s19 + $0x2b8] sm:$0xff]  ;;  %v4001_v56 = vld [vmem:[%s12254_s19 + $0x2b0] sm:$0xff] }
0x15b0   : > { %v4034_v53 = vld [vmem:[%s12254_s19 + $0x3b8] sm:$0xff]  ;;  %v4033_v57 = vld [vmem:[%s12254_s19 + $0x3b0] sm:$0xff] }
0x15b1   : > { %v3900_v62 = vmax.f32 %v3400_v60, 0.0  ;;  %v3902_v63 = vmax.f32 %v3471_v61, 0.0  ;;  %v3985_v58 = vld [vmem:[%s12254_s19 + $0x230] sm:$0xff]  ;;  %v4000_v60 = vld [vmem:[%s12254_s19 + $0x2a8] sm:$0xff] }
0x15b2   : > { %v4017_v59 = vld [vmem:[%s12254_s19 + $0x330] sm:$0xff]  ;;  %v4032_v61 = vld [vmem:[%s12254_s19 + $0x3a8] sm:$0xff] }
0x15b3   : > { %4242 = vmatprep.mubr.f32.mxu0 %v3900_v62  ;;  %4312 = vmatprep.mubr.f32.mxu1 %v3902_v63  ;;  %v12907_v62 = vsub.s32 4, %v12411_v19  ;;  %v12910_v63 = vsub.s32 6, %v12411_v19  ;;  %v3998_v19 = vld [vmem:[%s12254_s19 + $0x298] sm:$0xff] }
0x15b4   : > { %4243 = vmatmul.mubr.f32.vlgmr.msra.gmra.mxu0 %v3899_v1  ;;  %4313 = vmatmul.mubr.f32.vlgmr.msra.gmra.mxu1 %v3901_v2  ;;  %v3984_v1 = vld [vmem:[%s12254_s19 + $0x228] sm:$0xff] }
0x15b5   : > { %10971 = vmatpush3.msra.mxu0 %v3994_v30  ;;  %11006 = vmatpush3.msra.mxu1 %v4026_v3  ;;  %v4016_v2 = vld [vmem:[%s12254_s19 + $0x328] sm:$0xff]  ;;  %v3999_v30 = vld [vmem:[%s12254_s19 + $0x2a0] sm:$0xff] }
0x15b6   : > { %10972 = vmatprep.subr.mxu0 %v4009_v5  ;;  %11007 = vmatprep.subr.mxu1 %v4041_v6  ;;  %v4031_v3 = vld [vmem:[%s12254_s19 + $0x3a0] sm:$0xff] }
0x15b7   : > { %10973 = vmatpush3.msra.mxu0 %v3993_v7  ;;  %11008 = vmatpush3.msra.mxu1 %v4025_v8  ;;  %v3983_v5 = vld [vmem:[%s12254_s19 + $0x220] sm:$0xff]  ;;  %v4030_v7 = vld [vmem:[%s12254_s19 + $0x398] sm:$0xff]  ;;  %v3267_v8 = vrot.slane %v12839_v48, %v12907_v62 }
0x15b8   : > { %10974 = vmatprep.subr.mxu0 %v4008_v9  ;;  %11009 = vmatprep.subr.mxu1 %v4040_v10  ;;  %v4015_v6 = vld [vmem:[%s12254_s19 + $0x320] sm:$0xff]  ;;  %v3275_v9 = vrot.slane %v12839_v48, %v12910_v63  ;;  %v3982_v10 = vld [vmem:[%s12254_s19 + $0x218] sm:$0xff] }
0x15b9   : > { %10975 = vmatpush3.msra.mxu0 %v3992_v11  ;;  %11010 = vmatpush3.msra.mxu1 %v4024_v12  ;;  %v4014_v11 = vld [vmem:[%s12254_s19 + $0x318] sm:$0xff]  ;;  %v3997_v12 = vld [vmem:[%s12254_s19 + $0x290] sm:$0xff] }
0x15ba   : > { %10976 = vmatprep.subr.mxu0 %v4007_v13  ;;  %11011 = vmatprep.subr.mxu1 %v4039_v14  ;;  %v4029_v13 = vld [vmem:[%s12254_s19 + $0x390] sm:$0xff]  ;;  %v12929_v14 = vld [vmem:[%s12249_s14 + $0x8] sm:$0xff] }
0x15bb   : > { %10977 = vmatpush3.msra.mxu0 %v3991_v15  ;;  %11012 = vmatpush3.msra.mxu1 %v4023_v16  ;;  %v3981_v15 = vld [vmem:[%s12254_s19 + $0x210] sm:$0xff]  ;;  %v3287_v48 = vrot.slane %v12929_v14, %v12429_v25 }
0x15bc   : > { %10978 = vmatprep.subr.mxu0 %v4006_v17  ;;  %11013 = vmatprep.subr.mxu1 %v4038_v22  ;;  %v4013_v16 = vld [vmem:[%s12254_s19 + $0x310] sm:$0xff]  ;;  %v3295_v17 = vrot.slane %v12929_v14, %v12842_v49  ;;  %v3996_v22 = vld [vmem:[%s12254_s19 + $0x288] sm:$0xff] }
0x15bd   : > { %v12884_v35 = vpop.f32.mrf.mxu0  ;;  %v12886_v36 = vpop.f32.mrf.mxu1  ;;  %10979 = vmatpush3.msra.mxu0 %v3990_v23  ;;  %11014 = vmatpush3.msra.mxu1 %v4022_v26  ;;  %v4028_v23 = vld [vmem:[%s12254_s19 + $0x388] sm:$0xff] }
0x15be   : > { %10980 = vmatprep.subr.mxu0 %v4005_v27  ;;  %11015 = vmatprep.subr.mxu1 %v4037_v28  ;;  %v3540_v26 = vadd.f32 %v12884_v35, %v3267_v8  ;;  %v3611_v27 = vadd.f32 %v12886_v36, %v3275_v9  ;;  %v3979_v36 = vld [vmem:[%s12254_s19 + $0x200] sm:$0xff]  ;;  %v4085_v8 = vld [vmem:[%s12254_s19 + $0x550] sm:$0xff]  ;;  %v4068_v9 = vld [vmem:[%s12254_s19 + $0x4c8] sm:$0xff] }
0x15bf   : > { %v3541_v41 = vpop.f32.mrf.mxu0  ;;  %v3612_v42 = vpop.f32.mrf.mxu1  ;;  %10981 = vmatpush3.msra.mxu0 %v3989_v33  ;;  %11016 = vmatpush3.msra.mxu1 %v4021_v34  ;;  %v4012_v33 = vld [vmem:[%s12254_s19 + $0x308] sm:$0xff]  ;;  %v3995_v34 = vld [vmem:[%s12254_s19 + $0x280] sm:$0xff] }
0x15c0   : > { %v3542_v24 = vadd.f32 %v3541_v41, %v3271_v31  ;;  %v3613_v45 = vadd.f32 %v3612_v42, %v3279_v32  ;;  %10982 = vmatprep.subr.mxu0 %v4004_v37  ;;  %11017 = vmatprep.subr.mxu1 %v4036_v38  ;;  %v3980_v32 = vld [vmem:[%s12254_s19 + $0x208] sm:$0xff]  ;;  %v4027_v37 = vld [vmem:[%s12254_s19 + $0x380] sm:$0xff]  ;;  %v3903_v42 = vmax.f32 %v3540_v26, 0.0  ;;  %v4082_v26 = vld [vmem:[%s12254_s19 + $0x538] sm:$0xff] }
0x15c1   : > { %10983 = vmatpush3.msra.mxu0 %v3988_v39  ;;  %11018 = vmatpush3.msra.mxu1 %v4020_v40  ;;  %v4011_v39 = vld [vmem:[%s12254_s19 + $0x300] sm:$0xff] }
0x15c2   : > { %v3904_v50 = vmax.f32 %v3542_v24, 0.0  ;;  %v3906_v51 = vmax.f32 %v3613_v45, 0.0  ;;  %10984 = vmatprep.subr.mxu0 %v4003_v43  ;;  %11019 = vmatprep.subr.mxu1 %v4035_v44  ;;  %v3905_v43 = vmax.f32 %v3611_v27, 0.0  ;;  %v4074_v44 = vld [vmem:[%s12254_s19 + $0x4f8] sm:$0xff]  ;;  %v4065_v27 = vld [vmem:[%s12254_s19 + $0x4b0] sm:$0xff] }
0x15c3   : > { %10985 = vmatpush3.msra.mxu0 %v3987_v29  ;;  %11020 = vmatpush3.msra.mxu1 %v4019_v46  ;;  %v4106_v24 = vld [vmem:[%s12254_s19 + $0x5f8] sm:$0xff] }
0x15c4   : > { %4382 = vmatprep.mubr.f32.mxu0 %v3904_v50  ;;  %4452 = vmatprep.mubr.f32.mxu1 %v3906_v51  ;;  %v4058_v45 = vld [vmem:[%s12254_s19 + $0x478] sm:$0xff]  ;;  %v4073_v51 = vld [vmem:[%s12254_s19 + $0x4f0] sm:$0xff] }
0x15c5   : > { %10986 = vmatprep.subr.mxu0 %v4002_v52  ;;  %11021 = vmatprep.subr.mxu1 %v4034_v53  ;;  %v4090_v46 = vld [vmem:[%s12254_s19 + $0x578] sm:$0xff]  ;;  %v4105_v52 = vld [vmem:[%s12254_s19 + $0x5f0] sm:$0xff] }
0x15c6   : > { %10987 = vmatpush3.msra.mxu0 %v3986_v54  ;;  %11022 = vmatpush3.msra.mxu1 %v4018_v55  ;;  %v4057_v53 = vld [vmem:[%s12254_s19 + $0x470] sm:$0xff]  ;;  %v4072_v55 = vld [vmem:[%s12254_s19 + $0x4e8] sm:$0xff] }
0x15c7   : > { %10988 = vmatprep.subr.mxu0 %v4001_v56  ;;  %11023 = vmatprep.subr.mxu1 %v4033_v57  ;;  %v4089_v54 = vld [vmem:[%s12254_s19 + $0x570] sm:$0xff]  ;;  %v4104_v56 = vld [vmem:[%s12254_s19 + $0x5e8] sm:$0xff] }
0x15c8   : > { %10989 = vmatpush3.msra.mxu0 %v3985_v58  ;;  %11024 = vmatpush3.msra.mxu1 %v4017_v59  ;;  %v4056_v57 = vld [vmem:[%s12254_s19 + $0x468] sm:$0xff]  ;;  %v4071_v59 = vld [vmem:[%s12254_s19 + $0x4e0] sm:$0xff] }
0x15c9   : > { %10990 = vmatprep.subr.mxu0 %v4000_v60  ;;  %11025 = vmatprep.subr.mxu1 %v4032_v61  ;;  %v4088_v58 = vld [vmem:[%s12254_s19 + $0x568] sm:$0xff]  ;;  %v4103_v60 = vld [vmem:[%s12254_s19 + $0x5e0] sm:$0xff] }
0x15ca   : > { %10991 = vmatpush3.msra.mxu0 %v3984_v1  ;;  %11026 = vmatpush3.msra.mxu1 %v4016_v2  ;;  %v4055_v61 = vld [vmem:[%s12254_s19 + $0x460] sm:$0xff]  ;;  %v4070_v2 = vld [vmem:[%s12254_s19 + $0x4d8] sm:$0xff] }
0x15cb   : > { %10992 = vmatprep.subr.mxu0 %v3999_v30  ;;  %11027 = vmatprep.subr.mxu1 %v4031_v3  ;;  %v4087_v1 = vld [vmem:[%s12254_s19 + $0x560] sm:$0xff]  ;;  %v4102_v30 = vld [vmem:[%s12254_s19 + $0x5d8] sm:$0xff] }
0x15cc   : > { %10993 = vmatpush3.msra.mxu0 %v3983_v5  ;;  %11028 = vmatpush3.msra.mxu1 %v4015_v6  ;;  %v4054_v3 = vld [vmem:[%s12254_s19 + $0x458] sm:$0xff]  ;;  %v4069_v6 = vld [vmem:[%s12254_s19 + $0x4d0] sm:$0xff] }
0x15cd   : > { %10994 = vmatprep.subr.mxu0 %v3998_v19  ;;  %11029 = vmatprep.subr.mxu1 %v4030_v7  ;;  %v4086_v5 = vld [vmem:[%s12254_s19 + $0x558] sm:$0xff]  ;;  %v4101_v19 = vld [vmem:[%s12254_s19 + $0x5d0] sm:$0xff] }
0x15ce   : > { %10995 = vmatpush3.msra.mxu0 %v3982_v10  ;;  %11030 = vmatpush3.msra.mxu1 %v4014_v11  ;;  %v4053_v7 = vld [vmem:[%s12254_s19 + $0x450] sm:$0xff]  ;;  %v4100_v10 = vld [vmem:[%s12254_s19 + $0x5c8] sm:$0xff] }
0x15cf   : > { %v12941_v28 = vpop.f32.mrf.mxu0  ;;  %v12943_v31 = vpop.f32.mrf.mxu1  ;;  %10996 = vmatprep.subr.mxu0 %v3997_v12  ;;  %11031 = vmatprep.subr.mxu1 %v4029_v13  ;;  %v4052_v11 = vld [vmem:[%s12254_s19 + $0x448] sm:$0xff]  ;;  %v4067_v13 = vld [vmem:[%s12254_s19 + $0x4c0] sm:$0xff] }
0x15d0   : > { %10997 = vmatpush3.msra.mxu0 %v3981_v15  ;;  %11032 = vmatpush3.msra.mxu1 %v4013_v16  ;;  %v4084_v12 = vld [vmem:[%s12254_s19 + $0x548] sm:$0xff]  ;;  %v4099_v15 = vld [vmem:[%s12254_s19 + $0x5c0] sm:$0xff] }
0x15d1   : > { %v3683_v38 = vpop.f32.mrf.mxu0  ;;  %v3754_v35 = vpop.f32.mrf.mxu1  ;;  %10998 = vmatprep.subr.mxu0 %v3996_v22  ;;  %11033 = vmatprep.subr.mxu1 %v4028_v23  ;;  %v4051_v16 = vld [vmem:[%s12254_s19 + $0x440] sm:$0xff]  ;;  %v4098_v22 = vld [vmem:[%s12254_s19 + $0x5b8] sm:$0xff] }
0x15d2   : > { %v3684_v40 = vadd.f32 %v3683_v38, %v3287_v48  ;;  %v3755_v41 = vadd.f32 %v3754_v35, %v3295_v17  ;;  %10999 = vmatpush3.msra.mxu0 %v3980_v32  ;;  %11034 = vmatpush3.msra.mxu1 %v4012_v33  ;;  %v4083_v48 = vld [vmem:[%s12254_s19 + $0x540] sm:$0xff]  ;;  %v4066_v17 = vld [vmem:[%s12254_s19 + $0x4b8] sm:$0xff]  ;;  %v4097_v32 = vld [vmem:[%s12254_s19 + $0x5b0] sm:$0xff] }
0x15d3   : > { %11000 = vmatprep.subr.mxu0 %v3995_v34  ;;  %11035 = vmatprep.subr.mxu1 %v4027_v37  ;;  %v4050_v23 = vld [vmem:[%s12254_s19 + $0x438] sm:$0xff]  ;;  %v4049_v33 = vld [vmem:[%s12254_s19 + $0x430] sm:$0xff]  ;;  %v4064_v37 = vld [vmem:[%s12254_s19 + $0x4a8] sm:$0xff] }
0x15d4   : > { %11001 = vmatpush3.msra.mxu0 %v3979_v36  ;;  %11036 = vmatpush3.msra.mxu1 %v4011_v39  ;;  %v3908_v29 = vmax.f32 %v3684_v40, 0.0  ;;  %v3910_v50 = vmax.f32 %v3755_v41, 0.0  ;;  %v4081_v34 = vld [vmem:[%s12254_s19 + $0x530] sm:$0xff]  ;;  %v4096_v38 = vld [vmem:[%s12254_s19 + $0x5a8] sm:$0xff]  ;;  %v4063_v39 = vld [vmem:[%s12254_s19 + $0x4a0] sm:$0xff] }
0x15d5   : > { %4383 = vmatmul.mubr.f32.vlgmr.msra.gmra.mxu0 %v3903_v42  ;;  %4453 = vmatmul.mubr.f32.vlgmr.msra.gmra.mxu1 %v3905_v43  ;;  %v4048_v35 = vld [vmem:[%s12254_s19 + $0x428] sm:$0xff]  ;;  %v4095_v40 = vld [vmem:[%s12254_s19 + $0x5a0] sm:$0xff] }
0x15d6   : > { %11040 = vmatprep.subr.mxu0 %v4074_v44  ;;  %11075 = vmatprep.subr.mxu1 %v4106_v24  ;;  %v4080_v36 = vld [vmem:[%s12254_s19 + $0x528] sm:$0xff]  ;;  %v4047_v41 = vld [vmem:[%s12254_s19 + $0x420] sm:$0xff]  ;;  %v4062_v44 = vld [vmem:[%s12254_s19 + $0x498] sm:$0xff] }
0x15d7   : > { %11041 = vmatpush3.msra.mxu0 %v4058_v45  ;;  %4522 = vmatprep.mubr.f32.mxu0 %v3908_v29  ;;  %v4079_v42 = vld [vmem:[%s12254_s19 + $0x520] sm:$0xff]  ;;  %v4094_v24 = vld [vmem:[%s12254_s19 + $0x598] sm:$0xff]  ;;  %v3283_v45 = vrot.slane %v12929_v14, %v12418_v20  ;;  %v3291_v29 = vrot.slane %v12929_v14, %v12836_v47 }
0x15d8   : > { %11076 = vmatpush3.msra.mxu1 %v4090_v46  ;;  %4592 = vmatprep.mubr.f32.mxu1 %v3910_v50  ;;  %v4046_v50 = vld [vmem:[%s12254_s19 + $0x418] sm:$0xff] }
0x15d9   : > { %11042 = vmatprep.subr.mxu0 %v4073_v51  ;;  %11077 = vmatprep.subr.mxu1 %v4105_v52  ;;  %v4078_v51 = vld [vmem:[%s12254_s19 + $0x518] sm:$0xff]  ;;  %v4061_v52 = vld [vmem:[%s12254_s19 + $0x490] sm:$0xff] }
0x15da   : > { %11043 = vmatpush3.msra.mxu0 %v4057_v53  ;;  %11078 = vmatpush3.msra.mxu1 %v4089_v54  ;;  %v4093_v53 = vld [vmem:[%s12254_s19 + $0x590] sm:$0xff]  ;;  %v3303_v54 = vrot.slane %v12929_v14, %v12867_v18 }
0x15db   : > { %11044 = vmatprep.subr.mxu0 %v4072_v55  ;;  %11079 = vmatprep.subr.mxu1 %v4104_v56  ;;  %v4045_v55 = vld [vmem:[%s12254_s19 + $0x410] sm:$0xff] }
0x15dc   : > { %11045 = vmatpush3.msra.mxu0 %v4056_v57  ;;  %11080 = vmatpush3.msra.mxu1 %v4088_v58  ;;  %v4077_v56 = vld [vmem:[%s12254_s19 + $0x510] sm:$0xff]  ;;  %v3311_v58 = vrot.slane %v12929_v14, %v12870_v21 }
0x15dd   : > { %11046 = vmatprep.subr.mxu0 %v4071_v59  ;;  %11081 = vmatprep.subr.mxu1 %v4103_v60  ;;  %v4060_v59 = vld [vmem:[%s12254_s19 + $0x488] sm:$0xff] }
0x15de   : > { %11047 = vmatpush3.msra.mxu0 %v4055_v61  ;;  %11082 = vmatpush3.msra.mxu1 %v4087_v1  ;;  %v4092_v60 = vld [vmem:[%s12254_s19 + $0x588] sm:$0xff]  ;;  %v3682_v61 = vadd.f32 %v12941_v28, %v3283_v45  ;;  %v3753_v1 = vadd.f32 %v12943_v31, %v3291_v29  ;;  %v4149_v45 = vld [vmem:[%s12254_s19 + $0x750] sm:$0xff] }
0x15df   : > { %11048 = vmatprep.subr.mxu0 %v4070_v2  ;;  %11083 = vmatprep.subr.mxu1 %v4102_v30  ;;  %v4044_v30 = vld [vmem:[%s12254_s19 + $0x408] sm:$0xff] }
0x15e0   : > { %11049 = vmatpush3.msra.mxu0 %v4054_v3  ;;  %11084 = vmatpush3.msra.mxu1 %v4086_v5  ;;  %v4076_v3 = vld [vmem:[%s12254_s19 + $0x508] sm:$0xff]  ;;  %v4059_v5 = vld [vmem:[%s12254_s19 + $0x480] sm:$0xff]  ;;  %v3907_v31 = vmax.f32 %v3682_v61, 0.0  ;;  %v4129_v61 = vld [vmem:[%s12254_s19 + $0x6b0] sm:$0xff] }
0x15e1   : > { %11050 = vmatprep.subr.mxu0 %v4069_v6  ;;  %11085 = vmatprep.subr.mxu1 %v4101_v19  ;;  %v12999_v43 = vpop.f32.mrf.mxu0  ;;  %v13007_v46 = vpop.f32.mrf.mxu1  ;;  %v4091_v6 = vld [vmem:[%s12254_s19 + $0x580] sm:$0xff]  ;;  %v4132_v29 = vld [vmem:[%s12254_s19 + $0x6c8] sm:$0xff] }
0x15e2   : > { %11051 = vmatpush3.msra.mxu0 %v4053_v7  ;;  %11086 = vmatpush3.msra.mxu1 %v4085_v8  ;;  %v4043_v7 = vld [vmem:[%s12254_s19 + $0x400] sm:$0xff] }
0x15e3   : > { %11052 = vmatprep.subr.mxu0 %v4068_v9  ;;  %11087 = vmatprep.subr.mxu1 %v4100_v10  ;;  %v3825_v57 = vpop.f32.mrf.mxu0  ;;  %v3896_v2 = vpop.f32.mrf.mxu1  ;;  %v4075_v8 = vld [vmem:[%s12254_s19 + $0x500] sm:$0xff]  ;;  %v3909_v9 = vmax.f32 %v3753_v1, 0.0  ;;  %v4138_v10 = vld [vmem:[%s12254_s19 + $0x6f8] sm:$0xff]  ;;  %v4161_v1 = vld [vmem:[%s12254_s19 + $0x7b0] sm:$0xff] }
0x15e4   : > { %11053 = vmatpush3.msra.mxu0 %v4052_v11  ;;  %11088 = vmatpush3.msra.mxu1 %v4084_v12  ;;  %v3826_v19 = vadd.f32 %v3825_v57, %v3303_v54  ;;  %v3897_v28 = vadd.f32 %v3896_v2, %v3311_v58  ;;  %v4170_v11 = vld [vmem:[%s12254_s19 + $0x7f8] sm:$0xff]  ;;  %v4163_v54 = vld [vmem:[%s12254_s19 + $0x7c0] sm:$0xff]  ;;  %v4113_v2 = vld [vmem:[%s12254_s19 + $0x630] sm:$0xff] }
0x15e5   : > { %11054 = vmatprep.subr.mxu0 %v4067_v13  ;;  %11089 = vmatprep.subr.mxu1 %v4099_v15  ;;  %v4122_v12 = vld [vmem:[%s12254_s19 + $0x678] sm:$0xff] }
0x15e6   : > { %11055 = vmatpush3.msra.mxu0 %v4051_v16  ;;  %11090 = vmatpush3.msra.mxu1 %v4083_v48  ;;  %v3912_v13 = vmax.f32 %v3826_v19, 0.0  ;;  %v4154_v15 = vld [vmem:[%s12254_s19 + $0x778] sm:$0xff]  ;;  %v3914_v16 = vmax.f32 %v3897_v28, 0.0  ;;  %v4137_v48 = vld [vmem:[%s12254_s19 + $0x6f0] sm:$0xff]  ;;  %v4144_v19 = vld [vmem:[%s12254_s19 + $0x728] sm:$0xff] }
0x15e7   : > { %11056 = vmatprep.subr.mxu0 %v4066_v17  ;;  %11091 = vmatprep.subr.mxu1 %v4098_v22  ;;  %v4169_v17 = vld [vmem:[%s12254_s19 + $0x7f0] sm:$0xff]  ;;  %v4130_v57 = vld [vmem:[%s12254_s19 + $0x6b8] sm:$0xff]  ;;  %v4111_v28 = vld [vmem:[%s12254_s19 + $0x620] sm:$0xff] }
0x15e8   : > { %11057 = vmatpush3.msra.mxu0 %v4050_v23  ;;  %11092 = vmatpush3.msra.mxu1 %v4082_v26  ;;  %v4121_v22 = vld [vmem:[%s12254_s19 + $0x670] sm:$0xff]  ;;  %v4136_v26 = vld [vmem:[%s12254_s19 + $0x6e8] sm:$0xff]  ;;  %v4162_v58 = vld [vmem:[%s12254_s19 + $0x7b8] sm:$0xff] }
0x15e9   : > { %11058 = vmatprep.subr.mxu0 %v4065_v27  ;;  %11093 = vmatprep.subr.mxu1 %v4097_v32  ;;  %v4153_v23 = vld [vmem:[%s12254_s19 + $0x770] sm:$0xff]  ;;  %v4168_v27 = vld [vmem:[%s12254_s19 + $0x7e8] sm:$0xff] }
0x15ea   : > { %11059 = vmatpush3.msra.mxu0 %v4049_v33  ;;  %11094 = vmatpush3.msra.mxu1 %v4081_v34  ;;  %v4120_v32 = vld [vmem:[%s12254_s19 + $0x668] sm:$0xff]  ;;  %v4135_v34 = vld [vmem:[%s12254_s19 + $0x6e0] sm:$0xff] }
0x15eb   : > { %11060 = vmatprep.subr.mxu0 %v4064_v37  ;;  %11095 = vmatprep.subr.mxu1 %v4096_v38  ;;  %v4152_v33 = vld [vmem:[%s12254_s19 + $0x768] sm:$0xff]  ;;  %v4167_v37 = vld [vmem:[%s12254_s19 + $0x7e0] sm:$0xff] }
0x15ec   : > { %11061 = vmatpush3.msra.mxu0 %v4048_v35  ;;  %11096 = vmatpush3.msra.mxu1 %v4080_v36  ;;  %v4119_v38 = vld [vmem:[%s12254_s19 + $0x660] sm:$0xff]  ;;  %v4134_v36 = vld [vmem:[%s12254_s19 + $0x6d8] sm:$0xff] }
0x15ed   : > { %11062 = vmatprep.subr.mxu0 %v4063_v39  ;;  %11097 = vmatprep.subr.mxu1 %v4095_v40  ;;  %v4151_v35 = vld [vmem:[%s12254_s19 + $0x760] sm:$0xff]  ;;  %v4166_v39 = vld [vmem:[%s12254_s19 + $0x7d8] sm:$0xff] }
0x15ee   : > { %11063 = vmatpush3.msra.mxu0 %v4047_v41  ;;  %11098 = vmatpush3.msra.mxu1 %v4079_v42  ;;  %v4118_v40 = vld [vmem:[%s12254_s19 + $0x658] sm:$0xff]  ;;  %v4133_v42 = vld [vmem:[%s12254_s19 + $0x6d0] sm:$0xff] }
0x15ef   : > { %11064 = vmatprep.subr.mxu0 %v4062_v44  ;;  %11099 = vmatprep.subr.mxu1 %v4094_v24  ;;  %v4150_v41 = vld [vmem:[%s12254_s19 + $0x758] sm:$0xff]  ;;  %v4165_v44 = vld [vmem:[%s12254_s19 + $0x7d0] sm:$0xff] }
0x15f0   : > { %11065 = vmatpush3.msra.mxu0 %v4046_v50  ;;  %11100 = vmatpush3.msra.mxu1 %v4078_v51  ;;  %v4117_v24 = vld [vmem:[%s12254_s19 + $0x650] sm:$0xff]  ;;  %v4164_v50 = vld [vmem:[%s12254_s19 + $0x7c8] sm:$0xff] }
0x15f1   : > { %11066 = vmatprep.subr.mxu0 %v4061_v52  ;;  %11101 = vmatprep.subr.mxu1 %v4093_v53  ;;  %v4116_v51 = vld [vmem:[%s12254_s19 + $0x648] sm:$0xff]  ;;  %v4131_v53 = vld [vmem:[%s12254_s19 + $0x6c0] sm:$0xff] }
0x15f2   : > { %11067 = vmatpush3.msra.mxu0 %v4045_v55  ;;  %11102 = vmatpush3.msra.mxu1 %v4077_v56  ;;  %v4148_v52 = vld [vmem:[%s12254_s19 + $0x748] sm:$0xff]  ;;  %v4115_v55 = vld [vmem:[%s12254_s19 + $0x640] sm:$0xff] }
0x15f3   : > { %11068 = vmatprep.subr.mxu0 %v4060_v59  ;;  %11103 = vmatprep.subr.mxu1 %v4092_v60  ;;  %v4147_v56 = vld [vmem:[%s12254_s19 + $0x740] sm:$0xff]  ;;  %v4114_v59 = vld [vmem:[%s12254_s19 + $0x638] sm:$0xff] }
0x15f4   : > { %11069 = vmatpush3.msra.mxu0 %v4044_v30  ;;  %11104 = vmatpush3.msra.mxu1 %v4076_v3  ;;  %v4146_v60 = vld [vmem:[%s12254_s19 + $0x738] sm:$0xff]  ;;  %v4145_v30 = vld [vmem:[%s12254_s19 + $0x730] sm:$0xff]  ;;  %v4128_v3 = vld [vmem:[%s12254_s19 + $0x6a8] sm:$0xff] }
0x15f5   : > { %11070 = vmatprep.subr.mxu0 %v4059_v5  ;;  %11105 = vmatprep.subr.mxu1 %v4091_v6  ;;  %v4160_v5 = vld [vmem:[%s12254_s19 + $0x7a8] sm:$0xff] }
0x15f6   : > { %11071 = vmatpush3.msra.mxu0 %v4043_v7  ;;  %11106 = vmatpush3.msra.mxu1 %v4075_v8  ;;  %v4112_v6 = vld [vmem:[%s12254_s19 + $0x628] sm:$0xff]  ;;  %v4127_v7 = vld [vmem:[%s12254_s19 + $0x6a0] sm:$0xff] }
0x15f7   : > { %4523 = vmatmul.mubr.f32.vlgmr.msra.gmra.mxu0 %v3907_v31  ;;  %4593 = vmatmul.mubr.f32.vlgmr.msra.gmra.mxu1 %v3909_v9  ;;  %v4159_v8 = vld [vmem:[%s12254_s19 + $0x7a0] sm:$0xff]  ;;  %v4126_v9 = vld [vmem:[%s12254_s19 + $0x698] sm:$0xff] }
0x15f8   : > { %11110 = vmatprep.subr.mxu0 %v4138_v10  ;;  %11145 = vmatprep.subr.mxu1 %v4170_v11  ;;  %v4143_v31 = vld [vmem:[%s12254_s19 + $0x720] sm:$0xff]  ;;  %v4158_v10 = vld [vmem:[%s12254_s19 + $0x798] sm:$0xff]  ;;  %v3299_v11 = vrot.slane %v12929_v14, %v12907_v62 }
0x15f9   : > { %11111 = vmatpush3.msra.mxu0 %v4122_v12  ;;  %4662 = vmatprep.mubr.f32.mxu0 %v3912_v13  ;;  %v3307_v12 = vrot.slane %v12929_v14, %v12910_v63  ;;  %v4110_v13 = vld [vmem:[%s12254_s19 + $0x618] sm:$0xff]  ;;  %v4124_v14 = vld [vmem:[%s12254_s19 + $0x688] sm:$0xff] }
0x15fa   : > { %11146 = vmatpush3.msra.mxu1 %v4154_v15  ;;  %4732 = vmatprep.mubr.f32.mxu1 %v3914_v16  ;;  %v4142_v15 = vld [vmem:[%s12254_s19 + $0x718] sm:$0xff]  ;;  %v4125_v16 = vld [vmem:[%s12254_s19 + $0x690] sm:$0xff] }
0x15fb   : > { %11112 = vmatprep.subr.mxu0 %v4137_v48  ;;  %11147 = vmatprep.subr.mxu1 %v4169_v17  ;;  %v4157_v48 = vld [vmem:[%s12254_s19 + $0x790] sm:$0xff] }
0x15fc   : > { %11113 = vmatpush3.msra.mxu0 %v4121_v22  ;;  %11148 = vmatpush3.msra.mxu1 %v4153_v23  ;;  %v4109_v17 = vld [vmem:[%s12254_s19 + $0x610] sm:$0xff]  ;;  %v4156_v23 = vld [vmem:[%s12254_s19 + $0x788] sm:$0xff] }
0x15fd   : > { %11114 = vmatprep.subr.mxu0 %v4136_v26  ;;  %11149 = vmatprep.subr.mxu1 %v4168_v27  ;;  %v4141_v22 = vld [vmem:[%s12254_s19 + $0x710] sm:$0xff]  ;;  %v3824_v26 = vadd.f32 %v12999_v43, %v3299_v11  ;;  %v3895_v27 = vadd.f32 %v13007_v46, %v3307_v12 }
0x15fe   : > { %11115 = vmatpush3.msra.mxu0 %v4120_v32  ;;  %11150 = vmatpush3.msra.mxu1 %v4152_v33  ;;  %v4108_v32 = vld [vmem:[%s12254_s19 + $0x608] sm:$0xff] }
0x15ff   : > { %11116 = vmatprep.subr.mxu0 %v4135_v34  ;;  %11151 = vmatprep.subr.mxu1 %v4167_v37  ;;  %v4140_v33 = vld [vmem:[%s12254_s19 + $0x708] sm:$0xff]  ;;  %v4123_v34 = vld [vmem:[%s12254_s19 + $0x680] sm:$0xff]  ;;  %v3911_v43 = vmax.f32 %v3824_v26, 0.0  ;;  %v3913_v46 = vmax.f32 %v3895_v27, 0.0 }
0x1600   : > { %11117 = vmatpush3.msra.mxu0 %v4119_v38  ;;  %11152 = vmatpush3.msra.mxu1 %v4151_v35  ;;  %v4155_v37 = vld [vmem:[%s12254_s19 + $0x780] sm:$0xff] }
0x1601   : > { %11118 = vmatprep.subr.mxu0 %v4134_v36  ;;  %11153 = vmatprep.subr.mxu1 %v4166_v39  ;;  %v4107_v38 = vld [vmem:[%s12254_s19 + $0x600] sm:$0xff]  ;;  %v4784_v36 = vld [vmem:[%s12274_s12 + $0x78] sm:$0xff]  ;;  %v4783_v39 = vld [vmem:[%s12274_s12 + $0x70] sm:$0xff] }
0x1602   : > { %11119 = vmatpush3.msra.mxu0 %v4118_v40  ;;  %11154 = vmatpush3.msra.mxu1 %v4150_v41  ;;  %v4139_v35 = vld [vmem:[%s12254_s19 + $0x700] sm:$0xff]  ;;  %v4782_v40 = vld [vmem:[%s12274_s12 + $0x68] sm:$0xff] }
0x1603   : > { %11120 = vmatprep.subr.mxu0 %v4133_v42  ;;  %11155 = vmatprep.subr.mxu1 %v4165_v44  ;;  %v4781_v41 = vld [vmem:[%s12274_s12 + $0x60] sm:$0xff]  ;;  %v4780_v42 = vld [vmem:[%s12274_s12 + $0x58] sm:$0xff]  ;;  %v4779_v44 = vld [vmem:[%s12274_s12 + $0x50] sm:$0xff] }
0x1604   : > { %11121 = vmatpush3.msra.mxu0 %v4117_v24  ;;  %11156 = vmatpush3.msra.mxu1 %v4149_v45  ;;  %v4778_v24 = vld [vmem:[%s12274_s12 + $0x48] sm:$0xff]  ;;  %v4777_v45 = vld [vmem:[%s12274_s12 + $0x40] sm:$0xff] }
0x1605   : > { %11122 = vmatprep.subr.mxu0 %v4132_v29  ;;  %11157 = vmatprep.subr.mxu1 %v4164_v50  ;;  %v4776_v29 = vld [vmem:[%s12274_s12 + $0x38] sm:$0xff]  ;;  %v4775_v50 = vld [vmem:[%s12274_s12 + $0x30] sm:$0xff] }
0x1606   : > { %11123 = vmatpush3.msra.mxu0 %v4116_v51  ;;  %11158 = vmatpush3.msra.mxu1 %v4148_v52  ;;  %v4774_v51 = vld [vmem:[%s12274_s12 + $0x28] sm:$0xff]  ;;  %v4773_v52 = vld [vmem:[%s12274_s12 + $0x20] sm:$0xff] }
0x1607   : > { %11124 = vmatprep.subr.mxu0 %v4131_v53  ;;  %11159 = vmatprep.subr.mxu1 %v4163_v54  ;;  %v4772_v53 = vld [vmem:[%s12274_s12 + $0x18] sm:$0xff]  ;;  %v4771_v54 = vld [vmem:[%s12274_s12 + $0x10] sm:$0xff] }
0x1608   : > { %11125 = vmatpush3.msra.mxu0 %v4115_v55  ;;  %11160 = vmatpush3.msra.mxu1 %v4147_v56  ;;  %v4770_v55 = vld [vmem:[%s12274_s12 + $0x8] sm:$0xff]  ;;  %v4769_v56 = vld [vmem:[%s12274_s12] sm:$0xff] }
0x1609   : > { %11126 = vmatprep.subr.mxu0 %v4130_v57  ;;  %11161 = vmatprep.subr.mxu1 %v4162_v58  ;;  %v13121_v57 = vld [vmem:[%s1050_s16] sm:$0xff]  ;;  %s14085_s16 = sld [smem:[#allocation6_spill]] }
0x160a   : > { %11127 = vmatpush3.msra.mxu0 %v4114_v59  ;;  %11162 = vmatpush3.msra.mxu1 %v4146_v60  ;;  %v10761_v60 = vld [vmem:[%s12259_s24] ss:$0 sm:$0xff] }
0x160b   : > { %11128 = vmatprep.subr.mxu0 %v4129_v61  ;;  %11163 = vmatprep.subr.mxu1 %v4161_v1 }
0x160c   : > { %11129 = vmatpush3.msra.mxu0 %v4113_v2  ;;  %11164 = vmatpush3.msra.mxu1 %v4145_v30 }
0x160d   : > { %11130 = vmatprep.subr.mxu0 %v4128_v3  ;;  %11165 = vmatprep.subr.mxu1 %v4160_v5 }
0x160e   : > { %11131 = vmatpush3.msra.mxu0 %v4112_v6  ;;  %11166 = vmatpush3.msra.mxu1 %v4144_v19 }
0x160f   : > { %11132 = vmatprep.subr.mxu0 %v4127_v7  ;;  %11167 = vmatprep.subr.mxu1 %v4159_v8 }
0x1610   : > { %11133 = vmatpush3.msra.mxu0 %v4111_v28  ;;  %11168 = vmatpush3.msra.mxu1 %v4143_v31 }
0x1611   : > { %11134 = vmatprep.subr.mxu0 %v4126_v9  ;;  %11169 = vmatprep.subr.mxu1 %v4158_v10 }
0x1612   : > { %11135 = vmatpush3.msra.mxu0 %v4110_v13  ;;  %11170 = vmatpush3.msra.mxu1 %v4142_v15 }
0x1613   : > { %11136 = vmatprep.subr.mxu0 %v4125_v16  ;;  %11171 = vmatprep.subr.mxu1 %v4157_v48 }
0x1614   : > { %11137 = vmatpush3.msra.mxu0 %v4109_v17  ;;  %11172 = vmatpush3.msra.mxu1 %v4141_v22 }
0x1615   : > { %11138 = vmatprep.subr.mxu0 %v4124_v14  ;;  %11173 = vmatprep.subr.mxu1 %v4156_v23 }
0x1616   : > { %11139 = vmatpush3.msra.mxu0 %v4108_v32  ;;  %11174 = vmatpush3.msra.mxu1 %v4140_v33 }
0x1617   : > { %11140 = vmatprep.subr.mxu0 %v4123_v34  ;;  %11175 = vmatprep.subr.mxu1 %v4155_v37 }
0x1618   : > { %11141 = vmatpush3.msra.mxu0 %v4107_v38  ;;  %11176 = vmatpush3.msra.mxu1 %v4139_v35  ;;  %v4785_v38 = vld [vmem:[%s12279_s20] sm:$0x3] }
0x1619   : > { %4663 = vmatmul.mubr.f32.vlgmr.msra.gmra.mxu0 %v3911_v43  ;;  %4733 = vmatmul.mubr.f32.vlgmr.msra.gmra.mxu1 %v3913_v46  ;;  %v4790_v35 = vrot.slane %v4785_v38, %v12418_v20 }
0x161a   : > { %4816 = vmatprep.subr.mxu0 %v4784_v36  ;;  %4864 = vmatprep.mubr.f32.mxu0 %v12179_v4  ;;  %v4794_v36 = vrot.slane %v4785_v38, %v12429_v25 }
0x161b   : > { %4817 = vmatpush1.msra.mxu0 %v4783_v39  ;;  %11694 = vmatprep.subr.mxu1 %v12179_v4 }
0x161c   : > { %4818 = vmatprep.subr.mxu0 %v4782_v40  ;;  %11696 = vmatprep.mubr.msk.f32.mxu1 %vm12180_vm1, %v12179_v4 }
0x161d   : > { %4819 = vmatpush1.msra.mxu0 %v4781_v41 }
0x161e   : > { %4820 = vmatprep.subr.mxu0 %v4780_v42 }
0x161f   : > { %4821 = vmatpush1.msra.mxu0 %v4779_v44 }
0x1620   : > { %4822 = vmatprep.subr.mxu0 %v4778_v24 }
0x1621   : > { %4823 = vmatpush1.msra.mxu0 %v4777_v45 }
0x1622   : > { %4824 = vmatprep.subr.mxu0 %v4776_v29 }
0x1623   : > { %4825 = vmatpush1.msra.mxu0 %v4775_v50 }
0x1624   : > { %4826 = vmatprep.subr.mxu0 %v4774_v51 }
0x1625   : > { %4827 = vmatpush1.msra.mxu0 %v4773_v52 }
0x1626   : > { %4828 = vmatprep.subr.mxu0 %v4772_v53 }
0x1627   : > { %4829 = vmatpush1.msra.mxu0 %v4771_v54 }
0x1628   : > { %4830 = vmatprep.subr.mxu0 %v4770_v55 }
0x1629   : > { %4831 = vmatpush1.msra.mxu0 %v4769_v56 }
0x162a   : > { %10764 = vmatmul.mubr.msk.f32.vlgmr.msra.gmra.mxu0 %vm1084_vm0, %v13121_v57  ;;  %11714 = vmatprep.subr.mxu0 %v12179_v4 }
0x162b   : > { %11716 = vmatprep.mubr.msk.f32.mxu0 %vm12180_vm1, %v12179_v4 }
0x1674   : > { %v10932_v58 = vpop.f32.mrf.mxu0  ;;  %v10967_v59 = vpop.f32.mrf.mxu1 }
0x1676   : > { %v10933_v61 = vpop.f32.mrf.mxu0  ;;  %v10968_v1 = vpop.f32.mrf.mxu1 }
0x1677   : > { %v10934_v2 = vadd.f32 %v10933_v61, %v10932_v58  ;;  %v10969_v30 = vadd.f32 %v10968_v1, %v10967_v59 }
0x1679   : > { %v4245_v3 = vadd.f32 %v10934_v2, %v10761_v60 }
0x167b   : > { %v4315_v5 = vadd.f32 %v10969_v30, %v4245_v3 }
0x1695   : > { %v11002_v6 = vpop.f32.mrf.mxu0  ;;  %v11037_v19 = vpop.f32.mrf.mxu1 }
0x1697   : > { %v11003_v7 = vpop.f32.mrf.mxu0  ;;  %v11038_v8 = vpop.f32.mrf.mxu1 }
0x1698   : > { %v11004_v28 = vadd.f32 %v11003_v7, %v11002_v6  ;;  %v11039_v31 = vadd.f32 %v11038_v8, %v11037_v19 }
0x169a   : > { %v4385_v9 = vadd.f32 %v11004_v28, %v4315_v5  ;;  %v4872_v28 = vld [vmem:[%s14085_s16 + $0x8] sm:$0xff] }
0x169b   : > { %11715 = vmatpush3.msra.mxu0 %v4872_v28 }
0x169c   : > { %v4455_v10 = vadd.f32 %v11039_v31, %v4385_v9  ;;  %11724 = vmatprep.subr.mxu0 %v12179_v4 }
0x16b7   : > { %v11072_v11 = vpop.f32.mrf.mxu0  ;;  %v11107_v12 = vpop.f32.mrf.mxu1 }
0x16b9   : > { %v11073_v13 = vpop.f32.mrf.mxu0  ;;  %v11108_v15 = vpop.f32.mrf.mxu1 }
0x16ba   : > { %v11074_v16 = vadd.f32 %v11073_v13, %v11072_v11  ;;  %v11109_v48 = vadd.f32 %v11108_v15, %v11107_v12  ;;  %v4871_v11 = vld [vmem:[%s14085_s16] sm:$0xff] }
0x16bc   : > { %v4525_v17 = vadd.f32 %v11074_v16, %v4455_v10 }
0x16be   : > { %v4595_v22 = vadd.f32 %v11109_v48, %v4525_v17 }
0x16d9   : > { %v11142_v14 = vpop.f32.mrf.mxu0  ;;  %v11177_v23 = vpop.f32.mrf.mxu1 }
0x16db   : > { %v11143_v26 = vpop.f32.mrf.mxu0  ;;  %v11178_v27 = vpop.f32.mrf.mxu1 }
0x16dc   : > { %v11144_v32 = vadd.f32 %v11143_v26, %v11142_v14  ;;  %v11179_v34 = vadd.f32 %v11178_v27, %v11177_v23 }
0x16de   : > { %v4665_v33 = vadd.f32 %v11144_v32, %v4595_v22 }
0x16e0   : > { %v13129_v37 = vadd.f32 %v11179_v34, %v4665_v33 }
0x16ea   : > { %v4866_v43 = vpop.f32.mrf.mxu0 }
0x16eb   : > { %v13133_v46 = vadd.f32 %v4866_v43, %v4790_v35 }
0x16ec   : > { %v4868_v39 = vpop.f32.mrf.mxu0 }
0x16ed   : > { %4881 = vrot.lane.b32.xlu1 %v13133_v46, %s14060_s23  ;;  %v13140_v41 = vmul.f32 0.35355338, %v13133_v46  ;;  %v13143_v42 = vadd.f32 %v4868_v39, %v4794_v36  ;;  %s14094_s23 = sld [smem:[#allocation5_spill]] }
0x175f   : > { %v4882_v40 = vpop.permute.xlu1 %4881 }
0x1760   : > { %11695 = vmatpush3.xpose.msk.msra.mxu1 %vm1171_vm2, %v4882_v40 }
0x1761   : > { %11699 = vmatprep.subr.mxu1 %v12179_v4 }
0x1763   : > { %11697 = vmatmul.mubr.msk.f32.vlgmr.msra.gmra.mxu1 %vm1171_vm2, %v13140_v41 }
0x1764   : > { %11700 = vmatpush3.msra.mxu1 %v13143_v42  ;;  %11701 = vmatprep.mubr.msk.f32.mxu1 %vm12180_vm1, %v12179_v4 }
0x1765   : > { %11704 = vmatprep.subr.mxu1 %v12179_v4 }
0x1823   : > { %v4954_v44 = vpop.f32.mrf.mxu1 }
0x1824   : > { %v4958_v24 = vsel %vm1171_vm2, %v4954_v44, -inf }
0x1825   : > { %4959 = vmax.xlane.f32.xlu0 %v4958_v24  ;;  %v11698_v45 = vpop.f32.mrf.mxu1 }
0x1826   : > { %v4873_v45 = vld [vmem:[%s14085_s16 + $0x10] sm:$0xff] }
0x183b   : > { %5044 = vrot.lane.b32.xlu0 %v13133_v46, %s14061_s22  ;;  %s14095_s22 = sld [smem:[#allocation10_spill]] }
0x18ae   : > { %v4960_v29 = vpop.xlane.xlu0 %4959 }
0x18af   : > { %v4961_v50 = vsub.f32 %v4954_v44, %v4960_v29 }
0x18b1   : > { %v4962_v51 = vmul.f32 1.442695, %v4961_v50 }
0x18b2   : > { %v5045_v58 = vpop.permute.xlu0 %5044 }
0x18b3   : > { %12065 = vpow2.f32 %v4962_v51 }
0x18c0   : > { %v12066_v52 = vpop.eup %12065 }
0x18c1   : > { %v4964_v53 = vsel %vm1171_vm2, %v12066_v52, 0.0 }
0x18c2   : > { %4965 = vadd.xlane.f32.xlu1 %v4964_v53 }
0x18d3   : > { %5042 = vrot.lane.b32.xlu1 %v13140_v41, %s14062_s26 }
0x194b   : > { %v4966_v54 = vpop.xlane.xlu1 %4965 }
0x194c   : > { %12067 = vrcp.f32 %v4966_v54 }
0x194f   : > { %v5043_v59 = vpop.permute.xlu1 %5042 }
0x1959   : > { %v12068_v55 = vpop.eup %12067 }
0x195a   : > { %v4968_v56 = vmul.f32 %v12068_v55, %v12066_v52 }
0x195c   : > { %11702 = vmatmul.mubr.msk.f32.vlgmr.msra.gmra.mxu1 %vm1171_vm2, %v4968_v56 }
0x195d   : > { %11705 = vmatpush3.xpose.msk.msra.mxu1 %vm1171_vm2, %v5045_v58  ;;  %11706 = vmatprep.mubr.msk.f32.mxu1 %vm12180_vm1, %v12179_v4 }
0x195e   : > { %11709 = vmatprep.subr.mxu1 %v12179_v4 }
0x1960   : > { %11707 = vmatmul.mubr.msk.f32.vlgmr.msra.gmra.mxu1 %vm1171_vm2, %v5043_v59 }
0x1961   : > { %11711 = vmatprep.mubr.msk.f32.mxu1 %vm12180_vm1, %v12179_v4 }
0x1a1c   : > { %v5038_v60 = vpop.f32.mrf.mxu1 }
0x1a1e   : > { %v11703_v61 = vpop.f32.mrf.mxu1 }
0x1a20   : > { %v5116_v1 = vpop.f32.mrf.mxu1 }
0x1a21   : > { %v5120_v2 = vsel %vm1171_vm2, %v5116_v1, -inf }
0x1a22   : > { %5121 = vmax.xlane.f32.xlu0 %v5120_v2  ;;  %v11708_v30 = vpop.f32.mrf.mxu1 }
0x1a38   : > { %5132 = vrot.lane.b32.xlu0 %v13143_v42, %s14062_s26  ;;  %s14098_s26 = sld [smem:[#allocation13_spill]] }
0x1a3c   : > { %5354 = vrot.lane.b32.xlu0 %v13140_v41, %s14055_s28 }
0x1aab   : > { %v5122_v3 = vpop.xlane.xlu0 %5121 }
0x1aac   : > { %v5123_v5 = vsub.f32 %v5116_v1, %v5122_v3 }
0x1aae   : > { %v5124_v6 = vmul.f32 1.442695, %v5123_v5 }
0x1aaf   : > { %v5133_v19 = vpop.permute.xlu0 %5132 }
0x1ab0   : > { %12069 = vpow2.f32 %v5124_v6  ;;  %11710 = vmatpush3.msra.mxu1 %v5133_v19 }
0x1ab1   : > { %11719 = vmatprep.subr.mxu1 %v12179_v4 }
0x1ab3   : > { %v5355_v16 = vpop.permute.xlu0 %5354 }
0x1abd   : > { %v12070_v7 = vpop.eup %12069 }
0x1abe   : > { %v5126_v8 = vsel %vm1171_vm2, %v12070_v7, 0.0 }
0x1abf   : > { %5127 = vadd.xlane.f32.xlu1 %v5126_v8  ;;  %v4874_v8 = vld [vmem:[%s14085_s16 + $0x18] sm:$0xff] }
0x1ad0   : > { %5356 = vrot.lane.b32.xlu1 %v13133_v46, %s14050_s1  ;;  %s14087_s1 = smov 24  }
0x1b48   : > { %v5128_v31 = vpop.xlane.xlu1 %5127 }
0x1b49   : > { %12071 = vrcp.f32 %v5128_v31 }
0x1b4c   : > { %v5357_v13 = vpop.permute.xlu1 %5356 }
0x1b56   : > { %v12072_v9 = vpop.eup %12071 }
0x1b57   : > { %v5130_v10 = vmul.f32 %v12072_v9, %v12070_v7 }
0x1b59   : > { %11712 = vmatmul.mubr.msk.f32.vlgmr.msra.gmra.mxu1 %vm1171_vm2, %v5130_v10 }
0x1b5a   : > { %11720 = vmatpush3.msra.mxu1 %v4871_v11  ;;  %11721 = vmatprep.mubr.msk.f32.mxu1 %vm12180_vm1, %v12179_v4 }
0x1b5b   : > { %11729 = vmatprep.subr.mxu1 %v12179_v4 }
0x1b5d   : > { %11722 = vmatmul.mubr.msk.f32.vlgmr.msra.gmra.mxu1 %vm1171_vm2, %v5038_v60 }
0x1b5e   : > { %11731 = vmatprep.mubr.msk.f32.mxu1 %vm12180_vm1, %v12179_v4 }
0x1c19   : > { %v5204_v12 = vpop.f32.mrf.mxu1 }
0x1c1a   : > { %11717 = vmatmul.mubr.msk.f32.vlgmr.msra.gmra.mxu0 %vm1171_vm2, %v5204_v12 }
0x1c1b   : > { %11725 = vmatpush3.xpose.msk.msra.mxu0 %vm1171_vm2, %v5357_v13  ;;  %v11713_v15 = vpop.f32.mrf.mxu1  ;;  %11726 = vmatprep.mubr.msk.f32.mxu0 %vm12180_vm1, %v12179_v4 }
0x1c1c   : > { %11734 = vmatprep.subr.mxu0 %v12179_v4 }
0x1c1d   : > { %v5350_v48 = vpop.f32.mrf.mxu1 }
0x1c1e   : > { %11727 = vmatmul.mubr.msk.f32.vlgmr.msra.gmra.mxu0 %vm1171_vm2, %v5355_v16 }
0x1c1f   : > { %v11723_v17 = vpop.f32.mrf.mxu1  ;;  %11736 = vmatprep.mubr.msk.f32.mxu0 %vm12180_vm1, %v12179_v4  ;;  %11735 = vmatpush3.msra.mxu0 %v4873_v45 }
0x1c20   : > { %11744 = vmatprep.subr.mxu0 %v12179_v4 }
0x1cda   : > { %v5277_v22 = vpop.f32.mrf.mxu0 }
0x1cdb   : > { %v5351_v61 = vadd.f32 %v5350_v48, %v5277_v22 }
0x1cdc   : > { %v11718_v14 = vpop.f32.mrf.mxu0 }
0x1cde   : > { %v5428_v23 = vpop.f32.mrf.mxu0 }
0x1cdf   : > { %v5432_v26 = vsel %vm1171_vm2, %v5428_v23, -inf }
0x1ce0   : > { %5433 = vmax.xlane.f32.xlu0 %v5432_v26  ;;  %v11728_v27 = vpop.f32.mrf.mxu0 }
0x1cf6   : > { %5443 = vrot.lane.b32.xlu0 %v13143_v42, %s14055_s28  ;;  %s14090_s28 = smov 72  }
0x1cfa   : > { %5593 = vrot.lane.b32.xlu0 %v13140_v41, %s14051_s2 }
0x1d69   : > { %v5434_v32 = vpop.xlane.xlu0 %5433 }
0x1d6a   : > { %v5435_v33 = vsub.f32 %v5428_v23, %v5434_v32 }
0x1d6c   : > { %v5436_v34 = vmul.f32 1.442695, %v5435_v33 }
0x1d6d   : > { %v5444_v38 = vpop.permute.xlu0 %5443 }
0x1d6e   : > { %12073 = vpow2.f32 %v5436_v34  ;;  %11730 = vmatpush3.msra.mxu1 %v5444_v38  ;;  %v4875_v38 = vld [vmem:[%s14085_s16 + $0x20] sm:$0xff] }
0x1d6f   : > { %11739 = vmatprep.subr.mxu1 %v12179_v4 }
0x1d71   : > { %v5594_v24 = vpop.permute.xlu0 %5593 }
0x1d7b   : > { %v12074_v35 = vpop.eup %12073 }
0x1d7c   : > { %v5438_v43 = vsel %vm1171_vm2, %v12074_v35, 0.0 }
0x1d7d   : > { %5439 = vadd.xlane.f32.xlu1 %v5438_v43 }
0x1d8e   : > { %5595 = vrot.lane.b32.xlu1 %v13133_v46, %s14049_s7  ;;  %s14086_s7 = smov 32  }
0x1e06   : > { %v5440_v36 = vpop.xlane.xlu1 %5439 }
0x1e07   : > { %12075 = vrcp.f32 %v5440_v36 }
0x1e0a   : > { %v5596_v44 = vpop.permute.xlu1 %5595 }
0x1e14   : > { %v12076_v39 = vpop.eup %12075 }
0x1e15   : > { %v5442_v40 = vmul.f32 %v12076_v39, %v12074_v35 }
0x1e17   : > { %11732 = vmatmul.mubr.msk.f32.vlgmr.msra.gmra.mxu1 %vm1171_vm2, %v5442_v40 }
0x1e18   : > { %11740 = vmatpush3.xpose.msk.msra.mxu1 %vm1171_vm2, %v5596_v44  ;;  %11741 = vmatprep.mubr.msk.f32.mxu1 %vm12180_vm1, %v12179_v4 }
0x1e19   : > { %11749 = vmatprep.subr.mxu1 %v12179_v4 }
0x1e1b   : > { %11742 = vmatmul.mubr.msk.f32.vlgmr.msra.gmra.mxu1 %vm1171_vm2, %v5594_v24 }
0x1e1c   : > { %11751 = vmatprep.mubr.msk.f32.mxu1 %vm12180_vm1, %v12179_v4  ;;  %11750 = vmatpush3.msra.mxu1 %v4874_v8 }
0x1e1d   : > { %11759 = vmatprep.subr.mxu1 %v12179_v4 }
0x1ed7   : > { %v5515_v29 = vpop.f32.mrf.mxu1 }
0x1ed8   : > { %11737 = vmatmul.mubr.msk.f32.vlgmr.msra.gmra.mxu0 %vm1171_vm2, %v5515_v29 }
0x1ed9   : > { %v11733_v50 = vpop.f32.mrf.mxu1  ;;  %11746 = vmatprep.mubr.msk.f32.mxu0 %vm12180_vm1, %v12179_v4 }
0x1edb   : > { %v5667_v51 = vpop.f32.mrf.mxu1 }
0x1edc   : > { %v5671_v52 = vsel %vm1171_vm2, %v5667_v51, -inf }
0x1edd   : > { %5672 = vmax.xlane.f32.xlu0 %v5671_v52  ;;  %v11743_v53 = vpop.f32.mrf.mxu1 }
0x1ef3   : > { %5682 = vrot.lane.b32.xlu0 %v13143_v42, %s14051_s2  ;;  %s14088_s2 = smov 88  }
0x1ef7   : > { %5832 = vrot.lane.b32.xlu0 %v13140_v41, %s14053_s10 }
0x1f66   : > { %v5673_v54 = vpop.xlane.xlu0 %5672 }
0x1f67   : > { %v5674_v55 = vsub.f32 %v5667_v51, %v5673_v54 }
0x1f69   : > { %v5675_v56 = vmul.f32 1.442695, %v5674_v55 }
0x1f6a   : > { %v5683_v58 = vpop.permute.xlu0 %5682 }
0x1f6b   : > { %12077 = vpow2.f32 %v5675_v56  ;;  %11745 = vmatpush3.msra.mxu0 %v5683_v58 }
0x1f6c   : > { %11754 = vmatprep.subr.mxu0 %v12179_v4 }
0x1f6e   : > { %v5833_v7 = vpop.permute.xlu0 %5832 }
0x1f78   : > { %v12078_v59 = vpop.eup %12077 }
0x1f79   : > { %v5677_v60 = vsel %vm1171_vm2, %v12078_v59, 0.0 }
0x1f7a   : > { %5678 = vadd.xlane.f32.xlu1 %v5677_v60 }
0x1f8b   : > { %5834 = vrot.lane.b32.xlu1 %v13133_v46, %s14086_s7 }
0x1f98   : > { %v5588_v1 = vpop.f32.mrf.mxu0 }
0x1f99   : > { %v5592_v2 = vadd.f32 %v5588_v1, %v5351_v61  ;;  %v4876_v61 = vld [vmem:[%s14085_s16 + $0x28] sm:$0xff] }
0x1f9a   : > { %v11738_v30 = vpop.f32.mrf.mxu0 }
0x2003   : > { %v5679_v3 = vpop.xlane.xlu1 %5678 }
0x2004   : > { %12079 = vrcp.f32 %v5679_v3 }
0x2007   : > { %v5835_v19 = vpop.permute.xlu1 %5834 }
0x2011   : > { %v12080_v5 = vpop.eup %12079 }
0x2012   : > { %v5681_v6 = vmul.f32 %v12080_v5, %v12078_v59 }
0x2014   : > { %11747 = vmatmul.mubr.msk.f32.vlgmr.msra.gmra.mxu0 %vm1171_vm2, %v5681_v6 }
0x2015   : > { %11755 = vmatpush3.xpose.msk.msra.mxu0 %vm1171_vm2, %v5835_v19  ;;  %11756 = vmatprep.mubr.msk.f32.mxu0 %vm12180_vm1, %v12179_v4 }
0x2016   : > { %11764 = vmatprep.subr.mxu0 %v12179_v4 }
0x2018   : > { %11757 = vmatmul.mubr.msk.f32.vlgmr.msra.gmra.mxu0 %vm1171_vm2, %v5833_v7 }
0x2019   : > { %11766 = vmatprep.mubr.msk.f32.mxu0 %vm12180_vm1, %v12179_v4  ;;  %11765 = vmatpush3.msra.mxu0 %v4875_v38 }
0x201a   : > { %11774 = vmatprep.subr.mxu0 %v12179_v4 }
0x20d4   : > { %v5754_v28 = vpop.f32.mrf.mxu0 }
0x20d5   : > { %11752 = vmatmul.mubr.msk.f32.vlgmr.msra.gmra.mxu1 %vm1171_vm2, %v5754_v28 }
0x20d6   : > { %v11748_v31 = vpop.f32.mrf.mxu0  ;;  %11761 = vmatprep.mubr.msk.f32.mxu1 %vm12180_vm1, %v12179_v4 }
0x20d8   : > { %v5906_v9 = vpop.f32.mrf.mxu0 }
0x20d9   : > { %v5910_v10 = vsel %vm1171_vm2, %v5906_v9, -inf }
0x20da   : > { %5911 = vmax.xlane.f32.xlu1 %v5910_v10  ;;  %v11758_v11 = vpop.f32.mrf.mxu0 }
0x20eb   : > { %6073 = vrot.lane.b32.xlu1 %v13133_v46, %s14087_s1 }
0x20ef   : > { %6071 = vrot.lane.b32.xlu1 %v13140_v41, %s14088_s2 }
0x2163   : > { %v5912_v12 = vpop.xlane.xlu1 %5911 }
0x2164   : > { %v5913_v13 = vsub.f32 %v5906_v9, %v5912_v12 }
0x2166   : > { %v5914_v15 = vmul.f32 1.442695, %v5913_v13 }
0x2167   : > { %v6074_v32 = vpop.permute.xlu1 %6073 }
0x2168   : > { %12081 = vpow2.f32 %v5914_v15 }
0x216b   : > { %v6072_v34 = vpop.permute.xlu1 %6071 }
0x2175   : > { %v12082_v16 = vpop.eup %12081 }
0x2176   : > { %v5916_v48 = vsel %vm1171_vm2, %v12082_v16, 0.0 }
0x2177   : > { %5917 = vadd.xlane.f32.xlu0 %v5916_v48 }
0x218d   : > { %5921 = vrot.lane.b32.xlu0 %v13143_v42, %s14053_s10  ;;  %s14089_s10 = smov 16  }
0x2195   : > { %v5827_v17 = vpop.f32.mrf.mxu1 }
0x2196   : > { %v5831_v22 = vadd.f32 %v5827_v17, %v5592_v2 }
0x2197   : > { %v11753_v14 = vpop.f32.mrf.mxu1 }
0x2200   : > { %v5918_v23 = vpop.xlane.xlu0 %5917 }
0x2201   : > { %12083 = vrcp.f32 %v5918_v23 }
0x2204   : > { %v5922_v26 = vpop.permute.xlu0 %5921 }
0x2205   : > { %11760 = vmatpush3.msra.mxu1 %v5922_v26 }
0x2206   : > { %11769 = vmatprep.subr.mxu1 %v12179_v4 }
0x220e   : > { %v12084_v27 = vpop.eup %12083 }
0x220f   : > { %v5920_v33 = vmul.f32 %v12084_v27, %v12082_v16  ;;  %v4877_v16 = vld [vmem:[%s14085_s16 + $0x30] sm:$0xff] }
0x2211   : > { %11762 = vmatmul.mubr.msk.f32.vlgmr.msra.gmra.mxu1 %vm1171_vm2, %v5920_v33 }
0x2212   : > { %11770 = vmatpush3.xpose.msk.msra.mxu1 %vm1171_vm2, %v6074_v32  ;;  %11771 = vmatprep.mubr.msk.f32.mxu1 %vm12180_vm1, %v12179_v4 }
0x2213   : > { %11779 = vmatprep.subr.mxu1 %v12179_v4 }
0x2215   : > { %11772 = vmatmul.mubr.msk.f32.vlgmr.msra.gmra.mxu1 %vm1171_vm2, %v6072_v34 }
0x2216   : > { %11781 = vmatprep.mubr.msk.f32.mxu1 %vm12180_vm1, %v12179_v4  ;;  %11780 = vmatpush3.msra.mxu1 %v4876_v61 }
0x2217   : > { %11789 = vmatprep.subr.mxu1 %v12179_v4 }
0x22d1   : > { %v5993_v35 = vpop.f32.mrf.mxu1 }
0x22d2   : > { %11767 = vmatmul.mubr.msk.f32.vlgmr.msra.gmra.mxu0 %vm1171_vm2, %v5993_v35  ;;  %v4738_v35 = vadd.f32 %v13129_v37, %v12651_v0 }
0x22d3   : > { %v11763_v43 = vpop.f32.mrf.mxu1  ;;  %11776 = vmatprep.mubr.msk.f32.mxu0 %vm12180_vm1, %v12179_v4 }
0x22d4   : > { %v4741_v43 = vsel %vm1084_vm0, %v4738_v35, 0.0 }
0x22d5   : > { %v6145_v36 = vpop.f32.mrf.mxu1 }
0x22d6   : > { %v6149_v39 = vsel %vm1171_vm2, %v6145_v36, -inf }
0x22d7   : > { %6150 = vmax.xlane.f32.xlu0 %v6149_v39  ;;  %v11773_v40 = vpop.f32.mrf.mxu1 }
0x22ed   : > { %6160 = vrot.lane.b32.xlu0 %v13143_v42, %s14088_s2 }
0x22f1   : > { %6310 = vrot.lane.b32.xlu0 %v13140_v41, %s14058_s18 }
0x2360   : > { %v6151_v44 = vpop.xlane.xlu0 %6150 }
0x2361   : > { %v6152_v24 = vsub.f32 %v6145_v36, %v6151_v44  ;;  %v4878_v36 = vld [vmem:[%s14085_s16 + $0x38] sm:$0xff] }
0x2363   : > { %v6153_v45 = vmul.f32 1.442695, %v6152_v24 }
0x2364   : > { %v6161_v29 = vpop.permute.xlu0 %6160 }
0x2365   : > { %12085 = vpow2.f32 %v6153_v45  ;;  %11775 = vmatpush3.msra.mxu0 %v6161_v29 }
0x2366   : > { %11784 = vmatprep.subr.mxu0 %v12179_v4 }
0x2368   : > { %v6311_v60 = vpop.permute.xlu0 %6310 }
0x2372   : > { %v12086_v50 = vpop.eup %12085 }
0x2373   : > { %v6155_v51 = vsel %vm1171_vm2, %v12086_v50, 0.0 }
0x2374   : > { %6156 = vadd.xlane.f32.xlu1 %v6155_v51 }
0x2385   : > { %6312 = vrot.lane.b32.xlu1 %v13133_v46, %s14089_s10 }
0x2392   : > { %v6066_v52 = vpop.f32.mrf.mxu0 }
0x2393   : > { %v6070_v53 = vadd.f32 %v6066_v52, %v5831_v22 }
0x2394   : > { %v11768_v54 = vpop.f32.mrf.mxu0 }
0x23fd   : > { %v6157_v55 = vpop.xlane.xlu1 %6156 }
0x23fe   : > { %12087 = vrcp.f32 %v6157_v55 }
0x2401   : > { %v6313_v59 = vpop.permute.xlu1 %6312 }
0x240b   : > { %v12088_v56 = vpop.eup %12087 }
0x240c   : > { %v6159_v58 = vmul.f32 %v12088_v56, %v12086_v50 }
0x240e   : > { %11777 = vmatmul.mubr.msk.f32.vlgmr.msra.gmra.mxu0 %vm1171_vm2, %v6159_v58 }
0x240f   : > { %11785 = vmatpush3.xpose.msk.msra.mxu0 %vm1171_vm2, %v6313_v59  ;;  %11786 = vmatprep.mubr.msk.f32.mxu0 %vm12180_vm1, %v12179_v4 }
0x2410   : > { %11794 = vmatprep.subr.mxu0 %v12179_v4 }
0x2412   : > { %11787 = vmatmul.mubr.msk.f32.vlgmr.msra.gmra.mxu0 %vm1171_vm2, %v6311_v60 }
0x2413   : > { %11796 = vmatprep.mubr.msk.f32.mxu0 %vm12180_vm1, %v12179_v4  ;;  %11795 = vmatpush3.msra.mxu0 %v4877_v16 }
0x2414   : > { %11804 = vmatprep.subr.mxu0 %v12179_v4 }
0x24ce   : > { %v6232_v1 = vpop.f32.mrf.mxu0 }
0x24cf   : > { %11782 = vmatmul.mubr.msk.f32.vlgmr.msra.gmra.mxu1 %vm1171_vm2, %v6232_v1 }
0x24d0   : > { %v11778_v2 = vpop.f32.mrf.mxu0  ;;  %11791 = vmatprep.mubr.msk.f32.mxu1 %vm12180_vm1, %v12179_v4 }
0x24d2   : > { %v6384_v30 = vpop.f32.mrf.mxu0 }
0x24d3   : > { %v6388_v3 = vsel %vm1171_vm2, %v6384_v30, -inf }
0x24d4   : > { %6389 = vmax.xlane.f32.xlu1 %v6388_v3  ;;  %v11788_v5 = vpop.f32.mrf.mxu0 }
0x24e5   : > { %6551 = vrot.lane.b32.xlu1 %v13133_v46, %s14057_s11  ;;  %s14091_s11 = sld [smem:[#allocation7_spill]] }
0x24e9   : > { %6549 = vrot.lane.b32.xlu1 %v13140_v41, %s14090_s28 }
0x24eb   : > { %v10797_v52 = vld [vmem:[%s14091_s11] ss:$0 sm:$0xff]  ;;  %s14093_s11 = sld [smem:[#allocation4_spill]] }
0x255d   : > { %v6390_v6 = vpop.xlane.xlu1 %6389 }
0x255e   : > { %v6391_v19 = vsub.f32 %v6384_v30, %v6390_v6 }
0x2560   : > { %v6392_v7 = vmul.f32 1.442695, %v6391_v19 }
0x2561   : > { %v6552_v12 = vpop.permute.xlu1 %6551 }
0x2562   : > { %12089 = vpow2.f32 %v6392_v7 }
0x2565   : > { %v6550_v15 = vpop.permute.xlu1 %6549 }
0x256f   : > { %v12090_v8 = vpop.eup %12089 }
0x2570   : > { %v6394_v28 = vsel %vm1171_vm2, %v12090_v8, 0.0 }
0x2571   : > { %6395 = vadd.xlane.f32.xlu0 %v6394_v28 }
0x2587   : > { %6399 = vrot.lane.b32.xlu0 %v13143_v42, %s14058_s18  ;;  %s14092_s18 = sld [smem:[#allocation12_spill]] }
0x258d   : > { %v6921_v1 = vld [vmem:[%s14092_s18 + $0x38] sm:$0xff]  ;;  %v6920_v2 = vld [vmem:[%s14092_s18 + $0x30] sm:$0xff]  ;;  %v6918_v30 = vld [vmem:[%s14092_s18 + $0x20] sm:$0xff] }
0x258e   : > { %v6917_v3 = vld [vmem:[%s14092_s18 + $0x18] sm:$0xff]  ;;  %v6916_v5 = vld [vmem:[%s14092_s18 + $0x10] sm:$0xff]  ;;  %v6915_v6 = vld [vmem:[%s14092_s18 + $0x8] sm:$0xff] }
0x258f   : > { %v6305_v31 = vpop.f32.mrf.mxu1  ;;  %v6914_v19 = vld [vmem:[%s14092_s18] sm:$0xff] }
0x2590   : > { %v6309_v9 = vadd.f32 %v6305_v31, %v6070_v53 }
0x2591   : > { %v11783_v10 = vpop.f32.mrf.mxu1 }
0x25fa   : > { %v6396_v11 = vpop.xlane.xlu0 %6395 }
0x25fb   : > { %12091 = vrcp.f32 %v6396_v11 }
0x25fe   : > { %v6400_v46 = vpop.permute.xlu0 %6399 }
0x25ff   : > { %11790 = vmatpush3.msra.mxu1 %v6400_v46 }
0x2600   : > { %11799 = vmatprep.subr.mxu1 %v12179_v4 }
0x2608   : > { %v12092_v41 = vpop.eup %12091 }
0x2609   : > { %v6398_v13 = vmul.f32 %v12092_v41, %v12090_v8 }
0x260b   : > { %11792 = vmatmul.mubr.msk.f32.vlgmr.msra.gmra.mxu1 %vm1171_vm2, %v6398_v13 }
0x260c   : > { %11800 = vmatpush3.xpose.msk.msra.mxu1 %vm1171_vm2, %v6552_v12  ;;  %11801 = vmatprep.mubr.msk.f32.mxu1 %vm12180_vm1, %v12179_v4  ;;  %v10762_v12 = vld [vmem:[%s14093_s11] ss:$0 sm:$0xff]  ;;  %s14097_s11 = sld [smem:[#allocation9_spill]] }
0x260d   : > { %11809 = vmatprep.subr.mxu1 %v12179_v4 }
0x260f   : > { %11802 = vmatmul.mubr.msk.f32.vlgmr.msra.gmra.mxu1 %vm1171_vm2, %v6550_v15  ;;  %v10763_v15 = vld [vmem:[%s14094_s23] ss:$0 sm:$0xff]  ;;  %s14096_s23 = sld [smem:[#allocation8_spill]] }
0x2610   : > { %11811 = vmatprep.mubr.msk.f32.mxu1 %vm12180_vm1, %v12179_v4  ;;  %11810 = vmatpush3.msra.mxu1 %v4878_v36 }
0x2611   : > { %11833 = vmatprep.subr.mxu1 %v12179_v4 }
0x2615   : > { %v10798_v36 = vld [vmem:[%s14096_s23] ss:$0 sm:$0xff]  ;;  %s14104_s23 = sld [smem:[#allocation14_spill]] }
0x26cb   : > { %v6471_v48 = vpop.f32.mrf.mxu1 }
0x26cc   : > { %11797 = vmatmul.mubr.msk.f32.vlgmr.msra.gmra.mxu0 %vm1171_vm2, %v6471_v48 }
0x26cd   : > { %v11793_v17 = vpop.f32.mrf.mxu1  ;;  %11806 = vmatprep.mubr.msk.f32.mxu0 %vm12180_vm1, %v12179_v4 }
0x26ce   : > { %v6833_v17 = vld [vmem:[%s14095_s22 + $0x38] sm:$0xff] }
0x26cf   : > { %v6623_v22 = vpop.f32.mrf.mxu1 }
0x26d0   : > { %v6627_v14 = vsel %vm1171_vm2, %v6623_v22, -inf }
0x26d1   : > { %6628 = vmax.xlane.f32.xlu0 %v6627_v14  ;;  %v11803_v23 = vpop.f32.mrf.mxu1  ;;  %v6831_v14 = vld [vmem:[%s14095_s22 + $0x28] sm:$0xff] }
0x26d2   : > { %v6830_v23 = vld [vmem:[%s14095_s22 + $0x20] sm:$0xff] }
0x26e7   : > { %6638 = vrot.lane.b32.xlu0 %v13143_v42, %s14090_s28 }
0x275a   : > { %v6629_v26 = vpop.xlane.xlu0 %6628 }
0x275b   : > { %v6630_v27 = vsub.f32 %v6623_v22, %v6629_v26  ;;  %v6832_v22 = vld [vmem:[%s14095_s22 + $0x30] sm:$0xff]  ;;  %v6829_v26 = vld [vmem:[%s14095_s22 + $0x18] sm:$0xff] }
0x275d   : > { %v6631_v32 = vmul.f32 1.442695, %v6630_v27  ;;  %v6828_v27 = vld [vmem:[%s14095_s22 + $0x10] sm:$0xff] }
0x275e   : > { %v6639_v33 = vpop.permute.xlu0 %6638 }
0x275f   : > { %12093 = vpow2.f32 %v6631_v32  ;;  %11805 = vmatpush3.msra.mxu0 %v6639_v33  ;;  %v6827_v32 = vld [vmem:[%s14095_s22 + $0x8] sm:$0xff]  ;;  %v6826_v33 = vld [vmem:[%s14095_s22] sm:$0xff] }
0x2760   : > { %11814 = vmatprep.subr.mxu0 %v12179_v4 }
0x276c   : > { %v12094_v34 = vpop.eup %12093 }
0x276d   : > { %v6633_v38 = vsel %vm1171_vm2, %v12094_v34, 0.0 }
0x276e   : > { %6634 = vadd.xlane.f32.xlu1 %v6633_v38 }
0x2772   : > { %4742 = vadd.xlane.f32.xlu1 %v4741_v43 }
0x278c   : > { %v6544_v42 = vpop.f32.mrf.mxu0 }
0x278d   : > { %v6548_v39 = vadd.f32 %v6544_v42, %v6309_v9 }
0x278e   : > { %v11798_v40 = vpop.f32.mrf.mxu0 }
0x27f7   : > { %v6635_v44 = vpop.xlane.xlu1 %6634 }
0x27f8   : > { %12095 = vrcp.f32 %v6635_v44 }
0x27fb   : > { %v4743_v29 = vpop.xlane.xlu1 %4742 }
0x27fc   : > { %v4744_v50 = vmul.f32 0.015625, %v4743_v29  ;;  %v10800_v29 = vld [vmem:[%s14099_s3] ss:$0 sm:$0xff]  ;;  %s14102_s3 = smov 64  }
0x27fe   : > { %v4745_v55 = vsub.f32 %v4738_v35, %v4744_v50 }
0x2800   : > { %v4746_v60 = vmul.f32 %v4745_v55, %v4745_v55 }
0x2802   : > { %v4747_v61 = vsel %vm1084_vm0, %v4746_v60, 0.0 }
0x2805   : > { %v12096_v24 = vpop.eup %12095 }
0x2806   : > { %v6637_v45 = vmul.f32 %v12096_v24, %v12094_v34  ;;  %v10802_v24 = vld [vmem:[%s14098_s26] ss:$0 sm:$0xff]  ;;  %s14103_s26 = smov 112  }
0x2808   : > { %11807 = vmatmul.mubr.msk.f32.vlgmr.msra.gmra.mxu0 %vm1171_vm2, %v6637_v45 }
0x2809   : > { %11830 = vmatprep.mubr.msk.f32.mxu0 %vm12180_vm1, %v12179_v4  ;;  %11815 = vmatpush3.msra.mxu0 %v6833_v17 }
0x280a   : > { %11816 = vmatprep.subr.mxu0 %v12179_v4 }
0x280b   : > { %11817 = vmatpush3.msra.mxu0 %v6832_v22 }
0x280c   : > { %11818 = vmatprep.subr.mxu0 %v12179_v4 }
0x280d   : > { %11819 = vmatpush3.msra.mxu0 %v6831_v14 }
0x280e   : > { %11820 = vmatprep.subr.mxu0 %v12179_v4 }
0x280f   : > { %11821 = vmatpush3.msra.mxu0 %v6830_v23 }
0x2810   : > { %11822 = vmatprep.subr.mxu0 %v12179_v4 }
0x2811   : > { %11823 = vmatpush3.msra.mxu0 %v6829_v26 }
0x2812   : > { %11824 = vmatprep.subr.mxu0 %v12179_v4 }
0x2813   : > { %11825 = vmatpush3.msra.mxu0 %v6828_v27 }
0x2814   : > { %11826 = vmatprep.subr.mxu0 %v12179_v4 }
0x2815   : > { %11827 = vmatpush3.msra.mxu0 %v6827_v32 }
0x2816   : > { %11828 = vmatprep.subr.mxu0 %v12179_v4 }
0x2817   : > { %11829 = vmatpush3.msra.mxu0 %v6826_v33 }
0x2818   : > { %11852 = vmatprep.subr.mxu0 %v12179_v4 }
0x28c8   : > { %v6710_v0 = vpop.f32.mrf.mxu0 }
0x28c9   : > { %11812 = vmatmul.mubr.msk.f32.vlgmr.msra.gmra.mxu1 %vm1171_vm2, %v6710_v0 }
0x28ca   : > { %v11808_v37 = vpop.f32.mrf.mxu0  ;;  %11849 = vmatprep.mubr.msk.f32.mxu1 %vm12180_vm1, %v12179_v4  ;;  %11834 = vmatpush3.msra.mxu1 %v6921_v1 }
0x28cb   : > { %11835 = vmatprep.subr.mxu1 %v12179_v4 }
0x28cc   : > { %11836 = vmatpush3.msra.mxu1 %v6920_v2 }
0x28cd   : > { %11837 = vmatprep.subr.mxu1 %v12179_v4 }
0x2989   : > { %v6783_v51 = vpop.f32.mrf.mxu1 }
0x298a   : > { %v6787_v53 = vadd.f32 %v6783_v51, %v6548_v39  ;;  %v10799_v39 = vld [vmem:[%s14097_s11] ss:$0 sm:$0xff]  ;;  %s14105_s11 = smov 104  }
0x298b   : > { %v11813_v54 = vpop.f32.mrf.mxu1 }
0x298c   : > { %v6795_v56 = vadd.f32 %v10797_v52, %v6787_v53 }
0x298e   : > { %v6796_v58 = vadd.f32 %v6795_v56, %v13121_v57  ;;  %v6919_v57 = vld [vmem:[%s14092_s18 + $0x28] sm:$0xff] }
0x298f   : > { %11838 = vmatpush3.msra.mxu1 %v6919_v57 }
0x2990   : > { %v6799_v59 = vsel %vm1084_vm0, %v6796_v58, 0.0  ;;  %11839 = vmatprep.subr.mxu1 %v12179_v4 }
0x2991   : > { %6800 = vadd.xlane.f32.xlu1 %v6799_v59  ;;  %11840 = vmatpush3.msra.mxu1 %v6918_v30 }
0x2992   : > { %11841 = vmatprep.subr.mxu1 %v12179_v4 }
0x2993   : > { %11842 = vmatpush3.msra.mxu1 %v6917_v3 }
0x2994   : > { %11843 = vmatprep.subr.mxu1 %v12179_v4 }
0x2995   : > { %4748 = vadd.xlane.f32.xlu1 %v4747_v61  ;;  %11844 = vmatpush3.msra.mxu1 %v6916_v5 }
0x2996   : > { %11845 = vmatprep.subr.mxu1 %v12179_v4 }
0x2997   : > { %11846 = vmatpush3.msra.mxu1 %v6915_v6 }
0x2998   : > { %11847 = vmatprep.subr.mxu1 %v12179_v4 }
0x2999   : > { %11848 = vmatpush3.msra.mxu1 %v6914_v19 }
0x299a   : > { %11857 = vmatprep.subr.mxu1 %v12179_v4 }
0x2a1a   : > { %v6801_v7 = vpop.xlane.xlu1 %6800 }
0x2a1b   : > { %v6802_v8 = vmul.f32 0.015625, %v6801_v7 }
0x2a1d   : > { %v6803_v28 = vsub.f32 %v6796_v58, %v6802_v8 }
0x2a1e   : > { %v4749_v31 = vpop.xlane.xlu1 %4748 }
0x2a1f   : > { %v4750_v9 = vmul.f32 0.015625, %v4749_v31  ;;  %v6804_v10 = vmul.f32 %v6803_v28, %v6803_v28 }
0x2a21   : > { %v4751_v11 = vadd.f32 1e-05, %v4750_v9  ;;  %v6805_v46 = vsel %vm1084_vm0, %v6804_v10, 0.0 }
0x2a22   : > { %6806 = vadd.xlane.f32.xlu1 %v6805_v46 }
0x2a23   : > { %12097 = vrsqrt.f32 %v4751_v11 }
0x2a30   : > { %v12098_v41 = vpop.eup %12097 }
0x2a31   : > { %v4753_v13 = vmul.f32 %v12098_v41, %v4745_v55 }
0x2a33   : > { %v4760_v16 = vmul.f32 %v10762_v12, %v4753_v13 }
0x2a35   : > { %v4767_v48 = vadd.f32 %v10763_v15, %v4760_v16  ;;  %v7002_v15 = vld [vmem:[%s14104_s23] sm:$0xff]  ;;  %v7003_v16 = vld [vmem:[%s14104_s23 + $0x8] sm:$0xff] }
0x2a37   : > { %11850 = vmatmul.mubr.msk.f32.vlgmr.msra.gmra.mxu1 %vm1084_vm0, %v4767_v48 }
0x2a38   : > { %11859 = vmatprep.mubr.msk.f32.mxu1 %vm12180_vm1, %v12179_v4 }
0x2aab   : > { %v6807_v34 = vpop.xlane.xlu1 %6806 }
0x2aac   : > { %v6808_v38 = vmul.f32 0.015625, %v6807_v34 }
0x2aae   : > { %v6809_v35 = vadd.f32 1e-05, %v6808_v38 }
0x2ab0   : > { %12099 = vrsqrt.f32 %v6809_v35 }
0x2abd   : > { %v12100_v43 = vpop.eup %12099 }
0x2abe   : > { %v6811_v42 = vmul.f32 %v12100_v43, %v6803_v28 }
0x2ac0   : > { %v6818_v40 = vmul.f32 %v10798_v36, %v6811_v42 }
0x2ac2   : > { %v13362_v44 = vadd.f32 %v10799_v39, %v6818_v40 }
0x2ac4   : > { %11831 = vmatmul.mubr.msk.f32.vlgmr.msra.gmra.mxu0 %vm1084_vm0, %v13362_v44 }
0x2ac5   : > { %11854 = vmatprep.mubr.msk.f32.mxu0 %vm12180_vm1, %v12179_v4 }
0x2af7   : > { %v6998_v45 = vpop.f32.mrf.mxu1 }
0x2af8   : > { %v13369_v0 = vadd.f32 %v10802_v24, %v6998_v45 }
0x2af9   : > { %v11851_v37 = vpop.f32.mrf.mxu1 }
0x2afa   : > { %7176 = vrot.lane.b32.xlu0 %v13369_v0, %s14100_s5  ;;  %11853 = vmatpush3.xpose.msk.msra.mxu0 %vm1171_vm2, %v13369_v0 }
0x2afb   : > { %11862 = vmatprep.subr.mxu0 %v12179_v4 }
0x2b6c   : > { %v7177_v54 = vpop.permute.xlu0 %7176 }
0x2b84   : > { %v6910_v50 = vpop.f32.mrf.mxu0 }
0x2b85   : > { %v6911_v51 = vadd.f32 %v10800_v29, %v6910_v50 }
0x2b86   : > { %v11832_v52 = vpop.f32.mrf.mxu0 }
0x2b87   : > { %v13377_v53 = vmul.f32 0.35355338, %v6911_v51 }
0x2b89   : > { %7174 = vrot.lane.b32.xlu1 %v13377_v53, %s14100_s5  ;;  %11855 = vmatmul.mubr.msk.f32.vlgmr.msra.gmra.mxu0 %vm1171_vm2, %v13377_v53  ;;  %s14101_s5 = smov 56  }
0x2b8a   : > { %11863 = vmatpush3.xpose.msk.msra.mxu0 %vm1171_vm2, %v7177_v54  ;;  %11864 = vmatprep.mubr.msk.f32.mxu0 %vm12180_vm1, %v12179_v4 }
0x2b8b   : > { %11872 = vmatprep.subr.mxu0 %v12179_v4 }
0x2bfb   : > { %v7175_v55 = vpop.permute.xlu1 %7174 }
0x2bfc   : > { %11865 = vmatmul.mubr.msk.f32.vlgmr.msra.gmra.mxu0 %vm1171_vm2, %v7175_v55  ;;  %v7004_v55 = vld [vmem:[%s14104_s23 + $0x10] sm:$0xff] }
0x2bfd   : > { %11874 = vmatprep.mubr.msk.f32.mxu0 %vm12180_vm1, %v12179_v4  ;;  %11873 = vmatpush3.msra.mxu0 %v7003_v16 }
0x2bfe   : > { %11882 = vmatprep.subr.mxu0 %v12179_v4 }
0x2c49   : > { %v7083_v56 = vpop.f32.mrf.mxu0 }
0x2c4a   : > { %v7087_v58 = vsel %vm1171_vm2, %v7083_v56, -inf }
0x2c4b   : > { %7088 = vmax.xlane.f32.xlu0 %v7087_v58  ;;  %v11856_v59 = vpop.f32.mrf.mxu0 }
0x2cbc   : > { %v7248_v60 = vpop.f32.mrf.mxu0 }
0x2cbd   : > { %v7252_v61 = vsel %vm1171_vm2, %v7248_v60, -inf }
0x2cbe   : > { %7253 = vmax.xlane.f32.xlu1 %v7252_v61  ;;  %v11866_v1 = vpop.f32.mrf.mxu0 }
0x2ccf   : > { %7263 = vrot.lane.b32.xlu1 %v13369_v0, %s14101_s5  ;;  %s14106_s5 = smov 48  }
0x2cd4   : > { %v7089_v2 = vpop.xlane.xlu0 %7088 }
0x2cd5   : > { %v7090_v57 = vsub.f32 %v7083_v56, %v7089_v2 }
0x2cd7   : > { %v7091_v30 = vmul.f32 1.442695, %v7090_v57 }
0x2cd9   : > { %12101 = vpow2.f32 %v7091_v30 }
0x2ce6   : > { %v12102_v3 = vpop.eup %12101 }
0x2ce7   : > { %v7093_v5 = vsel %vm1171_vm2, %v12102_v3, 0.0 }
0x2ce8   : > { %7094 = vadd.xlane.f32.xlu0 %v7093_v5 }
0x2d47   : > { %v7254_v6 = vpop.xlane.xlu1 %7253 }
0x2d48   : > { %v7255_v19 = vsub.f32 %v7248_v60, %v7254_v6 }
0x2d4a   : > { %v7256_v7 = vmul.f32 1.442695, %v7255_v19 }
0x2d4b   : > { %v7264_v41 = vpop.permute.xlu1 %7263 }
0x2d4c   : > { %12103 = vpow2.f32 %v7256_v7 }
0x2d59   : > { %v12104_v8 = vpop.eup %12103 }
0x2d5a   : > { %v7258_v28 = vsel %vm1171_vm2, %v12104_v8, 0.0 }
0x2d5b   : > { %7259 = vadd.xlane.f32.xlu0 %v7258_v28 }
0x2d71   : > { %7098 = vrot.lane.b32.xlu0 %v13369_v0, %s14102_s3  ;;  %v7095_v31 = vpop.xlane.xlu0 %7094  ;;  %s14107_s3 = smov 40  }
0x2d72   : > { %12105 = vrcp.f32 %v7095_v31 }
0x2d75   : > { %7487 = vrot.lane.b32.xlu0 %v13369_v0, %s14103_s26 }
0x2d79   : > { %7485 = vrot.lane.b32.xlu0 %v13377_v53, %s14103_s26  ;;  %s14108_s26 = smov 96  }
0x2d7f   : > { %v12106_v10 = vpop.eup %12105 }
0x2d80   : > { %v7097_v46 = vmul.f32 %v12106_v10, %v12102_v3 }
0x2de4   : > { %v7260_v9 = vpop.xlane.xlu0 %7259 }
0x2de5   : > { %12107 = vrcp.f32 %v7260_v9 }
0x2de8   : > { %v7099_v11 = vpop.permute.xlu0 %7098 }
0x2de9   : > { %11858 = vmatpush3.msra.mxu1 %v7099_v11  ;;  %v7005_v11 = vld [vmem:[%s14104_s23 + $0x18] sm:$0xff] }
0x2dea   : > { %11860 = vmatmul.mubr.msk.f32.vlgmr.msra.gmra.mxu1 %vm1171_vm2, %v7097_v46  ;;  %11867 = vmatprep.subr.mxu1 %v12179_v4 }
0x2deb   : > { %11868 = vmatpush3.msra.mxu1 %v7264_v41  ;;  %11869 = vmatprep.mubr.msk.f32.mxu1 %vm12180_vm1, %v12179_v4 }
0x2dec   : > { %11877 = vmatprep.subr.mxu1 %v12179_v4  ;;  %v7488_v22 = vpop.permute.xlu0 %7487 }
0x2df0   : > { %v7486_v26 = vpop.permute.xlu0 %7485 }
0x2df2   : > { %v12108_v12 = vpop.eup %12107 }
0x2df3   : > { %v7262_v13 = vmul.f32 %v12108_v12, %v12104_v8 }
0x2df5   : > { %11870 = vmatmul.mubr.msk.f32.vlgmr.msra.gmra.mxu1 %vm1171_vm2, %v7262_v13 }
0x2df6   : > { %11879 = vmatprep.mubr.msk.f32.mxu1 %vm12180_vm1, %v12179_v4  ;;  %11878 = vmatpush3.msra.mxu1 %v7002_v15 }
0x2df7   : > { %11887 = vmatprep.subr.mxu1 %v12179_v4 }
0x2eaa   : > { %v7170_v48 = vpop.f32.mrf.mxu1 }
0x2eab   : > { %11880 = vmatmul.mubr.msk.f32.vlgmr.msra.gmra.mxu1 %vm1171_vm2, %v7170_v48 }
0x2eac   : > { %v11861_v17 = vpop.f32.mrf.mxu1  ;;  %11889 = vmatprep.mubr.msk.f32.mxu1 %vm12180_vm1, %v12179_v4 }
0x2eb5   : > { %v7335_v14 = vpop.f32.mrf.mxu1 }
0x2eb6   : > { %11875 = vmatmul.mubr.msk.f32.vlgmr.msra.gmra.mxu0 %vm1171_vm2, %v7335_v14 }
0x2eb7   : > { %11883 = vmatpush3.xpose.msk.msra.mxu0 %vm1171_vm2, %v7488_v22  ;;  %v11871_v23 = vpop.f32.mrf.mxu1  ;;  %11884 = vmatprep.mubr.msk.f32.mxu0 %vm12180_vm1, %v12179_v4 }
0x2eb8   : > { %11892 = vmatprep.subr.mxu0 %v12179_v4 }
0x2eba   : > { %11885 = vmatmul.mubr.msk.f32.vlgmr.msra.gmra.mxu0 %vm1171_vm2, %v7486_v26 }
0x2ebb   : > { %11894 = vmatprep.mubr.msk.f32.mxu0 %vm12180_vm1, %v12179_v4  ;;  %11893 = vmatpush3.msra.mxu0 %v7004_v55 }
0x2ebc   : > { %11902 = vmatprep.subr.mxu0 %v12179_v4 }
0x2f6b   : > { %v7481_v27 = vpop.f32.mrf.mxu1 }
0x2f6d   : > { %v11881_v32 = vpop.f32.mrf.mxu1 }
0x2f76   : > { %v7408_v33 = vpop.f32.mrf.mxu0 }
0x2f77   : > { %v7482_v34 = vadd.f32 %v7481_v27, %v7408_v33 }
0x2f78   : > { %v11876_v38 = vpop.f32.mrf.mxu0 }
0x2f7a   : > { %v7559_v35 = vpop.f32.mrf.mxu0 }
0x2f7b   : > { %v7563_v43 = vsel %vm1171_vm2, %v7559_v35, -inf }
0x2f7c   : > { %7564 = vmax.xlane.f32.xlu1 %v7563_v43  ;;  %v11886_v36 = vpop.f32.mrf.mxu0 }
0x2f7d   : > { %v7006_v36 = vld [vmem:[%s14104_s23 + $0x20] sm:$0xff] }
0x2f8d   : > { %7726 = vrot.lane.b32.xlu1 %v13369_v0, %s14105_s11 }
0x2f91   : > { %7724 = vrot.lane.b32.xlu1 %v13377_v53, %s14105_s11  ;;  %s14114_s11 = sld [smem:[#allocation17_spill]] }
0x3005   : > { %v7565_v42 = vpop.xlane.xlu1 %7564 }
0x3006   : > { %v7566_v39 = vsub.f32 %v7559_v35, %v7565_v42 }
0x3008   : > { %v7567_v40 = vmul.f32 1.442695, %v7566_v39 }
0x3009   : > { %v7727_v51 = vpop.permute.xlu1 %7726 }
0x300a   : > { %12109 = vpow2.f32 %v7567_v40 }
0x300d   : > { %v7725_v54 = vpop.permute.xlu1 %7724 }
0x3017   : > { %v12110_v24 = vpop.eup %12109 }
0x3018   : > { %v7569_v45 = vsel %vm1171_vm2, %v12110_v24, 0.0 }
0x3019   : > { %7570 = vadd.xlane.f32.xlu0 %v7569_v45 }
0x302f   : > { %7574 = vrot.lane.b32.xlu0 %v13369_v0, %s14106_s5  ;;  %s14115_s5 = sld [smem:[#allocation20_spill]] }
0x30a2   : > { %v7571_v37 = vpop.xlane.xlu0 %7570 }
0x30a3   : > { %12111 = vrcp.f32 %v7571_v37 }
0x30a6   : > { %v7575_v29 = vpop.permute.xlu0 %7574 }
0x30a7   : > { %11888 = vmatpush3.msra.mxu1 %v7575_v29 }
0x30a8   : > { %11897 = vmatprep.subr.mxu1 %v12179_v4 }
0x30b0   : > { %v12112_v50 = vpop.eup %12111 }
0x30b1   : > { %v7573_v52 = vmul.f32 %v12112_v50, %v12110_v24 }
0x30b3   : > { %11890 = vmatmul.mubr.msk.f32.vlgmr.msra.gmra.mxu1 %vm1171_vm2, %v7573_v52 }
0x30b4   : > { %11898 = vmatpush3.xpose.msk.msra.mxu1 %vm1171_vm2, %v7727_v51  ;;  %11899 = vmatprep.mubr.msk.f32.mxu1 %vm12180_vm1, %v12179_v4 }
0x30b5   : > { %11907 = vmatprep.subr.mxu1 %v12179_v4 }
0x30b7   : > { %11900 = vmatmul.mubr.msk.f32.vlgmr.msra.gmra.mxu1 %vm1171_vm2, %v7725_v54 }
0x30b8   : > { %11909 = vmatprep.mubr.msk.f32.mxu1 %vm12180_vm1, %v12179_v4  ;;  %11908 = vmatpush3.msra.mxu1 %v7005_v11 }
0x30b9   : > { %11917 = vmatprep.subr.mxu1 %v12179_v4 }
0x3173   : > { %v7646_v56 = vpop.f32.mrf.mxu1 }
0x3174   : > { %11895 = vmatmul.mubr.msk.f32.vlgmr.msra.gmra.mxu0 %vm1171_vm2, %v7646_v56 }
0x3175   : > { %v11891_v58 = vpop.f32.mrf.mxu1  ;;  %11904 = vmatprep.mubr.msk.f32.mxu0 %vm12180_vm1, %v12179_v4 }
0x3177   : > { %v7798_v59 = vpop.f32.mrf.mxu1 }
0x3178   : > { %v7802_v60 = vsel %vm1171_vm2, %v7798_v59, -inf }
0x3179   : > { %7803 = vmax.xlane.f32.xlu0 %v7802_v60  ;;  %v11901_v61 = vpop.f32.mrf.mxu1 }
0x318f   : > { %7813 = vrot.lane.b32.xlu0 %v13369_v0, %s14107_s3  ;;  %s14116_s3 = sld [smem:[#allocation19_spill]] }
0x3193   : > { %7963 = vrot.lane.b32.xlu0 %v13377_v53, %s14108_s26 }
0x3202   : > { %v7804_v1 = vpop.xlane.xlu0 %7803 }
0x3203   : > { %v7805_v2 = vsub.f32 %v7798_v59, %v7804_v1 }
0x3205   : > { %v7806_v57 = vmul.f32 1.442695, %v7805_v2 }
0x3206   : > { %v7814_v30 = vpop.permute.xlu0 %7813 }
0x3207   : > { %12113 = vpow2.f32 %v7806_v57  ;;  %11903 = vmatpush3.msra.mxu0 %v7814_v30  ;;  %v7007_v57 = vld [vmem:[%s14104_s23 + $0x28] sm:$0xff] }
0x3208   : > { %11912 = vmatprep.subr.mxu0 %v12179_v4 }
0x320a   : > { %v7964_v10 = vpop.permute.xlu0 %7963 }
0x3214   : > { %v12114_v3 = vpop.eup %12113 }
0x3215   : > { %v7808_v5 = vsel %vm1171_vm2, %v12114_v3, 0.0 }
0x3216   : > { %7809 = vadd.xlane.f32.xlu1 %v7808_v5 }
0x3227   : > { %7965 = vrot.lane.b32.xlu1 %v13369_v0, %s14108_s26  ;;  %s1054_s26 = scalar_lea.vmem %s12374_s6, %s12397_s0 }
0x3234   : > { %v7719_v6 = vpop.f32.mrf.mxu0 }
0x3235   : > { %v7723_v19 = vadd.f32 %v7719_v6, %v7482_v34 }
0x3236   : > { %v11896_v7 = vpop.f32.mrf.mxu0 }
0x329f   : > { %v7810_v8 = vpop.xlane.xlu1 %7809 }
0x32a0   : > { %12115 = vrcp.f32 %v7810_v8 }
0x32a3   : > { %v7966_v9 = vpop.permute.xlu1 %7965 }
0x32ad   : > { %v12116_v28 = vpop.eup %12115 }
0x32ae   : > { %v7812_v31 = vmul.f32 %v12116_v28, %v12114_v3 }
0x32b0   : > { %11905 = vmatmul.mubr.msk.f32.vlgmr.msra.gmra.mxu0 %vm1171_vm2, %v7812_v31 }
0x32b1   : > { %11913 = vmatpush3.xpose.msk.msra.mxu0 %vm1171_vm2, %v7966_v9  ;;  %11914 = vmatprep.mubr.msk.f32.mxu0 %vm12180_vm1, %v12179_v4 }
0x32b2   : > { %11922 = vmatprep.subr.mxu0 %v12179_v4 }
0x32b4   : > { %11915 = vmatmul.mubr.msk.f32.vlgmr.msra.gmra.mxu0 %vm1171_vm2, %v7964_v10 }
0x32b5   : > { %11924 = vmatprep.mubr.msk.f32.mxu0 %vm12180_vm1, %v12179_v4  ;;  %11923 = vmatpush3.msra.mxu0 %v7006_v36 }
0x32b6   : > { %11932 = vmatprep.subr.mxu0 %v12179_v4 }
0x3370   : > { %v7885_v46 = vpop.f32.mrf.mxu0 }
0x3371   : > { %11910 = vmatmul.mubr.msk.f32.vlgmr.msra.gmra.mxu1 %vm1171_vm2, %v7885_v46 }
0x3372   : > { %v11906_v41 = vpop.f32.mrf.mxu0  ;;  %11919 = vmatprep.mubr.msk.f32.mxu1 %vm12180_vm1, %v12179_v4 }
0x3374   : > { %v8037_v12 = vpop.f32.mrf.mxu0 }
0x3375   : > { %v8041_v13 = vsel %vm1171_vm2, %v8037_v12, -inf }
0x3376   : > { %8042 = vmax.xlane.f32.xlu1 %v8041_v13  ;;  %v11916_v15 = vpop.f32.mrf.mxu0 }
0x3387   : > { %8204 = vrot.lane.b32.xlu1 %v13369_v0, %s14088_s2 }
0x338b   : > { %8202 = vrot.lane.b32.xlu1 %v13377_v53, %s14088_s2  ;;  %s14109_s2 = smov 80  }
0x33ff   : > { %v8043_v16 = vpop.xlane.xlu1 %8042 }
0x3400   : > { %v8044_v48 = vsub.f32 %v8037_v12, %v8043_v16 }
0x3402   : > { %v8045_v17 = vmul.f32 1.442695, %v8044_v48  ;;  %v7008_v48 = vld [vmem:[%s14104_s23 + $0x30] sm:$0xff] }
0x3403   : > { %v8205_v38 = vpop.permute.xlu1 %8204 }
0x3404   : > { %12117 = vpow2.f32 %v8045_v17 }
0x3407   : > { %v8203_v43 = vpop.permute.xlu1 %8202 }
0x3411   : > { %v12118_v22 = vpop.eup %12117 }
0x3412   : > { %v8047_v14 = vsel %vm1171_vm2, %v12118_v22, 0.0 }
0x3413   : > { %8048 = vadd.xlane.f32.xlu0 %v8047_v14 }
0x3429   : > { %8052 = vrot.lane.b32.xlu0 %v13369_v0, %s14086_s7  ;;  %s14112_s7 = sld [smem:[#allocation18_spill]] }
0x3431   : > { %v7958_v23 = vpop.f32.mrf.mxu1 }
0x3432   : > { %v7962_v26 = vadd.f32 %v7958_v23, %v7723_v19 }
0x3433   : > { %v11911_v27 = vpop.f32.mrf.mxu1 }
0x349c   : > { %v8049_v32 = vpop.xlane.xlu0 %8048 }
0x349d   : > { %12119 = vrcp.f32 %v8049_v32 }
0x34a0   : > { %v8053_v33 = vpop.permute.xlu0 %8052 }
0x34a1   : > { %11918 = vmatpush3.msra.mxu1 %v8053_v33 }
0x34a2   : > { %11927 = vmatprep.subr.mxu1 %v12179_v4 }
0x34aa   : > { %v12120_v34 = vpop.eup %12119 }
0x34ab   : > { %v8051_v35 = vmul.f32 %v12120_v34, %v12118_v22 }
0x34ad   : > { %11920 = vmatmul.mubr.msk.f32.vlgmr.msra.gmra.mxu1 %vm1171_vm2, %v8051_v35 }
0x34ae   : > { %11928 = vmatpush3.xpose.msk.msra.mxu1 %vm1171_vm2, %v8205_v38  ;;  %11929 = vmatprep.mubr.msk.f32.mxu1 %vm12180_vm1, %v12179_v4 }
0x34af   : > { %11937 = vmatprep.subr.mxu1 %v12179_v4 }
0x34b1   : > { %11930 = vmatmul.mubr.msk.f32.vlgmr.msra.gmra.mxu1 %vm1171_vm2, %v8203_v43  ;;  %v7009_v43 = vld [vmem:[%s14104_s23 + $0x38] sm:$0xff] }
0x34b2   : > { %11939 = vmatprep.mubr.msk.f32.mxu1 %vm12180_vm1, %v12179_v4  ;;  %11938 = vmatpush3.msra.mxu1 %v7007_v57  ;;  %v9069_v57 = vld [vmem:[%s14112_s7 + $0x380] sm:$0xff] }
0x34b3   : > { %11947 = vmatprep.subr.mxu1 %v12179_v4 }
0x356d   : > { %v8124_v42 = vpop.f32.mrf.mxu1 }
0x356e   : > { %11925 = vmatmul.mubr.msk.f32.vlgmr.msra.gmra.mxu0 %vm1171_vm2, %v8124_v42 }
0x356f   : > { %v11921_v39 = vpop.f32.mrf.mxu1  ;;  %11934 = vmatprep.mubr.msk.f32.mxu0 %vm12180_vm1, %v12179_v4 }
0x3571   : > { %v8276_v40 = vpop.f32.mrf.mxu1 }
0x3572   : > { %v8280_v24 = vsel %vm1171_vm2, %v8276_v40, -inf }
0x3573   : > { %8281 = vmax.xlane.f32.xlu0 %v8280_v24  ;;  %v11931_v45 = vpop.f32.mrf.mxu1 }
0x3589   : > { %8291 = vrot.lane.b32.xlu0 %v13369_v0, %s14087_s1  ;;  %s14111_s1 = sld [smem:[#allocation15_spill]] }
0x358d   : > { %8441 = vrot.lane.b32.xlu0 %v13377_v53, %s14109_s2 }
0x35fc   : > { %v8282_v37 = vpop.xlane.xlu0 %8281 }
0x35fd   : > { %v8283_v29 = vsub.f32 %v8276_v40, %v8282_v37 }
0x35ff   : > { %v8284_v50 = vmul.f32 1.442695, %v8283_v29 }
0x3600   : > { %v8292_v51 = vpop.permute.xlu0 %8291 }
0x3601   : > { %12121 = vpow2.f32 %v8284_v50  ;;  %11933 = vmatpush3.msra.mxu0 %v8292_v51  ;;  %v10836_v50 = vld [vmem:[%s14111_s1] ss:$0 sm:$0xff] }
0x3602   : > { %11942 = vmatprep.subr.mxu0 %v12179_v4 }
0x3604   : > { %v8442_v2 = vpop.permute.xlu0 %8441 }
0x360e   : > { %v12122_v52 = vpop.eup %12121 }
0x360f   : > { %v8286_v54 = vsel %vm1171_vm2, %v12122_v52, 0.0 }
0x3610   : > { %8287 = vadd.xlane.f32.xlu1 %v8286_v54 }
0x3621   : > { %8443 = vrot.lane.b32.xlu1 %v13369_v0, %s14109_s2 }
0x362e   : > { %v8197_v55 = vpop.f32.mrf.mxu0 }
0x362f   : > { %v8201_v56 = vadd.f32 %v8197_v55, %v7962_v26 }
0x3630   : > { %v11926_v58 = vpop.f32.mrf.mxu0 }
0x3699   : > { %v8288_v59 = vpop.xlane.xlu1 %8287 }
0x369a   : > { %12123 = vrcp.f32 %v8288_v59 }
0x369d   : > { %v8444_v1 = vpop.permute.xlu1 %8443 }
0x36a7   : > { %v12124_v60 = vpop.eup %12123 }
0x36a8   : > { %v8290_v61 = vmul.f32 %v12124_v60, %v12122_v52 }
0x36aa   : > { %11935 = vmatmul.mubr.msk.f32.vlgmr.msra.gmra.mxu0 %vm1171_vm2, %v8290_v61 }
0x36ab   : > { %11943 = vmatpush3.xpose.msk.msra.mxu0 %vm1171_vm2, %v8444_v1  ;;  %11944 = vmatprep.mubr.msk.f32.mxu0 %vm12180_vm1, %v12179_v4 }
0x36ac   : > { %11952 = vmatprep.subr.mxu0 %v12179_v4 }
0x36ae   : > { %11945 = vmatmul.mubr.msk.f32.vlgmr.msra.gmra.mxu0 %vm1171_vm2, %v8442_v2  ;;  %v9070_v2 = vld [vmem:[%s14112_s7 + $0x388] sm:$0xff] }
0x36af   : > { %11954 = vmatprep.mubr.msk.f32.mxu0 %vm12180_vm1, %v12179_v4  ;;  %11953 = vmatpush3.msra.mxu0 %v7008_v48  ;;  %v8989_v48 = vld [vmem:[%s14112_s7 + $0x100] sm:$0xff] }
0x36b0   : > { %11962 = vmatprep.subr.mxu0 %v12179_v4 }
0x376a   : > { %v8363_v30 = vpop.f32.mrf.mxu0 }
0x376b   : > { %11940 = vmatmul.mubr.msk.f32.vlgmr.msra.gmra.mxu1 %vm1171_vm2, %v8363_v30  ;;  %v9071_v30 = vld [vmem:[%s14112_s7 + $0x390] sm:$0xff] }
0x376c   : > { %v11936_v3 = vpop.f32.mrf.mxu0  ;;  %11949 = vmatprep.mubr.msk.f32.mxu1 %vm12180_vm1, %v12179_v4 }
0x376d   : > { %v9054_v3 = vld [vmem:[%s14112_s7 + $0x308] sm:$0xff] }
0x376e   : > { %v8515_v5 = vpop.f32.mrf.mxu0 }
0x376f   : > { %v8519_v6 = vsel %vm1171_vm2, %v8515_v5, -inf }
0x3770   : > { %8520 = vmax.xlane.f32.xlu1 %v8519_v6  ;;  %v11946_v19 = vpop.f32.mrf.mxu0  ;;  %v9053_v6 = vld [vmem:[%s14112_s7 + $0x300] sm:$0xff] }
0x3771   : > { %v9055_v19 = vld [vmem:[%s14112_s7 + $0x310] sm:$0xff] }
0x3781   : > { %8682 = vrot.lane.b32.xlu1 %v13369_v0, %s14090_s28 }
0x3785   : > { %8680 = vrot.lane.b32.xlu1 %v13377_v53, %s14090_s28  ;;  %s14110_s28 = smov 8  }
0x37f9   : > { %v8521_v7 = vpop.xlane.xlu1 %8520 }
0x37fa   : > { %v8522_v8 = vsub.f32 %v8515_v5, %v8521_v7  ;;  %v9056_v5 = vld [vmem:[%s14112_s7 + $0x318] sm:$0xff]  ;;  %v9038_v7 = vld [vmem:[%s14112_s7 + $0x288] sm:$0xff] }
0x37fc   : > { %v8523_v28 = vmul.f32 1.442695, %v8522_v8  ;;  %v9040_v8 = vld [vmem:[%s14112_s7 + $0x298] sm:$0xff] }
0x37fd   : > { %v8683_v13 = vpop.permute.xlu1 %8682 }
0x37fe   : > { %12125 = vpow2.f32 %v8523_v28  ;;  %v9037_v28 = vld [vmem:[%s14112_s7 + $0x280] sm:$0xff] }
0x3801   : > { %v8681_v16 = vpop.permute.xlu1 %8680 }
0x380b   : > { %v12126_v31 = vpop.eup %12125 }
0x380c   : > { %v8525_v9 = vsel %vm1171_vm2, %v12126_v31, 0.0 }
0x380d   : > { %8526 = vadd.xlane.f32.xlu0 %v8525_v9  ;;  %v9022_v9 = vld [vmem:[%s14112_s7 + $0x208] sm:$0xff] }
0x3823   : > { %8530 = vrot.lane.b32.xlu0 %v13369_v0, %s14089_s10  ;;  %s14113_s10 = sld [smem:[#allocation16_spill]] }
0x382b   : > { %v8436_v10 = vpop.f32.mrf.mxu1 }
0x382c   : > { %v8440_v11 = vadd.f32 %v8436_v10, %v8201_v56  ;;  %v9024_v10 = vld [vmem:[%s14112_s7 + $0x218] sm:$0xff] }
0x382d   : > { %v11941_v46 = vpop.f32.mrf.mxu1 }
0x382e   : > { %v9023_v46 = vld [vmem:[%s14112_s7 + $0x210] sm:$0xff] }
0x3896   : > { %v8527_v41 = vpop.xlane.xlu0 %8526 }
0x3897   : > { %12127 = vrcp.f32 %v8527_v41  ;;  %v9006_v41 = vld [vmem:[%s14112_s7 + $0x188] sm:$0xff] }
0x389a   : > { %v8531_v12 = vpop.permute.xlu0 %8530 }
0x389b   : > { %11948 = vmatpush3.msra.mxu1 %v8531_v12  ;;  %v9008_v12 = vld [vmem:[%s14112_s7 + $0x198] sm:$0xff] }
0x389c   : > { %11957 = vmatprep.subr.mxu1 %v12179_v4 }
0x38a4   : > { %v12128_v53 = vpop.eup %12127 }
0x38a5   : > { %v8529_v15 = vmul.f32 %v12128_v53, %v12126_v31  ;;  %v9039_v31 = vld [vmem:[%s14112_s7 + $0x290] sm:$0xff]  ;;  %v9005_v53 = vld [vmem:[%s14112_s7 + $0x180] sm:$0xff] }
0x38a7   : > { %11950 = vmatmul.mubr.msk.f32.vlgmr.msra.gmra.mxu1 %vm1171_vm2, %v8529_v15  ;;  %v8990_v15 = vld [vmem:[%s14112_s7 + $0x108] sm:$0xff] }
0x38a8   : > { %11958 = vmatpush3.xpose.msk.msra.mxu1 %vm1171_vm2, %v8683_v13  ;;  %11959 = vmatprep.mubr.msk.f32.mxu1 %vm12180_vm1, %v12179_v4  ;;  %v9007_v13 = vld [vmem:[%s14112_s7 + $0x190] sm:$0xff] }
0x38a9   : > { %11967 = vmatprep.subr.mxu1 %v12179_v4 }
0x38ab   : > { %11960 = vmatmul.mubr.msk.f32.vlgmr.msra.gmra.mxu1 %vm1171_vm2, %v8681_v16  ;;  %v8992_v16 = vld [vmem:[%s14112_s7 + $0x118] sm:$0xff] }
0x38ac   : > { %11969 = vmatprep.mubr.msk.f32.mxu1 %vm12180_vm1, %v12179_v4  ;;  %11968 = vmatpush3.msra.mxu1 %v7009_v43 }
0x3967   : > { %v8602_v17 = vpop.f32.mrf.mxu1 }
0x3968   : > { %11955 = vmatmul.mubr.msk.f32.vlgmr.msra.gmra.mxu0 %vm1171_vm2, %v8602_v17  ;;  %v8991_v17 = vld [vmem:[%s14112_s7 + $0x110] sm:$0xff] }
0x3969   : > { %v11951_v22 = vpop.f32.mrf.mxu1  ;;  %11964 = vmatprep.mubr.msk.f32.mxu0 %vm12180_vm1, %v12179_v4 }
0x396a   : > { %v8974_v22 = vld [vmem:[%s14112_s7 + $0x88] sm:$0xff] }
0x396b   : > { %v8754_v14 = vpop.f32.mrf.mxu1 }
0x396c   : > { %v8758_v23 = vsel %vm1171_vm2, %v8754_v14, -inf }
0x396d   : > { %8759 = vmax.xlane.f32.xlu0 %v8758_v23  ;;  %v11961_v26 = vpop.f32.mrf.mxu1  ;;  %v8973_v23 = vld [vmem:[%s14112_s7 + $0x80] sm:$0xff] }
0x396e   : > { %v8975_v26 = vld [vmem:[%s14112_s7 + $0x90] sm:$0xff] }
0x3983   : > { %8769 = vrot.lane.b32.xlu0 %v13369_v0, %s14110_s28 }
0x39f6   : > { %v8760_v27 = vpop.xlane.xlu0 %8759 }
0x39f7   : > { %v8761_v32 = vsub.f32 %v8754_v14, %v8760_v27  ;;  %v8976_v14 = vld [vmem:[%s14112_s7 + $0x98] sm:$0xff]  ;;  %v8958_v27 = vld [vmem:[%s14112_s7 + $0x8] sm:$0xff] }
0x39f9   : > { %v8762_v33 = vmul.f32 1.442695, %v8761_v32  ;;  %v8960_v32 = vld [vmem:[%s14112_s7 + $0x18] sm:$0xff] }
0x39fa   : > { %v8770_v34 = vpop.permute.xlu0 %8769 }
0x39fb   : > { %12129 = vpow2.f32 %v8762_v33  ;;  %11963 = vmatpush3.msra.mxu0 %v8770_v34  ;;  %v8957_v33 = vld [vmem:[%s14112_s7] sm:$0xff]  ;;  %v8959_v34 = vld [vmem:[%s14112_s7 + $0x10] sm:$0xff] }
0x39fc   : > { %9188 = vmatprep.subr.mxu0 %v9070_v2  ;;  %v9025_v2 = vld [vmem:[%s14112_s7 + $0x220] sm:$0xff] }
0x3a08   : > { %v12130_v38 = vpop.eup %12129 }
0x3a09   : > { %v8764_v35 = vsel %vm1171_vm2, %v12130_v38, 0.0 }
0x3a0a   : > { %8765 = vadd.xlane.f32.xlu1 %v8764_v35  ;;  %v9076_v35 = vld [vmem:[%s14112_s7 + $0x3b8] sm:$0xff] }
0x3a28   : > { %v8675_v36 = vpop.f32.mrf.mxu0 }
0x3a29   : > { %v8679_v42 = vadd.f32 %v8675_v36, %v8440_v11  ;;  %v9021_v11 = vld [vmem:[%s14112_s7 + $0x200] sm:$0xff] }
0x3a2a   : > { %v11956_v39 = vpop.f32.mrf.mxu0 }
0x3a93   : > { %v8766_v40 = vpop.xlane.xlu1 %8765 }
0x3a94   : > { %12131 = vrcp.f32 %v8766_v40  ;;  %v10837_v40 = vld [vmem:[%s14113_s10] ss:$0 sm:$0xff] }
0x3aa1   : > { %v12132_v24 = vpop.eup %12131 }
0x3aa2   : > { %v8768_v0 = vmul.f32 %v12132_v24, %v12130_v38  ;;  %v9074_v38 = vld [vmem:[%s14112_s7 + $0x3a8] sm:$0xff] }
0x3aa4   : > { %11965 = vmatmul.mubr.msk.f32.vlgmr.msra.gmra.mxu0 %vm1171_vm2, %v8768_v0  ;;  %v10838_v0 = vld [vmem:[%s14114_s11] ss:$0 sm:$0xff] }
0x3aa5   : > { %9236 = vmatprep.mubr.f32.mxu0 %v12179_v4  ;;  %9189 = vmatpush1.msra.mxu0 %v9069_v57  ;;  %v9010_v57 = vld [vmem:[%s14112_s7 + $0x1a8] sm:$0xff] }
0x3aa6   : > { %9190 = vmatprep.subr.mxu0 %v9054_v3  ;;  %v9009_v3 = vld [vmem:[%s14112_s7 + $0x1a0] sm:$0xff] }
0x3aa7   : > { %9191 = vmatpush1.msra.mxu0 %v9053_v6  ;;  %v8994_v6 = vld [vmem:[%s14112_s7 + $0x128] sm:$0xff] }
0x3aa8   : > { %9192 = vmatprep.subr.mxu0 %v9038_v7  ;;  %v8993_v7 = vld [vmem:[%s14112_s7 + $0x120] sm:$0xff] }
0x3aa9   : > { %9193 = vmatpush1.msra.mxu0 %v9037_v28  ;;  %v8978_v28 = vld [vmem:[%s14112_s7 + $0xa8] sm:$0xff] }
0x3aaa   : > { %9194 = vmatprep.subr.mxu0 %v9022_v9  ;;  %v8977_v9 = vld [vmem:[%s14112_s7 + $0xa0] sm:$0xff] }
0x3aab   : > { %9195 = vmatpush1.msra.mxu0 %v9021_v11  ;;  %v8962_v11 = vld [vmem:[%s14112_s7 + $0x28] sm:$0xff] }
0x3aac   : > { %9196 = vmatprep.subr.mxu0 %v9006_v41  ;;  %v8961_v41 = vld [vmem:[%s14112_s7 + $0x20] sm:$0xff] }
0x3aad   : > { %9197 = vmatpush1.msra.mxu0 %v9005_v53  ;;  %v9078_v53 = vld [vmem:[%s14112_s7 + $0x3c8] sm:$0xff] }
0x3aae   : > { %9198 = vmatprep.subr.mxu0 %v8990_v15  ;;  %v9077_v15 = vld [vmem:[%s14112_s7 + $0x3c0] sm:$0xff] }
0x3aaf   : > { %9199 = vmatpush1.msra.mxu0 %v8989_v48  ;;  %v9062_v48 = vld [vmem:[%s14112_s7 + $0x348] sm:$0xff] }
0x3ab0   : > { %9200 = vmatprep.subr.mxu0 %v8974_v22  ;;  %v9061_v22 = vld [vmem:[%s14112_s7 + $0x340] sm:$0xff] }
0x3ab1   : > { %9201 = vmatpush1.msra.mxu0 %v8973_v23  ;;  %v9046_v23 = vld [vmem:[%s14112_s7 + $0x2c8] sm:$0xff] }
0x3ab2   : > { %9202 = vmatprep.subr.mxu0 %v8958_v27  ;;  %v9045_v27 = vld [vmem:[%s14112_s7 + $0x2c0] sm:$0xff] }
0x3ab3   : > { %9203 = vmatpush1.msra.mxu0 %v8957_v33  ;;  %v9030_v33 = vld [vmem:[%s14112_s7 + $0x248] sm:$0xff] }
0x3ab4   : > { %9330 = vmatprep.subr.mxu0 %v9074_v38  ;;  %v9029_v38 = vld [vmem:[%s14112_s7 + $0x240] sm:$0xff] }
0x3b64   : > { %v8841_v45 = vpop.f32.mrf.mxu0 }
0x3b65   : > { %11970 = vmatmul.mubr.msk.f32.vlgmr.msra.gmra.mxu1 %vm1171_vm2, %v8841_v45 }
0x3b66   : > { %v11966_v37 = vpop.f32.mrf.mxu0  ;;  %9307 = vmatprep.mubr.f32.mxu1 %v12179_v4 }
0x3c25   : > { %v8914_v29 = vpop.f32.mrf.mxu1 }
0x3c26   : > { %v8918_v51 = vadd.f32 %v8914_v29, %v8679_v42  ;;  %v9073_v29 = vld [vmem:[%s14112_s7 + $0x3a0] sm:$0xff] }
0x3c27   : > { %v11971_v52 = vpop.f32.mrf.mxu1 }
0x3c28   : > { %v8926_v54 = vadd.f32 %v10836_v50, %v8918_v51  ;;  %v9075_v50 = vld [vmem:[%s14112_s7 + $0x3b0] sm:$0xff]  ;;  %v9058_v51 = vld [vmem:[%s14112_s7 + $0x328] sm:$0xff]  ;;  %v9060_v52 = vld [vmem:[%s14112_s7 + $0x338] sm:$0xff] }
0x3c2a   : > { %v8927_v55 = vadd.f32 %v8926_v54, %v13362_v44  ;;  %v9072_v44 = vld [vmem:[%s14112_s7 + $0x398] sm:$0xff]  ;;  %v9057_v54 = vld [vmem:[%s14112_s7 + $0x320] sm:$0xff] }
0x3c2b   : > { %9259 = vmatprep.subr.mxu1 %v9072_v44  ;;  %v9027_v44 = vld [vmem:[%s14112_s7 + $0x230] sm:$0xff] }
0x3c2c   : > { %v8930_v56 = vsel %vm1084_vm0, %v8927_v55, 0.0  ;;  %9260 = vmatpush1.msra.mxu1 %v9071_v30  ;;  %v9012_v30 = vld [vmem:[%s14112_s7 + $0x1b8] sm:$0xff] }
0x3c2d   : > { %8931 = vadd.xlane.f32.xlu1 %v8930_v56  ;;  %9261 = vmatprep.subr.mxu1 %v9056_v5  ;;  %v9042_v56 = vld [vmem:[%s14112_s7 + $0x2a8] sm:$0xff]  ;;  %v9011_v5 = vld [vmem:[%s14112_s7 + $0x1b0] sm:$0xff] }
0x3c2e   : > { %9262 = vmatpush1.msra.mxu1 %v9055_v19  ;;  %v8996_v19 = vld [vmem:[%s14112_s7 + $0x138] sm:$0xff] }
0x3c2f   : > { %9263 = vmatprep.subr.mxu1 %v9040_v8  ;;  %v8995_v8 = vld [vmem:[%s14112_s7 + $0x130] sm:$0xff] }
0x3c30   : > { %9264 = vmatpush1.msra.mxu1 %v9039_v31  ;;  %v8980_v31 = vld [vmem:[%s14112_s7 + $0xb8] sm:$0xff] }
0x3c31   : > { %9265 = vmatprep.subr.mxu1 %v9024_v10  ;;  %v8979_v10 = vld [vmem:[%s14112_s7 + $0xb0] sm:$0xff] }
0x3c32   : > { %9266 = vmatpush1.msra.mxu1 %v9023_v46  ;;  %v8964_v46 = vld [vmem:[%s14112_s7 + $0x38] sm:$0xff] }
0x3c33   : > { %9267 = vmatprep.subr.mxu1 %v9008_v12  ;;  %v8963_v12 = vld [vmem:[%s14112_s7 + $0x30] sm:$0xff] }
0x3c34   : > { %9268 = vmatpush1.msra.mxu1 %v9007_v13  ;;  %v9080_v13 = vld [vmem:[%s14112_s7 + $0x3d8] sm:$0xff] }
0x3c35   : > { %9269 = vmatprep.subr.mxu1 %v8992_v16  ;;  %v9079_v16 = vld [vmem:[%s14112_s7 + $0x3d0] sm:$0xff] }
0x3c36   : > { %9270 = vmatpush1.msra.mxu1 %v8991_v17  ;;  %v9064_v17 = vld [vmem:[%s14112_s7 + $0x358] sm:$0xff] }
0x3c37   : > { %9271 = vmatprep.subr.mxu1 %v8976_v14  ;;  %v9063_v14 = vld [vmem:[%s14112_s7 + $0x350] sm:$0xff] }
0x3c38   : > { %9272 = vmatpush1.msra.mxu1 %v8975_v26  ;;  %v9048_v26 = vld [vmem:[%s14112_s7 + $0x2d8] sm:$0xff] }
0x3c39   : > { %9273 = vmatprep.subr.mxu1 %v8960_v32  ;;  %v9047_v32 = vld [vmem:[%s14112_s7 + $0x2d0] sm:$0xff] }
0x3c3a   : > { %9274 = vmatpush1.msra.mxu1 %v8959_v34  ;;  %v9032_v34 = vld [vmem:[%s14112_s7 + $0x258] sm:$0xff] }
0x3c3b   : > { %9401 = vmatprep.subr.mxu1 %v9076_v35  ;;  %v9031_v35 = vld [vmem:[%s14112_s7 + $0x250] sm:$0xff] }
0x3cb6   : > { %v8932_v58 = vpop.xlane.xlu1 %8931 }
0x3cb7   : > { %v8933_v59 = vmul.f32 0.015625, %v8932_v58  ;;  %v9044_v58 = vld [vmem:[%s14112_s7 + $0x2b8] sm:$0xff] }
0x3cb9   : > { %v13547_v60 = vsub.f32 %v8927_v55, %v8933_v59  ;;  %v9059_v55 = vld [vmem:[%s14112_s7 + $0x330] sm:$0xff]  ;;  %v9041_v59 = vld [vmem:[%s14112_s7 + $0x2a0] sm:$0xff] }
0x3cbb   : > { %v8935_v61 = vmul.f32 %v13547_v60, %v13547_v60 }
0x3cbd   : > { %v8936_v1 = vsel %vm1084_vm0, %v8935_v61, 0.0  ;;  %v9026_v61 = vld [vmem:[%s14112_s7 + $0x228] sm:$0xff] }
0x3cbe   : > { %8937 = vadd.xlane.f32.xlu1 %v8936_v1  ;;  %v9028_v1 = vld [vmem:[%s14112_s7 + $0x238] sm:$0xff] }
0x3d47   : > { %v8938_v43 = vpop.xlane.xlu1 %8937 }
0x3d48   : > { %v8939_v36 = vmul.f32 0.015625, %v8938_v43  ;;  %v9014_v43 = vld [vmem:[%s14112_s7 + $0x1c8] sm:$0xff] }
0x3d4a   : > { %v8940_v42 = vadd.f32 1e-05, %v8939_v36  ;;  %v9016_v36 = vld [vmem:[%s14112_s7 + $0x1d8] sm:$0xff] }
0x3d4c   : > { %12133 = vrsqrt.f32 %v8940_v42  ;;  %v9013_v42 = vld [vmem:[%s14112_s7 + $0x1c0] sm:$0xff] }
0x3d59   : > { %v12134_v39 = vpop.eup %12133 }
0x3d5a   : > { %v8942_v24 = vmul.f32 %v12134_v39, %v13547_v60  ;;  %v9043_v60 = vld [vmem:[%s14112_s7 + $0x2b0] sm:$0xff] }
0x3d5b   : > { %v9015_v39 = vld [vmem:[%s14112_s7 + $0x1d0] sm:$0xff] }
0x3d5c   : > { %v8949_v45 = vmul.f32 %v10837_v40, %v8942_v24  ;;  %v8998_v40 = vld [vmem:[%s14112_s7 + $0x148] sm:$0xff]  ;;  %v9000_v24 = vld [vmem:[%s14112_s7 + $0x158] sm:$0xff] }
0x3d5e   : > { %v13589_v37 = vadd.f32 %v10838_v0, %v8949_v45  ;;  %v8997_v0 = vld [vmem:[%s14112_s7 + $0x140] sm:$0xff]  ;;  %v8999_v45 = vld [vmem:[%s14112_s7 + $0x150] sm:$0xff] }
0x3d60   : > { %10839 = vmatmul.mubr.msk.f32.vlgmr.msra.gmra.mxu0 %vm1084_vm0, %v13589_v37  ;;  %10840 = vmatmul.mubr.msk.f32.vlgmr.msra.gmra.mxu1 %vm1084_vm0, %v13589_v37 }
0x3d61   : > { %9331 = vmatpush1.msra.mxu0 %v9073_v29  ;;  %9402 = vmatpush1.msra.mxu1 %v9075_v50  ;;  %v8982_v29 = vld [vmem:[%s14112_s7 + $0xc8] sm:$0xff]  ;;  %v8984_v50 = vld [vmem:[%s14112_s7 + $0xd8] sm:$0xff] }
0x3d62   : > { %9332 = vmatprep.subr.mxu0 %v9058_v51  ;;  %9403 = vmatprep.subr.mxu1 %v9060_v52  ;;  %v8981_v51 = vld [vmem:[%s14112_s7 + $0xc0] sm:$0xff]  ;;  %v8983_v52 = vld [vmem:[%s14112_s7 + $0xd0] sm:$0xff] }
0x3d63   : > { %9333 = vmatpush1.msra.mxu0 %v9057_v54  ;;  %9404 = vmatpush1.msra.mxu1 %v9059_v55  ;;  %v8966_v54 = vld [vmem:[%s14112_s7 + $0x48] sm:$0xff]  ;;  %v8968_v55 = vld [vmem:[%s14112_s7 + $0x58] sm:$0xff] }
0x3d64   : > { %9334 = vmatprep.subr.mxu0 %v9042_v56  ;;  %9405 = vmatprep.subr.mxu1 %v9044_v58  ;;  %v8965_v56 = vld [vmem:[%s14112_s7 + $0x40] sm:$0xff]  ;;  %v8967_v58 = vld [vmem:[%s14112_s7 + $0x50] sm:$0xff] }
0x3d65   : > { %9335 = vmatpush1.msra.mxu0 %v9041_v59  ;;  %9406 = vmatpush1.msra.mxu1 %v9043_v60  ;;  %v9082_v59 = vld [vmem:[%s14112_s7 + $0x3e8] sm:$0xff]  ;;  %v9084_v60 = vld [vmem:[%s14112_s7 + $0x3f8] sm:$0xff] }
0x3d66   : > { %9336 = vmatprep.subr.mxu0 %v9026_v61  ;;  %9407 = vmatprep.subr.mxu1 %v9028_v1  ;;  %v9081_v61 = vld [vmem:[%s14112_s7 + $0x3e0] sm:$0xff]  ;;  %v9083_v1 = vld [vmem:[%s14112_s7 + $0x3f0] sm:$0xff] }
0x3d67   : > { %9337 = vmatpush1.msra.mxu0 %v9025_v2  ;;  %9408 = vmatpush1.msra.mxu1 %v9027_v44  ;;  %v9066_v2 = vld [vmem:[%s14112_s7 + $0x368] sm:$0xff]  ;;  %v9068_v44 = vld [vmem:[%s14112_s7 + $0x378] sm:$0xff] }
0x3d68   : > { %9338 = vmatprep.subr.mxu0 %v9010_v57  ;;  %9409 = vmatprep.subr.mxu1 %v9012_v30  ;;  %v9065_v57 = vld [vmem:[%s14112_s7 + $0x360] sm:$0xff]  ;;  %v9067_v30 = vld [vmem:[%s14112_s7 + $0x370] sm:$0xff] }
0x3d69   : > { %9339 = vmatpush1.msra.mxu0 %v9009_v3  ;;  %9410 = vmatpush1.msra.mxu1 %v9011_v5  ;;  %v9050_v3 = vld [vmem:[%s14112_s7 + $0x2e8] sm:$0xff]  ;;  %v9052_v5 = vld [vmem:[%s14112_s7 + $0x2f8] sm:$0xff] }
0x3d6a   : > { %9340 = vmatprep.subr.mxu0 %v8994_v6  ;;  %9411 = vmatprep.subr.mxu1 %v8996_v19  ;;  %v9049_v6 = vld [vmem:[%s14112_s7 + $0x2e0] sm:$0xff]  ;;  %v9051_v19 = vld [vmem:[%s14112_s7 + $0x2f0] sm:$0xff] }
0x3d6b   : > { %9341 = vmatpush1.msra.mxu0 %v8993_v7  ;;  %9412 = vmatpush1.msra.mxu1 %v8995_v8  ;;  %v9034_v7 = vld [vmem:[%s14112_s7 + $0x268] sm:$0xff]  ;;  %v9036_v8 = vld [vmem:[%s14112_s7 + $0x278] sm:$0xff] }
0x3d6c   : > { %9342 = vmatprep.subr.mxu0 %v8978_v28  ;;  %9413 = vmatprep.subr.mxu1 %v8980_v31  ;;  %v9033_v28 = vld [vmem:[%s14112_s7 + $0x260] sm:$0xff]  ;;  %v9035_v31 = vld [vmem:[%s14112_s7 + $0x270] sm:$0xff] }
0x3d6d   : > { %9343 = vmatpush1.msra.mxu0 %v8977_v9  ;;  %9414 = vmatpush1.msra.mxu1 %v8979_v10  ;;  %v9018_v9 = vld [vmem:[%s14112_s7 + $0x1e8] sm:$0xff]  ;;  %v9020_v10 = vld [vmem:[%s14112_s7 + $0x1f8] sm:$0xff] }
0x3d6e   : > { %9344 = vmatprep.subr.mxu0 %v8962_v11  ;;  %9415 = vmatprep.subr.mxu1 %v8964_v46  ;;  %v9017_v11 = vld [vmem:[%s14112_s7 + $0x1e0] sm:$0xff]  ;;  %v9019_v46 = vld [vmem:[%s14112_s7 + $0x1f0] sm:$0xff] }
0x3d6f   : > { %9345 = vmatpush1.msra.mxu0 %v8961_v41  ;;  %9378 = vmatprep.mubr.f32.mxu0 %v12179_v4  ;;  %v9002_v41 = vld [vmem:[%s14112_s7 + $0x168] sm:$0xff] }
0x3d70   : > { %9416 = vmatpush1.msra.mxu1 %v8963_v12  ;;  %9449 = vmatprep.mubr.f32.mxu1 %v12179_v4  ;;  %v9004_v12 = vld [vmem:[%s14112_s7 + $0x178] sm:$0xff] }
0x3d71   : > { %10841 = vmatmul.mubr.msk.f32.vlgmr.msra.gmra.mxu0 %vm1084_vm0, %v13589_v37  ;;  %10842 = vmatmul.mubr.msk.f32.vlgmr.msra.gmra.mxu1 %vm1084_vm0, %v13589_v37 }
0x3d72   : > { %9472 = vmatprep.subr.mxu0 %v9078_v53  ;;  %9543 = vmatprep.subr.mxu1 %v9080_v13  ;;  %v9001_v53 = vld [vmem:[%s14112_s7 + $0x160] sm:$0xff]  ;;  %v9003_v13 = vld [vmem:[%s14112_s7 + $0x170] sm:$0xff] }
0x3d73   : > { %9473 = vmatpush1.msra.mxu0 %v9077_v15  ;;  %9544 = vmatpush1.msra.mxu1 %v9079_v16  ;;  %v8986_v15 = vld [vmem:[%s14112_s7 + $0xe8] sm:$0xff]  ;;  %v8988_v16 = vld [vmem:[%s14112_s7 + $0xf8] sm:$0xff] }
0x3d74   : > { %9474 = vmatprep.subr.mxu0 %v9062_v48  ;;  %9545 = vmatprep.subr.mxu1 %v9064_v17  ;;  %v8985_v48 = vld [vmem:[%s14112_s7 + $0xe0] sm:$0xff]  ;;  %v8987_v17 = vld [vmem:[%s14112_s7 + $0xf0] sm:$0xff] }
0x3d75   : > { %9475 = vmatpush1.msra.mxu0 %v9061_v22  ;;  %9546 = vmatpush1.msra.mxu1 %v9063_v14  ;;  %v8970_v22 = vld [vmem:[%s14112_s7 + $0x68] sm:$0xff]  ;;  %v8972_v14 = vld [vmem:[%s14112_s7 + $0x78] sm:$0xff] }
0x3d76   : > { %9476 = vmatprep.subr.mxu0 %v9046_v23  ;;  %9547 = vmatprep.subr.mxu1 %v9048_v26  ;;  %v8969_v23 = vld [vmem:[%s14112_s7 + $0x60] sm:$0xff]  ;;  %v8971_v26 = vld [vmem:[%s14112_s7 + $0x70] sm:$0xff] }
0x3d77   : > { %9477 = vmatpush1.msra.mxu0 %v9045_v27  ;;  %9548 = vmatpush1.msra.mxu1 %v9047_v32  ;;  %v9787_v27 = vld [vmem:[%s14115_s5 + $0xf8] sm:$0xff] }
0x3d78   : > { %9478 = vmatprep.subr.mxu0 %v9030_v33  ;;  %9549 = vmatprep.subr.mxu1 %v9032_v34  ;;  %v9819_v32 = vld [vmem:[%s14115_s5 + $0x1f8] sm:$0xff] }
0x3d79   : > { %9479 = vmatpush1.msra.mxu0 %v9029_v38  ;;  %9550 = vmatpush1.msra.mxu1 %v9031_v35  ;;  %v9771_v33 = vld [vmem:[%s14115_s5 + $0x78] sm:$0xff]  ;;  %v9786_v38 = vld [vmem:[%s14115_s5 + $0xf0] sm:$0xff] }
0x3d7a   : > { %9480 = vmatprep.subr.mxu0 %v9014_v43  ;;  %9551 = vmatprep.subr.mxu1 %v9016_v36  ;;  %v9803_v34 = vld [vmem:[%s14115_s5 + $0x178] sm:$0xff]  ;;  %v9818_v35 = vld [vmem:[%s14115_s5 + $0x1f0] sm:$0xff] }
0x3d7b   : > { %9481 = vmatpush1.msra.mxu0 %v9013_v42  ;;  %9552 = vmatpush1.msra.mxu1 %v9015_v39  ;;  %v9770_v43 = vld [vmem:[%s14115_s5 + $0x70] sm:$0xff]  ;;  %v9817_v42 = vld [vmem:[%s14115_s5 + $0x1e8] sm:$0xff] }
0x3d7c   : > { %9482 = vmatprep.subr.mxu0 %v8998_v40  ;;  %9553 = vmatprep.subr.mxu1 %v9000_v24  ;;  %v9802_v36 = vld [vmem:[%s14115_s5 + $0x170] sm:$0xff]  ;;  %v9769_v39 = vld [vmem:[%s14115_s5 + $0x68] sm:$0xff]  ;;  %v9784_v24 = vld [vmem:[%s14115_s5 + $0xe0] sm:$0xff] }
0x3d7d   : > { %9483 = vmatpush1.msra.mxu0 %v8997_v0  ;;  %9554 = vmatpush1.msra.mxu1 %v8999_v45  ;;  %v9801_v40 = vld [vmem:[%s14115_s5 + $0x168] sm:$0xff]  ;;  %v9816_v0 = vld [vmem:[%s14115_s5 + $0x1e0] sm:$0xff] }
0x3d7e   : > { %9484 = vmatprep.subr.mxu0 %v8982_v29  ;;  %9555 = vmatprep.subr.mxu1 %v8984_v50  ;;  %v9768_v45 = vld [vmem:[%s14115_s5 + $0x60] sm:$0xff]  ;;  %v9783_v50 = vld [vmem:[%s14115_s5 + $0xd8] sm:$0xff] }
0x3d7f   : > { %9485 = vmatpush1.msra.mxu0 %v8981_v51  ;;  %9556 = vmatpush1.msra.mxu1 %v8983_v52  ;;  %v9800_v29 = vld [vmem:[%s14115_s5 + $0x160] sm:$0xff]  ;;  %v9815_v51 = vld [vmem:[%s14115_s5 + $0x1d8] sm:$0xff] }
0x3d80   : > { %9486 = vmatprep.subr.mxu0 %v8966_v54  ;;  %9557 = vmatprep.subr.mxu1 %v8968_v55  ;;  %v9767_v52 = vld [vmem:[%s14115_s5 + $0x58] sm:$0xff]  ;;  %v9782_v55 = vld [vmem:[%s14115_s5 + $0xd0] sm:$0xff] }
0x3d81   : > { %9487 = vmatpush1.msra.mxu0 %v8965_v56  ;;  %9520 = vmatprep.mubr.f32.mxu0 %v12179_v4  ;;  %v9799_v54 = vld [vmem:[%s14115_s5 + $0x158] sm:$0xff]  ;;  %v9814_v56 = vld [vmem:[%s14115_s5 + $0x1d0] sm:$0xff] }
0x3d82   : > { %9558 = vmatpush1.msra.mxu1 %v8967_v58  ;;  %9591 = vmatprep.mubr.f32.mxu1 %v12179_v4  ;;  %v9766_v58 = vld [vmem:[%s14115_s5 + $0x50] sm:$0xff] }
0x3d83   : > { %10843 = vmatmul.mubr.msk.f32.vlgmr.msra.gmra.mxu0 %vm1084_vm0, %v13589_v37  ;;  %10844 = vmatmul.mubr.msk.f32.vlgmr.msra.gmra.mxu1 %vm1084_vm0, %v13589_v37 }
0x3d84   : > { %9614 = vmatprep.subr.mxu0 %v9082_v59  ;;  %9685 = vmatprep.subr.mxu1 %v9084_v60  ;;  %v9798_v59 = vld [vmem:[%s14115_s5 + $0x150] sm:$0xff]  ;;  %v9781_v60 = vld [vmem:[%s14115_s5 + $0xc8] sm:$0xff] }
0x3d85   : > { %9615 = vmatpush1.msra.mxu0 %v9081_v61  ;;  %9686 = vmatpush1.msra.mxu1 %v9083_v1  ;;  %v9813_v61 = vld [vmem:[%s14115_s5 + $0x1c8] sm:$0xff] }
0x3d86   : > { %9616 = vmatprep.subr.mxu0 %v9066_v2  ;;  %9687 = vmatprep.subr.mxu1 %v9068_v44  ;;  %v9765_v1 = vld [vmem:[%s14115_s5 + $0x48] sm:$0xff]  ;;  %v9780_v44 = vld [vmem:[%s14115_s5 + $0xc0] sm:$0xff] }
0x3d87   : > { %9617 = vmatpush1.msra.mxu0 %v9065_v57  ;;  %9688 = vmatpush1.msra.mxu1 %v9067_v30  ;;  %v9797_v2 = vld [vmem:[%s14115_s5 + $0x148] sm:$0xff]  ;;  %v9812_v57 = vld [vmem:[%s14115_s5 + $0x1c0] sm:$0xff] }
0x3d88   : > { %9618 = vmatprep.subr.mxu0 %v9050_v3  ;;  %9689 = vmatprep.subr.mxu1 %v9052_v5  ;;  %v9764_v30 = vld [vmem:[%s14115_s5 + $0x40] sm:$0xff]  ;;  %v9779_v5 = vld [vmem:[%s14115_s5 + $0xb8] sm:$0xff] }
0x3d89   : > { %9619 = vmatpush1.msra.mxu0 %v9049_v6  ;;  %9690 = vmatpush1.msra.mxu1 %v9051_v19  ;;  %v9796_v3 = vld [vmem:[%s14115_s5 + $0x140] sm:$0xff]  ;;  %v9811_v6 = vld [vmem:[%s14115_s5 + $0x1b8] sm:$0xff] }
0x3d8a   : > { %9620 = vmatprep.subr.mxu0 %v9034_v7  ;;  %9691 = vmatprep.subr.mxu1 %v9036_v8  ;;  %v9763_v19 = vld [vmem:[%s14115_s5 + $0x38] sm:$0xff]  ;;  %v9778_v8 = vld [vmem:[%s14115_s5 + $0xb0] sm:$0xff] }
0x3d8b   : > { %9621 = vmatpush1.msra.mxu0 %v9033_v28  ;;  %9692 = vmatpush1.msra.mxu1 %v9035_v31  ;;  %v9795_v7 = vld [vmem:[%s14115_s5 + $0x138] sm:$0xff]  ;;  %v9810_v28 = vld [vmem:[%s14115_s5 + $0x1b0] sm:$0xff] }
0x3d8c   : > { %9622 = vmatprep.subr.mxu0 %v9018_v9  ;;  %9693 = vmatprep.subr.mxu1 %v9020_v10  ;;  %v9762_v31 = vld [vmem:[%s14115_s5 + $0x30] sm:$0xff]  ;;  %v9777_v10 = vld [vmem:[%s14115_s5 + $0xa8] sm:$0xff] }
0x3d8d   : > { %9623 = vmatpush1.msra.mxu0 %v9017_v11  ;;  %9694 = vmatpush1.msra.mxu1 %v9019_v46  ;;  %v9794_v9 = vld [vmem:[%s14115_s5 + $0x130] sm:$0xff]  ;;  %v9809_v11 = vld [vmem:[%s14115_s5 + $0x1a8] sm:$0xff] }
0x3d8e   : > { %9624 = vmatprep.subr.mxu0 %v9002_v41  ;;  %9695 = vmatprep.subr.mxu1 %v9004_v12  ;;  %v9761_v46 = vld [vmem:[%s14115_s5 + $0x28] sm:$0xff]  ;;  %v9776_v12 = vld [vmem:[%s14115_s5 + $0xa0] sm:$0xff] }
0x3d8f   : > { %9625 = vmatpush1.msra.mxu0 %v9001_v53  ;;  %9696 = vmatpush1.msra.mxu1 %v9003_v13  ;;  %v9793_v41 = vld [vmem:[%s14115_s5 + $0x128] sm:$0xff]  ;;  %v9808_v53 = vld [vmem:[%s14115_s5 + $0x1a0] sm:$0xff] }
0x3d90   : > { %9626 = vmatprep.subr.mxu0 %v8986_v15  ;;  %9697 = vmatprep.subr.mxu1 %v8988_v16  ;;  %v9760_v13 = vld [vmem:[%s14115_s5 + $0x20] sm:$0xff]  ;;  %v9775_v16 = vld [vmem:[%s14115_s5 + $0x98] sm:$0xff] }
0x3d91   : > { %9627 = vmatpush1.msra.mxu0 %v8985_v48  ;;  %9698 = vmatpush1.msra.mxu1 %v8987_v17  ;;  %v9792_v15 = vld [vmem:[%s14115_s5 + $0x120] sm:$0xff]  ;;  %v9807_v48 = vld [vmem:[%s14115_s5 + $0x198] sm:$0xff] }
0x3d92   : > { %9628 = vmatprep.subr.mxu0 %v8970_v22  ;;  %9699 = vmatprep.subr.mxu1 %v8972_v14  ;;  %v9759_v17 = vld [vmem:[%s14115_s5 + $0x18] sm:$0xff]  ;;  %v9774_v14 = vld [vmem:[%s14115_s5 + $0x90] sm:$0xff] }
0x3d93   : > { %9629 = vmatpush1.msra.mxu0 %v8969_v23  ;;  %9662 = vmatprep.mubr.f32.mxu0 %v12179_v4  ;;  %v9791_v22 = vld [vmem:[%s14115_s5 + $0x118] sm:$0xff]  ;;  %v9806_v23 = vld [vmem:[%s14115_s5 + $0x190] sm:$0xff] }
0x3d94   : > { %9700 = vmatpush1.msra.mxu1 %v8971_v26  ;;  %9733 = vmatprep.mubr.f32.mxu1 %v12179_v4  ;;  %v9785_v4 = vld [vmem:[%s14115_s5 + $0xe8] sm:$0xff]  ;;  %v9758_v26 = vld [vmem:[%s14115_s5 + $0x10] sm:$0xff] }
0x3d95   : > { %10845 = vmatmul.mubr.msk.f32.vlgmr.msra.gmra.mxu0 %vm1084_vm0, %v13589_v37  ;;  %10846 = vmatmul.mubr.msk.f32.vlgmr.msra.gmra.mxu1 %vm1084_vm0, %v13589_v37 }
0x3d96   : > { %11294 = vmatprep.subr.mxu0 %v9787_v27  ;;  %11329 = vmatprep.subr.mxu1 %v9819_v32  ;;  %v9790_v27 = vld [vmem:[%s14115_s5 + $0x110] sm:$0xff]  ;;  %v9773_v32 = vld [vmem:[%s14115_s5 + $0x88] sm:$0xff] }
0x3d97   : > { %11295 = vmatpush3.msra.mxu0 %v9771_v33  ;;  %11330 = vmatpush3.msra.mxu1 %v9803_v34  ;;  %v9805_v33 = vld [vmem:[%s14115_s5 + $0x188] sm:$0xff] }
0x3d98   : > { %11296 = vmatprep.subr.mxu0 %v9786_v38  ;;  %11331 = vmatprep.subr.mxu1 %v9818_v35  ;;  %v9757_v34 = vld [vmem:[%s14115_s5 + $0x8] sm:$0xff]  ;;  %v9772_v35 = vld [vmem:[%s14115_s5 + $0x80] sm:$0xff] }
0x3d99   : > { %11297 = vmatpush3.msra.mxu0 %v9770_v43  ;;  %11332 = vmatpush3.msra.mxu1 %v9802_v36  ;;  %v9789_v38 = vld [vmem:[%s14115_s5 + $0x108] sm:$0xff]  ;;  %v9804_v43 = vld [vmem:[%s14115_s5 + $0x180] sm:$0xff] }
0x3d9a   : > { %11298 = vmatprep.subr.mxu0 %v9785_v4  ;;  %11333 = vmatprep.subr.mxu1 %v9817_v42  ;;  %v9756_v36 = vld [vmem:[%s14115_s5] sm:$0xff]  ;;  %v9851_v42 = vld [vmem:[%s14115_s5 + $0x2f8] sm:$0xff] }
0x3d9b   : > { %11299 = vmatpush3.msra.mxu0 %v9769_v39  ;;  %11334 = vmatpush3.msra.mxu1 %v9801_v40  ;;  %v9788_v4 = vld [vmem:[%s14115_s5 + $0x100] sm:$0xff]  ;;  %v9883_v39 = vld [vmem:[%s14115_s5 + $0x3f8] sm:$0xff] }
0x3d9c   : > { %11300 = vmatprep.subr.mxu0 %v9784_v24  ;;  %11335 = vmatprep.subr.mxu1 %v9816_v0  ;;  %v13774_v40 = vld [vmem:[%s14116_s3] sm:$0xff] }
0x3d9d   : > { %11301 = vmatpush3.msra.mxu0 %v9768_v45  ;;  %11336 = vmatpush3.msra.mxu1 %v9800_v29  ;;  %v9092_v24 = vrot.slane %v13774_v40, %v12418_v20  ;;  %v9100_v0 = vrot.slane %v13774_v40, %v12836_v47  ;;  %v9096_v45 = vrot.slane %v13774_v40, %v12429_v25 }
0x3d9e   : > { %11302 = vmatprep.subr.mxu0 %v9783_v50  ;;  %11337 = vmatprep.subr.mxu1 %v9815_v51  ;;  %v9104_v29 = vrot.slane %v13774_v40, %v12842_v49 }
0x3d9f   : > { %11303 = vmatpush3.msra.mxu0 %v9767_v52  ;;  %11338 = vmatpush3.msra.mxu1 %v9799_v54 }
0x3da0   : > { %11304 = vmatprep.subr.mxu0 %v9782_v55  ;;  %11339 = vmatprep.subr.mxu1 %v9814_v56 }
0x3da1   : > { %11305 = vmatpush3.msra.mxu0 %v9766_v58  ;;  %11340 = vmatpush3.msra.mxu1 %v9798_v59 }
0x3da2   : > { %11306 = vmatprep.subr.mxu0 %v9781_v60  ;;  %11341 = vmatprep.subr.mxu1 %v9813_v61 }
0x3da3   : > { %11307 = vmatpush3.msra.mxu0 %v9765_v1  ;;  %11342 = vmatpush3.msra.mxu1 %v9797_v2 }
0x3da4   : > { %11308 = vmatprep.subr.mxu0 %v9780_v44  ;;  %11343 = vmatprep.subr.mxu1 %v9812_v57  ;;  %v9835_v44 = vld [vmem:[%s14115_s5 + $0x278] sm:$0xff] }
0x3da5   : > { %11309 = vmatpush3.msra.mxu0 %v9764_v30  ;;  %11344 = vmatpush3.msra.mxu1 %v9796_v3  ;;  %v9867_v57 = vld [vmem:[%s14115_s5 + $0x378] sm:$0xff]  ;;  %v9850_v30 = vld [vmem:[%s14115_s5 + $0x2f0] sm:$0xff] }
0x3da6   : > { %11310 = vmatprep.subr.mxu0 %v9779_v5  ;;  %11345 = vmatprep.subr.mxu1 %v9811_v6  ;;  %v9882_v3 = vld [vmem:[%s14115_s5 + $0x3f0] sm:$0xff] }
0x3da7   : > { %11311 = vmatpush3.msra.mxu0 %v9763_v19  ;;  %11346 = vmatpush3.msra.mxu1 %v9795_v7  ;;  %v9834_v5 = vld [vmem:[%s14115_s5 + $0x270] sm:$0xff]  ;;  %v9849_v19 = vld [vmem:[%s14115_s5 + $0x2e8] sm:$0xff] }
0x3da8   : > { %11312 = vmatprep.subr.mxu0 %v9778_v8  ;;  %11347 = vmatprep.subr.mxu1 %v9810_v28  ;;  %v9866_v6 = vld [vmem:[%s14115_s5 + $0x370] sm:$0xff]  ;;  %v9881_v7 = vld [vmem:[%s14115_s5 + $0x3e8] sm:$0xff] }
0x3da9   : > { %11313 = vmatpush3.msra.mxu0 %v9762_v31  ;;  %11348 = vmatpush3.msra.mxu1 %v9794_v9  ;;  %v9833_v8 = vld [vmem:[%s14115_s5 + $0x268] sm:$0xff]  ;;  %v9848_v31 = vld [vmem:[%s14115_s5 + $0x2e0] sm:$0xff] }
0x3daa   : > { %11314 = vmatprep.subr.mxu0 %v9777_v10  ;;  %11349 = vmatprep.subr.mxu1 %v9809_v11  ;;  %v9865_v28 = vld [vmem:[%s14115_s5 + $0x368] sm:$0xff]  ;;  %v9880_v9 = vld [vmem:[%s14115_s5 + $0x3e0] sm:$0xff] }
0x3dab   : > { %11315 = vmatpush3.msra.mxu0 %v9761_v46  ;;  %11350 = vmatpush3.msra.mxu1 %v9793_v41  ;;  %v9832_v10 = vld [vmem:[%s14115_s5 + $0x260] sm:$0xff]  ;;  %v9847_v46 = vld [vmem:[%s14115_s5 + $0x2d8] sm:$0xff] }
0x3dac   : > { %11316 = vmatprep.subr.mxu0 %v9776_v12  ;;  %11351 = vmatprep.subr.mxu1 %v9808_v53  ;;  %v9864_v11 = vld [vmem:[%s14115_s5 + $0x360] sm:$0xff]  ;;  %v9879_v41 = vld [vmem:[%s14115_s5 + $0x3d8] sm:$0xff] }
0x3dad   : > { %11317 = vmatpush3.msra.mxu0 %v9760_v13  ;;  %11352 = vmatpush3.msra.mxu1 %v9792_v15  ;;  %v9831_v12 = vld [vmem:[%s14115_s5 + $0x258] sm:$0xff]  ;;  %v9846_v13 = vld [vmem:[%s14115_s5 + $0x2d0] sm:$0xff] }
0x3dae   : > { %11318 = vmatprep.subr.mxu0 %v9775_v16  ;;  %11353 = vmatprep.subr.mxu1 %v9807_v48  ;;  %v9863_v53 = vld [vmem:[%s14115_s5 + $0x358] sm:$0xff]  ;;  %v9878_v15 = vld [vmem:[%s14115_s5 + $0x3d0] sm:$0xff]  ;;  %v9112_v16 = vrot.slane %v13774_v40, %v12867_v18  ;;  %v9120_v48 = vrot.slane %v13774_v40, %v12870_v21 }
0x3daf   : > { %11319 = vmatpush3.msra.mxu0 %v9759_v17  ;;  %11354 = vmatpush3.msra.mxu1 %v9791_v22  ;;  %v9830_v17 = vld [vmem:[%s14115_s5 + $0x250] sm:$0xff] }
0x3db0   : > { %11320 = vmatprep.subr.mxu0 %v9774_v14  ;;  %11355 = vmatprep.subr.mxu1 %v9806_v23  ;;  %v9862_v22 = vld [vmem:[%s14115_s5 + $0x350] sm:$0xff] }
0x3db1   : > { %11321 = vmatpush3.msra.mxu0 %v9758_v26  ;;  %11356 = vmatpush3.msra.mxu1 %v9790_v27  ;;  %v9845_v26 = vld [vmem:[%s14115_s5 + $0x2c8] sm:$0xff] }
0x3db2   : > { %11322 = vmatprep.subr.mxu0 %v9773_v32  ;;  %11357 = vmatprep.subr.mxu1 %v9805_v33  ;;  %v9877_v27 = vld [vmem:[%s14115_s5 + $0x3c8] sm:$0xff] }
0x3db3   : > { %11323 = vmatpush3.msra.mxu0 %v9757_v34  ;;  %11358 = vmatpush3.msra.mxu1 %v9789_v38  ;;  %v9829_v32 = vld [vmem:[%s14115_s5 + $0x248] sm:$0xff] }
0x3db4   : > { %11324 = vmatprep.subr.mxu0 %v9772_v35  ;;  %11359 = vmatprep.subr.mxu1 %v9804_v43  ;;  %v9861_v33 = vld [vmem:[%s14115_s5 + $0x348] sm:$0xff]  ;;  %v9844_v35 = vld [vmem:[%s14115_s5 + $0x2c0] sm:$0xff] }
0x3db5   : > { %11325 = vmatpush3.msra.mxu0 %v9756_v36  ;;  %11360 = vmatpush3.msra.mxu1 %v9788_v4  ;;  %v9876_v43 = vld [vmem:[%s14115_s5 + $0x3c0] sm:$0xff] }
0x3db6   : > { %11364 = vmatprep.subr.mxu0 %v9851_v42  ;;  %11399 = vmatprep.subr.mxu1 %v9883_v39  ;;  %v9828_v42 = vld [vmem:[%s14115_s5 + $0x240] sm:$0xff] }
0x3db7   : > { %v9860_v39 = vld [vmem:[%s14115_s5 + $0x340] sm:$0xff] }
0x3e20   : > { %v9238_v50 = vpop.f32.mrf.mxu0  ;;  %v9309_v51 = vpop.f32.mrf.mxu1 }
0x3e21   : > { %v9239_v52 = vadd.f32 %v9238_v50, %v9092_v24  ;;  %v9310_v54 = vadd.f32 %v9309_v51, %v9100_v0  ;;  %v9827_v50 = vld [vmem:[%s14115_s5 + $0x238] sm:$0xff] }
0x3e22   : > { %v9240_v55 = vpop.f32.mrf.mxu0  ;;  %v9311_v56 = vpop.f32.mrf.mxu1  ;;  %v9859_v51 = vld [vmem:[%s14115_s5 + $0x338] sm:$0xff] }
0x3e23   : > { %v9241_v58 = vadd.f32 %v9240_v55, %v9096_v45  ;;  %v9312_v59 = vadd.f32 %v9311_v56, %v9104_v29  ;;  %v9740_v1 = vmax.f32 %v9239_v52, 0.0  ;;  %v9742_v2 = vmax.f32 %v9310_v54, 0.0  ;;  %v9843_v45 = vld [vmem:[%s14115_s5 + $0x2b8] sm:$0xff]  ;;  %v9842_v52 = vld [vmem:[%s14115_s5 + $0x2b0] sm:$0xff] }
0x3e24   : > { %v9875_v29 = vld [vmem:[%s14115_s5 + $0x3b8] sm:$0xff]  ;;  %v9874_v54 = vld [vmem:[%s14115_s5 + $0x3b0] sm:$0xff] }
0x3e25   : > { %v9741_v60 = vmax.f32 %v9241_v58, 0.0  ;;  %v9743_v61 = vmax.f32 %v9312_v59, 0.0  ;;  %v9826_v55 = vld [vmem:[%s14115_s5 + $0x230] sm:$0xff]  ;;  %v9841_v58 = vld [vmem:[%s14115_s5 + $0x2a8] sm:$0xff] }
0x3e26   : > { %v9858_v56 = vld [vmem:[%s14115_s5 + $0x330] sm:$0xff]  ;;  %v9873_v59 = vld [vmem:[%s14115_s5 + $0x3a8] sm:$0xff] }
0x3e27   : > { %10083 = vmatprep.mubr.f32.mxu0 %v9741_v60  ;;  %10153 = vmatprep.mubr.f32.mxu1 %v9743_v61  ;;  %v9825_v60 = vld [vmem:[%s14115_s5 + $0x228] sm:$0xff] }
0x3e28   : > { %10084 = vmatmul.mubr.f32.vlgmr.msra.gmra.mxu0 %v9740_v1  ;;  %10154 = vmatmul.mubr.f32.vlgmr.msra.gmra.mxu1 %v9742_v2  ;;  %v9857_v61 = vld [vmem:[%s14115_s5 + $0x328] sm:$0xff]  ;;  %v9840_v1 = vld [vmem:[%s14115_s5 + $0x2a0] sm:$0xff] }
0x3e29   : > { %11365 = vmatpush3.msra.mxu0 %v9835_v44  ;;  %11400 = vmatpush3.msra.mxu1 %v9867_v57  ;;  %v9872_v2 = vld [vmem:[%s14115_s5 + $0x3a0] sm:$0xff] }
0x3e2a   : > { %11366 = vmatprep.subr.mxu0 %v9850_v30  ;;  %11401 = vmatprep.subr.mxu1 %v9882_v3  ;;  %v9824_v44 = vld [vmem:[%s14115_s5 + $0x220] sm:$0xff]  ;;  %v9839_v30 = vld [vmem:[%s14115_s5 + $0x298] sm:$0xff] }
0x3e2b   : > { %11367 = vmatpush3.msra.mxu0 %v9834_v5  ;;  %11402 = vmatpush3.msra.mxu1 %v9866_v6  ;;  %v9856_v57 = vld [vmem:[%s14115_s5 + $0x320] sm:$0xff]  ;;  %v9871_v3 = vld [vmem:[%s14115_s5 + $0x398] sm:$0xff]  ;;  %v9108_v5 = vrot.slane %v13774_v40, %v12907_v62  ;;  %v9116_v6 = vrot.slane %v13774_v40, %v12910_v63 }
0x3e2c   : > { %11368 = vmatprep.subr.mxu0 %v9849_v19  ;;  %11403 = vmatprep.subr.mxu1 %v9881_v7  ;;  %v9823_v19 = vld [vmem:[%s14115_s5 + $0x218] sm:$0xff] }
0x3e2d   : > { %11369 = vmatpush3.msra.mxu0 %v9833_v8  ;;  %11404 = vmatpush3.msra.mxu1 %v9865_v28  ;;  %v9855_v7 = vld [vmem:[%s14115_s5 + $0x318] sm:$0xff]  ;;  %v9838_v8 = vld [vmem:[%s14115_s5 + $0x290] sm:$0xff] }
0x3e2e   : > { %11370 = vmatprep.subr.mxu0 %v9848_v31  ;;  %11405 = vmatprep.subr.mxu1 %v9880_v9  ;;  %v9870_v28 = vld [vmem:[%s14115_s5 + $0x390] sm:$0xff]  ;;  %v13849_v31 = vld [vmem:[%s14116_s3 + $0x8] sm:$0xff] }
0x3e2f   : > { %11371 = vmatpush3.msra.mxu0 %v9832_v10  ;;  %11406 = vmatpush3.msra.mxu1 %v9864_v11  ;;  %v9822_v9 = vld [vmem:[%s14115_s5 + $0x210] sm:$0xff]  ;;  %v9128_v40 = vrot.slane %v13849_v31, %v12429_v25  ;;  %v9136_v11 = vrot.slane %v13849_v31, %v12842_v49  ;;  %v9836_v25 = vld [vmem:[%s14115_s5 + $0x280] sm:$0xff] }
0x3e30   : > { %11372 = vmatprep.subr.mxu0 %v9847_v46  ;;  %11407 = vmatprep.subr.mxu1 %v9879_v41  ;;  %v9854_v10 = vld [vmem:[%s14115_s5 + $0x310] sm:$0xff]  ;;  %v9837_v46 = vld [vmem:[%s14115_s5 + $0x288] sm:$0xff]  ;;  %v9868_v49 = vld [vmem:[%s14115_s5 + $0x380] sm:$0xff] }
0x3e31   : > { %v13810_v14 = vpop.f32.mrf.mxu0  ;;  %v13812_v23 = vpop.f32.mrf.mxu1  ;;  %11373 = vmatpush3.msra.mxu0 %v9831_v12  ;;  %11408 = vmatpush3.msra.mxu1 %v9863_v53  ;;  %v9869_v41 = vld [vmem:[%s14115_s5 + $0x388] sm:$0xff] }
0x3e32   : > { %11374 = vmatprep.subr.mxu0 %v9846_v13  ;;  %11409 = vmatprep.subr.mxu1 %v9878_v15  ;;  %v9381_v12 = vadd.f32 %v13810_v14, %v9108_v5  ;;  %v9452_v53 = vadd.f32 %v13812_v23, %v9116_v6  ;;  %v9820_v14 = vld [vmem:[%s14115_s5 + $0x200] sm:$0xff]  ;;  %v9893_v5 = vld [vmem:[%s14115_s5 + $0x448] sm:$0xff] }
0x3e33   : > { %v9382_v34 = vpop.f32.mrf.mxu0  ;;  %v9453_v38 = vpop.f32.mrf.mxu1  ;;  %11375 = vmatpush3.msra.mxu0 %v9830_v17  ;;  %11410 = vmatpush3.msra.mxu1 %v9862_v22  ;;  %v9852_v23 = vld [vmem:[%s14115_s5 + $0x300] sm:$0xff]  ;;  %v9925_v6 = vld [vmem:[%s14115_s5 + $0x548] sm:$0xff] }
0x3e34   : > { %v9383_v36 = vadd.f32 %v9382_v34, %v9112_v16  ;;  %v9454_v4 = vadd.f32 %v9453_v38, %v9120_v48  ;;  %11376 = vmatprep.subr.mxu0 %v9845_v26  ;;  %11411 = vmatprep.subr.mxu1 %v9877_v27  ;;  %v9821_v16 = vld [vmem:[%s14115_s5 + $0x208] sm:$0xff]  ;;  %v9915_v34 = vld [vmem:[%s14115_s5 + $0x4f8] sm:$0xff] }
0x3e35   : > { %11377 = vmatpush3.msra.mxu0 %v9829_v32  ;;  %11412 = vmatpush3.msra.mxu1 %v9861_v33  ;;  %v9853_v48 = vld [vmem:[%s14115_s5 + $0x308] sm:$0xff]  ;;  %v9744_v32 = vmax.f32 %v9381_v12, 0.0  ;;  %v9746_v33 = vmax.f32 %v9452_v53, 0.0  ;;  %v9947_v38 = vld [vmem:[%s14115_s5 + $0x5f8] sm:$0xff]  ;;  %v9890_v12 = vld [vmem:[%s14115_s5 + $0x430] sm:$0xff] }
0x3e36   : > { %v9745_v24 = vmax.f32 %v9383_v36, 0.0  ;;  %v9747_v0 = vmax.f32 %v9454_v4, 0.0  ;;  %11378 = vmatprep.subr.mxu0 %v9844_v35  ;;  %11413 = vmatprep.subr.mxu1 %v9876_v43  ;;  %v9899_v35 = vld [vmem:[%s14115_s5 + $0x478] sm:$0xff]  ;;  %v9922_v53 = vld [vmem:[%s14115_s5 + $0x530] sm:$0xff] }
0x3e37   : > { %11379 = vmatpush3.msra.mxu0 %v9828_v42  ;;  %11414 = vmatpush3.msra.mxu1 %v9860_v39  ;;  %v9931_v36 = vld [vmem:[%s14115_s5 + $0x578] sm:$0xff]  ;;  %v9914_v42 = vld [vmem:[%s14115_s5 + $0x4f0] sm:$0xff] }
0x3e38   : > { %10223 = vmatprep.mubr.f32.mxu0 %v9745_v24  ;;  %10293 = vmatprep.mubr.f32.mxu1 %v9747_v0  ;;  %v9946_v39 = vld [vmem:[%s14115_s5 + $0x5f0] sm:$0xff] }
0x3e39   : > { %11380 = vmatprep.subr.mxu0 %v9843_v45  ;;  %11415 = vmatprep.subr.mxu1 %v9875_v29  ;;  %v9898_v24 = vld [vmem:[%s14115_s5 + $0x470] sm:$0xff]  ;;  %v9913_v45 = vld [vmem:[%s14115_s5 + $0x4e8] sm:$0xff] }
0x3e3a   : > { %11381 = vmatpush3.msra.mxu0 %v9827_v50  ;;  %11416 = vmatpush3.msra.mxu1 %v9859_v51  ;;  %v9930_v0 = vld [vmem:[%s14115_s5 + $0x570] sm:$0xff]  ;;  %v9945_v29 = vld [vmem:[%s14115_s5 + $0x5e8] sm:$0xff] }
0x3e3b   : > { %11382 = vmatprep.subr.mxu0 %v9842_v52  ;;  %11417 = vmatprep.subr.mxu1 %v9874_v54  ;;  %v9897_v50 = vld [vmem:[%s14115_s5 + $0x468] sm:$0xff]  ;;  %v9912_v52 = vld [vmem:[%s14115_s5 + $0x4e0] sm:$0xff] }
0x3e3c   : > { %11383 = vmatpush3.msra.mxu0 %v9826_v55  ;;  %11418 = vmatpush3.msra.mxu1 %v9858_v56  ;;  %v9929_v51 = vld [vmem:[%s14115_s5 + $0x568] sm:$0xff]  ;;  %v9944_v54 = vld [vmem:[%s14115_s5 + $0x5e0] sm:$0xff] }
0x3e3d   : > { %11384 = vmatprep.subr.mxu0 %v9841_v58  ;;  %11419 = vmatprep.subr.mxu1 %v9873_v59  ;;  %v9896_v55 = vld [vmem:[%s14115_s5 + $0x460] sm:$0xff]  ;;  %v9911_v58 = vld [vmem:[%s14115_s5 + $0x4d8] sm:$0xff] }
0x3e3e   : > { %11385 = vmatpush3.msra.mxu0 %v9825_v60  ;;  %11420 = vmatpush3.msra.mxu1 %v9857_v61  ;;  %v9928_v56 = vld [vmem:[%s14115_s5 + $0x560] sm:$0xff]  ;;  %v9943_v59 = vld [vmem:[%s14115_s5 + $0x5d8] sm:$0xff] }
0x3e3f   : > { %11386 = vmatprep.subr.mxu0 %v9840_v1  ;;  %11421 = vmatprep.subr.mxu1 %v9872_v2  ;;  %v9895_v60 = vld [vmem:[%s14115_s5 + $0x458] sm:$0xff]  ;;  %v9910_v1 = vld [vmem:[%s14115_s5 + $0x4d0] sm:$0xff] }
0x3e40   : > { %11387 = vmatpush3.msra.mxu0 %v9824_v44  ;;  %11422 = vmatpush3.msra.mxu1 %v9856_v57  ;;  %v9927_v61 = vld [vmem:[%s14115_s5 + $0x558] sm:$0xff]  ;;  %v9942_v2 = vld [vmem:[%s14115_s5 + $0x5d0] sm:$0xff] }
0x3e41   : > { %11388 = vmatprep.subr.mxu0 %v9839_v30  ;;  %11423 = vmatprep.subr.mxu1 %v9871_v3  ;;  %v9894_v44 = vld [vmem:[%s14115_s5 + $0x450] sm:$0xff]  ;;  %v9909_v30 = vld [vmem:[%s14115_s5 + $0x4c8] sm:$0xff] }
0x3e42   : > { %11389 = vmatpush3.msra.mxu0 %v9823_v19  ;;  %11424 = vmatpush3.msra.mxu1 %v9855_v7  ;;  %v9926_v57 = vld [vmem:[%s14115_s5 + $0x550] sm:$0xff]  ;;  %v9941_v3 = vld [vmem:[%s14115_s5 + $0x5c8] sm:$0xff]  ;;  %v9908_v19 = vld [vmem:[%s14115_s5 + $0x4c0] sm:$0xff] }
0x3e43   : > { %v13861_v13 = vpop.f32.mrf.mxu0  ;;  %v13863_v15 = vpop.f32.mrf.mxu1  ;;  %11390 = vmatprep.subr.mxu0 %v9838_v8  ;;  %11425 = vmatprep.subr.mxu1 %v9870_v28  ;;  %v9940_v7 = vld [vmem:[%s14115_s5 + $0x5c0] sm:$0xff] }
0x3e44   : > { %11391 = vmatpush3.msra.mxu0 %v9822_v9  ;;  %11426 = vmatpush3.msra.mxu1 %v9854_v10  ;;  %v9892_v8 = vld [vmem:[%s14115_s5 + $0x440] sm:$0xff]  ;;  %v9907_v9 = vld [vmem:[%s14115_s5 + $0x4b8] sm:$0xff] }
0x3e45   : > { %v9524_v17 = vpop.f32.mrf.mxu0  ;;  %v9595_v22 = vpop.f32.mrf.mxu1  ;;  %11392 = vmatprep.subr.mxu0 %v9837_v46  ;;  %11427 = vmatprep.subr.mxu1 %v9869_v41  ;;  %v9924_v28 = vld [vmem:[%s14115_s5 + $0x540] sm:$0xff]  ;;  %v9939_v10 = vld [vmem:[%s14115_s5 + $0x5b8] sm:$0xff]  ;;  %v9906_v46 = vld [vmem:[%s14115_s5 + $0x4b0] sm:$0xff] }
0x3e46   : > { %v9525_v26 = vadd.f32 %v9524_v17, %v9128_v40  ;;  %v9596_v27 = vadd.f32 %v9595_v22, %v9136_v11  ;;  %11393 = vmatpush3.msra.mxu0 %v9821_v16  ;;  %11428 = vmatpush3.msra.mxu1 %v9853_v48  ;;  %v9891_v40 = vld [vmem:[%s14115_s5 + $0x438] sm:$0xff]  ;;  %v9938_v41 = vld [vmem:[%s14115_s5 + $0x5b0] sm:$0xff]  ;;  %v9905_v16 = vld [vmem:[%s14115_s5 + $0x4a8] sm:$0xff] }
0x3e47   : > { %11394 = vmatprep.subr.mxu0 %v9836_v25  ;;  %11429 = vmatprep.subr.mxu1 %v9868_v49  ;;  %v9923_v11 = vld [vmem:[%s14115_s5 + $0x538] sm:$0xff]  ;;  %v9937_v48 = vld [vmem:[%s14115_s5 + $0x5a8] sm:$0xff]  ;;  %v9904_v17 = vld [vmem:[%s14115_s5 + $0x4a0] sm:$0xff] }
0x3e48   : > { %11395 = vmatpush3.msra.mxu0 %v9820_v14  ;;  %11430 = vmatpush3.msra.mxu1 %v9852_v23  ;;  %v9749_v43 = vmax.f32 %v9525_v26, 0.0  ;;  %v9751_v4 = vmax.f32 %v9596_v27, 0.0  ;;  %v9889_v25 = vld [vmem:[%s14115_s5 + $0x428] sm:$0xff]  ;;  %v9936_v22 = vld [vmem:[%s14115_s5 + $0x5a0] sm:$0xff]  ;;  %v9903_v27 = vld [vmem:[%s14115_s5 + $0x498] sm:$0xff] }
0x3e49   : > { %10224 = vmatmul.mubr.f32.vlgmr.msra.gmra.mxu0 %v9744_v32  ;;  %10294 = vmatmul.mubr.f32.vlgmr.msra.gmra.mxu1 %v9746_v33  ;;  %v9921_v49 = vld [vmem:[%s14115_s5 + $0x528] sm:$0xff]  ;;  %v9888_v14 = vld [vmem:[%s14115_s5 + $0x420] sm:$0xff]  ;;  %v9935_v32 = vld [vmem:[%s14115_s5 + $0x598] sm:$0xff]  ;;  %v9124_v33 = vrot.slane %v13849_v31, %v12418_v20 }
0x3e4a   : > { %11434 = vmatprep.subr.mxu0 %v9915_v34  ;;  %11469 = vmatprep.subr.mxu1 %v9947_v38  ;;  %v9920_v23 = vld [vmem:[%s14115_s5 + $0x520] sm:$0xff]  ;;  %v9132_v34 = vrot.slane %v13849_v31, %v12836_v47  ;;  %v9886_v20 = vld [vmem:[%s14115_s5 + $0x410] sm:$0xff] }
0x3e4b   : > { %11435 = vmatpush3.msra.mxu0 %v9899_v35  ;;  %10363 = vmatprep.mubr.f32.mxu0 %v9749_v43  ;;  %v9887_v35 = vld [vmem:[%s14115_s5 + $0x418] sm:$0xff]  ;;  %v9918_v47 = vld [vmem:[%s14115_s5 + $0x510] sm:$0xff] }
0x3e4c   : > { %11470 = vmatpush3.msra.mxu1 %v9931_v36  ;;  %10433 = vmatprep.mubr.f32.mxu1 %v9751_v4  ;;  %v9919_v43 = vld [vmem:[%s14115_s5 + $0x518] sm:$0xff]  ;;  %v9902_v36 = vld [vmem:[%s14115_s5 + $0x490] sm:$0xff] }
0x3e4d   : > { %11436 = vmatprep.subr.mxu0 %v9914_v42  ;;  %11471 = vmatprep.subr.mxu1 %v9946_v39  ;;  %v9934_v4 = vld [vmem:[%s14115_s5 + $0x590] sm:$0xff]  ;;  %v9144_v42 = vrot.slane %v13849_v31, %v12867_v18  ;;  %v9523_v18 = vadd.f32 %v13861_v13, %v9124_v33  ;;  %v9956_v33 = vld [vmem:[%s14115_s5 + $0x640] sm:$0xff] }
0x3e4e   : > { %11437 = vmatpush3.msra.mxu0 %v9898_v24  ;;  %11472 = vmatpush3.msra.mxu1 %v9930_v0  ;;  %v9152_v24 = vrot.slane %v13849_v31, %v12870_v21  ;;  %v9901_v0 = vld [vmem:[%s14115_s5 + $0x488] sm:$0xff]  ;;  %v9900_v21 = vld [vmem:[%s14115_s5 + $0x480] sm:$0xff] }
0x3e4f   : > { %11438 = vmatprep.subr.mxu0 %v9913_v45  ;;  %11473 = vmatprep.subr.mxu1 %v9945_v29  ;;  %v9933_v45 = vld [vmem:[%s14115_s5 + $0x588] sm:$0xff]  ;;  %v9594_v29 = vadd.f32 %v13863_v15, %v9132_v34  ;;  %v9748_v15 = vmax.f32 %v9523_v18, 0.0  ;;  %v9988_v34 = vld [vmem:[%s14115_s5 + $0x740] sm:$0xff] }
0x3e50   : > { %11439 = vmatpush3.msra.mxu0 %v9897_v50  ;;  %11474 = vmatpush3.msra.mxu1 %v9929_v51  ;;  %v9885_v51 = vld [vmem:[%s14115_s5 + $0x408] sm:$0xff] }
0x3e51   : > { %11440 = vmatprep.subr.mxu0 %v9912_v52  ;;  %11475 = vmatprep.subr.mxu1 %v9944_v54  ;;  %v9917_v52 = vld [vmem:[%s14115_s5 + $0x508] sm:$0xff]  ;;  %v9932_v54 = vld [vmem:[%s14115_s5 + $0x580] sm:$0xff] }
0x3e52   : > { %11441 = vmatpush3.msra.mxu0 %v9896_v55  ;;  %11476 = vmatpush3.msra.mxu1 %v9928_v56  ;;  %v9884_v56 = vld [vmem:[%s14115_s5 + $0x400] sm:$0xff]  ;;  %v9985_v18 = vld [vmem:[%s14115_s5 + $0x728] sm:$0xff] }
0x3e53   : > { %11442 = vmatprep.subr.mxu0 %v9911_v58  ;;  %11477 = vmatprep.subr.mxu1 %v9943_v59  ;;  %v9916_v58 = vld [vmem:[%s14115_s5 + $0x500] sm:$0xff]  ;;  %v9750_v59 = vmax.f32 %v9594_v29, 0.0 }
0x3e54   : > { %11443 = vmatpush3.msra.mxu0 %v9895_v60  ;;  %11478 = vmatpush3.msra.mxu1 %v9927_v61  ;;  %v9979_v60 = vld [vmem:[%s14115_s5 + $0x6f8] sm:$0xff]  ;;  %v9968_v29 = vld [vmem:[%s14115_s5 + $0x6a0] sm:$0xff] }
0x3e55   : > { %11444 = vmatprep.subr.mxu0 %v9910_v1  ;;  %11479 = vmatprep.subr.mxu1 %v9942_v2  ;;  %v13919_v26 = vpop.f32.mrf.mxu0  ;;  %v13927_v38 = vpop.f32.mrf.mxu1  ;;  %v10011_v61 = vld [vmem:[%s14115_s5 + $0x7f8] sm:$0xff] }
0x3e56   : > { %11445 = vmatpush3.msra.mxu0 %v9894_v44  ;;  %11480 = vmatpush3.msra.mxu1 %v9926_v57  ;;  %v9963_v1 = vld [vmem:[%s14115_s5 + $0x678] sm:$0xff] }
0x3e57   : > { %11446 = vmatprep.subr.mxu0 %v9909_v30  ;;  %11481 = vmatprep.subr.mxu1 %v9941_v3  ;;  %v9666_v39 = vpop.f32.mrf.mxu0  ;;  %v9737_v50 = vpop.f32.mrf.mxu1  ;;  %v9995_v44 = vld [vmem:[%s14115_s5 + $0x778] sm:$0xff]  ;;  %v9978_v30 = vld [vmem:[%s14115_s5 + $0x6f0] sm:$0xff] }
0x3e58   : > { %11447 = vmatpush3.msra.mxu0 %v9893_v5  ;;  %11482 = vmatpush3.msra.mxu1 %v9925_v6  ;;  %v9667_v55 = vadd.f32 %v9666_v39, %v9144_v42  ;;  %v9738_v13 = vadd.f32 %v9737_v50, %v9152_v24  ;;  %v10010_v3 = vld [vmem:[%s14115_s5 + $0x7f0] sm:$0xff]  ;;  %v9969_v24 = vld [vmem:[%s14115_s5 + $0x6a8] sm:$0xff]  ;;  %v10000_v50 = vld [vmem:[%s14115_s5 + $0x7a0] sm:$0xff] }
0x3e59   : > { %11448 = vmatprep.subr.mxu0 %v9908_v19  ;;  %11483 = vmatprep.subr.mxu1 %v9940_v7  ;;  %v9962_v5 = vld [vmem:[%s14115_s5 + $0x670] sm:$0xff]  ;;  %v9977_v19 = vld [vmem:[%s14115_s5 + $0x6e8] sm:$0xff] }
0x3e5a   : > { %11449 = vmatpush3.msra.mxu0 %v9892_v8  ;;  %11484 = vmatpush3.msra.mxu1 %v9924_v28  ;;  %v9753_v2 = vmax.f32 %v9667_v55, 0.0  ;;  %v9755_v57 = vmax.f32 %v9738_v13, 0.0  ;;  %v9994_v6 = vld [vmem:[%s14115_s5 + $0x770] sm:$0xff]  ;;  %v10009_v7 = vld [vmem:[%s14115_s5 + $0x7e8] sm:$0xff]  ;;  %v9140_v55 = vrot.slane %v13849_v31, %v12907_v62  ;;  %v9983_v13 = vld [vmem:[%s14115_s5 + $0x718] sm:$0xff] }
0x3e5b   : > { %11450 = vmatprep.subr.mxu0 %v9907_v9  ;;  %11485 = vmatprep.subr.mxu1 %v9939_v10  ;;  %v9961_v8 = vld [vmem:[%s14115_s5 + $0x668] sm:$0xff]  ;;  %v9976_v9 = vld [vmem:[%s14115_s5 + $0x6e0] sm:$0xff]  ;;  %v9970_v42 = vld [vmem:[%s14115_s5 + $0x6b0] sm:$0xff] }
0x3e5c   : > { %11451 = vmatpush3.msra.mxu0 %v9891_v40  ;;  %11486 = vmatpush3.msra.mxu1 %v9923_v11  ;;  %v9993_v28 = vld [vmem:[%s14115_s5 + $0x768] sm:$0xff]  ;;  %v10008_v10 = vld [vmem:[%s14115_s5 + $0x7e0] sm:$0xff]  ;;  %v9986_v39 = vld [vmem:[%s14115_s5 + $0x730] sm:$0xff] }
0x3e5d   : > { %11452 = vmatprep.subr.mxu0 %v9906_v46  ;;  %11487 = vmatprep.subr.mxu1 %v9938_v41  ;;  %v9960_v40 = vld [vmem:[%s14115_s5 + $0x660] sm:$0xff]  ;;  %v9975_v46 = vld [vmem:[%s14115_s5 + $0x6d8] sm:$0xff]  ;;  %v9950_v62 = vld [vmem:[%s14115_s5 + $0x610] sm:$0xff] }
0x3e5e   : > { %11453 = vmatpush3.msra.mxu0 %v9890_v12  ;;  %11488 = vmatpush3.msra.mxu1 %v9922_v53  ;;  %v9992_v11 = vld [vmem:[%s14115_s5 + $0x760] sm:$0xff]  ;;  %v10007_v41 = vld [vmem:[%s14115_s5 + $0x7d8] sm:$0xff] }
0x3e5f   : > { %11454 = vmatprep.subr.mxu0 %v9905_v16  ;;  %11489 = vmatprep.subr.mxu1 %v9937_v48  ;;  %v9959_v12 = vld [vmem:[%s14115_s5 + $0x658] sm:$0xff]  ;;  %v9974_v16 = vld [vmem:[%s14115_s5 + $0x6d0] sm:$0xff] }
0x3e60   : > { %11455 = vmatpush3.msra.mxu0 %v9889_v25  ;;  %11490 = vmatpush3.msra.mxu1 %v9921_v49  ;;  %v9991_v53 = vld [vmem:[%s14115_s5 + $0x758] sm:$0xff]  ;;  %v10006_v48 = vld [vmem:[%s14115_s5 + $0x7d0] sm:$0xff] }
0x3e61   : > { %11456 = vmatprep.subr.mxu0 %v9904_v17  ;;  %11491 = vmatprep.subr.mxu1 %v9936_v22  ;;  %v9958_v25 = vld [vmem:[%s14115_s5 + $0x650] sm:$0xff]  ;;  %v9973_v17 = vld [vmem:[%s14115_s5 + $0x6c8] sm:$0xff] }
0x3e62   : > { %11457 = vmatpush3.msra.mxu0 %v9888_v14  ;;  %11492 = vmatpush3.msra.mxu1 %v9920_v23  ;;  %v9990_v49 = vld [vmem:[%s14115_s5 + $0x750] sm:$0xff]  ;;  %v10005_v22 = vld [vmem:[%s14115_s5 + $0x7c8] sm:$0xff] }
0x3e63   : > { %11458 = vmatprep.subr.mxu0 %v9903_v27  ;;  %11493 = vmatprep.subr.mxu1 %v9935_v32  ;;  %v9957_v14 = vld [vmem:[%s14115_s5 + $0x648] sm:$0xff]  ;;  %v9972_v27 = vld [vmem:[%s14115_s5 + $0x6c0] sm:$0xff] }
0x3e64   : > { %11459 = vmatpush3.msra.mxu0 %v9887_v35  ;;  %11494 = vmatpush3.msra.mxu1 %v9919_v43  ;;  %v9989_v23 = vld [vmem:[%s14115_s5 + $0x748] sm:$0xff]  ;;  %v10004_v32 = vld [vmem:[%s14115_s5 + $0x7c0] sm:$0xff]  ;;  %v9971_v35 = vld [vmem:[%s14115_s5 + $0x6b8] sm:$0xff] }
0x3e65   : > { %11460 = vmatprep.subr.mxu0 %v9902_v36  ;;  %11495 = vmatprep.subr.mxu1 %v9934_v4  ;;  %v10003_v43 = vld [vmem:[%s14115_s5 + $0x7b8] sm:$0xff] }
0x3e66   : > { %11461 = vmatpush3.msra.mxu0 %v9886_v20  ;;  %11496 = vmatpush3.msra.mxu1 %v9918_v47  ;;  %v9955_v36 = vld [vmem:[%s14115_s5 + $0x638] sm:$0xff]  ;;  %v10002_v20 = vld [vmem:[%s14115_s5 + $0x7b0] sm:$0xff] }
0x3e67   : > { %11462 = vmatprep.subr.mxu0 %v9901_v0  ;;  %11497 = vmatprep.subr.mxu1 %v9933_v45  ;;  %v9987_v4 = vld [vmem:[%s14115_s5 + $0x738] sm:$0xff]  ;;  %v9954_v47 = vld [vmem:[%s14115_s5 + $0x630] sm:$0xff]  ;;  %v10001_v0 = vld [vmem:[%s14115_s5 + $0x7a8] sm:$0xff] }
0x3e68   : > { %11463 = vmatpush3.msra.mxu0 %v9885_v51  ;;  %11498 = vmatpush3.msra.mxu1 %v9917_v52  ;;  %v9953_v45 = vld [vmem:[%s14115_s5 + $0x628] sm:$0xff]  ;;  %v9952_v51 = vld [vmem:[%s14115_s5 + $0x620] sm:$0xff] }
0x3e69   : > { %11464 = vmatprep.subr.mxu0 %v9900_v21  ;;  %11499 = vmatprep.subr.mxu1 %v9932_v54  ;;  %v9984_v52 = vld [vmem:[%s14115_s5 + $0x720] sm:$0xff]  ;;  %v9967_v21 = vld [vmem:[%s14115_s5 + $0x698] sm:$0xff] }
0x3e6a   : > { %11465 = vmatpush3.msra.mxu0 %v9884_v56  ;;  %11500 = vmatpush3.msra.mxu1 %v9916_v58  ;;  %v9999_v54 = vld [vmem:[%s14115_s5 + $0x798] sm:$0xff]  ;;  %v9148_v56 = vrot.slane %v13849_v31, %v12910_v63  ;;  %v9965_v63 = vld [vmem:[%s14115_s5 + $0x688] sm:$0xff] }
0x3e6b   : > { %10364 = vmatmul.mubr.f32.vlgmr.msra.gmra.mxu0 %v9748_v15  ;;  %10434 = vmatmul.mubr.f32.vlgmr.msra.gmra.mxu1 %v9750_v59  ;;  %v9951_v58 = vld [vmem:[%s14115_s5 + $0x618] sm:$0xff]  ;;  %v9966_v15 = vld [vmem:[%s14115_s5 + $0x690] sm:$0xff]  ;;  %v9997_v31 = vld [vmem:[%s14115_s5 + $0x788] sm:$0xff] }
0x3e6c   : > { %11504 = vmatprep.subr.mxu0 %v9979_v60  ;;  %11539 = vmatprep.subr.mxu1 %v10011_v61  ;;  %v9998_v59 = vld [vmem:[%s14115_s5 + $0x790] sm:$0xff]  ;;  %v9665_v61 = vadd.f32 %v13919_v26, %v9140_v55 }
0x3e6d   : > { %11505 = vmatpush3.msra.mxu0 %v9963_v1  ;;  %10503 = vmatprep.mubr.f32.mxu0 %v9753_v2  ;;  %v9982_v60 = vld [vmem:[%s14115_s5 + $0x710] sm:$0xff]  ;;  %v9736_v1 = vadd.f32 %v13927_v38, %v9148_v56  ;;  %v9949_v2 = vld [vmem:[%s14115_s5 + $0x608] sm:$0xff]  ;;  %v10848_v56 = vld [vmem:[%s12364_s27] ss:$0 sm:$0xff] }
0x3e6e   : > { %11540 = vmatpush3.msra.mxu1 %v9995_v44  ;;  %10573 = vmatprep.mubr.f32.mxu1 %v9755_v57  ;;  %v9981_v44 = vld [vmem:[%s14115_s5 + $0x708] sm:$0xff]  ;;  %v9964_v57 = vld [vmem:[%s14115_s5 + $0x680] sm:$0xff] }
0x3e6f   : > { %11506 = vmatprep.subr.mxu0 %v9978_v30  ;;  %11541 = vmatprep.subr.mxu1 %v10010_v3  ;;  %v9996_v30 = vld [vmem:[%s14115_s5 + $0x780] sm:$0xff] }
0x3e70   : > { %11507 = vmatpush3.msra.mxu0 %v9962_v5  ;;  %11542 = vmatpush3.msra.mxu1 %v9994_v6  ;;  %v9948_v3 = vld [vmem:[%s14115_s5 + $0x600] sm:$0xff]  ;;  %v9752_v6 = vmax.f32 %v9665_v61, 0.0 }
0x3e71   : > { %11508 = vmatprep.subr.mxu0 %v9977_v19  ;;  %11543 = vmatprep.subr.mxu1 %v10009_v7  ;;  %v9980_v5 = vld [vmem:[%s14115_s5 + $0x700] sm:$0xff]  ;;  %v9754_v19 = vmax.f32 %v9736_v1, 0.0 }
0x3e72   : > { %11509 = vmatpush3.msra.mxu0 %v9961_v8  ;;  %11544 = vmatpush3.msra.mxu1 %v9993_v28 }
0x3e73   : > { %11510 = vmatprep.subr.mxu0 %v9976_v9  ;;  %11545 = vmatprep.subr.mxu1 %v10008_v10  ;;  %v10847_v9 = vld [vmem:[%s12359_s30] ss:$0 sm:$0xff] }
0x3e74   : > { %11511 = vmatpush3.msra.mxu0 %v9960_v40  ;;  %11546 = vmatpush3.msra.mxu1 %v9992_v11 }
0x3e75   : > { %11512 = vmatprep.subr.mxu0 %v9975_v46  ;;  %11547 = vmatprep.subr.mxu1 %v10007_v41 }
0x3e76   : > { %11513 = vmatpush3.msra.mxu0 %v9959_v12  ;;  %11548 = vmatpush3.msra.mxu1 %v9991_v53 }
0x3e77   : > { %11514 = vmatprep.subr.mxu0 %v9974_v16  ;;  %11549 = vmatprep.subr.mxu1 %v10006_v48 }
0x3e78   : > { %11515 = vmatpush3.msra.mxu0 %v9958_v25  ;;  %11550 = vmatpush3.msra.mxu1 %v9990_v49 }
0x3e79   : > { %11516 = vmatprep.subr.mxu0 %v9973_v17  ;;  %11551 = vmatprep.subr.mxu1 %v10005_v22 }
0x3e7a   : > { %11517 = vmatpush3.msra.mxu0 %v9957_v14  ;;  %11552 = vmatpush3.msra.mxu1 %v9989_v23 }
0x3e7b   : > { %11518 = vmatprep.subr.mxu0 %v9972_v27  ;;  %11553 = vmatprep.subr.mxu1 %v10004_v32 }
0x3e7c   : > { %11519 = vmatpush3.msra.mxu0 %v9956_v33  ;;  %11554 = vmatpush3.msra.mxu1 %v9988_v34 }
0x3e7d   : > { %11520 = vmatprep.subr.mxu0 %v9971_v35  ;;  %11555 = vmatprep.subr.mxu1 %v10003_v43 }
0x3e7e   : > { %11521 = vmatpush3.msra.mxu0 %v9955_v36  ;;  %11556 = vmatpush3.msra.mxu1 %v9987_v4 }
0x3e7f   : > { %11522 = vmatprep.subr.mxu0 %v9970_v42  ;;  %11557 = vmatprep.subr.mxu1 %v10002_v20 }
0x3e80   : > { %11523 = vmatpush3.msra.mxu0 %v9954_v47  ;;  %11558 = vmatpush3.msra.mxu1 %v9986_v39 }
0x3e81   : > { %11524 = vmatprep.subr.mxu0 %v9969_v24  ;;  %11559 = vmatprep.subr.mxu1 %v10001_v0 }
0x3e82   : > { %11525 = vmatpush3.msra.mxu0 %v9953_v45  ;;  %11560 = vmatpush3.msra.mxu1 %v9985_v18 }
0x3e83   : > { %11526 = vmatprep.subr.mxu0 %v9968_v29  ;;  %11561 = vmatprep.subr.mxu1 %v10000_v50 }
0x3e84   : > { %11527 = vmatpush3.msra.mxu0 %v9952_v51  ;;  %11562 = vmatpush3.msra.mxu1 %v9984_v52 }
0x3e85   : > { %11528 = vmatprep.subr.mxu0 %v9967_v21  ;;  %11563 = vmatprep.subr.mxu1 %v9999_v54 }
0x3e86   : > { %11529 = vmatpush3.msra.mxu0 %v9951_v58  ;;  %11564 = vmatpush3.msra.mxu1 %v9983_v13  ;;  %v10849_v58 = vld [vmem:[%s12369_s4] ss:$0 sm:$0xff] }
0x3e87   : > { %11530 = vmatprep.subr.mxu0 %v9966_v15  ;;  %11565 = vmatprep.subr.mxu1 %v9998_v59 }
0x3e88   : > { %11531 = vmatpush3.msra.mxu0 %v9950_v62  ;;  %11566 = vmatpush3.msra.mxu1 %v9982_v60 }
0x3e89   : > { %11532 = vmatprep.subr.mxu0 %v9965_v63  ;;  %11567 = vmatprep.subr.mxu1 %v9997_v31 }
0x3e8a   : > { %11533 = vmatpush3.msra.mxu0 %v9949_v2  ;;  %11568 = vmatpush3.msra.mxu1 %v9981_v44 }
0x3e8b   : > { %11534 = vmatprep.subr.mxu0 %v9964_v57  ;;  %11569 = vmatprep.subr.mxu1 %v9996_v30 }
0x3e8c   : > { %11535 = vmatpush3.msra.mxu0 %v9948_v3  ;;  %11570 = vmatpush3.msra.mxu1 %v9980_v5 }
0x3e8d   : > { %10504 = vmatmul.mubr.f32.vlgmr.msra.gmra.mxu0 %v9752_v6  ;;  %10574 = vmatmul.mubr.f32.vlgmr.msra.gmra.mxu1 %v9754_v19 }
0x3ee8   : > { %v11326_v26 = vpop.f32.mrf.mxu0  ;;  %v11361_v7 = vpop.f32.mrf.mxu1 }
0x3eea   : > { %v11327_v38 = vpop.f32.mrf.mxu0  ;;  %v11362_v10 = vpop.f32.mrf.mxu1 }
0x3eeb   : > { %v11328_v28 = vadd.f32 %v11327_v38, %v11326_v26  ;;  %v11363_v12 = vadd.f32 %v11362_v10, %v11361_v7 }
0x3eed   : > { %v10086_v11 = vadd.f32 %v11328_v28, %v10847_v9 }
0x3eef   : > { %v10156_v16 = vadd.f32 %v11363_v12, %v10086_v11 }
0x3f09   : > { %v11396_v8 = vpop.f32.mrf.mxu0  ;;  %v11431_v46 = vpop.f32.mrf.mxu1 }
0x3f0b   : > { %v11397_v40 = vpop.f32.mrf.mxu0  ;;  %v11432_v48 = vpop.f32.mrf.mxu1 }
0x3f0c   : > { %v11398_v53 = vadd.f32 %v11397_v40, %v11396_v8  ;;  %v11433_v22 = vadd.f32 %v11432_v48, %v11431_v46 }
0x3f0e   : > { %v10226_v49 = vadd.f32 %v11398_v53, %v10156_v16 }
0x3f10   : > { %v10296_v23 = vadd.f32 %v11433_v22, %v10226_v49 }
0x3f2b   : > { %v11466_v41 = vpop.f32.mrf.mxu0  ;;  %v11501_v17 = vpop.f32.mrf.mxu1 }
0x3f2d   : > { %v11467_v25 = vpop.f32.mrf.mxu0  ;;  %v11502_v27 = vpop.f32.mrf.mxu1 }
0x3f2e   : > { %v11468_v14 = vadd.f32 %v11467_v25, %v11466_v41  ;;  %v11503_v35 = vadd.f32 %v11502_v27, %v11501_v17 }
0x3f30   : > { %v10366_v32 = vadd.f32 %v11468_v14, %v10296_v23 }
0x3f32   : > { %v10436_v4 = vadd.f32 %v11503_v35, %v10366_v32 }
0x3f4d   : > { %v11536_v33 = vpop.f32.mrf.mxu0  ;;  %v11571_v34 = vpop.f32.mrf.mxu1 }
0x3f4f   : > { %v11537_v43 = vpop.f32.mrf.mxu0  ;;  %v11572_v36 = vpop.f32.mrf.mxu1 }
0x3f50   : > { %v11538_v42 = vadd.f32 %v11537_v43, %v11536_v33  ;;  %v11573_v47 = vadd.f32 %v11572_v36, %v11571_v34 }
0x3f52   : > { %v10506_v20 = vadd.f32 %v11538_v42, %v10436_v4 }
0x3f54   : > { %v10576_v39 = vadd.f32 %v11573_v47, %v10506_v20 }
0x3f56   : > { %v10579_v24 = vadd.f32 %v10576_v39, %v13589_v37 }
0x3f58   : > { %v10582_v0 = vsel %vm1084_vm0, %v10579_v24, 0.0 }
0x3f59   : > { %10583 = vadd.xlane.f32.xlu1 %v10582_v0 }
0x3fe2   : > { %v10584_v45 = vpop.xlane.xlu1 %10583 }
0x3fe3   : > { %v10585_v18 = vmul.f32 0.015625, %v10584_v45 }
0x3fe5   : > { %v10586_v29 = vsub.f32 %v10579_v24, %v10585_v18 }
0x3fe7   : > { %v10587_v50 = vmul.f32 %v10586_v29, %v10586_v29 }
0x3fe9   : > { %v10588_v51 = vsel %vm1084_vm0, %v10587_v50, 0.0 }
0x3fea   : > { %10589 = vadd.xlane.f32.xlu1 %v10588_v51 }
0x4073   : > { %v10590_v52 = vpop.xlane.xlu1 %10589 }
0x4074   : > { %v10591_v21 = vmul.f32 0.015625, %v10590_v52 }
0x4076   : > { %v10592_v54 = vadd.f32 1e-05, %v10591_v21 }
0x4078   : > { %12135 = vrsqrt.f32 %v10592_v54 }
0x4085   : > { %v12136_v55 = vpop.eup %12135 }
0x4086   : > { %v10594_v37 = vmul.f32 %v12136_v55, %v10586_v29 }
0x4088   : > { %v10601_v13 = vmul.f32 %v10848_v56, %v10594_v37 }
0x408a   : > { %v10608_v15 = vadd.f32 %v10849_v58, %v10601_v13 }
0x408c   : > { %10609 = vst.msk [vmem:[%s1054_s26] sm:$0xff] %vm1084_vm0, %v10608_v15 }
0x408d PF: > { %s79_s15 = sadd.s32 1, %s12143_s15  }
0x408e   : > { %p76_p4 = scmp.ge.s32.totalorder %s79_s15, 4  }
0x4090   :  { %78 = sbr.rel (!%p76_p4) target bundleno = 55 (0x37), region = 223 }

</bundles_post_ra>
